<compile_context>
chip_gen: v6e
topology: v6e:2x2x1
jax: 0.10.0
libtpu: 0.0.40
codegen_flags: <defaults>
</compile_context>

<pallas_src>
import functools

import jax
import jax.numpy as jnp
from jax.experimental import pallas as pl
from jax.experimental.pallas import tpu as pltpu


def _round_up(x, m):
    return (x + m - 1) // m * m


WIDTH_MULT_LIST = (0.5, 1.0)   # part=2
NUM_CLASSES = 10
FC_TN = 512                    # fc2 K-slab rows per grid step (4 MiB bf16 @ wm=1.0)
MP_FC = 16                     # padded batch rows for the FC head (bf16 sublane mult.)


# ------------------------------------------------------------------
# Pallas kernels
# ------------------------------------------------------------------

def _mm_bias_kernel(x_ref, w_ref, b_ref, o_ref):
    """Single-shot o = x @ w + b (full tiles: no K grid axis, no accumulator)."""
    o_ref[...] = (jnp.dot(x_ref[...], w_ref[...],
                          preferred_element_type=jnp.float32)
                  + b_ref[...]).astype(o_ref.dtype)


def matmul_bias_oneshot(x_pad, w_pad, b_pad, out_dtype=jnp.bfloat16):
    """x_pad:[Mp,Kp] bf16 @ w_pad:[Kp,Np] bf16 + b_pad:[1,Np] f32, one grid step."""
    Mp, Kp = x_pad.shape
    Kp2, Np = w_pad.shape
    assert Kp == Kp2
    return pl.pallas_call(
        _mm_bias_kernel,
        out_shape=jax.ShapeDtypeStruct((Mp, Np), out_dtype),
        grid_spec=pltpu.PrefetchScalarGridSpec(
            num_scalar_prefetch=0,
            grid=(1,),
            in_specs=[
                pl.BlockSpec((Mp, Kp), lambda i: (0, 0)),
                pl.BlockSpec((Kp, Np), lambda i: (0, 0)),
                pl.BlockSpec((1, Np), lambda i: (0, 0)),
            ],
            out_specs=pl.BlockSpec((Mp, Np), lambda i: (0, 0)),
        ),
        compiler_params=pltpu.CompilerParams(
            dimension_semantics=("arbitrary",)),
    )(x_pad, w_pad, b_pad)


def _fc_head_kernel(x_ref, w1_ref, b1_ref, w2_ref, b2_ref, w3_ref, b3_ref,
                    logits_ref, conf_ref, acc_ref):
    """Fused fc1->fc2->fc3 + softmax + top-2 confidence.

    Grid axis j walks FC_TN-wide panels of the hidden dim:
      h1_panel = x @ W1[:, panel] + b1[panel]
      acc     += h1_panel @ W2[panel, :]
    Last step: logits = (acc + b2) @ W3 + b3; softmax over the 10 valid classes;
    confidence = top1 - top2 (first-occurrence tie handling like torch.topk).
    """
    j = pl.program_id(0)

    @pl.when(j == 0)
    def _():
        acc_ref[...] = jnp.zeros_like(acc_ref)

    h1 = (jnp.dot(x_ref[...], w1_ref[...], preferred_element_type=jnp.float32)
          + b1_ref[...])
    acc_ref[...] += jnp.dot(h1.astype(jnp.bfloat16), w2_ref[...],
                            preferred_element_type=jnp.float32)

    @pl.when(j == pl.num_programs(0) - 1)
    def _():
        h2 = (acc_ref[...] + b2_ref[...]).astype(jnp.bfloat16)
        logits = (jnp.dot(h2, w3_ref[...], preferred_element_type=jnp.float32)
                  + b3_ref[...])
        logits_ref[...] = logits

        # Softmax over the NUM_CLASSES valid columns (rest of the 128-lane
        # padded output is masked to -inf -> exp() == 0 exactly).
        col = jax.lax.broadcasted_iota(jnp.int32, logits.shape, 1)
        valid = col < NUM_CLASSES
        neg_inf = jnp.full_like(logits, -jnp.inf)
        masked = jnp.where(valid, logits, neg_inf)
        m = jnp.max(masked, axis=1, keepdims=True)
        e = jnp.exp(masked - m)                       # exp(-inf) == 0
        p = e / jnp.sum(e, axis=1, keepdims=True)

        top1 = jnp.max(p, axis=1, keepdims=True)
        # first column achieving the max (matches torch.topk tie behaviour)
        amax = jnp.min(jnp.where(p == top1, col, jnp.full_like(col, 2 ** 30)),
                       axis=1, keepdims=True)
        p2 = jnp.where(col == amax, neg_inf, p)
        top2 = jnp.max(p2, axis=1, keepdims=True)
        conf_ref[...] = jnp.zeros_like(conf_ref) + (top1 - top2)


def fc_head(x_vec, w1, b1, w2, b2, w3, b3):
    """x_vec:[1,Kc] -> (logits [1,10] f32, confidence scalar f32)."""
    Kc, Nf = w1.shape                      # Kc = padded c256, Nf = slimmed 4096
    tn = FC_TN
    assert Nf % tn == 0
    n_steps = Nf // tn

    xp = jnp.pad(x_vec.astype(jnp.bfloat16),
                 ((0, MP_FC - x_vec.shape[0]), (0, Kc - x_vec.shape[1])))

    logits_pad, conf_pad = pl.pallas_call(
        _fc_head_kernel,
        out_shape=(jax.ShapeDtypeStruct((MP_FC, 128), jnp.float32),
                   jax.ShapeDtypeStruct((MP_FC, 128), jnp.float32)),
        grid_spec=pltpu.PrefetchScalarGridSpec(
            num_scalar_prefetch=0,
            grid=(n_steps,),
            in_specs=[
                pl.BlockSpec((MP_FC, Kc), lambda j: (0, 0)),   # x (resident)
                pl.BlockSpec((Kc, tn), lambda j: (0, j)),      # W1 panel
                pl.BlockSpec((1, tn), lambda j: (0, j)),       # b1 panel
                pl.BlockSpec((tn, Nf), lambda j: (j, 0)),      # W2 K-slab
                pl.BlockSpec((1, Nf), lambda j: (0, 0)),       # b2 (resident)
                pl.BlockSpec((Nf, 128), lambda j: (0, 0)),     # W3 (resident)
                pl.BlockSpec((1, 128), lambda j: (0, 0)),      # b3 (resident)
            ],
            out_specs=(pl.BlockSpec((MP_FC, 128), lambda j: (0, 0)),
                       pl.BlockSpec((MP_FC, 128), lambda j: (0, 0))),
            scratch_shapes=[pltpu.VMEM((MP_FC, Nf), jnp.float32)],
        ),
        compiler_params=pltpu.CompilerParams(
            dimension_semantics=("arbitrary",),
            vmem_limit_bytes=24 * 1024 * 1024,
        ),
    )(xp, w1, b1, w2, b2, w3, b3)

    return logits_pad[:1, :NUM_CLASSES], conf_pad[0, 0]


# ------------------------------------------------------------------
# Layer wrappers (NHWC bf16; windows via strided slices, no gathers)
# ------------------------------------------------------------------

def _windows_nhwc(x, k, stride):
    """List (length k*k, order (dh, dw)) of [B, Ho, Wo, C] strided slices."""
    B, H, W, C = x.shape
    Ho = (H - k) // stride + 1
    Wo = (W - k) // stride + 1
    wins = []
    for dh in range(k):
        for dw in range(k):
            sl = jax.lax.slice(
                x,
                (0, dh, dw, 0),
                (B, dh + (Ho - 1) * stride + 1, dw + (Wo - 1) * stride + 1, C),
                (1, stride, stride, 1))
            wins.append(sl)
    return wins, Ho, Wo


def conv2d_nhwc(x, w_pad, b_pad, *, out_c, k, stride, pad):
    """x: [B,H,W,C] NHWC bf16.  w_pad is the pre-packed [k*k*C (padded), out_c
    (padded)] bf16 matrix ((kh, kw, cin) flattening == the (dh, dw, c) patch order)."""
    B, H, W, C = x.shape
    xp = jnp.pad(x, ((0, 0), (pad, pad), (pad, pad), (0, 0)))
    wins, Ho, Wo = _windows_nhwc(xp, k, stride)
    patches = jnp.concatenate(wins, axis=-1).reshape(B * Ho * Wo, k * k * C)
    M, K = patches.shape
    Kp, Np = w_pad.shape
    Mp = _round_up(M, 16)
    patches = jnp.pad(patches.astype(jnp.bfloat16), ((0, Mp - M), (0, Kp - K)))
    out = matmul_bias_oneshot(patches, w_pad, b_pad)          # bf16 [Mp, Np]
    return out[:M, :out_c].reshape(B, Ho, Wo, out_c)


def maxpool2d_nhwc(x, k=3, stride=2):
    """jnp.maximum reduction tree over the k*k strided window slices (XLA fuses)."""
    wins, Ho, Wo = _windows_nhwc(x, k, stride)
    out = wins[0]
    for w in wins[1:]:
        out = jnp.maximum(out, w)
    return out


# ------------------------------------------------------------------
# AlexSNN parameters, per-width weight packing, forward
# ------------------------------------------------------------------

def init_params(key):
    """Torch-layout parameters: conv [Cout,Cin,k,k], linear [out,in]."""
    def conv_p(k_, cout, cin, ksz):
        kw, kb = jax.random.split(k_)
        fan_in = cin * ksz * ksz
        w = jax.random.normal(kw, (cout, cin, ksz, ksz), jnp.float32) \
            / jnp.sqrt(float(fan_in))
        b = jax.random.normal(kb, (cout,), jnp.float32) * 0.01
        return (w, b)

    def lin_p(k_, cout, cin):
        kw, kb = jax.random.split(k_)
        w = jax.random.normal(kw, (cout, cin), jnp.float32) / jnp.sqrt(float(cin))
        b = jax.random.normal(kb, (cout,), jnp.float32) * 0.01
        return (w, b)

    ks = jax.random.split(key, 8)
    return {
        "conv1": conv_p(ks[0], 64, 3, 11),
        "conv2": conv_p(ks[1], 192, 64, 5),
        "conv3": conv_p(ks[2], 384, 192, 3),
        "conv4": conv_p(ks[3], 256, 384, 3),
        "conv5": conv_p(ks[4], 256, 256, 3),
        "fc1": lin_p(ks[5], 4096, 256),
        "fc2": lin_p(ks[6], 4096, 4096),
        "fc3": lin_p(ks[7], 10, 4096),
    }


def _pack_weight(w_mat, b):
    """[K,N] f32 weight + [N] bias -> (padded bf16 [Kp,Np], padded f32 [1,Np]).

    Zero-padding applied BEFORE the bf16 cast so padded lanes stay exactly 0.
    """
    K, N = w_mat.shape
    Kp = _round_up(K, 128)
    Np = _round_up(N, 128)
    w_pad = jnp.zeros((Kp, Np), jnp.float32).at[:K, :N].set(w_mat)
    w_pad = w_pad.astype(jnp.bfloat16)
    b_pad = jnp.zeros((1, Np), jnp.float32).at[0, :N].set(b)
    return (w_pad, b_pad)


def prepare_width_params(params, wm):
    """Slice to the slimmable width, reshape to matmul layout, pad & cast bf16.
    Done ONCE per width multiplier (not per forward pass)."""
    def cdim(base):
        return int(wm * base)

    def conv_prep(name, in_c, out_c):
        w_full, b_full = params[name]
        k = w_full.shape[-1]
        w = w_full[:out_c, :in_c]                                 # [out,in,k,k]
        # (kh, kw, cin, cout) flattening matches the (dh, dw, c) patch order.
        w_mat = jnp.transpose(w, (2, 3, 1, 0)).reshape(k * k * in_c, out_c)
        return _pack_weight(w_mat, b_full[:out_c])

    def lin_prep(name, in_f, out_f):
        w_full, b_full = params[name]
        w_mat = jnp.transpose(w_full[:out_f, :in_f])              # [in, out]
        return _pack_weight(w_mat, b_full[:out_f])

    c64, c192, c384, c256 = cdim(64), cdim(192), cdim(384), cdim(256)
    f4096 = cdim(4096)
    return {
        "conv1": conv_prep("conv1", 3, c64),
        "conv2": conv_prep("conv2", c64, c192),
        "conv3": conv_prep("conv3", c192, c384),
        "conv4": conv_prep("conv4", c384, c256),
        "conv5": conv_prep("conv5", c256, c256),
        "fc1": lin_prep("fc1", c256, f4096),
        "fc2": lin_prep("fc2", f4096, f4096),
        "fc3": lin_prep("fc3", f4096, NUM_CLASSES),
    }


@functools.partial(jax.jit, static_argnums=2)
def alexsnn_forward_at_width(prep, x_nhwc, wm):
    """Single pass at a fixed width multiplier.  Returns (logits, confidence)."""
    c64, c192 = int(wm * 64), int(wm * 192)
    c384, c256 = int(wm * 384), int(wm * 256)

    h = conv2d_nhwc(x_nhwc, *prep["conv1"], out_c=c64, k=11, stride=4, pad=2)
    h = maxpool2d_nhwc(h)                                   # [B, 7, 7, c64]
    h = conv2d_nhwc(h, *prep["conv2"], out_c=c192, k=5, stride=1, pad=2)
    h = maxpool2d_nhwc(h)                                   # [B, 3, 3, c192]
    h = conv2d_nhwc(h, *prep["conv3"], out_c=c384, k=3, stride=1, pad=1)
    h = conv2d_nhwc(h, *prep["conv4"], out_c=c256, k=3, stride=1, pad=1)
    h = conv2d_nhwc(h, *prep["conv5"], out_c=c256, k=3, stride=1, pad=1)
    h = maxpool2d_nhwc(h)                                   # [B, 1, 1, c256]
    # nn.Dropout -> identity (eval mode)
    h = h.reshape(h.shape[0], -1)                           # torch.flatten(x, 1)
    # nn.Dropout -> identity (eval mode); fused fc1->fc2->fc3 + softmax/top-2
    logits, confidence = fc_head(h, *prep["fc1"], *prep["fc2"], *prep["fc3"])
    return logits, confidence


def alexsnn_forward(prepared, x_nchw, confidence_threshold=0.9):
    """Reproduces the width-escalation / early-exit loop of AlexSNN.forward."""
    x_nhwc = jnp.transpose(x_nchw, (0, 2, 3, 1)).astype(jnp.bfloat16)  # one-time flip/cast
    logits = None
    for wm in WIDTH_MULT_LIST:
        logits, conf = alexsnn_forward_at_width(prepared[wm], x_nhwc, wm)
        # Mirrors torch: max(softmax,1)[0] - topk(softmax,2)[0][:,1].item()
        # (one host sync per width pass, just like .item()).
        if float(conf) > confidence_threshold:
            break
        if wm == WIDTH_MULT_LIST[-1]:
            break
    return logits


# ------------------------------------------------------------------

if __name__ == "__main__":
    key = jax.random.PRNGKey(0)
    k_param, k_x = jax.random.split(key)
    params = init_params(k_param)
    # Pack per-width matmul-ready weights once (pre-sliced, pre-transposed,
    # padded, bf16) — not re-done inside the forward.
    prepared = {wm: prepare_width_params(params, wm) for wm in WIDTH_MULT_LIST}

    # input_shape declared by the module: (3, 64, 64); batch=1 (the forward's
    # .item()-based confidence check implies a single-sample batch).
    x = jax.random.normal(k_x, (1, 3, 64, 64), jnp.float32)

    out = alexsnn_forward(prepared, x)
    out = jax.block_until_ready(out)
    assert out.shape == (1, NUM_CLASSES) and bool(jnp.all(jnp.isfinite(out)))
    print("KERNEL_OK")
</pallas_src>

<mosaic_0001>
module attributes {stable_mosaic.version = 11 : i64} {
  func.func @_mm_bias_kernel(%arg0: i32, %arg1: memref<240x384xbf16, #tpu.memory_space<vmem>>, %arg2: memref<384x128xbf16, #tpu.memory_space<vmem>>, %arg3: memref<1x128xf32, #tpu.memory_space<vmem>>, %arg4: memref<240x128xbf16, #tpu.memory_space<vmem>>) attributes {dimension_semantics = [#tpu.dimension_semantics<arbitrary>], iteration_bounds = array<i64: 1>, scalar_prefetch = 0 : i64, scratch_operands = 0 : i64, tpu.core_type = #tpu.core_type<tc>, window_params = [{pipeline_mode = #tpu.pipeline_mode<synchronous>, transform_indices = @transform_0, window_bounds = array<i64: 240, 384>}, {pipeline_mode = #tpu.pipeline_mode<synchronous>, transform_indices = @transform_1, window_bounds = array<i64: 384, 128>}, {pipeline_mode = #tpu.pipeline_mode<synchronous>, transform_indices = @transform_2, window_bounds = array<i64: 1, 128>}, {pipeline_mode = #tpu.pipeline_mode<synchronous>, transform_indices = @transform_3, window_bounds = array<i64: 240, 128>}]} {
    %c0 = arith.constant 0 : index
    %c0_0 = arith.constant 0 : index
    %0 = vector.load %arg1[%c0, %c0_0] : memref<240x384xbf16, #tpu.memory_space<vmem>>, vector<240x384xbf16>
    %c0_1 = arith.constant 0 : index
    %c0_2 = arith.constant 0 : index
    %1 = vector.load %arg2[%c0_1, %c0_2] : memref<384x128xbf16, #tpu.memory_space<vmem>>, vector<384x128xbf16>
    %cst = arith.constant dense<0.000000e+00> : vector<240x128xf32>
    %2 = tpu.matmul %0, %1, %cst {dimension_numbers = #tpu.dot_dimension_numbers<[1], [0], [0], [1], [0, 0, 1, 1], [], []>} : vector<240x384xbf16>, vector<384x128xbf16>, vector<240x128xf32> -> vector<240x128xf32>
    %c0_3 = arith.constant 0 : index
    %c0_4 = arith.constant 0 : index
    %3 = vector.load %arg3[%c0_3, %c0_4] : memref<1x128xf32, #tpu.memory_space<vmem>>, vector<1x128xf32>
    %4 = vector.broadcast %3 : vector<1x128xf32> to vector<240x128xf32>
    %5 = arith.addf %2, %4 : vector<240x128xf32>
    %6 = arith.truncf %5 : vector<240x128xf32> to vector<240x128xbf16>
    %c0_5 = arith.constant 0 : index
    %c0_6 = arith.constant 0 : index
    %7 = vector.load %arg4[%c0_5, %c0_6] : memref<240x128xbf16, #tpu.memory_space<vmem>>, vector<240x128xbf16>
    tpu.vector_store %arg4[%c0_5, %c0_6], %6 {strides = array<i32>} : memref<240x128xbf16, #tpu.memory_space<vmem>>, vector<240x128xbf16>,
    return
  }
  func.func @transform_0(%arg0: i32) -> (i32, i32) {
    %c0_i32 = arith.constant 0 : i32
    %c0_i32_0 = arith.constant 0 : i32
    %c0_i32_1 = arith.constant 0 : i32
    return %c0_i32, %c0_i32_0 : i32, i32
  }
  func.func @transform_1(%arg0: i32) -> (i32, i32) {
    %c0_i32 = arith.constant 0 : i32
    %c0_i32_0 = arith.constant 0 : i32
    %c0_i32_1 = arith.constant 0 : i32
    return %c0_i32, %c0_i32_0 : i32, i32
  }
  func.func @transform_2(%arg0: i32) -> (i32, i32) {
    %c0_i32 = arith.constant 0 : i32
    %c0_i32_0 = arith.constant 0 : i32
    %c0_i32_1 = arith.constant 0 : i32
    return %c0_i32, %c0_i32_0 : i32, i32
  }
  func.func @transform_3(%arg0: i32) -> (i32, i32) {
    %c0_i32 = arith.constant 0 : i32
    %c0_i32_0 = arith.constant 0 : i32
    %c0_i32_1 = arith.constant 0 : i32
    return %c0_i32, %c0_i32_0 : i32, i32
  }
}

module attributes {stable_mosaic.version = 11 : i64} {
  func.func @_mm_bias_kernel(%arg0: i32, %arg1: memref<64x896xbf16, #tpu.memory_space<vmem>>, %arg2: memref<896x128xbf16, #tpu.memory_space<vmem>>, %arg3: memref<1x128xf32, #tpu.memory_space<vmem>>, %arg4: memref<64x128xbf16, #tpu.memory_space<vmem>>) attributes {dimension_semantics = [#tpu.dimension_semantics<arbitrary>], iteration_bounds = array<i64: 1>, scalar_prefetch = 0 : i64, scratch_operands = 0 : i64, tpu.core_type = #tpu.core_type<tc>, window_params = [{pipeline_mode = #tpu.pipeline_mode<synchronous>, transform_indices = @transform_0, window_bounds = array<i64: 64, 896>}, {pipeline_mode = #tpu.pipeline_mode<synchronous>, transform_indices = @transform_1, window_bounds = array<i64: 896, 128>}, {pipeline_mode = #tpu.pipeline_mode<synchronous>, transform_indices = @transform_2, window_bounds = array<i64: 1, 128>}, {pipeline_mode = #tpu.pipeline_mode<synchronous>, transform_indices = @transform_3, window_bounds = array<i64: 64, 128>}]} {
    %c0 = arith.constant 0 : index
    %c0_0 = arith.constant 0 : index
    %0 = vector.load %arg1[%c0, %c0_0] : memref<64x896xbf16, #tpu.memory_space<vmem>>, vector<64x896xbf16>
    %c0_1 = arith.constant 0 : index
    %c0_2 = arith.constant 0 : index
    %1 = vector.load %arg2[%c0_1, %c0_2] : memref<896x128xbf16, #tpu.memory_space<vmem>>, vector<896x128xbf16>
    %cst = arith.constant dense<0.000000e+00> : vector<64x128xf32>
    %2 = tpu.matmul %0, %1, %cst {dimension_numbers = #tpu.dot_dimension_numbers<[1], [0], [0], [1], [0, 0, 1, 1], [], []>} : vector<64x896xbf16>, vector<896x128xbf16>, vector<64x128xf32> -> vector<64x128xf32>
    %c0_3 = arith.constant 0 : index
    %c0_4 = arith.constant 0 : index
    %3 = vector.load %arg3[%c0_3, %c0_4] : memref<1x128xf32, #tpu.memory_space<vmem>>, vector<1x128xf32>
    %4 = vector.broadcast %3 : vector<1x128xf32> to vector<64x128xf32>
    %5 = arith.addf %2, %4 : vector<64x128xf32>
    %6 = arith.truncf %5 : vector<64x128xf32> to vector<64x128xbf16>
    %c0_5 = arith.constant 0 : index
    %c0_6 = arith.constant 0 : index
    %7 = vector.load %arg4[%c0_5, %c0_6] : memref<64x128xbf16, #tpu.memory_space<vmem>>, vector<64x128xbf16>
    tpu.vector_store %arg4[%c0_5, %c0_6], %6 {strides = array<i32>} : memref<64x128xbf16, #tpu.memory_space<vmem>>, vector<64x128xbf16>,
    return
  }
  func.func @transform_0(%arg0: i32) -> (i32, i32) {
    %c0_i32 = arith.constant 0 : i32
    %c0_i32_0 = arith.constant 0 : i32
    %c0_i32_1 = arith.constant 0 : i32
    return %c0_i32, %c0_i32_0 : i32, i32
  }
  func.func @transform_1(%arg0: i32) -> (i32, i32) {
    %c0_i32 = arith.constant 0 : i32
    %c0_i32_0 = arith.constant 0 : i32
    %c0_i32_1 = arith.constant 0 : i32
    return %c0_i32, %c0_i32_0 : i32, i32
  }
  func.func @transform_2(%arg0: i32) -> (i32, i32) {
    %c0_i32 = arith.constant 0 : i32
    %c0_i32_0 = arith.constant 0 : i32
    %c0_i32_1 = arith.constant 0 : i32
    return %c0_i32, %c0_i32_0 : i32, i32
  }
  func.func @transform_3(%arg0: i32) -> (i32, i32) {
    %c0_i32 = arith.constant 0 : i32
    %c0_i32_0 = arith.constant 0 : i32
    %c0_i32_1 = arith.constant 0 : i32
    return %c0_i32, %c0_i32_0 : i32, i32
  }
}

module attributes {stable_mosaic.version = 11 : i64} {
  func.func @_mm_bias_kernel(%arg0: i32, %arg1: memref<16x896xbf16, #tpu.memory_space<vmem>>, %arg2: memref<896x256xbf16, #tpu.memory_space<vmem>>, %arg3: memref<1x256xf32, #tpu.memory_space<vmem>>, %arg4: memref<16x256xbf16, #tpu.memory_space<vmem>>) attributes {dimension_semantics = [#tpu.dimension_semantics<arbitrary>], iteration_bounds = array<i64: 1>, scalar_prefetch = 0 : i64, scratch_operands = 0 : i64, tpu.core_type = #tpu.core_type<tc>, window_params = [{pipeline_mode = #tpu.pipeline_mode<synchronous>, transform_indices = @transform_0, window_bounds = array<i64: 16, 896>}, {pipeline_mode = #tpu.pipeline_mode<synchronous>, transform_indices = @transform_1, window_bounds = array<i64: 896, 256>}, {pipeline_mode = #tpu.pipeline_mode<synchronous>, transform_indices = @transform_2, window_bounds = array<i64: 1, 256>}, {pipeline_mode = #tpu.pipeline_mode<synchronous>, transform_indices = @transform_3, window_bounds = array<i64: 16, 256>}]} {
    %c0 = arith.constant 0 : index
    %c0_0 = arith.constant 0 : index
    %0 = vector.load %arg1[%c0, %c0_0] : memref<16x896xbf16, #tpu.memory_space<vmem>>, vector<16x896xbf16>
    %c0_1 = arith.constant 0 : index
    %c0_2 = arith.constant 0 : index
    %1 = vector.load %arg2[%c0_1, %c0_2] : memref<896x256xbf16, #tpu.memory_space<vmem>>, vector<896x256xbf16>
    %cst = arith.constant dense<0.000000e+00> : vector<16x256xf32>
    %2 = tpu.matmul %0, %1, %cst {dimension_numbers = #tpu.dot_dimension_numbers<[1], [0], [0], [1], [0, 0, 1, 1], [], []>} : vector<16x896xbf16>, vector<896x256xbf16>, vector<16x256xf32> -> vector<16x256xf32>
    %c0_3 = arith.constant 0 : index
    %c0_4 = arith.constant 0 : index
    %3 = vector.load %arg3[%c0_3, %c0_4] : memref<1x256xf32, #tpu.memory_space<vmem>>, vector<1x256xf32>
    %4 = vector.broadcast %3 : vector<1x256xf32> to vector<16x256xf32>
    %5 = arith.addf %2, %4 : vector<16x256xf32>
    %6 = arith.truncf %5 : vector<16x256xf32> to vector<16x256xbf16>
    %c0_5 = arith.constant 0 : index
    %c0_6 = arith.constant 0 : index
    %7 = vector.load %arg4[%c0_5, %c0_6] : memref<16x256xbf16, #tpu.memory_space<vmem>>, vector<16x256xbf16>
    tpu.vector_store %arg4[%c0_5, %c0_6], %6 {strides = array<i32>} : memref<16x256xbf16, #tpu.memory_space<vmem>>, vector<16x256xbf16>,
    return
  }
  func.func @transform_0(%arg0: i32) -> (i32, i32) {
    %c0_i32 = arith.constant 0 : i32
    %c0_i32_0 = arith.constant 0 : i32
    %c0_i32_1 = arith.constant 0 : i32
    return %c0_i32, %c0_i32_0 : i32, i32
  }
  func.func @transform_1(%arg0: i32) -> (i32, i32) {
    %c0_i32 = arith.constant 0 : i32
    %c0_i32_0 = arith.constant 0 : i32
    %c0_i32_1 = arith.constant 0 : i32
    return %c0_i32, %c0_i32_0 : i32, i32
  }
  func.func @transform_2(%arg0: i32) -> (i32, i32) {
    %c0_i32 = arith.constant 0 : i32
    %c0_i32_0 = arith.constant 0 : i32
    %c0_i32_1 = arith.constant 0 : i32
    return %c0_i32, %c0_i32_0 : i32, i32
  }
  func.func @transform_3(%arg0: i32) -> (i32, i32) {
    %c0_i32 = arith.constant 0 : i32
    %c0_i32_0 = arith.constant 0 : i32
    %c0_i32_1 = arith.constant 0 : i32
    return %c0_i32, %c0_i32_0 : i32, i32
  }
}

module attributes {stable_mosaic.version = 11 : i64} {
  func.func @_mm_bias_kernel(%arg0: i32, %arg1: memref<16x1792xbf16, #tpu.memory_space<vmem>>, %arg2: memref<1792x128xbf16, #tpu.memory_space<vmem>>, %arg3: memref<1x128xf32, #tpu.memory_space<vmem>>, %arg4: memref<16x128xbf16, #tpu.memory_space<vmem>>) attributes {dimension_semantics = [#tpu.dimension_semantics<arbitrary>], iteration_bounds = array<i64: 1>, scalar_prefetch = 0 : i64, scratch_operands = 0 : i64, tpu.core_type = #tpu.core_type<tc>, window_params = [{pipeline_mode = #tpu.pipeline_mode<synchronous>, transform_indices = @transform_0, window_bounds = array<i64: 16, 1792>}, {pipeline_mode = #tpu.pipeline_mode<synchronous>, transform_indices = @transform_1, window_bounds = array<i64: 1792, 128>}, {pipeline_mode = #tpu.pipeline_mode<synchronous>, transform_indices = @transform_2, window_bounds = array<i64: 1, 128>}, {pipeline_mode = #tpu.pipeline_mode<synchronous>, transform_indices = @transform_3, window_bounds = array<i64: 16, 128>}]} {
    %c0 = arith.constant 0 : index
    %c0_0 = arith.constant 0 : index
    %0 = vector.load %arg1[%c0, %c0_0] : memref<16x1792xbf16, #tpu.memory_space<vmem>>, vector<16x1792xbf16>
    %c0_1 = arith.constant 0 : index
    %c0_2 = arith.constant 0 : index
    %1 = vector.load %arg2[%c0_1, %c0_2] : memref<1792x128xbf16, #tpu.memory_space<vmem>>, vector<1792x128xbf16>
    %cst = arith.constant dense<0.000000e+00> : vector<16x128xf32>
    %2 = tpu.matmul %0, %1, %cst {dimension_numbers = #tpu.dot_dimension_numbers<[1], [0], [0], [1], [0, 0, 1, 1], [], []>} : vector<16x1792xbf16>, vector<1792x128xbf16>, vector<16x128xf32> -> vector<16x128xf32>
    %c0_3 = arith.constant 0 : index
    %c0_4 = arith.constant 0 : index
    %3 = vector.load %arg3[%c0_3, %c0_4] : memref<1x128xf32, #tpu.memory_space<vmem>>, vector<1x128xf32>
    %4 = vector.broadcast %3 : vector<1x128xf32> to vector<16x128xf32>
    %5 = arith.addf %2, %4 : vector<16x128xf32>
    %6 = arith.truncf %5 : vector<16x128xf32> to vector<16x128xbf16>
    %c0_5 = arith.constant 0 : index
    %c0_6 = arith.constant 0 : index
    %7 = vector.load %arg4[%c0_5, %c0_6] : memref<16x128xbf16, #tpu.memory_space<vmem>>, vector<16x128xbf16>
    tpu.vector_store %arg4[%c0_5, %c0_6], %6 {strides = array<i32>} : memref<16x128xbf16, #tpu.memory_space<vmem>>, vector<16x128xbf16>,
    return
  }
  func.func @transform_0(%arg0: i32) -> (i32, i32) {
    %c0_i32 = arith.constant 0 : i32
    %c0_i32_0 = arith.constant 0 : i32
    %c0_i32_1 = arith.constant 0 : i32
    return %c0_i32, %c0_i32_0 : i32, i32
  }
  func.func @transform_1(%arg0: i32) -> (i32, i32) {
    %c0_i32 = arith.constant 0 : i32
    %c0_i32_0 = arith.constant 0 : i32
    %c0_i32_1 = arith.constant 0 : i32
    return %c0_i32, %c0_i32_0 : i32, i32
  }
  func.func @transform_2(%arg0: i32) -> (i32, i32) {
    %c0_i32 = arith.constant 0 : i32
    %c0_i32_0 = arith.constant 0 : i32
    %c0_i32_1 = arith.constant 0 : i32
    return %c0_i32, %c0_i32_0 : i32, i32
  }
  func.func @transform_3(%arg0: i32) -> (i32, i32) {
    %c0_i32 = arith.constant 0 : i32
    %c0_i32_0 = arith.constant 0 : i32
    %c0_i32_1 = arith.constant 0 : i32
    return %c0_i32, %c0_i32_0 : i32, i32
  }
}

module attributes {stable_mosaic.version = 11 : i64} {
  func.func @_mm_bias_kernel(%arg0: i32, %arg1: memref<16x1152xbf16, #tpu.memory_space<vmem>>, %arg2: memref<1152x128xbf16, #tpu.memory_space<vmem>>, %arg3: memref<1x128xf32, #tpu.memory_space<vmem>>, %arg4: memref<16x128xbf16, #tpu.memory_space<vmem>>) attributes {dimension_semantics = [#tpu.dimension_semantics<arbitrary>], iteration_bounds = array<i64: 1>, scalar_prefetch = 0 : i64, scratch_operands = 0 : i64, tpu.core_type = #tpu.core_type<tc>, window_params = [{pipeline_mode = #tpu.pipeline_mode<synchronous>, transform_indices = @transform_0, window_bounds = array<i64: 16, 1152>}, {pipeline_mode = #tpu.pipeline_mode<synchronous>, transform_indices = @transform_1, window_bounds = array<i64: 1152, 128>}, {pipeline_mode = #tpu.pipeline_mode<synchronous>, transform_indices = @transform_2, window_bounds = array<i64: 1, 128>}, {pipeline_mode = #tpu.pipeline_mode<synchronous>, transform_indices = @transform_3, window_bounds = array<i64: 16, 128>}]} {
    %c0 = arith.constant 0 : index
    %c0_0 = arith.constant 0 : index
    %0 = vector.load %arg1[%c0, %c0_0] : memref<16x1152xbf16, #tpu.memory_space<vmem>>, vector<16x1152xbf16>
    %c0_1 = arith.constant 0 : index
    %c0_2 = arith.constant 0 : index
    %1 = vector.load %arg2[%c0_1, %c0_2] : memref<1152x128xbf16, #tpu.memory_space<vmem>>, vector<1152x128xbf16>
    %cst = arith.constant dense<0.000000e+00> : vector<16x128xf32>
    %2 = tpu.matmul %0, %1, %cst {dimension_numbers = #tpu.dot_dimension_numbers<[1], [0], [0], [1], [0, 0, 1, 1], [], []>} : vector<16x1152xbf16>, vector<1152x128xbf16>, vector<16x128xf32> -> vector<16x128xf32>
    %c0_3 = arith.constant 0 : index
    %c0_4 = arith.constant 0 : index
    %3 = vector.load %arg3[%c0_3, %c0_4] : memref<1x128xf32, #tpu.memory_space<vmem>>, vector<1x128xf32>
    %4 = vector.broadcast %3 : vector<1x128xf32> to vector<16x128xf32>
    %5 = arith.addf %2, %4 : vector<16x128xf32>
    %6 = arith.truncf %5 : vector<16x128xf32> to vector<16x128xbf16>
    %c0_5 = arith.constant 0 : index
    %c0_6 = arith.constant 0 : index
    %7 = vector.load %arg4[%c0_5, %c0_6] : memref<16x128xbf16, #tpu.memory_space<vmem>>, vector<16x128xbf16>
    tpu.vector_store %arg4[%c0_5, %c0_6], %6 {strides = array<i32>} : memref<16x128xbf16, #tpu.memory_space<vmem>>, vector<16x128xbf16>,
    return
  }
  func.func @transform_0(%arg0: i32) -> (i32, i32) {
    %c0_i32 = arith.constant 0 : i32
    %c0_i32_0 = arith.constant 0 : i32
    %c0_i32_1 = arith.constant 0 : i32
    return %c0_i32, %c0_i32_0 : i32, i32
  }
  func.func @transform_1(%arg0: i32) -> (i32, i32) {
    %c0_i32 = arith.constant 0 : i32
    %c0_i32_0 = arith.constant 0 : i32
    %c0_i32_1 = arith.constant 0 : i32
    return %c0_i32, %c0_i32_0 : i32, i32
  }
  func.func @transform_2(%arg0: i32) -> (i32, i32) {
    %c0_i32 = arith.constant 0 : i32
    %c0_i32_0 = arith.constant 0 : i32
    %c0_i32_1 = arith.constant 0 : i32
    return %c0_i32, %c0_i32_0 : i32, i32
  }
  func.func @transform_3(%arg0: i32) -> (i32, i32) {
    %c0_i32 = arith.constant 0 : i32
    %c0_i32_0 = arith.constant 0 : i32
    %c0_i32_1 = arith.constant 0 : i32
    return %c0_i32, %c0_i32_0 : i32, i32
  }
}

module attributes {stable_mosaic.version = 11 : i64} {
  func.func @_fc_head_kernel(%arg0: i32, %arg1: memref<16x128xbf16, #tpu.memory_space<vmem>>, %arg2: memref<128x512xbf16, #tpu.memory_space<vmem>>, %arg3: memref<1x512xf32, #tpu.memory_space<vmem>>, %arg4: memref<512x2048xbf16, #tpu.memory_space<vmem>>, %arg5: memref<1x2048xf32, #tpu.memory_space<vmem>>, %arg6: memref<2048x128xbf16, #tpu.memory_space<vmem>>, %arg7: memref<1x128xf32, #tpu.memory_space<vmem>>, %arg8: memref<16x128xf32, #tpu.memory_space<vmem>>, %arg9: memref<16x128xf32, #tpu.memory_space<vmem>>, %arg10: memref<16x2048xf32, #tpu.memory_space<vmem>>) attributes {dimension_semantics = [#tpu.dimension_semantics<arbitrary>], iteration_bounds = array<i64: 4>, scalar_prefetch = 0 : i64, scratch_operands = 1 : i64, tpu.core_type = #tpu.core_type<tc>, window_params = [{pipeline_mode = #tpu.pipeline_mode<synchronous>, transform_indices = @transform_0, window_bounds = array<i64: 16, 128>}, {transform_indices = @transform_1, window_bounds = array<i64: 128, 512>}, {transform_indices = @transform_2, window_bounds = array<i64: 1, 512>}, {transform_indices = @transform_3, window_bounds = array<i64: 512, 2048>}, {pipeline_mode = #tpu.pipeline_mode<synchronous>, transform_indices = @transform_4, window_bounds = array<i64: 1, 2048>}, {pipeline_mode = #tpu.pipeline_mode<synchronous>, transform_indices = @transform_5, window_bounds = array<i64: 2048, 128>}, {pipeline_mode = #tpu.pipeline_mode<synchronous>, transform_indices = @transform_6, window_bounds = array<i64: 1, 128>}, {pipeline_mode = #tpu.pipeline_mode<synchronous>, transform_indices = @transform_7, window_bounds = array<i64: 16, 128>}, {pipeline_mode = #tpu.pipeline_mode<synchronous>, transform_indices = @transform_8, window_bounds = array<i64: 16, 128>}]} {
    %c0_i32 = arith.constant 0 : i32
    %0 = arith.cmpi eq, %arg0, %c0_i32 : i32
    %1 = arith.extui %0 : i1 to i32
    %c0_i32_0 = arith.constant 0 : i32
    %2 = arith.cmpi ne, %1, %c0_i32_0 : i32
    scf.if %2 {
      %cst_14 = arith.constant 0.000000e+00 : f32
      %18 = vector.broadcast %cst_14 : f32 to vector<16x2048xf32>
      %c0_15 = arith.constant 0 : index
      %c0_16 = arith.constant 0 : index
      %19 = vector.load %arg10[%c0_15, %c0_16] : memref<16x2048xf32, #tpu.memory_space<vmem>>, vector<16x2048xf32>
      tpu.vector_store %arg10[%c0_15, %c0_16], %18 {strides = array<i32>} : memref<16x2048xf32, #tpu.memory_space<vmem>>, vector<16x2048xf32>,
    } else {
    }
    %c0 = arith.constant 0 : index
    %c0_1 = arith.constant 0 : index
    %3 = vector.load %arg1[%c0, %c0_1] : memref<16x128xbf16, #tpu.memory_space<vmem>>, vector<16x128xbf16>
    %c0_2 = arith.constant 0 : index
    %c0_3 = arith.constant 0 : index
    %4 = vector.load %arg2[%c0_2, %c0_3] : memref<128x512xbf16, #tpu.memory_space<vmem>>, vector<128x512xbf16>
    %cst = arith.constant dense<0.000000e+00> : vector<16x512xf32>
    %5 = tpu.matmul %3, %4, %cst {dimension_numbers = #tpu.dot_dimension_numbers<[1], [0], [0], [1], [0, 0, 1, 1], [], []>} : vector<16x128xbf16>, vector<128x512xbf16>, vector<16x512xf32> -> vector<16x512xf32>
    %c0_4 = arith.constant 0 : index
    %c0_5 = arith.constant 0 : index
    %6 = vector.load %arg3[%c0_4, %c0_5] : memref<1x512xf32, #tpu.memory_space<vmem>>, vector<1x512xf32>
    %7 = vector.broadcast %6 : vector<1x512xf32> to vector<16x512xf32>
    %8 = arith.addf %5, %7 : vector<16x512xf32>
    %c0_6 = arith.constant 0 : index
    %c0_7 = arith.constant 0 : index
    %9 = vector.load %arg10[%c0_6, %c0_7] : memref<16x2048xf32, #tpu.memory_space<vmem>>, vector<16x2048xf32>
    %10 = arith.truncf %8 : vector<16x512xf32> to vector<16x512xbf16>
    %c0_8 = arith.constant 0 : index
    %c0_9 = arith.constant 0 : index
    %11 = vector.load %arg4[%c0_8, %c0_9] : memref<512x2048xbf16, #tpu.memory_space<vmem>>, vector<512x2048xbf16>
    %cst_10 = arith.constant dense<0.000000e+00> : vector<16x2048xf32>
    %12 = tpu.matmul %10, %11, %cst_10 {dimension_numbers = #tpu.dot_dimension_numbers<[1], [0], [0], [1], [0, 0, 1, 1], [], []>} : vector<16x512xbf16>, vector<512x2048xbf16>, vector<16x2048xf32> -> vector<16x2048xf32>
    %13 = arith.addf %9, %12 : vector<16x2048xf32>
    %c0_11 = arith.constant 0 : index
    %c0_12 = arith.constant 0 : index
    %14 = vector.load %arg10[%c0_11, %c0_12] : memref<16x2048xf32, #tpu.memory_space<vmem>>, vector<16x2048xf32>
    tpu.vector_store %arg10[%c0_11, %c0_12], %13 {strides = array<i32>} : memref<16x2048xf32, #tpu.memory_space<vmem>>, vector<16x2048xf32>,
    %c3_i32 = arith.constant 3 : i32
    %15 = arith.cmpi eq, %arg0, %c3_i32 : i32
    %16 = arith.extui %15 : i1 to i32
    %c0_i32_13 = arith.constant 0 : i32
    %17 = arith.cmpi ne, %16, %c0_i32_13 : i32
    scf.if %17 {
      %c0_14 = arith.constant 0 : index
      %c0_15 = arith.constant 0 : index
      %18 = vector.load %arg10[%c0_14, %c0_15] : memref<16x2048xf32, #tpu.memory_space<vmem>>, vector<16x2048xf32>
      %c0_16 = arith.constant 0 : index
      %c0_17 = arith.constant 0 : index
      %19 = vector.load %arg5[%c0_16, %c0_17] : memref<1x2048xf32, #tpu.memory_space<vmem>>, vector<1x2048xf32>
      %20 = vector.broadcast %19 : vector<1x2048xf32> to vector<16x2048xf32>
      %21 = arith.addf %18, %20 : vector<16x2048xf32>
      %22 = arith.truncf %21 : vector<16x2048xf32> to vector<16x2048xbf16>
      %c0_18 = arith.constant 0 : index
      %c0_19 = arith.constant 0 : index
      %23 = vector.load %arg6[%c0_18, %c0_19] : memref<2048x128xbf16, #tpu.memory_space<vmem>>, vector<2048x128xbf16>
      %cst_20 = arith.constant dense<0.000000e+00> : vector<16x128xf32>
      %24 = tpu.matmul %22, %23, %cst_20 {dimension_numbers = #tpu.dot_dimension_numbers<[1], [0], [0], [1], [0, 0, 1, 1], [], []>} : vector<16x2048xbf16>, vector<2048x128xbf16>, vector<16x128xf32> -> vector<16x128xf32>
      %c0_21 = arith.constant 0 : index
      %c0_22 = arith.constant 0 : index
      %25 = vector.load %arg7[%c0_21, %c0_22] : memref<1x128xf32, #tpu.memory_space<vmem>>, vector<1x128xf32>
      %26 = vector.broadcast %25 : vector<1x128xf32> to vector<16x128xf32>
      %27 = arith.addf %24, %26 : vector<16x128xf32>
      %c0_23 = arith.constant 0 : index
      %c0_24 = arith.constant 0 : index
      %28 = vector.load %arg8[%c0_23, %c0_24] : memref<16x128xf32, #tpu.memory_space<vmem>>, vector<16x128xf32>
      tpu.vector_store %arg8[%c0_23, %c0_24], %27 {strides = array<i32>} : memref<16x128xf32, #tpu.memory_space<vmem>>, vector<16x128xf32>,
      %29 = tpu.iota {dimensions = array<i32: 1>} : vector<16x128xi32>
      %c10_i32 = arith.constant 10 : i32
      %30 = vector.broadcast %c10_i32 : i32 to vector<16x128xi32>
      %31 = arith.cmpi slt, %29, %30 : vector<16x128xi32>
      %cst_25 = arith.constant 0xFF800000 : f32
      %32 = vector.broadcast %cst_25 : f32 to vector<16x128xf32>
      %33 = arith.select %31, %27, %32 : vector<16x128xi1>, vector<16x128xf32>
      %cst_26 = arith.constant dense<0xFF800000> : vector<16xf32>
      %34 = vector.multi_reduction <maximumf>, %33, %cst_26 [1] : vector<16x128xf32> to vector<16xf32>
      %35 = vector.shape_cast %34 : vector<16xf32> to vector<16x1xf32>
      %36 = vector.broadcast %35 : vector<16x1xf32> to vector<16x128xf32>
      %37 = arith.subf %33, %36 : vector<16x128xf32>
      %38 = math.exp %37 : vector<16x128xf32>
      %cst_27 = arith.constant dense<0.000000e+00> : vector<16xf32>
      %39 = vector.multi_reduction <add>, %38, %cst_27 [1] : vector<16x128xf32> to vector<16xf32>
      %40 = vector.shape_cast %39 : vector<16xf32> to vector<16x1xf32>
      %41 = vector.broadcast %40 : vector<16x1xf32> to vector<16x128xf32>
      %42 = arith.divf %38, %41 : vector<16x128xf32>
      %cst_28 = arith.constant dense<0xFF800000> : vector<16xf32>
      %43 = vector.multi_reduction <maximumf>, %42, %cst_28 [1] : vector<16x128xf32> to vector<16xf32>
      %44 = vector.shape_cast %43 : vector<16xf32> to vector<16x1xf32>
      %45 = vector.broadcast %44 : vector<16x1xf32> to vector<16x128xf32>
      %46 = arith.cmpf oeq, %42, %45 : vector<16x128xf32>
      %c1073741824_i32 = arith.constant 1073741824 : i32
      %47 = vector.broadcast %c1073741824_i32 : i32 to vector<16x128xi32>
      %48 = arith.select %46, %29, %47 : vector<16x128xi1>, vector<16x128xi32>
      %cst_29 = arith.constant dense<2147483647> : vector<16xi32>
      %49 = vector.multi_reduction <minsi>, %48, %cst_29 [1] : vector<16x128xi32> to vector<16xi32>
      %50 = vector.shape_cast %49 : vector<16xi32> to vector<16x1xi32>
      %51 = vector.broadcast %50 : vector<16x1xi32> to vector<16x128xi32>
      %52 = arith.cmpi eq, %29, %51 : vector<16x128xi32>
      %53 = arith.select %52, %32, %42 : vector<16x128xi1>, vector<16x128xf32>
      %cst_30 = arith.constant dense<0xFF800000> : vector<16xf32>
      %54 = vector.multi_reduction <maximumf>, %53, %cst_30 [1] : vector<16x128xf32> to vector<16xf32>
      %55 = vector.shape_cast %54 : vector<16xf32> to vector<16x1xf32>
      %cst_31 = arith.constant 0.000000e+00 : f32
      %56 = vector.broadcast %cst_31 : f32 to vector<16x128xf32>
      %57 = arith.subf %44, %55 : vector<16x1xf32>
      %58 = vector.broadcast %57 : vector<16x1xf32> to vector<16x128xf32>
      %59 = arith.addf %56, %58 : vector<16x128xf32>
      %c0_32 = arith.constant 0 : index
      %c0_33 = arith.constant 0 : index
      %60 = vector.load %arg9[%c0_32, %c0_33] : memref<16x128xf32, #tpu.memory_space<vmem>>, vector<16x128xf32>
      tpu.vector_store %arg9[%c0_32, %c0_33], %59 {strides = array<i32>} : memref<16x128xf32, #tpu.memory_space<vmem>>, vector<16x128xf32>,
    } else {
    }
    return
  }
  func.func @transform_0(%arg0: i32) -> (i32, i32) {
    %c0_i32 = arith.constant 0 : i32
    %c0_i32_0 = arith.constant 0 : i32
    %c0_i32_1 = arith.constant 0 : i32
    return %c0_i32, %c0_i32_0 : i32, i32
  }
  func.func @transform_1(%arg0: i32) -> (i32, i32) {
    %c0_i32 = arith.constant 0 : i32
    %c0_i32_0 = arith.constant 0 : i32
    return %c0_i32, %arg0 : i32, i32
  }
  func.func @transform_2(%arg0: i32) -> (i32, i32) {
    %c0_i32 = arith.constant 0 : i32
    %c0_i32_0 = arith.constant 0 : i32
    return %c0_i32, %arg0 : i32, i32
  }
  func.func @transform_3(%arg0: i32) -> (i32, i32) {
    %c0_i32 = arith.constant 0 : i32
    %c0_i32_0 = arith.constant 0 : i32
    return %arg0, %c0_i32 : i32, i32
  }
  func.func @transform_4(%arg0: i32) -> (i32, i32) {
    %c0_i32 = arith.constant 0 : i32
    %c0_i32_0 = arith.constant 0 : i32
    %c0_i32_1 = arith.constant 0 : i32
    return %c0_i32, %c0_i32_0 : i32, i32
  }
  func.func @transform_5(%arg0: i32) -> (i32, i32) {
    %c0_i32 = arith.constant 0 : i32
    %c0_i32_0 = arith.constant 0 : i32
    %c0_i32_1 = arith.constant 0 : i32
    return %c0_i32, %c0_i32_0 : i32, i32
  }
  func.func @transform_6(%arg0: i32) -> (i32, i32) {
    %c0_i32 = arith.constant 0 : i32
    %c0_i32_0 = arith.constant 0 : i32
    %c0_i32_1 = arith.constant 0 : i32
    return %c0_i32, %c0_i32_0 : i32, i32
  }
  func.func @transform_7(%arg0: i32) -> (i32, i32) {
    %c0_i32 = arith.constant 0 : i32
    %c0_i32_0 = arith.constant 0 : i32
    %c0_i32_1 = arith.constant 0 : i32
    return %c0_i32, %c0_i32_0 : i32, i32
  }
  func.func @transform_8(%arg0: i32) -> (i32, i32) {
    %c0_i32 = arith.constant 0 : i32
    %c0_i32_0 = arith.constant 0 : i32
    %c0_i32_1 = arith.constant 0 : i32
    return %c0_i32, %c0_i32_0 : i32, i32
  }
}

</mosaic_0001>

<bundles_post_ra>
// kernel: alexsnn_forward_at_width.6
= control target key start
LH: loop header
LB: loop body
LE: loop exit
PB: predicated region body
PF: predicated region fallthrough
CT: control target
= control target key end

     0   :  { %v1484_v1 = vmov 0.0   ;;  %vm1485_vm0 = vmmov 0   ;;  %s1831_s1 = inlined_call_operand.vmem [shape: bf16[384,128], index: 1, kind: input, shape index: {}]   ;;  %s1832_s0 = inlined_call_operand.vmem [shape: bf16[240,384], index: 0, kind: input, shape index: {}]   ;;  %s1833_s2 = inlined_call_operand.vmem [shape: f32[1,128], index: 2, kind: input, shape index: {}]   ;;  %s1834_s3 = inlined_call_operand.vmem [shape: bf16[240,128], index: 3, kind: output, shape index: {}]  }
   0x1   :  { %v1400_v0 = vld [vmem:[%s1831_s1 + $0x78] sm:$0xff]   ;;  %1322 = vmatprep.subr.bf16.mxu1 %v1484_v1  ;;  %1338 = vmatprep.mubr.msk.bf16.mxu1 %vm1485_vm0, %v1484_v1  ;;  %v1403_v4 = vld [vmem:[%s1831_s1 + $0x70] sm:$0xff]   ;;  %v1406_v7 = vld [vmem:[%s1831_s1 + $0x68] sm:$0xff]  }
   0x2   :  { %v1401_v2 = vld [vmem:[%s1831_s1 + $0x38] sm:$0xff]   ;;  %1193 = vmatprep.subr.bf16.mxu0 %v1400_v0  ;;  %v1404_v5 = vld [vmem:[%s1831_s1 + $0x30] sm:$0xff]   ;;  %v1407_v8 = vld [vmem:[%s1831_s1 + $0x28] sm:$0xff]  }
   0x3   :  { %v1402_v3 = vld [vmem:[%s1831_s1 + $0xb8] sm:$0xff]   ;;  %1194 = vmatpush3.bf16.msra.mxu0 %v1401_v2  ;;  %v1405_v6 = vld [vmem:[%s1831_s1 + $0xb0] sm:$0xff]   ;;  %v1408_v9 = vld [vmem:[%s1831_s1 + $0xa8] sm:$0xff]  }
   0x4   :  { %1323 = vmatpush3.bf16.msra.mxu1 %v1402_v3  ;;  %1195 = vmatprep.subr.bf16.mxu0 %v1403_v4  ;;  %v1409_v10 = vld [vmem:[%s1831_s1 + $0x60] sm:$0xff]   ;;  %v1412_v13 = vld [vmem:[%s1831_s1 + $0x58] sm:$0xff]   ;;  %v1415_v16 = vld [vmem:[%s1831_s1 + $0x50] sm:$0xff]  }
   0x5   :  { %1324 = vmatprep.subr.bf16.mxu1 %v1484_v1  ;;  %v1410_v11 = vld [vmem:[%s1831_s1 + $0x20] sm:$0xff]   ;;  %v1413_v14 = vld [vmem:[%s1831_s1 + $0x18] sm:$0xff]   ;;  %v1416_v17 = vld [vmem:[%s1831_s1 + $0x10] sm:$0xff]  }
   0x6   :  { %v1411_v12 = vld [vmem:[%s1831_s1 + $0xa0] sm:$0xff]   ;;  %v1414_v15 = vld [vmem:[%s1831_s1 + $0x98] sm:$0xff]   ;;  %v1417_v18 = vld [vmem:[%s1831_s1 + $0x90] sm:$0xff]  }
   0x7   :  { %1196 = vmatpush3.bf16.msra.mxu0 %v1404_v5  ;;  %v1418_v19 = vld [vmem:[%s1831_s1 + $0x48] sm:$0xff]   ;;  %v1421_v22 = vld [vmem:[%s1831_s1 + $0x40] sm:$0xff]   ;;  %v1434_v32 = vld [vmem:[%s1832_s0 + $0x30] ss:$12 sps:$4 sm:$0xff]  }
   0x8   :  { %1325 = vmatpush3.bf16.msra.mxu1 %v1405_v6  ;;  %1197 = vmatprep.subr.bf16.mxu0 %v1406_v7  ;;  %v1419_v20 = vld [vmem:[%s1831_s1 + $0x8] sm:$0xff]   ;;  %v1426_v23 = vld [vmem:[%s1832_s0 + $0x4] ss:$12 sps:$4 sm:$0xff]   ;;  %v1432_v31 = vld [vmem:[%s1832_s0 + $0x34] ss:$12 sps:$4 sm:$0xff]  }
   0x9   :  { %1326 = vmatprep.subr.bf16.mxu1 %v1484_v1  ;;  %v1420_v21 = vld [vmem:[%s1831_s1 + $0x88] sm:$0xff]   ;;  %v1422_v24 = vld [vmem:[%s1831_s1] sm:$0xff]   ;;  %546 = vmatprep.mubr.bf16.mxu0 %v1426_v23  ;;  %v1439_v36 = vld [vmem:[%s1832_s0 + $0x50] ss:$12 sps:$4 sm:$0xff]  }
   0xa   :  { %v1423_v25 = vld [vmem:[%s1831_s1 + $0x80] sm:$0xff]   ;;  %v1427_v27 = vld [vmem:[%s1832_s0 + $0x8] ss:$12 sps:$4 sm:$0xff]   ;;  %v1436_v34 = vld [vmem:[%s1832_s0 + $0x4c] ss:$12 sps:$4 sm:$0xff]  }
   0xb   :  { %1198 = vmatpush3.bf16.msra.mxu0 %v1407_v8  ;;  %v1424_v26 = vld [vmem:[%s1832_s0] ss:$12 sps:$4 sm:$0xff]   ;;  %v1428_v28 = vld [vmem:[%s1832_s0 + $0x1c] ss:$12 sps:$4 sm:$0xff]   ;;  %v1430_v29 = vld [vmem:[%s1832_s0 + $0x18] ss:$12 sps:$4 sm:$0xff]  }
   0xc   :  { %1327 = vmatpush3.bf16.msra.mxu1 %v1408_v9  ;;  %1199 = vmatprep.subr.bf16.mxu0 %v1409_v10  ;;  %v1431_v30 = vld [vmem:[%s1832_s0 + $0x20] ss:$12 sps:$4 sm:$0xff]   ;;  %v1435_v33 = vld [vmem:[%s1832_s0 + $0x38] ss:$12 sps:$4 sm:$0xff]   ;;  %v1438_v35 = vld [vmem:[%s1832_s0 + $0x48] ss:$12 sps:$4 sm:$0xff]  }
   0xd   :  { %1328 = vmatprep.subr.bf16.mxu1 %v1484_v1  ;;  %v1440_v37 = vld [vmem:[%s1832_s0 + $0x64] ss:$12 sps:$4 sm:$0xff]   ;;  %v1442_v38 = vld [vmem:[%s1832_s0 + $0x60] ss:$12 sps:$4 sm:$0xff]   ;;  %v1443_v39 = vld [vmem:[%s1832_s0 + $0x68] ss:$12 sps:$4 sm:$0xff]  }
   0xe   :  { %v1444_v40 = vld [vmem:[%s1832_s0 + $0x7c] ss:$12 sps:$4 sm:$0xff]   ;;  %v1446_v41 = vld [vmem:[%s1832_s0 + $0x78] ss:$12 sps:$4 sm:$0xff]   ;;  %v1447_v42 = vld [vmem:[%s1832_s0 + $0x80] ss:$12 sps:$4 sm:$0xff]  }
   0xf   :  { %1200 = vmatpush3.bf16.msra.mxu0 %v1410_v11  ;;  %v1448_v43 = vld [vmem:[%s1832_s0 + $0x94] ss:$12 sps:$4 sm:$0xff]   ;;  %v1450_v44 = vld [vmem:[%s1832_s0 + $0x90] ss:$12 sps:$4 sm:$0xff]   ;;  %v1451_v45 = vld [vmem:[%s1832_s0 + $0x98] ss:$12 sps:$4 sm:$0xff]  }
  0x10   :  { %1329 = vmatpush3.bf16.msra.mxu1 %v1411_v12  ;;  %1201 = vmatprep.subr.bf16.mxu0 %v1412_v13  ;;  %v1452_v46 = vld [vmem:[%s1832_s0 + $0xac] ss:$12 sps:$4 sm:$0xff]   ;;  %v1454_v47 = vld [vmem:[%s1832_s0 + $0xa8] ss:$12 sps:$4 sm:$0xff]   ;;  %v1455_v48 = vld [vmem:[%s1832_s0 + $0xb0] ss:$12 sps:$4 sm:$0xff]  }
  0x11   :  { %1330 = vmatprep.subr.bf16.mxu1 %v1484_v1  ;;  %v1456_v49 = vld [vmem:[%s1832_s0 + $0xc4] ss:$12 sps:$4 sm:$0xff]   ;;  %v1458_v50 = vld [vmem:[%s1832_s0 + $0xc0] ss:$12 sps:$4 sm:$0xff]   ;;  %v1459_v51 = vld [vmem:[%s1832_s0 + $0xc8] ss:$12 sps:$4 sm:$0xff]  }
  0x12   :  { %v1460_v52 = vld [vmem:[%s1832_s0 + $0xdc] ss:$12 sps:$4 sm:$0xff]   ;;  %v1462_v53 = vld [vmem:[%s1832_s0 + $0xd8] ss:$12 sps:$4 sm:$0xff]   ;;  %v1463_v54 = vld [vmem:[%s1832_s0 + $0xe0] ss:$12 sps:$4 sm:$0xff]  }
  0x13   :  { %1202 = vmatpush3.bf16.msra.mxu0 %v1413_v14  ;;  %v1464_v55 = vld [vmem:[%s1832_s0 + $0xf4] ss:$12 sps:$4 sm:$0xff]   ;;  %v1466_v56 = vld [vmem:[%s1832_s0 + $0xf0] ss:$12 sps:$4 sm:$0xff]   ;;  %v1467_v57 = vld [vmem:[%s1832_s0 + $0xf8] ss:$12 sps:$4 sm:$0xff]  }
  0x14   :  { %1331 = vmatpush3.bf16.msra.mxu1 %v1414_v15  ;;  %1203 = vmatprep.subr.bf16.mxu0 %v1415_v16  ;;  %v1468_v58 = vld [vmem:[%s1832_s0 + $0x10c] ss:$12 sps:$4 sm:$0xff]   ;;  %v1470_v59 = vld [vmem:[%s1832_s0 + $0x108] ss:$12 sps:$4 sm:$0xff]   ;;  %v1471_v60 = vld [vmem:[%s1832_s0 + $0x110] ss:$12 sps:$4 sm:$0xff]  }
  0x15   :  { %1332 = vmatprep.subr.bf16.mxu1 %v1484_v1  ;;  %v1472_v61 = vld [vmem:[%s1832_s0 + $0x124] ss:$12 sps:$4 sm:$0xff]   ;;  %v1474_v62 = vld [vmem:[%s1832_s0 + $0x120] ss:$12 sps:$4 sm:$0xff]   ;;  %v1475_v63 = vld [vmem:[%s1832_s0 + $0x128] ss:$12 sps:$4 sm:$0xff]  }
  0x16   :  { %v1476_v0 = vld [vmem:[%s1832_s0 + $0x13c] ss:$12 sps:$4 sm:$0xff]   ;;  %v1478_v2 = vld [vmem:[%s1832_s0 + $0x138] ss:$12 sps:$4 sm:$0xff]   ;;  %v1479_v3 = vld [vmem:[%s1832_s0 + $0x140] ss:$12 sps:$4 sm:$0xff]  }
  0x17   :  { %1204 = vmatpush3.bf16.msra.mxu0 %v1416_v17  ;;  %v1480_v4 = vld [vmem:[%s1832_s0 + $0x154] ss:$12 sps:$4 sm:$0xff]   ;;  %v1482_v5 = vld [vmem:[%s1832_s0 + $0x150] ss:$12 sps:$4 sm:$0xff]   ;;  %v1483_v6 = vld [vmem:[%s1832_s0 + $0x158] ss:$12 sps:$4 sm:$0xff]  }
  0x18   :  { %1333 = vmatpush3.bf16.msra.mxu1 %v1417_v18  ;;  %1205 = vmatprep.subr.bf16.mxu0 %v1418_v19  ;;  %v1754_v12 = vld [vmem:[%s1833_s2] ss:$0 sm:$0xff] }
  0x19   :  { %1334 = vmatprep.subr.bf16.mxu1 %v1484_v1 }
  0x1b   :  { %1206 = vmatpush3.bf16.msra.mxu0 %v1419_v20 }
  0x1c   :  { %1335 = vmatpush3.bf16.msra.mxu1 %v1420_v21  ;;  %1207 = vmatprep.subr.bf16.mxu0 %v1421_v22 }
  0x1d   :  { %1336 = vmatprep.subr.bf16.mxu1 %v1484_v1 }
  0x1f   :  { %1208 = vmatpush3.bf16.msra.mxu0 %v1422_v24 }
  0x20   :  { %1337 = vmatpush3.bf16.msra.mxu1 %v1423_v25 }
  0x22   :  { %547 = vmatmul.mubr.bf16.vlgmr.msra.gmra.mxu0 %v1424_v26 }
  0x23   :  { %1339 = vmatmul.mubr.bf16.vlgmr.msra.gmra.mxu1 %v1427_v27  ;;  %554 = vmatprep.mubr.bf16.mxu0 %v1428_v28 }
  0x24   :  { %1342 = vmatprep.mubr.msk.bf16.mxu1 %vm1485_vm0, %v1484_v1 }
  0x2a   :  { %555 = vmatmul.mubr.bf16.gmra.mxu0 %v1430_v29 }
  0x2b   :  { %1343 = vmatmul.mubr.bf16.gmra.mxu1 %v1431_v30  ;;  %562 = vmatprep.mubr.bf16.mxu0 %v1432_v31 }
  0x2c   :  { %1346 = vmatprep.mubr.msk.bf16.mxu1 %vm1485_vm0, %v1484_v1 }
  0x32   :  { %563 = vmatmul.mubr.bf16.gmra.mxu0 %v1434_v32 }
  0x33   :  { %1347 = vmatmul.mubr.bf16.gmra.mxu1 %v1435_v33  ;;  %570 = vmatprep.mubr.bf16.mxu0 %v1436_v34 }
  0x34   :  { %1350 = vmatprep.mubr.msk.bf16.mxu1 %vm1485_vm0, %v1484_v1 }
  0x3a   :  { %571 = vmatmul.mubr.bf16.gmra.mxu0 %v1438_v35 }
  0x3b   :  { %1351 = vmatmul.mubr.bf16.gmra.mxu1 %v1439_v36  ;;  %578 = vmatprep.mubr.bf16.mxu0 %v1440_v37 }
  0x3c   :  { %1354 = vmatprep.mubr.msk.bf16.mxu1 %vm1485_vm0, %v1484_v1 }
  0x42   :  { %579 = vmatmul.mubr.bf16.gmra.mxu0 %v1442_v38 }
  0x43   :  { %1355 = vmatmul.mubr.bf16.gmra.mxu1 %v1443_v39  ;;  %586 = vmatprep.mubr.bf16.mxu0 %v1444_v40 }
  0x44   :  { %1358 = vmatprep.mubr.msk.bf16.mxu1 %vm1485_vm0, %v1484_v1 }
  0x4a   :  { %587 = vmatmul.mubr.bf16.gmra.mxu0 %v1446_v41 }
  0x4b   :  { %1359 = vmatmul.mubr.bf16.gmra.mxu1 %v1447_v42  ;;  %594 = vmatprep.mubr.bf16.mxu0 %v1448_v43 }
  0x4c   :  { %1362 = vmatprep.mubr.msk.bf16.mxu1 %vm1485_vm0, %v1484_v1 }
  0x52   :  { %595 = vmatmul.mubr.bf16.gmra.mxu0 %v1450_v44 }
  0x53   :  { %1363 = vmatmul.mubr.bf16.gmra.mxu1 %v1451_v45  ;;  %602 = vmatprep.mubr.bf16.mxu0 %v1452_v46 }
  0x54   :  { %1366 = vmatprep.mubr.msk.bf16.mxu1 %vm1485_vm0, %v1484_v1 }
  0x5a   :  { %603 = vmatmul.mubr.bf16.gmra.mxu0 %v1454_v47 }
  0x5b   :  { %1367 = vmatmul.mubr.bf16.gmra.mxu1 %v1455_v48  ;;  %610 = vmatprep.mubr.bf16.mxu0 %v1456_v49 }
  0x5c   :  { %1370 = vmatprep.mubr.msk.bf16.mxu1 %vm1485_vm0, %v1484_v1 }
  0x62   :  { %611 = vmatmul.mubr.bf16.gmra.mxu0 %v1458_v50 }
  0x63   :  { %1371 = vmatmul.mubr.bf16.gmra.mxu1 %v1459_v51  ;;  %618 = vmatprep.mubr.bf16.mxu0 %v1460_v52 }
  0x64   :  { %1374 = vmatprep.mubr.msk.bf16.mxu1 %vm1485_vm0, %v1484_v1 }
  0x6a   :  { %619 = vmatmul.mubr.bf16.gmra.mxu0 %v1462_v53 }
  0x6b   :  { %1375 = vmatmul.mubr.bf16.gmra.mxu1 %v1463_v54  ;;  %626 = vmatprep.mubr.bf16.mxu0 %v1464_v55 }
  0x6c   :  { %1378 = vmatprep.mubr.msk.bf16.mxu1 %vm1485_vm0, %v1484_v1 }
  0x72   :  { %627 = vmatmul.mubr.bf16.gmra.mxu0 %v1466_v56 }
  0x73   :  { %1379 = vmatmul.mubr.bf16.gmra.mxu1 %v1467_v57  ;;  %634 = vmatprep.mubr.bf16.mxu0 %v1468_v58 }
  0x74   :  { %1382 = vmatprep.mubr.msk.bf16.mxu1 %vm1485_vm0, %v1484_v1 }
  0x7a   :  { %635 = vmatmul.mubr.bf16.gmra.mxu0 %v1470_v59 }
  0x7b   :  { %1383 = vmatmul.mubr.bf16.gmra.mxu1 %v1471_v60  ;;  %642 = vmatprep.mubr.bf16.mxu0 %v1472_v61 }
  0x7c   :  { %1386 = vmatprep.mubr.msk.bf16.mxu1 %vm1485_vm0, %v1484_v1 }
  0x82   :  { %643 = vmatmul.mubr.bf16.gmra.mxu0 %v1474_v62 }
  0x83   :  { %1387 = vmatmul.mubr.bf16.gmra.mxu1 %v1475_v63  ;;  %650 = vmatprep.mubr.bf16.mxu0 %v1476_v0 }
  0x84   :  { %1390 = vmatprep.mubr.msk.bf16.mxu1 %vm1485_vm0, %v1484_v1 }
  0x8a   :  { %651 = vmatmul.mubr.bf16.gmra.mxu0 %v1478_v2 }
  0x8b   :  { %1391 = vmatmul.mubr.bf16.gmra.mxu1 %v1479_v3  ;;  %658 = vmatprep.mubr.bf16.mxu0 %v1480_v4 }
  0x8c   :  { %1394 = vmatprep.mubr.msk.bf16.mxu1 %vm1485_vm0, %v1484_v1 }
  0x92   :  { %659 = vmatmul.mubr.bf16.gmra.mxu0 %v1482_v5 }
  0x93   :  { %1395 = vmatmul.mubr.bf16.gmra.mxu1 %v1483_v6 }
  0xe2   :  { %v1209_v7 = vpop.f32.mrf.mxu0 }
  0xe3   :  { %v701_v8 = vpop.f32.mrf.mxu1 }
  0xe4   :  { %v1210_v9 = vpop.f32.mrf.mxu0 }
  0xe5   :  { %v1211_v10 = vadd.f32 %v1210_v9, %v1209_v7  ;;  %v1340_v11 = vpop.f32.mrf.mxu1 }
  0xe6   :  { %v1212_v1 = vpop.f32.mrf.mxu0 }
  0xe7   :  { %v704_v13 = vpop.f32.mrf.mxu1  ;;  %v549_v15 = vadd.f32 %v1211_v10, %v1754_v12 }
  0xe8   :  { %v1213_v14 = vpop.f32.mrf.mxu0 }
  0xe9   :  { %v1214_v16 = vadd.f32 %v1213_v14, %v1212_v1  ;;  %v1341_v17 = vpop.f32.mrf.mxu1  ;;  %v702_v22 = vadd.f32 %v701_v8, %v549_v15 }
  0xea   :  { %v1215_v18 = vpop.f32.mrf.mxu0 }
  0xeb   :  { %v552_v19 = vadd.f32 %v1214_v16, %v1754_v12  ;;  %v709_v20 = vpop.f32.mrf.mxu1 }
  0xec   :  { %v1216_v21 = vpop.f32.mrf.mxu0 }
  0xed   :  { %v705_v23 = vadd.f32 %v704_v13, %v552_v19  ;;  %v1217_v24 = vadd.f32 %v1216_v21, %v1215_v18  ;;  %v1344_v25 = vpop.f32.mrf.mxu1 }
  0xee   :  { %v1218_v26 = vpop.f32.mrf.mxu0 }
  0xef   :  { %v1107_v27 = vpack.c.bf16 %v705_v23, %v702_v22  ;;  %v712_v28 = vpop.f32.mrf.mxu1  ;;  %v557_v30 = vadd.f32 %v1217_v24, %v1754_v12 }
  0xf0   :  { %v1219_v29 = vpop.f32.mrf.mxu0 }
  0xf1   :  { %1108 = vst [vmem:[%s1834_s3] sm:$0xff] %v1107_v27   ;;  %v1220_v31 = vadd.f32 %v1219_v29, %v1218_v26  ;;  %v1345_v32 = vpop.f32.mrf.mxu1  ;;  %v710_v37 = vadd.f32 %v709_v20, %v557_v30 }
  0xf2   :  { %v1221_v33 = vpop.f32.mrf.mxu0 }
  0xf3   :  { %v560_v34 = vadd.f32 %v1220_v31, %v1754_v12  ;;  %v717_v35 = vpop.f32.mrf.mxu1 }
  0xf4   :  { %v1222_v36 = vpop.f32.mrf.mxu0 }
  0xf5   :  { %v713_v38 = vadd.f32 %v712_v28, %v560_v34  ;;  %v1223_v39 = vadd.f32 %v1222_v36, %v1221_v33  ;;  %v1348_v40 = vpop.f32.mrf.mxu1 }
  0xf6   :  { %v1224_v41 = vpop.f32.mrf.mxu0 }
  0xf7   :  { %v1112_v42 = vpack.c.bf16 %v713_v38, %v710_v37  ;;  %v720_v43 = vpop.f32.mrf.mxu1  ;;  %v565_v45 = vadd.f32 %v1223_v39, %v1754_v12 }
  0xf8   :  { %v1225_v44 = vpop.f32.mrf.mxu0 }
  0xf9   :  { %1179 = vst [vmem:[%s1834_s3 + $0x8] sm:$0xff] %v1112_v42   ;;  %v1226_v46 = vadd.f32 %v1225_v44, %v1224_v41  ;;  %v1349_v47 = vpop.f32.mrf.mxu1  ;;  %v718_v52 = vadd.f32 %v717_v35, %v565_v45 }
  0xfa   :  { %v1227_v48 = vpop.f32.mrf.mxu0 }
  0xfb   :  { %v568_v49 = vadd.f32 %v1226_v46, %v1754_v12  ;;  %v725_v50 = vpop.f32.mrf.mxu1 }
  0xfc   :  { %v1228_v51 = vpop.f32.mrf.mxu0 }
  0xfd   :  { %v721_v53 = vadd.f32 %v720_v43, %v568_v49  ;;  %v1229_v54 = vadd.f32 %v1228_v51, %v1227_v48  ;;  %v1352_v55 = vpop.f32.mrf.mxu1 }
  0xfe   :  { %v1230_v56 = vpop.f32.mrf.mxu0 }
  0xff   :  { %v1117_v57 = vpack.c.bf16 %v721_v53, %v718_v52  ;;  %v728_v58 = vpop.f32.mrf.mxu1  ;;  %v573_v60 = vadd.f32 %v1229_v54, %v1754_v12 }
 0x100   :  { %v1231_v59 = vpop.f32.mrf.mxu0 }
 0x101   :  { %1180 = vst [vmem:[%s1834_s3 + $0x10] sm:$0xff] %v1117_v57   ;;  %v1232_v61 = vadd.f32 %v1231_v59, %v1230_v56  ;;  %v1353_v62 = vpop.f32.mrf.mxu1  ;;  %v726_v4 = vadd.f32 %v725_v50, %v573_v60 }
 0x102   :  { %v1233_v63 = vpop.f32.mrf.mxu0 }
 0x103   :  { %v576_v0 = vadd.f32 %v1232_v61, %v1754_v12  ;;  %v733_v2 = vpop.f32.mrf.mxu1 }
 0x104   :  { %v1234_v3 = vpop.f32.mrf.mxu0 }
 0x105   :  { %v729_v5 = vadd.f32 %v728_v58, %v576_v0  ;;  %v1235_v6 = vadd.f32 %v1234_v3, %v1233_v63  ;;  %v1356_v7 = vpop.f32.mrf.mxu1 }
 0x106   :  { %v1236_v8 = vpop.f32.mrf.mxu0 }
 0x107   :  { %v1122_v9 = vpack.c.bf16 %v729_v5, %v726_v4  ;;  %v736_v10 = vpop.f32.mrf.mxu1  ;;  %v581_v1 = vadd.f32 %v1235_v6, %v1754_v12 }
 0x108   :  { %v1237_v11 = vpop.f32.mrf.mxu0 }
 0x109   :  { %1181 = vst [vmem:[%s1834_s3 + $0x18] sm:$0xff] %v1122_v9   ;;  %v1238_v13 = vadd.f32 %v1237_v11, %v1236_v8  ;;  %v1357_v14 = vpop.f32.mrf.mxu1  ;;  %v734_v19 = vadd.f32 %v733_v2, %v581_v1 }
 0x10a   :  { %v1239_v15 = vpop.f32.mrf.mxu0 }
 0x10b   :  { %v584_v16 = vadd.f32 %v1238_v13, %v1754_v12  ;;  %v741_v17 = vpop.f32.mrf.mxu1 }
 0x10c   :  { %v1240_v18 = vpop.f32.mrf.mxu0 }
 0x10d   :  { %v737_v20 = vadd.f32 %v736_v10, %v584_v16  ;;  %v1241_v21 = vadd.f32 %v1240_v18, %v1239_v15  ;;  %v1360_v22 = vpop.f32.mrf.mxu1 }
 0x10e   :  { %v1242_v23 = vpop.f32.mrf.mxu0 }
 0x10f   :  { %v1127_v24 = vpack.c.bf16 %v737_v20, %v734_v19  ;;  %v744_v25 = vpop.f32.mrf.mxu1  ;;  %v589_v27 = vadd.f32 %v1241_v21, %v1754_v12 }
 0x110   :  { %v1243_v26 = vpop.f32.mrf.mxu0 }
 0x111   :  { %1182 = vst [vmem:[%s1834_s3 + $0x20] sm:$0xff] %v1127_v24   ;;  %v1244_v28 = vadd.f32 %v1243_v26, %v1242_v23  ;;  %v1361_v29 = vpop.f32.mrf.mxu1  ;;  %v742_v34 = vadd.f32 %v741_v17, %v589_v27 }
 0x112   :  { %v1245_v30 = vpop.f32.mrf.mxu0 }
 0x113   :  { %v592_v31 = vadd.f32 %v1244_v28, %v1754_v12  ;;  %v749_v32 = vpop.f32.mrf.mxu1 }
 0x114   :  { %v1246_v33 = vpop.f32.mrf.mxu0 }
 0x115   :  { %v745_v35 = vadd.f32 %v744_v25, %v592_v31  ;;  %v1247_v36 = vadd.f32 %v1246_v33, %v1245_v30  ;;  %v1364_v37 = vpop.f32.mrf.mxu1 }
 0x116   :  { %v1248_v38 = vpop.f32.mrf.mxu0 }
 0x117   :  { %v1132_v39 = vpack.c.bf16 %v745_v35, %v742_v34  ;;  %v752_v40 = vpop.f32.mrf.mxu1  ;;  %v597_v42 = vadd.f32 %v1247_v36, %v1754_v12 }
 0x118   :  { %v1249_v41 = vpop.f32.mrf.mxu0 }
 0x119   :  { %1183 = vst [vmem:[%s1834_s3 + $0x28] sm:$0xff] %v1132_v39   ;;  %v1250_v43 = vadd.f32 %v1249_v41, %v1248_v38  ;;  %v1365_v44 = vpop.f32.mrf.mxu1  ;;  %v750_v49 = vadd.f32 %v749_v32, %v597_v42 }
 0x11a   :  { %v1251_v45 = vpop.f32.mrf.mxu0 }
 0x11b   :  { %v600_v46 = vadd.f32 %v1250_v43, %v1754_v12  ;;  %v757_v47 = vpop.f32.mrf.mxu1 }
 0x11c   :  { %v1252_v48 = vpop.f32.mrf.mxu0 }
 0x11d   :  { %v753_v50 = vadd.f32 %v752_v40, %v600_v46  ;;  %v1253_v51 = vadd.f32 %v1252_v48, %v1251_v45  ;;  %v1368_v52 = vpop.f32.mrf.mxu1 }
 0x11e   :  { %v1254_v53 = vpop.f32.mrf.mxu0 }
 0x11f   :  { %v1137_v54 = vpack.c.bf16 %v753_v50, %v750_v49  ;;  %v760_v55 = vpop.f32.mrf.mxu1  ;;  %v605_v57 = vadd.f32 %v1253_v51, %v1754_v12 }
 0x120   :  { %v1255_v56 = vpop.f32.mrf.mxu0 }
 0x121   :  { %1184 = vst [vmem:[%s1834_s3 + $0x30] sm:$0xff] %v1137_v54   ;;  %v1256_v58 = vadd.f32 %v1255_v56, %v1254_v53  ;;  %v1369_v59 = vpop.f32.mrf.mxu1  ;;  %v758_v0 = vadd.f32 %v757_v47, %v605_v57 }
 0x122   :  { %v1257_v60 = vpop.f32.mrf.mxu0 }
 0x123   :  { %v608_v61 = vadd.f32 %v1256_v58, %v1754_v12  ;;  %v765_v62 = vpop.f32.mrf.mxu1 }
 0x124   :  { %v1258_v63 = vpop.f32.mrf.mxu0 }
 0x125   :  { %v761_v2 = vadd.f32 %v760_v55, %v608_v61  ;;  %v1259_v3 = vadd.f32 %v1258_v63, %v1257_v60  ;;  %v1372_v4 = vpop.f32.mrf.mxu1 }
 0x126   :  { %v1260_v5 = vpop.f32.mrf.mxu0 }
 0x127   :  { %v1142_v6 = vpack.c.bf16 %v761_v2, %v758_v0  ;;  %v768_v7 = vpop.f32.mrf.mxu1  ;;  %v613_v9 = vadd.f32 %v1259_v3, %v1754_v12 }
 0x128   :  { %v1261_v8 = vpop.f32.mrf.mxu0 }
 0x129   :  { %1185 = vst [vmem:[%s1834_s3 + $0x38] sm:$0xff] %v1142_v6   ;;  %v1262_v10 = vadd.f32 %v1261_v8, %v1260_v5  ;;  %v1373_v11 = vpop.f32.mrf.mxu1  ;;  %v766_v16 = vadd.f32 %v765_v62, %v613_v9 }
 0x12a   :  { %v1263_v1 = vpop.f32.mrf.mxu0 }
 0x12b   :  { %v616_v13 = vadd.f32 %v1262_v10, %v1754_v12  ;;  %v773_v14 = vpop.f32.mrf.mxu1 }
 0x12c   :  { %v1264_v15 = vpop.f32.mrf.mxu0 }
 0x12d   :  { %v769_v17 = vadd.f32 %v768_v7, %v616_v13  ;;  %v1265_v18 = vadd.f32 %v1264_v15, %v1263_v1  ;;  %v1376_v19 = vpop.f32.mrf.mxu1 }
 0x12e   :  { %v1266_v20 = vpop.f32.mrf.mxu0 }
 0x12f   :  { %v1147_v21 = vpack.c.bf16 %v769_v17, %v766_v16  ;;  %v776_v22 = vpop.f32.mrf.mxu1  ;;  %v621_v24 = vadd.f32 %v1265_v18, %v1754_v12 }
 0x130   :  { %v1267_v23 = vpop.f32.mrf.mxu0 }
 0x131   :  { %1186 = vst [vmem:[%s1834_s3 + $0x40] sm:$0xff] %v1147_v21   ;;  %v1268_v25 = vadd.f32 %v1267_v23, %v1266_v20  ;;  %v1377_v26 = vpop.f32.mrf.mxu1  ;;  %v774_v31 = vadd.f32 %v773_v14, %v621_v24 }
 0x132   :  { %v1269_v27 = vpop.f32.mrf.mxu0 }
 0x133   :  { %v624_v28 = vadd.f32 %v1268_v25, %v1754_v12  ;;  %v781_v29 = vpop.f32.mrf.mxu1 }
 0x134   :  { %v1270_v30 = vpop.f32.mrf.mxu0 }
 0x135   :  { %v777_v32 = vadd.f32 %v776_v22, %v624_v28  ;;  %v1271_v33 = vadd.f32 %v1270_v30, %v1269_v27  ;;  %v1380_v34 = vpop.f32.mrf.mxu1 }
 0x136   :  { %v1272_v35 = vpop.f32.mrf.mxu0 }
 0x137   :  { %v1152_v36 = vpack.c.bf16 %v777_v32, %v774_v31  ;;  %v784_v37 = vpop.f32.mrf.mxu1  ;;  %v629_v39 = vadd.f32 %v1271_v33, %v1754_v12 }
 0x138   :  { %v1273_v38 = vpop.f32.mrf.mxu0 }
 0x139   :  { %1187 = vst [vmem:[%s1834_s3 + $0x48] sm:$0xff] %v1152_v36   ;;  %v1274_v40 = vadd.f32 %v1273_v38, %v1272_v35  ;;  %v1381_v41 = vpop.f32.mrf.mxu1  ;;  %v782_v46 = vadd.f32 %v781_v29, %v629_v39 }
 0x13a   :  { %v1275_v42 = vpop.f32.mrf.mxu0 }
 0x13b   :  { %v632_v43 = vadd.f32 %v1274_v40, %v1754_v12  ;;  %v789_v44 = vpop.f32.mrf.mxu1 }
 0x13c   :  { %v1276_v45 = vpop.f32.mrf.mxu0 }
 0x13d   :  { %v785_v47 = vadd.f32 %v784_v37, %v632_v43  ;;  %v1277_v48 = vadd.f32 %v1276_v45, %v1275_v42  ;;  %v1384_v49 = vpop.f32.mrf.mxu1 }
 0x13e   :  { %v1278_v50 = vpop.f32.mrf.mxu0 }
 0x13f   :  { %v1157_v51 = vpack.c.bf16 %v785_v47, %v782_v46  ;;  %v792_v52 = vpop.f32.mrf.mxu1  ;;  %v637_v54 = vadd.f32 %v1277_v48, %v1754_v12 }
 0x140   :  { %v1279_v53 = vpop.f32.mrf.mxu0 }
 0x141   :  { %1188 = vst [vmem:[%s1834_s3 + $0x50] sm:$0xff] %v1157_v51   ;;  %v1280_v55 = vadd.f32 %v1279_v53, %v1278_v50  ;;  %v1385_v56 = vpop.f32.mrf.mxu1  ;;  %v790_v61 = vadd.f32 %v789_v44, %v637_v54 }
 0x142   :  { %v1281_v57 = vpop.f32.mrf.mxu0 }
 0x143   :  { %v640_v58 = vadd.f32 %v1280_v55, %v1754_v12  ;;  %v797_v59 = vpop.f32.mrf.mxu1 }
 0x144   :  { %v1282_v60 = vpop.f32.mrf.mxu0 }
 0x145   :  { %v793_v62 = vadd.f32 %v792_v52, %v640_v58  ;;  %v1283_v63 = vadd.f32 %v1282_v60, %v1281_v57  ;;  %v1388_v0 = vpop.f32.mrf.mxu1 }
 0x146   :  { %v1284_v2 = vpop.f32.mrf.mxu0 }
 0x147   :  { %v1162_v3 = vpack.c.bf16 %v793_v62, %v790_v61  ;;  %v800_v4 = vpop.f32.mrf.mxu1  ;;  %v645_v6 = vadd.f32 %v1283_v63, %v1754_v12 }
 0x148   :  { %v1285_v5 = vpop.f32.mrf.mxu0 }
 0x149   :  { %1189 = vst [vmem:[%s1834_s3 + $0x58] sm:$0xff] %v1162_v3   ;;  %v1286_v7 = vadd.f32 %v1285_v5, %v1284_v2  ;;  %v1389_v8 = vpop.f32.mrf.mxu1  ;;  %v798_v13 = vadd.f32 %v797_v59, %v645_v6 }
 0x14a   :  { %v1287_v9 = vpop.f32.mrf.mxu0 }
 0x14b   :  { %v648_v10 = vadd.f32 %v1286_v7, %v1754_v12  ;;  %v805_v11 = vpop.f32.mrf.mxu1 }
 0x14c   :  { %v1288_v1 = vpop.f32.mrf.mxu0 }
 0x14d   :  { %v801_v14 = vadd.f32 %v800_v4, %v648_v10  ;;  %v1289_v15 = vadd.f32 %v1288_v1, %v1287_v9  ;;  %v1392_v16 = vpop.f32.mrf.mxu1 }
 0x14e   :  { %v1290_v17 = vpop.f32.mrf.mxu0 }
 0x14f   :  { %v1167_v18 = vpack.c.bf16 %v801_v14, %v798_v13  ;;  %v808_v19 = vpop.f32.mrf.mxu1  ;;  %v653_v21 = vadd.f32 %v1289_v15, %v1754_v12 }
 0x150   :  { %v1291_v20 = vpop.f32.mrf.mxu0 }
 0x151   :  { %1190 = vst [vmem:[%s1834_s3 + $0x60] sm:$0xff] %v1167_v18   ;;  %v1292_v22 = vadd.f32 %v1291_v20, %v1290_v17  ;;  %v1393_v23 = vpop.f32.mrf.mxu1  ;;  %v806_v28 = vadd.f32 %v805_v11, %v653_v21 }
 0x152   :  { %v1293_v24 = vpop.f32.mrf.mxu0 }
 0x153   :  { %v656_v25 = vadd.f32 %v1292_v22, %v1754_v12  ;;  %v813_v26 = vpop.f32.mrf.mxu1 }
 0x154   :  { %v1294_v27 = vpop.f32.mrf.mxu0 }
 0x155   :  { %v809_v29 = vadd.f32 %v808_v19, %v656_v25  ;;  %v1295_v30 = vadd.f32 %v1294_v27, %v1293_v24  ;;  %v1396_v31 = vpop.f32.mrf.mxu1 }
 0x156   :  { %v1296_v32 = vpop.f32.mrf.mxu0 }
 0x157   :  { %v1172_v33 = vpack.c.bf16 %v809_v29, %v806_v28  ;;  %v816_v34 = vpop.f32.mrf.mxu1  ;;  %v661_v36 = vadd.f32 %v1295_v30, %v1754_v12 }
 0x158   :  { %v1297_v35 = vpop.f32.mrf.mxu0 }
 0x159   :  { %1191 = vst [vmem:[%s1834_s3 + $0x68] sm:$0xff] %v1172_v33   ;;  %v1298_v37 = vadd.f32 %v1297_v35, %v1296_v32  ;;  %v1397_v38 = vpop.f32.mrf.mxu1  ;;  %v814_v40 = vadd.f32 %v813_v26, %v661_v36 }
 0x15b   :  { %v664_v39 = vadd.f32 %v1298_v37, %v1754_v12 }
 0x15d   :  { %v817_v41 = vadd.f32 %v816_v34, %v664_v39 }
 0x15f   :  { %v1177_v42 = vpack.c.bf16 %v817_v41, %v814_v40 }
 0x161   :  { %1192 = vst [vmem:[%s1834_s3 + $0x70] sm:$0xff] %v1177_v42  }

// kernel: alexsnn_forward_at_width.7
= control target key start
LH: loop header
LB: loop body
LE: loop exit
PB: predicated region body
PF: predicated region fallthrough
CT: control target
= control target key end

     0   :  { %s1647_s1 = inlined_call_operand.vmem [shape: bf16[896,128], index: 1, kind: input, shape index: {}]   ;;  %s1648_s0 = inlined_call_operand.vmem [shape: bf16[64,896], index: 0, kind: input, shape index: {}]   ;;  %s1649_s2 = inlined_call_operand.vmem [shape: f32[1,128], index: 2, kind: input, shape index: {}]   ;;  %s1650_s3 = inlined_call_operand.vmem [shape: bf16[64,128], index: 3, kind: output, shape index: {}]  }
   0x1   :  { %v1230_v0 = vld [vmem:[%s1647_s1 + $0x78] sm:$0xff]   ;;  %v1234_v4 = vld [vmem:[%s1647_s1 + $0x70] sm:$0xff]   ;;  %v1238_v8 = vld [vmem:[%s1647_s1 + $0x68] sm:$0xff]  }
   0x2   :  { %v1231_v1 = vld [vmem:[%s1647_s1 + $0x38] sm:$0xff]   ;;  %1074 = vmatprep.subr.bf16.mxu0 %v1230_v0  ;;  %v1235_v5 = vld [vmem:[%s1647_s1 + $0x30] sm:$0xff]   ;;  %v1239_v9 = vld [vmem:[%s1647_s1 + $0x28] sm:$0xff]  }
   0x3   :  { %v1232_v2 = vld [vmem:[%s1647_s1 + $0xf8] sm:$0xff]   ;;  %1075 = vmatpush3.bf16.msra.mxu0 %v1231_v1  ;;  %v1236_v6 = vld [vmem:[%s1647_s1 + $0xf0] sm:$0xff]   ;;  %v1240_v10 = vld [vmem:[%s1647_s1 + $0xe8] sm:$0xff]  }
   0x4   :  { %v1233_v3 = vld [vmem:[%s1647_s1 + $0xb8] sm:$0xff]   ;;  %1114 = vmatprep.subr.bf16.mxu1 %v1232_v2  ;;  %1076 = vmatprep.subr.bf16.mxu0 %v1234_v4  ;;  %v1237_v7 = vld [vmem:[%s1647_s1 + $0xb0] sm:$0xff]   ;;  %v1241_v11 = vld [vmem:[%s1647_s1 + $0xa8] sm:$0xff]  }
   0x5   :  { %1115 = vmatpush3.bf16.msra.mxu1 %v1233_v3  ;;  %v1242_v12 = vld [vmem:[%s1647_s1 + $0x60] sm:$0xff]   ;;  %v1246_v16 = vld [vmem:[%s1647_s1 + $0x58] sm:$0xff]   ;;  %v1250_v20 = vld [vmem:[%s1647_s1 + $0x50] sm:$0xff]  }
   0x6   :  { %1116 = vmatprep.subr.bf16.mxu1 %v1236_v6  ;;  %v1243_v13 = vld [vmem:[%s1647_s1 + $0x20] sm:$0xff]   ;;  %v1247_v17 = vld [vmem:[%s1647_s1 + $0x18] sm:$0xff]   ;;  %v1251_v21 = vld [vmem:[%s1647_s1 + $0x10] sm:$0xff]  }
   0x7   :  { %1077 = vmatpush3.bf16.msra.mxu0 %v1235_v5  ;;  %v1244_v14 = vld [vmem:[%s1647_s1 + $0xe0] sm:$0xff]   ;;  %v1248_v18 = vld [vmem:[%s1647_s1 + $0xd8] sm:$0xff]   ;;  %v1252_v22 = vld [vmem:[%s1647_s1 + $0xd0] sm:$0xff]  }
   0x8   :  { %1078 = vmatprep.subr.bf16.mxu0 %v1238_v8  ;;  %v1245_v15 = vld [vmem:[%s1647_s1 + $0xa0] sm:$0xff]   ;;  %v1249_v19 = vld [vmem:[%s1647_s1 + $0x98] sm:$0xff]   ;;  %v1253_v23 = vld [vmem:[%s1647_s1 + $0x90] sm:$0xff]  }
   0x9   :  { %1117 = vmatpush3.bf16.msra.mxu1 %v1237_v7  ;;  %v1254_v24 = vld [vmem:[%s1647_s1 + $0x48] sm:$0xff]   ;;  %v1258_v28 = vld [vmem:[%s1647_s1 + $0x40] sm:$0xff]   ;;  %v1265_v34 = vld [vmem:[%s1647_s1 + $0x178] sm:$0xff]  }
   0xa   :  { %1118 = vmatprep.subr.bf16.mxu1 %v1240_v10  ;;  %v1255_v25 = vld [vmem:[%s1647_s1 + $0x8] sm:$0xff]   ;;  %v1259_v29 = vld [vmem:[%s1647_s1] sm:$0xff]   ;;  %v1269_v37 = vld [vmem:[%s1647_s1 + $0x138] sm:$0xff]  }
   0xb   :  { %1079 = vmatpush3.bf16.msra.mxu0 %v1239_v9  ;;  %v1256_v26 = vld [vmem:[%s1647_s1 + $0xc8] sm:$0xff]   ;;  %v1260_v30 = vld [vmem:[%s1647_s1 + $0xc0] sm:$0xff]   ;;  %v1270_v38 = vld [vmem:[%s1647_s1 + $0x170] sm:$0xff]  }
   0xc   :  { %1080 = vmatprep.subr.bf16.mxu0 %v1242_v12  ;;  %v1257_v27 = vld [vmem:[%s1647_s1 + $0x88] sm:$0xff]   ;;  %v1261_v31 = vld [vmem:[%s1648_s0] ss:$28 sps:$4 sm:$0xff]   ;;  %v1272_v40 = vld [vmem:[%s1647_s1 + $0x130] sm:$0xff]  }
   0xd   :  { %1119 = vmatpush3.bf16.msra.mxu1 %v1241_v11  ;;  %v1263_v32 = vld [vmem:[%s1648_s0 + $0x4] ss:$28 sps:$4 sm:$0xff]   ;;  %v1268_v36 = vld [vmem:[%s1648_s0 + $0xc] ss:$28 sps:$4 sm:$0xff]   ;;  %v1271_v39 = vld [vmem:[%s1647_s1 + $0x1b8] sm:$0xff]  }
   0xe   :  { %1120 = vmatprep.subr.bf16.mxu1 %v1244_v14  ;;  %v1264_v33 = vld [vmem:[%s1647_s1 + $0x80] sm:$0xff]   ;;  %678 = vmatprep.mubr.bf16.mxu0 %v1263_v32  ;;  %v1273_v41 = vld [vmem:[%s1648_s0 + $0x3c] ss:$28 sps:$4 sm:$0xff]   ;;  %v1276_v43 = vld [vmem:[%s1647_s1 + $0x168] sm:$0xff]  }
   0xf   :  { %1081 = vmatpush3.bf16.msra.mxu0 %v1243_v13  ;;  %v1266_v35 = vld [vmem:[%s1648_s0 + $0x8] ss:$28 sps:$4 sm:$0xff]   ;;  %743 = vmatprep.mubr.bf16.mxu1 %v1268_v36  ;;  %v1275_v42 = vld [vmem:[%s1648_s0 + $0x38] ss:$28 sps:$4 sm:$0xff]   ;;  %v1281_v47 = vld [vmem:[%s1648_s0 + $0x40] ss:$28 sps:$4 sm:$0xff]  }
  0x10   :  { %1082 = vmatprep.subr.bf16.mxu0 %v1246_v16  ;;  %v1277_v44 = vld [vmem:[%s1647_s1 + $0x1b0] sm:$0xff]   ;;  %v1278_v45 = vld [vmem:[%s1648_s0 + $0x44] ss:$28 sps:$4 sm:$0xff]   ;;  %v1280_v46 = vld [vmem:[%s1647_s1 + $0x128] sm:$0xff]  }
  0x11   :  { %1121 = vmatpush3.bf16.msra.mxu1 %v1245_v15  ;;  %v1282_v48 = vld [vmem:[%s1647_s1 + $0x160] sm:$0xff]   ;;  %v1283_v49 = vld [vmem:[%s1647_s1 + $0x1a8] sm:$0xff]   ;;  %v1285_v51 = vld [vmem:[%s1648_s0 + $0x74] ss:$28 sps:$4 sm:$0xff]  }
  0x12   :  { %1122 = vmatprep.subr.bf16.mxu1 %v1248_v18  ;;  %v1284_v50 = vld [vmem:[%s1647_s1 + $0x120] sm:$0xff]   ;;  %v1287_v52 = vld [vmem:[%s1648_s0 + $0x70] ss:$28 sps:$4 sm:$0xff]   ;;  %v1288_v53 = vld [vmem:[%s1647_s1 + $0x158] sm:$0xff]  }
  0x13   :  { %1083 = vmatpush3.bf16.msra.mxu0 %v1247_v17  ;;  %v1289_v54 = vld [vmem:[%s1647_s1 + $0x1a0] sm:$0xff]   ;;  %v1290_v55 = vld [vmem:[%s1648_s0 + $0x7c] ss:$28 sps:$4 sm:$0xff]   ;;  %v1294_v58 = vld [vmem:[%s1647_s1 + $0x150] sm:$0xff]  }
  0x14   :  { %1084 = vmatprep.subr.bf16.mxu0 %v1250_v20  ;;  %v1292_v56 = vld [vmem:[%s1647_s1 + $0x118] sm:$0xff]   ;;  %v1296_v60 = vld [vmem:[%s1647_s1 + $0x110] sm:$0xff]   ;;  %v1297_v61 = vld [vmem:[%s1648_s0 + $0xac] ss:$28 sps:$4 sm:$0xff]  }
  0x15   :  { %1123 = vmatpush3.bf16.msra.mxu1 %v1249_v19  ;;  %v1293_v57 = vld [vmem:[%s1648_s0 + $0x78] ss:$28 sps:$4 sm:$0xff]   ;;  %v1299_v62 = vld [vmem:[%s1648_s0 + $0xa8] ss:$28 sps:$4 sm:$0xff]   ;;  %v1305_v3 = vld [vmem:[%s1648_s0 + $0xb0] ss:$28 sps:$4 sm:$0xff]  }
  0x16   :  { %1124 = vmatprep.subr.bf16.mxu1 %v1252_v22  ;;  %v1295_v59 = vld [vmem:[%s1647_s1 + $0x198] sm:$0xff]   ;;  %v1300_v63 = vld [vmem:[%s1647_s1 + $0x148] sm:$0xff]   ;;  %v1301_v0 = vld [vmem:[%s1647_s1 + $0x190] sm:$0xff]  }
  0x17   :  { %1085 = vmatpush3.bf16.msra.mxu0 %v1251_v21  ;;  %v1302_v1 = vld [vmem:[%s1648_s0 + $0xb4] ss:$28 sps:$4 sm:$0xff]   ;;  %v1304_v2 = vld [vmem:[%s1647_s1 + $0x108] sm:$0xff]   ;;  %v1306_v4 = vld [vmem:[%s1647_s1 + $0x140] sm:$0xff]  }
  0x18   :  { %1086 = vmatprep.subr.bf16.mxu0 %v1254_v24  ;;  %v1307_v5 = vld [vmem:[%s1647_s1 + $0x188] sm:$0xff]   ;;  %v1308_v6 = vld [vmem:[%s1647_s1 + $0x100] sm:$0xff]   ;;  %v1311_v8 = vld [vmem:[%s1648_s0 + $0x14] ss:$28 sps:$4 sm:$0xff]  }
  0x19   :  { %1125 = vmatpush3.bf16.msra.mxu1 %v1253_v23  ;;  %v1309_v7 = vld [vmem:[%s1648_s0 + $0x10] ss:$28 sps:$4 sm:$0xff]   ;;  %v1312_v9 = vld [vmem:[%s1647_s1 + $0x180] sm:$0xff]   ;;  %v1313_v10 = vld [vmem:[%s1648_s0 + $0x18] ss:$28 sps:$4 sm:$0xff]  }
  0x1a   :  { %1126 = vmatprep.subr.bf16.mxu1 %v1256_v26  ;;  %v1314_v11 = vld [vmem:[%s1648_s0 + $0x50] ss:$28 sps:$4 sm:$0xff]   ;;  %v1321_v13 = vld [vmem:[%s1648_s0 + $0x88] ss:$28 sps:$4 sm:$0xff]   ;;  %v1322_v16 = vld [vmem:[%s1648_s0 + $0xc0] ss:$28 sps:$4 sm:$0xff]  }
  0x1b   :  { %1087 = vmatpush3.bf16.msra.mxu0 %v1255_v25  ;;  %v1315_v12 = vld [vmem:[%s1648_s0 + $0x4c] ss:$28 sps:$4 sm:$0xff]   ;;  %v1318_v15 = vld [vmem:[%s1648_s0 + $0x84] ss:$28 sps:$4 sm:$0xff]   ;;  %v1323_v18 = vld [vmem:[%s1648_s0 + $0xbc] ss:$28 sps:$4 sm:$0xff]  }
  0x1c   :  { %1088 = vmatprep.subr.bf16.mxu0 %v1258_v28  ;;  %v1317_v14 = vld [vmem:[%s1648_s0 + $0x48] ss:$28 sps:$4 sm:$0xff]   ;;  %v1320_v17 = vld [vmem:[%s1648_s0 + $0x80] ss:$28 sps:$4 sm:$0xff]   ;;  %v1325_v19 = vld [vmem:[%s1648_s0 + $0xb8] ss:$28 sps:$4 sm:$0xff]  }
  0x1d   :  { %1127 = vmatpush3.bf16.msra.mxu1 %v1257_v27 }
  0x1e   :  { %1128 = vmatprep.subr.bf16.mxu1 %v1260_v30 }
  0x1f   :  { %1089 = vmatpush3.bf16.msra.mxu0 %v1259_v29 }
  0x20   :  { %1154 = vmatprep.subr.bf16.mxu0 %v1265_v34 }
  0x21   :  { %1129 = vmatpush3.bf16.msra.mxu1 %v1264_v33 }
  0x22   :  { %679 = vmatmul.mubr.bf16.vlgmr.msra.gmra.mxu0 %v1261_v31  ;;  %1206 = vmatprep.subr.bf16.mxu1 %v1271_v39 }
  0x23   :  { %1155 = vmatpush3.bf16.msra.mxu0 %v1269_v37  ;;  %686 = vmatprep.mubr.bf16.mxu0 %v1273_v41 }
  0x24   :  { %744 = vmatmul.mubr.bf16.vlgmr.msra.gmra.mxu1 %v1266_v35  ;;  %1156 = vmatprep.subr.bf16.mxu0 %v1270_v38 }
  0x25   :  { %1207 = vmatpush3.bf16.msra.mxu1 %v1271_v39  ;;  %751 = vmatprep.mubr.bf16.mxu1 %v1278_v45 }
  0x26   :  { %1208 = vmatprep.subr.bf16.mxu1 %v1277_v44 }
  0x27   :  { %1157 = vmatpush3.bf16.msra.mxu0 %v1272_v40 }
  0x28   :  { %1158 = vmatprep.subr.bf16.mxu0 %v1276_v43 }
  0x29   :  { %1209 = vmatpush3.bf16.msra.mxu1 %v1277_v44 }
  0x2a   :  { %687 = vmatmul.mubr.bf16.gmra.mxu0 %v1275_v42  ;;  %1210 = vmatprep.subr.bf16.mxu1 %v1283_v49 }
  0x2b   :  { %1159 = vmatpush3.bf16.msra.mxu0 %v1280_v46  ;;  %694 = vmatprep.mubr.bf16.mxu0 %v1285_v51 }
  0x2c   :  { %752 = vmatmul.mubr.bf16.gmra.mxu1 %v1281_v47  ;;  %1160 = vmatprep.subr.bf16.mxu0 %v1282_v48 }
  0x2d   :  { %1211 = vmatpush3.bf16.msra.mxu1 %v1283_v49  ;;  %759 = vmatprep.mubr.bf16.mxu1 %v1290_v55 }
  0x2e   :  { %1212 = vmatprep.subr.bf16.mxu1 %v1289_v54 }
  0x2f   :  { %1161 = vmatpush3.bf16.msra.mxu0 %v1284_v50 }
  0x30   :  { %1162 = vmatprep.subr.bf16.mxu0 %v1288_v53 }
  0x31   :  { %1213 = vmatpush3.bf16.msra.mxu1 %v1289_v54 }
  0x32   :  { %695 = vmatmul.mubr.bf16.gmra.mxu0 %v1287_v52  ;;  %1214 = vmatprep.subr.bf16.mxu1 %v1295_v59  ;;  %v1615_v52 = vld [vmem:[%s1649_s2] ss:$0 sm:$0xff] }
  0x33   :  { %1163 = vmatpush3.bf16.msra.mxu0 %v1292_v56  ;;  %702 = vmatprep.mubr.bf16.mxu0 %v1297_v61 }
  0x34   :  { %760 = vmatmul.mubr.bf16.gmra.mxu1 %v1293_v57  ;;  %1164 = vmatprep.subr.bf16.mxu0 %v1294_v58 }
  0x35   :  { %1215 = vmatpush3.bf16.msra.mxu1 %v1295_v59  ;;  %767 = vmatprep.mubr.bf16.mxu1 %v1302_v1 }
  0x36   :  { %1216 = vmatprep.subr.bf16.mxu1 %v1301_v0 }
  0x37   :  { %1165 = vmatpush3.bf16.msra.mxu0 %v1296_v60 }
  0x38   :  { %1166 = vmatprep.subr.bf16.mxu0 %v1300_v63 }
  0x39   :  { %1217 = vmatpush3.bf16.msra.mxu1 %v1301_v0 }
  0x3a   :  { %703 = vmatmul.mubr.bf16.gmra.mxu0 %v1299_v62  ;;  %1218 = vmatprep.subr.bf16.mxu1 %v1307_v5 }
  0x3b   :  { %1167 = vmatpush3.bf16.msra.mxu0 %v1304_v2  ;;  %808 = vmatprep.mubr.bf16.mxu0 %v1311_v8 }
  0x3c   :  { %768 = vmatmul.mubr.bf16.gmra.mxu1 %v1305_v3  ;;  %1168 = vmatprep.subr.bf16.mxu0 %v1306_v4 }
  0x3d   :  { %1219 = vmatpush3.bf16.msra.mxu1 %v1307_v5  ;;  %1222 = vmatprep.mubr.bf16.mxu1 %v1313_v10 }
  0x3e   :  { %1220 = vmatprep.subr.bf16.mxu1 %v1312_v9 }
  0x3f   :  { %1169 = vmatpush3.bf16.msra.mxu0 %v1308_v6 }
  0x41   :  { %1221 = vmatpush3.bf16.msra.mxu1 %v1312_v9 }
  0x42   :  { %809 = vmatmul.mubr.bf16.vlgmr.msra.gmra.mxu0 %v1309_v7 }
  0x43   :  { %816 = vmatprep.mubr.bf16.mxu0 %v1315_v12 }
  0x44   :  { %1223 = vmatmul.mubr.bf16.vlgmr.msra.gmra.mxu1 %v1314_v11 }
  0x45   :  { %1226 = vmatprep.mubr.bf16.mxu1 %v1321_v13 }
  0x4a   :  { %817 = vmatmul.mubr.bf16.gmra.mxu0 %v1317_v14 }
  0x4b   :  { %824 = vmatprep.mubr.bf16.mxu0 %v1318_v15 }
  0x4c   :  { %1227 = vmatmul.mubr.bf16.gmra.mxu1 %v1322_v16 }
  0x52   :  { %825 = vmatmul.mubr.bf16.gmra.mxu0 %v1320_v17 }
  0x53   :  { %832 = vmatprep.mubr.bf16.mxu0 %v1323_v18 }
  0x5a   :  { %833 = vmatmul.mubr.bf16.gmra.mxu0 %v1325_v19 }
  0xe2   :  { %v1090_v20 = vpop.f32.mrf.mxu0 }
  0xe4   :  { %v1091_v21 = vpop.f32.mrf.mxu0  ;;  %v1130_v22 = vpop.f32.mrf.mxu1 }
  0xe5   :  { %v1092_v50 = vadd.f32 %v1091_v21, %v1090_v20 }
  0xe6   :  { %v1093_v23 = vpop.f32.mrf.mxu0  ;;  %v1131_v24 = vpop.f32.mrf.mxu1 }
  0xe7   :  { %v681_v55 = vadd.f32 %v1092_v50, %v1615_v52  ;;  %v1132_v56 = vadd.f32 %v1131_v24, %v1130_v22 }
  0xe8   :  { %v1094_v25 = vpop.f32.mrf.mxu0  ;;  %v1133_v26 = vpop.f32.mrf.mxu1 }
  0xe9   :  { %v1095_v53 = vadd.f32 %v1094_v25, %v1093_v23  ;;  %v746_v0 = vadd.f32 %v1132_v56, %v681_v55 }
  0xea   :  { %v1096_v27 = vpop.f32.mrf.mxu0  ;;  %v1134_v28 = vpop.f32.mrf.mxu1 }
  0xeb   :  { %v684_v59 = vadd.f32 %v1095_v53, %v1615_v52  ;;  %v1135_v60 = vadd.f32 %v1134_v28, %v1133_v26 }
  0xec   :  { %v1097_v29 = vpop.f32.mrf.mxu0  ;;  %v1136_v30 = vpop.f32.mrf.mxu1 }
  0xed   :  { %v1098_v1 = vadd.f32 %v1097_v29, %v1096_v27  ;;  %v749_v5 = vadd.f32 %v1135_v60, %v684_v59 }
  0xee   :  { %v1099_v31 = vpop.f32.mrf.mxu0  ;;  %v1137_v32 = vpop.f32.mrf.mxu1 }
  0xef   :  { %v689_v10 = vadd.f32 %v1098_v1, %v1615_v52  ;;  %v1138_v11 = vadd.f32 %v1137_v32, %v1136_v30 }
  0xf0   :  { %v1100_v33 = vpop.f32.mrf.mxu0  ;;  %v1139_v34 = vpop.f32.mrf.mxu1 }
  0xf1   :  { %v1101_v3 = vadd.f32 %v1100_v33, %v1099_v31  ;;  %v754_v22 = vadd.f32 %v1138_v11, %v689_v10 }
  0xf2   :  { %v1102_v35 = vpop.f32.mrf.mxu0  ;;  %v1140_v36 = vpop.f32.mrf.mxu1 }
  0xf3   :  { %v692_v14 = vadd.f32 %v1101_v3, %v1615_v52  ;;  %v1141_v16 = vadd.f32 %v1140_v36, %v1139_v34 }
  0xf4   :  { %v1103_v37 = vpop.f32.mrf.mxu0  ;;  %v1142_v38 = vpop.f32.mrf.mxu1 }
  0xf5   :  { %v1104_v23 = vadd.f32 %v1103_v37, %v1102_v35  ;;  %v757_v27 = vadd.f32 %v1141_v16, %v692_v14 }
  0xf6   :  { %v1105_v39 = vpop.f32.mrf.mxu0  ;;  %v1143_v40 = vpop.f32.mrf.mxu1 }
  0xf7   :  { %v697_v32 = vadd.f32 %v1104_v23, %v1615_v52  ;;  %v1144_v33 = vadd.f32 %v1143_v40, %v1142_v38 }
  0xf8   :  { %v1106_v41 = vpop.f32.mrf.mxu0  ;;  %v1145_v42 = vpop.f32.mrf.mxu1 }
  0xf9   :  { %v1107_v25 = vadd.f32 %v1106_v41, %v1105_v39  ;;  %v762_v55 = vadd.f32 %v1144_v33, %v697_v32 }
  0xfa   :  { %v1598_v43 = vpop.f32.mrf.mxu0  ;;  %v1146_v44 = vpop.f32.mrf.mxu1 }
  0xfb   :  { %v700_v36 = vadd.f32 %v1107_v25, %v1615_v52  ;;  %v1147_v35 = vadd.f32 %v1146_v44, %v1145_v42 }
  0xfc   :  { %v1600_v45 = vpop.f32.mrf.mxu0  ;;  %v1602_v46 = vpop.f32.mrf.mxu1 }
  0xfd   :  { %v1110_v56 = vadd.f32 %v1600_v45, %v1598_v43  ;;  %v765_v38 = vadd.f32 %v1147_v35, %v700_v36 }
  0xfe   :  { %v1604_v47 = vpop.f32.mrf.mxu0  ;;  %v1606_v48 = vpop.f32.mrf.mxu1 }
 0x100   :  { %v1608_v49 = vpop.f32.mrf.mxu0  ;;  %v1610_v51 = vpop.f32.mrf.mxu1 }
 0x101   :  { %v1113_v59 = vadd.f32 %v1608_v49, %v1604_v47 }
 0x102   :  { %v1170_v54 = vpop.f32.mrf.mxu0  ;;  %v1618_v57 = vpop.f32.mrf.mxu1 }
 0x103   :  { %v708_v45 = vadd.f32 %v1113_v59, %v1615_v52  ;;  %v1153_v47 = vadd.f32 %v1618_v57, %v1610_v51 }
 0x104   :  { %v1171_v58 = vpop.f32.mrf.mxu0  ;;  %v1224_v62 = vpop.f32.mrf.mxu1 }
 0x105   :  { %v1172_v61 = vadd.f32 %v1171_v58, %v1170_v54 }
 0x106   :  { %v1173_v63 = vpop.f32.mrf.mxu0  ;;  %v875_v2 = vpop.f32.mrf.mxu1 }
 0x107   :  { %v811_v7 = vadd.f32 %v1172_v61, %v746_v0 }
 0x108   :  { %v1174_v4 = vpop.f32.mrf.mxu0  ;;  %v1225_v8 = vpop.f32.mrf.mxu1 }
 0x109   :  { %v1175_v6 = vadd.f32 %v1174_v4, %v1173_v63  ;;  %v876_v17 = vadd.f32 %v875_v2, %v811_v7  ;;  %v1150_v63 = vadd.f32 %v1606_v48, %v1602_v46  ;;  %v773_v7 = vadd.f32 %v1153_v47, %v708_v45 }
 0x10a   :  { %v1176_v9 = vpop.f32.mrf.mxu0  ;;  %v878_v13 = vpop.f32.mrf.mxu1 }
 0x10b   :  { %v814_v12 = vadd.f32 %v1175_v6, %v749_v5 }
 0x10c   :  { %v1177_v15 = vpop.f32.mrf.mxu0  ;;  %v1228_v21 = vpop.f32.mrf.mxu1 }
 0x10d   :  { %v1178_v18 = vadd.f32 %v1177_v15, %v1176_v9  ;;  %v879_v19 = vadd.f32 %v878_v13, %v814_v12 }
 0x10e   :  { %v1179_v20 = vpop.f32.mrf.mxu0  ;;  %v891_v31 = vpop.f32.mrf.mxu1 }
 0x10f   :  { %v1054_v24 = vpack.c.bf16 %v879_v19, %v876_v17  ;;  %v819_v28 = vadd.f32 %v1178_v18, %v754_v22 }
 0x110   :  { %v1180_v26 = vpop.f32.mrf.mxu0  ;;  %v1229_v54 = vpop.f32.mrf.mxu1 }
 0x111   :  { %1055 = vst [vmem:[%s1650_s3] sm:$0xff] %v1054_v24   ;;  %v1181_v29 = vadd.f32 %v1180_v26, %v1179_v20  ;;  %v884_v37 = vadd.f32 %v1224_v62, %v819_v28  ;;  %v705_v62 = vadd.f32 %v1110_v56, %v1615_v52 }
 0x112   :  { %v1182_v30 = vpop.f32.mrf.mxu0  ;;  %v894_v61 = vpop.f32.mrf.mxu1 }
 0x113   :  { %v822_v34 = vadd.f32 %v1181_v29, %v757_v27  ;;  %v770_v4 = vadd.f32 %v1150_v63, %v705_v62 }
 0x114   :  { %v1183_v50 = vpop.f32.mrf.mxu0 }
 0x115   :  { %v887_v39 = vadd.f32 %v1225_v8, %v822_v34  ;;  %v1184_v41 = vadd.f32 %v1183_v50, %v1182_v30 }
 0x116   :  { %v1185_v53 = vpop.f32.mrf.mxu0 }
 0x117   :  { %v1059_v58 = vpack.c.bf16 %v887_v39, %v884_v37  ;;  %v827_v42 = vadd.f32 %v1184_v41, %v762_v55 }
 0x118   :  { %v1186_v60 = vpop.f32.mrf.mxu0 }
 0x119   :  { %1071 = vst [vmem:[%s1650_s3 + $0x8] sm:$0xff] %v1059_v58   ;;  %v1187_v40 = vadd.f32 %v1186_v60, %v1185_v53  ;;  %v892_v49 = vadd.f32 %v891_v31, %v827_v42 }
 0x11a   :  { %v1188_v44 = vpop.f32.mrf.mxu0 }
 0x11b   :  { %v830_v43 = vadd.f32 %v1187_v40, %v765_v38 }
 0x11c   :  { %v1189_v0 = vpop.f32.mrf.mxu0 }
 0x11d   :  { %v1190_v1 = vadd.f32 %v1189_v0, %v1188_v44  ;;  %v895_v2 = vadd.f32 %v894_v61, %v830_v43 }
 0x11e   :  { %v1191_v3 = vpop.f32.mrf.mxu0 }
 0x11f   :  { %v1064_v5 = vpack.c.bf16 %v895_v2, %v892_v49  ;;  %v835_v8 = vadd.f32 %v1190_v1, %v770_v4 }
 0x120   :  { %v1192_v6 = vpop.f32.mrf.mxu0 }
 0x121   :  { %1072 = vst [vmem:[%s1650_s3 + $0x10] sm:$0xff] %v1064_v5   ;;  %v1193_v46 = vadd.f32 %v1192_v6, %v1191_v3  ;;  %v900_v52 = vadd.f32 %v1228_v21, %v835_v8 }
 0x123   :  { %v838_v48 = vadd.f32 %v1193_v46, %v773_v7 }
 0x125   :  { %v903_v9 = vadd.f32 %v1229_v54, %v838_v48 }
 0x127   :  { %v1069_v10 = vpack.c.bf16 %v903_v9, %v900_v52 }
 0x129   :  { %1073 = vst [vmem:[%s1650_s3 + $0x18] sm:$0xff] %v1069_v10  }

// kernel: alexsnn_forward_at_width.8
= control target key start
LH: loop header
LB: loop body
LE: loop exit
PB: predicated region body
PF: predicated region fallthrough
CT: control target
= control target key end

     0   :  { %s1622_s1 = inlined_call_operand.vmem [shape: bf16[896,256], index: 1, kind: input, shape index: {}]   ;;  %s1623_s0 = inlined_call_operand.vmem [shape: bf16[16,896], index: 0, kind: input, shape index: {}]   ;;  %s1624_s2 = inlined_call_operand.vmem [shape: f32[1,256], index: 2, kind: input, shape index: {}]   ;;  %s1625_s3 = inlined_call_operand.vmem [shape: bf16[16,256], index: 3, kind: output, shape index: {}]  }
   0x1   :  { %v1057_v0 = vld [vmem:[%s1622_s1 + $0x74] ss:$8 sps:$4 sm:$0xff]   ;;  %v1059_v1 = vld [vmem:[%s1622_s1 + $0x70] ss:$8 sps:$4 sm:$0xff]   ;;  %v1063_v4 = vld [vmem:[%s1622_s1 + $0x64] ss:$8 sps:$4 sm:$0xff]  }
   0x2   :  { %743 = vmatprep.subr.bf16.mxu0 %v1057_v0  ;;  %v1060_v2 = vld [vmem:[%s1622_s1 + $0x174] ss:$8 sps:$4 sm:$0xff]   ;;  %v1062_v3 = vld [vmem:[%s1622_s1 + $0x170] ss:$8 sps:$4 sm:$0xff]   ;;  %v1065_v5 = vld [vmem:[%s1622_s1 + $0x60] ss:$8 sps:$4 sm:$0xff]  }
   0x3   :  { %744 = vmatpush1.bf16.msra.mxu0 %v1059_v1  ;;  %786 = vmatprep.subr.bf16.mxu1 %v1060_v2  ;;  %v1066_v6 = vld [vmem:[%s1622_s1 + $0x164] ss:$8 sps:$4 sm:$0xff]   ;;  %v1068_v7 = vld [vmem:[%s1622_s1 + $0x160] ss:$8 sps:$4 sm:$0xff]   ;;  %v1069_v8 = vld [vmem:[%s1622_s1 + $0x54] ss:$8 sps:$4 sm:$0xff]  }
   0x4   :  { %787 = vmatpush1.bf16.msra.mxu1 %v1062_v3  ;;  %745 = vmatprep.subr.bf16.mxu0 %v1063_v4  ;;  %v1071_v9 = vld [vmem:[%s1622_s1 + $0x50] ss:$8 sps:$4 sm:$0xff]   ;;  %v1072_v10 = vld [vmem:[%s1622_s1 + $0x154] ss:$8 sps:$4 sm:$0xff]   ;;  %v1075_v11 = vld [vmem:[%s1622_s1 + $0x44] ss:$8 sps:$4 sm:$0xff]  }
   0x5   :  { %788 = vmatprep.subr.bf16.mxu1 %v1066_v6  ;;  %v1074_v12 = vld [vmem:[%s1622_s1 + $0x150] ss:$8 sps:$4 sm:$0xff]   ;;  %v1078_v13 = vld [vmem:[%s1622_s1 + $0x144] ss:$8 sps:$4 sm:$0xff]   ;;  %v1077_v14 = vld [vmem:[%s1622_s1 + $0x40] ss:$8 sps:$4 sm:$0xff]  }
   0x6   :  { %v1081_v15 = vld [vmem:[%s1622_s1 + $0x34] ss:$8 sps:$4 sm:$0xff]   ;;  %v1080_v16 = vld [vmem:[%s1622_s1 + $0x140] ss:$8 sps:$4 sm:$0xff]   ;;  %v1083_v18 = vld [vmem:[%s1622_s1 + $0x30] ss:$8 sps:$4 sm:$0xff]  }
   0x7   :  { %746 = vmatpush1.bf16.msra.mxu0 %v1065_v5  ;;  %v1084_v17 = vld [vmem:[%s1622_s1 + $0x134] ss:$8 sps:$4 sm:$0xff]   ;;  %v1087_v19 = vld [vmem:[%s1622_s1 + $0x24] ss:$8 sps:$4 sm:$0xff]   ;;  %v1086_v20 = vld [vmem:[%s1622_s1 + $0x130] ss:$8 sps:$4 sm:$0xff]  }
   0x8   :  { %747 = vmatprep.subr.bf16.mxu0 %v1069_v8  ;;  %789 = vmatpush1.bf16.msra.mxu1 %v1068_v7  ;;  %v1090_v21 = vld [vmem:[%s1622_s1 + $0x124] ss:$8 sps:$4 sm:$0xff]   ;;  %v1089_v22 = vld [vmem:[%s1622_s1 + $0x20] ss:$8 sps:$4 sm:$0xff]   ;;  %v1093_v23 = vld [vmem:[%s1622_s1 + $0x14] ss:$8 sps:$4 sm:$0xff]  }
   0x9   :  { %790 = vmatprep.subr.bf16.mxu1 %v1072_v10  ;;  %v1092_v24 = vld [vmem:[%s1622_s1 + $0x120] ss:$8 sps:$4 sm:$0xff]   ;;  %v1096_v25 = vld [vmem:[%s1622_s1 + $0x114] ss:$8 sps:$4 sm:$0xff]   ;;  %v1095_v26 = vld [vmem:[%s1622_s1 + $0x10] ss:$8 sps:$4 sm:$0xff]  }
   0xa   :  { %v1099_v27 = vld [vmem:[%s1622_s1 + $0x4] ss:$8 sps:$4 sm:$0xff]   ;;  %v1098_v28 = vld [vmem:[%s1622_s1 + $0x110] ss:$8 sps:$4 sm:$0xff]   ;;  %v1101_v30 = vld [vmem:[%s1622_s1] ss:$8 sps:$4 sm:$0xff]  }
   0xb   :  { %748 = vmatpush1.bf16.msra.mxu0 %v1071_v9  ;;  %v1102_v29 = vld [vmem:[%s1622_s1 + $0x104] ss:$8 sps:$4 sm:$0xff]   ;;  %v1105_v31 = vld [vmem:[%s1622_s1 + $0xf4] ss:$8 sps:$4 sm:$0xff]   ;;  %v1104_v32 = vld [vmem:[%s1622_s1 + $0x100] ss:$8 sps:$4 sm:$0xff]  }
   0xc   :  { %749 = vmatprep.subr.bf16.mxu0 %v1075_v11  ;;  %791 = vmatpush1.bf16.msra.mxu1 %v1074_v12  ;;  %v1108_v33 = vld [vmem:[%s1622_s1 + $0x1f4] ss:$8 sps:$4 sm:$0xff]   ;;  %v1107_v34 = vld [vmem:[%s1622_s1 + $0xf0] ss:$8 sps:$4 sm:$0xff]   ;;  %v1111_v35 = vld [vmem:[%s1622_s1 + $0xe4] ss:$8 sps:$4 sm:$0xff]  }
   0xd   :  { %792 = vmatprep.subr.bf16.mxu1 %v1078_v13  ;;  %v1110_v36 = vld [vmem:[%s1622_s1 + $0x1f0] ss:$8 sps:$4 sm:$0xff]   ;;  %v1114_v37 = vld [vmem:[%s1622_s1 + $0x1e4] ss:$8 sps:$4 sm:$0xff]   ;;  %v1113_v38 = vld [vmem:[%s1622_s1 + $0xe0] ss:$8 sps:$4 sm:$0xff]  }
   0xe   :  { %v1117_v39 = vld [vmem:[%s1622_s1 + $0xd4] ss:$8 sps:$4 sm:$0xff]   ;;  %v1116_v40 = vld [vmem:[%s1622_s1 + $0x1e0] ss:$8 sps:$4 sm:$0xff]   ;;  %v1119_v42 = vld [vmem:[%s1622_s1 + $0xd0] ss:$8 sps:$4 sm:$0xff]  }
   0xf   :  { %750 = vmatpush1.bf16.msra.mxu0 %v1077_v14  ;;  %v1120_v41 = vld [vmem:[%s1622_s1 + $0x1d4] ss:$8 sps:$4 sm:$0xff]   ;;  %v1123_v43 = vld [vmem:[%s1622_s1 + $0xc4] ss:$8 sps:$4 sm:$0xff]   ;;  %v1122_v44 = vld [vmem:[%s1622_s1 + $0x1d0] ss:$8 sps:$4 sm:$0xff]  }
  0x10   :  { %751 = vmatprep.subr.bf16.mxu0 %v1081_v15  ;;  %793 = vmatpush1.bf16.msra.mxu1 %v1080_v16  ;;  %v1126_v45 = vld [vmem:[%s1622_s1 + $0x1c4] ss:$8 sps:$4 sm:$0xff]   ;;  %v1125_v46 = vld [vmem:[%s1622_s1 + $0xc0] ss:$8 sps:$4 sm:$0xff]   ;;  %v1129_v48 = vld [vmem:[%s1622_s1 + $0xb4] ss:$8 sps:$4 sm:$0xff]  }
  0x11   :  { %794 = vmatprep.subr.bf16.mxu1 %v1084_v17  ;;  %v1154_v47 = vld [vmem:[%s1623_s0 + $0x4] ss:$28 sps:$4 sm:$0xff]   ;;  %v1132_v50 = vld [vmem:[%s1622_s1 + $0x1b4] ss:$8 sps:$4 sm:$0xff]   ;;  %v1161_v51 = vld [vmem:[%s1623_s0 + $0xc] ss:$28 sps:$4 sm:$0xff]  }
  0x12   :  { %v1128_v49 = vld [vmem:[%s1622_s1 + $0x1c0] ss:$8 sps:$4 sm:$0xff]   ;;  %775 = vmatprep.mubr.bf16.mxu0 %v1154_v47  ;;  %v1131_v52 = vld [vmem:[%s1622_s1 + $0xb0] ss:$8 sps:$4 sm:$0xff]   ;;  %v1135_v53 = vld [vmem:[%s1622_s1 + $0xa4] ss:$8 sps:$4 sm:$0xff]   ;;  %818 = vmatprep.mubr.bf16.mxu1 %v1161_v51 }
  0x13   :  { %752 = vmatpush1.bf16.msra.mxu0 %v1083_v18  ;;  %v1134_v54 = vld [vmem:[%s1622_s1 + $0x1b0] ss:$8 sps:$4 sm:$0xff]   ;;  %v1138_v55 = vld [vmem:[%s1622_s1 + $0x1a4] ss:$8 sps:$4 sm:$0xff]   ;;  %v1137_v56 = vld [vmem:[%s1622_s1 + $0xa0] ss:$8 sps:$4 sm:$0xff]  }
  0x14   :  { %753 = vmatprep.subr.bf16.mxu0 %v1087_v19  ;;  %795 = vmatpush1.bf16.msra.mxu1 %v1086_v20  ;;  %v1141_v57 = vld [vmem:[%s1622_s1 + $0x94] ss:$8 sps:$4 sm:$0xff]   ;;  %v1140_v58 = vld [vmem:[%s1622_s1 + $0x1a0] ss:$8 sps:$4 sm:$0xff]   ;;  %v1143_v60 = vld [vmem:[%s1622_s1 + $0x90] ss:$8 sps:$4 sm:$0xff]  }
  0x15   :  { %796 = vmatprep.subr.bf16.mxu1 %v1090_v21  ;;  %v1144_v59 = vld [vmem:[%s1622_s1 + $0x194] ss:$8 sps:$4 sm:$0xff]   ;;  %v1147_v61 = vld [vmem:[%s1622_s1 + $0x84] ss:$8 sps:$4 sm:$0xff]   ;;  %v1146_v62 = vld [vmem:[%s1622_s1 + $0x190] ss:$8 sps:$4 sm:$0xff]  }
  0x16   :  { %v1150_v63 = vld [vmem:[%s1622_s1 + $0x184] ss:$8 sps:$4 sm:$0xff]   ;;  %v1149_v0 = vld [vmem:[%s1622_s1 + $0x80] ss:$8 sps:$4 sm:$0xff]   ;;  %v1158_v1 = vld [vmem:[%s1622_s1 + $0x274] ss:$8 sps:$4 sm:$0xff]  }
  0x17   :  { %754 = vmatpush1.bf16.msra.mxu0 %v1089_v22  ;;  %v1155_v2 = vld [vmem:[%s1622_s1 + $0x180] ss:$8 sps:$4 sm:$0xff]   ;;  %v1185_v4 = vld [vmem:[%s1622_s1 + $0x374] ss:$8 sps:$4 sm:$0xff]   ;;  %v1156_v5 = vld [vmem:[%s1622_s1 + $0x270] ss:$8 sps:$4 sm:$0xff]  }
  0x18   :  { %755 = vmatprep.subr.bf16.mxu0 %v1093_v23  ;;  %797 = vmatpush1.bf16.msra.mxu1 %v1092_v24  ;;  %v1152_v3 = vld [vmem:[%s1623_s0] ss:$28 sps:$4 sm:$0xff]   ;;  %v1159_v6 = vld [vmem:[%s1623_s0 + $0x8] ss:$28 sps:$4 sm:$0xff]   ;;  %v1183_v8 = vld [vmem:[%s1622_s1 + $0x370] ss:$8 sps:$4 sm:$0xff]  }
  0x19   :  { %798 = vmatprep.subr.bf16.mxu1 %v1096_v25  ;;  %v1164_v7 = vld [vmem:[%s1622_s1 + $0x264] ss:$8 sps:$4 sm:$0xff]   ;;  %v1162_v10 = vld [vmem:[%s1622_s1 + $0x260] ss:$8 sps:$4 sm:$0xff]   ;;  %v1167_v11 = vld [vmem:[%s1622_s1 + $0x254] ss:$8 sps:$4 sm:$0xff]  }
  0x1a   :  { %v1191_v9 = vld [vmem:[%s1622_s1 + $0x364] ss:$8 sps:$4 sm:$0xff]   ;;  %v1189_v12 = vld [vmem:[%s1622_s1 + $0x360] ss:$8 sps:$4 sm:$0xff]   ;;  %v1235_v13 = vmov 0  }
  0x1b   :  { %756 = vmatpush1.bf16.msra.mxu0 %v1095_v26  ;;  %v1197_v14 = vld [vmem:[%s1622_s1 + $0x354] ss:$8 sps:$4 sm:$0xff]   ;;  %v1165_v15 = vld [vmem:[%s1622_s1 + $0x250] ss:$8 sps:$4 sm:$0xff]   ;;  %v1170_v16 = vld [vmem:[%s1622_s1 + $0x244] ss:$8 sps:$4 sm:$0xff]  }
  0x1c   :  { %757 = vmatprep.subr.bf16.mxu0 %v1099_v27  ;;  %799 = vmatpush1.bf16.msra.mxu1 %v1098_v28  ;;  %v1195_v17 = vld [vmem:[%s1622_s1 + $0x350] ss:$8 sps:$4 sm:$0xff]   ;;  %v1203_v18 = vld [vmem:[%s1622_s1 + $0x344] ss:$8 sps:$4 sm:$0xff]   ;;  %v1168_v19 = vld [vmem:[%s1622_s1 + $0x240] ss:$8 sps:$4 sm:$0xff]  }
  0x1d   :  { %800 = vmatprep.subr.bf16.mxu1 %v1102_v29  ;;  %v1173_v20 = vld [vmem:[%s1622_s1 + $0x234] ss:$8 sps:$4 sm:$0xff]   ;;  %v1201_v21 = vld [vmem:[%s1622_s1 + $0x340] ss:$8 sps:$4 sm:$0xff]   ;;  %v1171_v23 = vld [vmem:[%s1622_s1 + $0x230] ss:$8 sps:$4 sm:$0xff]  }
  0x1e   :  { %v1209_v22 = vld [vmem:[%s1622_s1 + $0x334] ss:$8 sps:$4 sm:$0xff]   ;;  %v1176_v25 = vld [vmem:[%s1622_s1 + $0x224] ss:$8 sps:$4 sm:$0xff]   ;;  %v1207_v26 = vld [vmem:[%s1622_s1 + $0x330] ss:$8 sps:$4 sm:$0xff]  }
  0x1f   :  { %758 = vmatpush1.bf16.msra.mxu0 %v1101_v30  ;;  %v1234_v24 = vld [vmem:[%s1623_s0 + $0x14] ss:$28 sps:$4 sm:$0xff]   ;;  %v1215_v27 = vld [vmem:[%s1622_s1 + $0x324] ss:$8 sps:$4 sm:$0xff]   ;;  %v1174_v28 = vld [vmem:[%s1622_s1 + $0x220] ss:$8 sps:$4 sm:$0xff]  }
  0x20   :  { %759 = vmatprep.subr.bf16.mxu0 %v1105_v31  ;;  %801 = vmatpush1.bf16.msra.mxu1 %v1104_v32  ;;  %v1179_v29 = vld [vmem:[%s1622_s1 + $0x214] ss:$8 sps:$4 sm:$0xff]   ;;  %v1213_v30 = vld [vmem:[%s1622_s1 + $0x320] ss:$8 sps:$4 sm:$0xff]   ;;  %v1177_v32 = vld [vmem:[%s1622_s1 + $0x210] ss:$8 sps:$4 sm:$0xff]  }
  0x21   :  { %802 = vmatprep.subr.bf16.mxu1 %v1108_v33  ;;  %v1221_v31 = vld [vmem:[%s1622_s1 + $0x314] ss:$8 sps:$4 sm:$0xff]   ;;  %v1182_v33 = vld [vmem:[%s1622_s1 + $0x204] ss:$8 sps:$4 sm:$0xff]  }
  0x22   :  { %v1212_v47 = vld [vmem:[%s1622_s1 + $0x2b4] ss:$8 sps:$4 sm:$0xff]  }
  0x23   :  { %760 = vmatpush2.bf16.msra.mxu0 %v1107_v34  ;;  %v1219_v34 = vld [vmem:[%s1622_s1 + $0x310] ss:$8 sps:$4 sm:$0xff]   ;;  %v1224_v51 = vld [vmem:[%s1622_s1 + $0x294] ss:$8 sps:$4 sm:$0xff]  }
  0x24   :  { %761 = vmatprep.subr.bf16.mxu0 %v1111_v35  ;;  %803 = vmatpush2.bf16.msra.mxu1 %v1110_v36  ;;  %v1227_v35 = vld [vmem:[%s1622_s1 + $0x304] ss:$8 sps:$4 sm:$0xff]   ;;  %v1180_v36 = vld [vmem:[%s1622_s1 + $0x200] ss:$8 sps:$4 sm:$0xff]  }
  0x25   :  { %804 = vmatprep.subr.bf16.mxu1 %v1114_v37  ;;  %v1188_v37 = vld [vmem:[%s1622_s1 + $0x2f4] ss:$8 sps:$4 sm:$0xff]  }
  0x27   :  { %762 = vmatpush2.bf16.msra.mxu0 %v1113_v38  ;;  %v1225_v38 = vld [vmem:[%s1622_s1 + $0x300] ss:$8 sps:$4 sm:$0xff]  }
  0x28   :  { %763 = vmatprep.subr.bf16.mxu0 %v1117_v39  ;;  %805 = vmatpush2.bf16.msra.mxu1 %v1116_v40  ;;  %v1186_v39 = vld [vmem:[%s1622_s1 + $0x2f0] ss:$8 sps:$4 sm:$0xff]   ;;  %v1194_v40 = vld [vmem:[%s1622_s1 + $0x2e4] ss:$8 sps:$4 sm:$0xff]  }
  0x29   :  { %806 = vmatprep.subr.bf16.mxu1 %v1120_v41  ;;  %v1231_v41 = vld [vmem:[%s1623_s0 + $0x18] ss:$28 sps:$4 sm:$0xff]  }
  0x2b   :  { %764 = vmatpush2.bf16.msra.mxu0 %v1119_v42  ;;  %v1192_v42 = vld [vmem:[%s1622_s1 + $0x2e0] ss:$8 sps:$4 sm:$0xff]  }
  0x2c   :  { %765 = vmatprep.subr.bf16.mxu0 %v1123_v43  ;;  %807 = vmatpush2.bf16.msra.mxu1 %v1122_v44  ;;  %v1200_v43 = vld [vmem:[%s1622_s1 + $0x2d4] ss:$8 sps:$4 sm:$0xff]   ;;  %v1198_v44 = vld [vmem:[%s1622_s1 + $0x2d0] ss:$8 sps:$4 sm:$0xff]  }
  0x2d   :  { %808 = vmatprep.subr.bf16.mxu1 %v1126_v45  ;;  %v1206_v45 = vld [vmem:[%s1622_s1 + $0x2c4] ss:$8 sps:$4 sm:$0xff]  }
  0x2f   :  { %766 = vmatpush2.bf16.msra.mxu0 %v1125_v46  ;;  %v1204_v46 = vld [vmem:[%s1622_s1 + $0x2c0] ss:$8 sps:$4 sm:$0xff]  }
  0x30   :  { %767 = vmatprep.subr.bf16.mxu0 %v1129_v48  ;;  %809 = vmatpush2.bf16.msra.mxu1 %v1128_v49  ;;  %v1210_v48 = vld [vmem:[%s1622_s1 + $0x2b0] ss:$8 sps:$4 sm:$0xff]   ;;  %v1218_v49 = vld [vmem:[%s1622_s1 + $0x2a4] ss:$8 sps:$4 sm:$0xff]  }
  0x31   :  { %810 = vmatprep.subr.bf16.mxu1 %v1132_v50  ;;  %v1216_v50 = vld [vmem:[%s1622_s1 + $0x2a0] ss:$8 sps:$4 sm:$0xff]  }
  0x33   :  { %768 = vmatpush2.bf16.msra.mxu0 %v1131_v52  ;;  %v1222_v52 = vld [vmem:[%s1622_s1 + $0x290] ss:$8 sps:$4 sm:$0xff]  }
  0x34   :  { %769 = vmatprep.subr.bf16.mxu0 %v1135_v53  ;;  %811 = vmatpush2.bf16.msra.mxu1 %v1134_v54  ;;  %v1230_v53 = vld [vmem:[%s1622_s1 + $0x284] ss:$8 sps:$4 sm:$0xff]   ;;  %v1228_v54 = vld [vmem:[%s1622_s1 + $0x280] ss:$8 sps:$4 sm:$0xff]  }
  0x35   :  { %812 = vmatprep.subr.bf16.mxu1 %v1138_v55  ;;  %v1232_v55 = vld [vmem:[%s1623_s0 + $0x10] ss:$28 sps:$4 sm:$0xff]  }
  0x37   :  { %770 = vmatpush2.bf16.msra.mxu0 %v1137_v56  ;;  %v137_v56 = vlaneseq }
  0x38   :  { %771 = vmatprep.subr.bf16.mxu0 %v1141_v57  ;;  %813 = vmatpush2.bf16.msra.mxu1 %v1140_v58 }
  0x39   :  { %814 = vmatprep.subr.bf16.mxu1 %v1144_v59  ;;  %v138_v58 = vshrl.u32 %v137_v56, 7 }
  0x3b   :  { %772 = vmatpush2.bf16.msra.mxu0 %v1143_v60 }
  0x3c   :  { %773 = vmatprep.subr.bf16.mxu0 %v1147_v61  ;;  %815 = vmatpush2.bf16.msra.mxu1 %v1146_v62  ;;  %v139_v61 = vsub.s32 0, %v138_v58  ;;  %v135_v62 = vld [vmem:[%s1624_s2] sm:$0x3] }
  0x3d   :  { %816 = vmatprep.subr.bf16.mxu1 %v1150_v63  ;;  %v143_v63 = vsub.s32 1, %v138_v58 }
  0x3f   :  { %774 = vmatpush2.bf16.msra.mxu0 %v1149_v0 }
  0x40   :  { %829 = vmatprep.subr.bf16.mxu0 %v1158_v1  ;;  %817 = vmatpush2.bf16.msra.mxu1 %v1155_v2  ;;  %v140_v2 = vrot.slane %v135_v62, %v139_v61 }
  0x41   :  { %872 = vmatprep.subr.bf16.mxu1 %v1185_v4 }
  0x42   :  { %776 = vmatmul.mubr.bf16.vlgmr.msra.gmra.mxu0 %v1152_v3  ;;  %v144_v3 = vrot.slane %v135_v62, %v143_v63 }
  0x43   :  { %830 = vmatpush1.bf16.msra.mxu0 %v1156_v5  ;;  %819 = vmatmul.mubr.bf16.vlgmr.msra.gmra.mxu1 %v1159_v6 }
  0x44   :  { %831 = vmatprep.subr.bf16.mxu0 %v1164_v7  ;;  %873 = vmatpush1.bf16.msra.mxu1 %v1183_v8 }
  0x45   :  { %904 = vmatprep.mubr.bf16.mxu1 %v1235_v13  ;;  %874 = vmatprep.subr.bf16.mxu1 %v1191_v9 }
  0x46   :  { %861 = vmatprep.mubr.bf16.mxu0 %v1234_v24 }
  0x47   :  { %832 = vmatpush1.bf16.msra.mxu0 %v1162_v10 }
  0x48   :  { %833 = vmatprep.subr.bf16.mxu0 %v1167_v11  ;;  %875 = vmatpush1.bf16.msra.mxu1 %v1189_v12 }
  0x49   :  { %876 = vmatprep.subr.bf16.mxu1 %v1197_v14 }
  0x4b   :  { %834 = vmatpush1.bf16.msra.mxu0 %v1165_v15 }
  0x4c   :  { %835 = vmatprep.subr.bf16.mxu0 %v1170_v16  ;;  %877 = vmatpush1.bf16.msra.mxu1 %v1195_v17 }
  0x4d   :  { %878 = vmatprep.subr.bf16.mxu1 %v1203_v18 }
  0x4f   :  { %836 = vmatpush1.bf16.msra.mxu0 %v1168_v19 }
  0x50   :  { %837 = vmatprep.subr.bf16.mxu0 %v1173_v20  ;;  %879 = vmatpush1.bf16.msra.mxu1 %v1201_v21 }
  0x51   :  { %880 = vmatprep.subr.bf16.mxu1 %v1209_v22 }
  0x53   :  { %838 = vmatpush1.bf16.msra.mxu0 %v1171_v23 }
  0x54   :  { %839 = vmatprep.subr.bf16.mxu0 %v1176_v25  ;;  %881 = vmatpush1.bf16.msra.mxu1 %v1207_v26 }
  0x55   :  { %882 = vmatprep.subr.bf16.mxu1 %v1215_v27 }
  0x57   :  { %840 = vmatpush1.bf16.msra.mxu0 %v1174_v28 }
  0x58   :  { %841 = vmatprep.subr.bf16.mxu0 %v1179_v29  ;;  %883 = vmatpush1.bf16.msra.mxu1 %v1213_v30 }
  0x59   :  { %884 = vmatprep.subr.bf16.mxu1 %v1221_v31 }
  0x5b   :  { %842 = vmatpush1.bf16.msra.mxu0 %v1177_v32 }
  0x5c   :  { %843 = vmatprep.subr.bf16.mxu0 %v1182_v33  ;;  %885 = vmatpush1.bf16.msra.mxu1 %v1219_v34 }
  0x5d   :  { %886 = vmatprep.subr.bf16.mxu1 %v1227_v35 }
  0x5f   :  { %844 = vmatpush1.bf16.msra.mxu0 %v1180_v36 }
  0x60   :  { %845 = vmatprep.subr.bf16.mxu0 %v1188_v37  ;;  %887 = vmatpush1.bf16.msra.mxu1 %v1225_v38 }
  0x63   :  { %846 = vmatpush2.bf16.msra.mxu0 %v1186_v39  ;;  %905 = vmatmul.mubr.bf16.vlgmr.msra.gmra.mxu1 %v1231_v41 }
  0x64   :  { %847 = vmatprep.subr.bf16.mxu0 %v1194_v40 }
  0x67   :  { %848 = vmatpush2.bf16.msra.mxu0 %v1192_v42 }
  0x68   :  { %849 = vmatprep.subr.bf16.mxu0 %v1200_v43 }
  0x6b   :  { %850 = vmatpush2.bf16.msra.mxu0 %v1198_v44 }
  0x6c   :  { %851 = vmatprep.subr.bf16.mxu0 %v1206_v45 }
  0x6f   :  { %852 = vmatpush2.bf16.msra.mxu0 %v1204_v46 }
  0x70   :  { %853 = vmatprep.subr.bf16.mxu0 %v1212_v47 }
  0x73   :  { %854 = vmatpush2.bf16.msra.mxu0 %v1210_v48 }
  0x74   :  { %855 = vmatprep.subr.bf16.mxu0 %v1218_v49 }
  0x77   :  { %856 = vmatpush2.bf16.msra.mxu0 %v1216_v50 }
  0x78   :  { %857 = vmatprep.subr.bf16.mxu0 %v1224_v51 }
  0x7b   :  { %858 = vmatpush2.bf16.msra.mxu0 %v1222_v52 }
  0x7c   :  { %859 = vmatprep.subr.bf16.mxu0 %v1230_v53 }
  0x7f   :  { %860 = vmatpush2.bf16.msra.mxu0 %v1228_v54 }
  0x82   :  { %862 = vmatmul.mubr.bf16.vlgmr.msra.gmra.mxu0 %v1232_v55 }
 0x102   :  { %v777_v59 = vpop.f32.mrf.mxu0 }
 0x103   :  { %v820_v57 = vpop.f32.mrf.mxu1  ;;  %v778_v6 = vadd.f32 %v777_v59, %v140_v2 }
 0x104   :  { %v779_v0 = vpop.f32.mrf.mxu0 }
 0x105   :  { %v822_v60 = vpop.f32.mrf.mxu1  ;;  %v780_v8 = vadd.f32 %v779_v0, %v144_v3  ;;  %v821_v10 = vadd.f32 %v820_v57, %v778_v6 }
 0x106   :  { %v781_v4 = vpop.f32.mrf.mxu0 }
 0x107   :  { %v824_v1 = vpop.f32.mrf.mxu1  ;;  %v782_v11 = vadd.f32 %v781_v4, %v140_v2  ;;  %v823_v14 = vadd.f32 %v822_v60, %v780_v8 }
 0x108   :  { %v783_v9 = vpop.f32.mrf.mxu0 }
 0x109   :  { %v826_v5 = vpop.f32.mrf.mxu1  ;;  %v784_v15 = vadd.f32 %v783_v9, %v144_v3  ;;  %v825_v18 = vadd.f32 %v824_v1, %v782_v11 }
 0x10b   :  { %v827_v22 = vadd.f32 %v826_v5, %v784_v15 }
 0x123   :  { %v906_v7 = vpop.f32.mrf.mxu1 }
 0x125   :  { %v908_v12 = vpop.f32.mrf.mxu1 }
 0x127   :  { %v910_v20 = vpop.f32.mrf.mxu1 }
 0x129   :  { %v912_v29 = vpop.f32.mrf.mxu1 }
 0x142   :  { %v863_v13 = vpop.f32.mrf.mxu0 }
 0x143   :  { %v864_v16 = vadd.f32 %v863_v13, %v821_v10 }
 0x144   :  { %v865_v17 = vpop.f32.mrf.mxu0 }
 0x145   :  { %v866_v19 = vadd.f32 %v865_v17, %v823_v14  ;;  %v907_v23 = vadd.f32 %v906_v7, %v864_v16 }
 0x146   :  { %v867_v21 = vpop.f32.mrf.mxu0 }
 0x147   :  { %v909_v24 = vadd.f32 %v908_v12, %v866_v19  ;;  %v868_v25 = vadd.f32 %v867_v21, %v825_v18 }
 0x148   :  { %v869_v26 = vpop.f32.mrf.mxu0 }
 0x149   :  { %v1054_v27 = vpack.c.bf16 %v909_v24, %v907_v23  ;;  %v870_v28 = vadd.f32 %v869_v26, %v827_v22  ;;  %v911_v30 = vadd.f32 %v910_v20, %v868_v25 }
 0x14b   :  { %927 = vst [vmem:[%s1625_s3] sm:$0xff] %v1054_v27  ;;  %v913_v31 = vadd.f32 %v912_v29, %v870_v28 }
 0x14d   :  { %v1055_v32 = vpack.c.bf16 %v913_v31, %v911_v30 }
 0x14f   :  { %928 = vst [vmem:[%s1625_s3 + $0x8] sm:$0xff] %v1055_v32 }

// kernel: alexsnn_forward_at_width.9
= control target key start
LH: loop header
LB: loop body
LE: loop exit
PB: predicated region body
PF: predicated region fallthrough
CT: control target
= control target key end

     0   :  { %s2130_s1 = inlined_call_operand.vmem [shape: bf16[1792,128], index: 1, kind: input, shape index: {}]   ;;  %s2131_s0 = inlined_call_operand.vmem [shape: bf16[16,1792], index: 0, kind: input, shape index: {}]   ;;  %s2132_s2 = inlined_call_operand.vmem [shape: f32[1,128], index: 2, kind: input, shape index: {}]   ;;  %s2133_s3 = inlined_call_operand.vmem [shape: bf16[16,128], index: 3, kind: output, shape index: {}]  }
   0x1   :  { %v1593_v0 = vld [vmem:[%s2130_s1 + $0x78] sm:$0xff]   ;;  %v1597_v4 = vld [vmem:[%s2130_s1 + $0x70] sm:$0xff]   ;;  %v1601_v8 = vld [vmem:[%s2130_s1 + $0x68] sm:$0xff]  }
   0x2   :  { %v1594_v1 = vld [vmem:[%s2130_s1 + $0x38] sm:$0xff]   ;;  %1439 = vmatprep.subr.bf16.mxu0 %v1593_v0  ;;  %v1598_v5 = vld [vmem:[%s2130_s1 + $0x30] sm:$0xff]   ;;  %v1602_v9 = vld [vmem:[%s2130_s1 + $0x28] sm:$0xff]  }
   0x3   :  { %v1595_v2 = vld [vmem:[%s2130_s1 + $0xf8] sm:$0xff]   ;;  %1440 = vmatpush3.bf16.msra.mxu0 %v1594_v1  ;;  %v1599_v6 = vld [vmem:[%s2130_s1 + $0xf0] sm:$0xff]   ;;  %v1603_v10 = vld [vmem:[%s2130_s1 + $0xe8] sm:$0xff]  }
   0x4   :  { %v1596_v3 = vld [vmem:[%s2130_s1 + $0xb8] sm:$0xff]   ;;  %1461 = vmatprep.subr.bf16.mxu1 %v1595_v2  ;;  %1441 = vmatprep.subr.bf16.mxu0 %v1597_v4  ;;  %v1600_v7 = vld [vmem:[%s2130_s1 + $0xb0] sm:$0xff]   ;;  %v1604_v11 = vld [vmem:[%s2130_s1 + $0xa8] sm:$0xff]  }
   0x5   :  { %1462 = vmatpush3.bf16.msra.mxu1 %v1596_v3  ;;  %v1605_v12 = vld [vmem:[%s2130_s1 + $0x60] sm:$0xff]   ;;  %v1609_v16 = vld [vmem:[%s2130_s1 + $0x58] sm:$0xff]   ;;  %v1613_v20 = vld [vmem:[%s2130_s1 + $0x50] sm:$0xff]  }
   0x6   :  { %1463 = vmatprep.subr.bf16.mxu1 %v1599_v6  ;;  %v1606_v13 = vld [vmem:[%s2130_s1 + $0x20] sm:$0xff]   ;;  %v1610_v17 = vld [vmem:[%s2130_s1 + $0x18] sm:$0xff]   ;;  %v1614_v21 = vld [vmem:[%s2130_s1 + $0x10] sm:$0xff]  }
   0x7   :  { %1442 = vmatpush3.bf16.msra.mxu0 %v1598_v5  ;;  %v1607_v14 = vld [vmem:[%s2130_s1 + $0xe0] sm:$0xff]   ;;  %v1611_v18 = vld [vmem:[%s2130_s1 + $0xd8] sm:$0xff]   ;;  %v1615_v22 = vld [vmem:[%s2130_s1 + $0xd0] sm:$0xff]  }
   0x8   :  { %1443 = vmatprep.subr.bf16.mxu0 %v1601_v8  ;;  %v1608_v15 = vld [vmem:[%s2130_s1 + $0xa0] sm:$0xff]   ;;  %v1612_v19 = vld [vmem:[%s2130_s1 + $0x98] sm:$0xff]   ;;  %v1616_v23 = vld [vmem:[%s2130_s1 + $0x90] sm:$0xff]  }
   0x9   :  { %1464 = vmatpush3.bf16.msra.mxu1 %v1600_v7  ;;  %v1617_v24 = vld [vmem:[%s2130_s1 + $0x48] sm:$0xff]   ;;  %v1621_v28 = vld [vmem:[%s2130_s1 + $0x40] sm:$0xff]   ;;  %v1628_v34 = vld [vmem:[%s2130_s1 + $0x178] sm:$0xff]  }
   0xa   :  { %1465 = vmatprep.subr.bf16.mxu1 %v1603_v10  ;;  %v1618_v25 = vld [vmem:[%s2130_s1 + $0x8] sm:$0xff]   ;;  %v1622_v29 = vld [vmem:[%s2130_s1] sm:$0xff]   ;;  %v1632_v37 = vld [vmem:[%s2130_s1 + $0x138] sm:$0xff]  }
   0xb   :  { %1444 = vmatpush3.bf16.msra.mxu0 %v1602_v9  ;;  %v1619_v26 = vld [vmem:[%s2130_s1 + $0xc8] sm:$0xff]   ;;  %v1623_v30 = vld [vmem:[%s2130_s1 + $0xc0] sm:$0xff]   ;;  %v1633_v38 = vld [vmem:[%s2130_s1 + $0x1f8] sm:$0xff]  }
   0xc   :  { %1445 = vmatprep.subr.bf16.mxu0 %v1605_v12  ;;  %v1620_v27 = vld [vmem:[%s2130_s1 + $0x88] sm:$0xff]   ;;  %v1624_v31 = vld [vmem:[%s2131_s0] ss:$56 sps:$4 sm:$0xff]   ;;  %v1626_v32 = vld [vmem:[%s2131_s0 + $0x4] ss:$56 sps:$4 sm:$0xff]  }
   0xd   :  { %1466 = vmatpush3.bf16.msra.mxu1 %v1604_v11  ;;  %v1627_v33 = vld [vmem:[%s2130_s1 + $0x80] sm:$0xff]   ;;  %1034 = vmatprep.mubr.bf16.mxu0 %v1626_v32  ;;  %v1634_v39 = vld [vmem:[%s2130_s1 + $0x1b8] sm:$0xff]   ;;  %v1635_v40 = vld [vmem:[%s2130_s1 + $0x170] sm:$0xff]  }
   0xe   :  { %1467 = vmatprep.subr.bf16.mxu1 %v1607_v14  ;;  %v1629_v35 = vld [vmem:[%s2131_s0 + $0x8] ss:$56 sps:$4 sm:$0xff]   ;;  %v1631_v36 = vld [vmem:[%s2131_s0 + $0xc] ss:$56 sps:$4 sm:$0xff]   ;;  %v1636_v41 = vld [vmem:[%s2130_s1 + $0x130] sm:$0xff]  }
   0xf   :  { %1446 = vmatpush3.bf16.msra.mxu0 %v1606_v13  ;;  %1075 = vmatprep.mubr.bf16.mxu1 %v1631_v36  ;;  %v1637_v42 = vld [vmem:[%s2130_s1 + $0x1f0] sm:$0xff]   ;;  %v1639_v44 = vld [vmem:[%s2130_s1 + $0x168] sm:$0xff]   ;;  %v1643_v48 = vld [vmem:[%s2130_s1 + $0x160] sm:$0xff]  }
  0x10   :  { %1447 = vmatprep.subr.bf16.mxu0 %v1609_v16  ;;  %v1638_v43 = vld [vmem:[%s2130_s1 + $0x1b0] sm:$0xff]   ;;  %v1640_v45 = vld [vmem:[%s2130_s1 + $0x128] sm:$0xff]   ;;  %v1644_v49 = vld [vmem:[%s2130_s1 + $0x120] sm:$0xff]  }
  0x11   :  { %1468 = vmatpush3.bf16.msra.mxu1 %v1608_v15  ;;  %v1641_v46 = vld [vmem:[%s2130_s1 + $0x1e8] sm:$0xff]   ;;  %v1645_v50 = vld [vmem:[%s2130_s1 + $0x1e0] sm:$0xff]   ;;  %v1647_v52 = vld [vmem:[%s2130_s1 + $0x158] sm:$0xff]  }
  0x12   :  { %1469 = vmatprep.subr.bf16.mxu1 %v1611_v18  ;;  %v1642_v47 = vld [vmem:[%s2130_s1 + $0x1a8] sm:$0xff]   ;;  %v1646_v51 = vld [vmem:[%s2130_s1 + $0x1a0] sm:$0xff]   ;;  %v1648_v53 = vld [vmem:[%s2130_s1 + $0x118] sm:$0xff]  }
  0x13   :  { %1448 = vmatpush3.bf16.msra.mxu0 %v1610_v17  ;;  %v1649_v54 = vld [vmem:[%s2130_s1 + $0x1d8] sm:$0xff]   ;;  %v1651_v56 = vld [vmem:[%s2130_s1 + $0x150] sm:$0xff]   ;;  %v1655_v60 = vld [vmem:[%s2130_s1 + $0x148] sm:$0xff]  }
  0x14   :  { %1449 = vmatprep.subr.bf16.mxu0 %v1613_v20  ;;  %v1650_v55 = vld [vmem:[%s2130_s1 + $0x198] sm:$0xff]   ;;  %v1652_v57 = vld [vmem:[%s2130_s1 + $0x110] sm:$0xff]   ;;  %v1656_v61 = vld [vmem:[%s2130_s1 + $0x108] sm:$0xff]  }
  0x15   :  { %1470 = vmatpush3.bf16.msra.mxu1 %v1612_v19  ;;  %v1653_v58 = vld [vmem:[%s2130_s1 + $0x1d0] sm:$0xff]   ;;  %v1657_v62 = vld [vmem:[%s2130_s1 + $0x1c8] sm:$0xff]   ;;  %v1659_v0 = vld [vmem:[%s2130_s1 + $0x140] sm:$0xff]  }
  0x16   :  { %1471 = vmatprep.subr.bf16.mxu1 %v1615_v22  ;;  %v1654_v59 = vld [vmem:[%s2130_s1 + $0x190] sm:$0xff]   ;;  %v1658_v63 = vld [vmem:[%s2130_s1 + $0x188] sm:$0xff]   ;;  %v1660_v1 = vld [vmem:[%s2130_s1 + $0x100] sm:$0xff]  }
  0x17   :  { %1450 = vmatpush3.bf16.msra.mxu0 %v1614_v21  ;;  %v1661_v2 = vld [vmem:[%s2130_s1 + $0x1c0] sm:$0xff]   ;;  %v1662_v3 = vld [vmem:[%s2131_s0 + $0x10] ss:$56 sps:$4 sm:$0xff]   ;;  %v1664_v4 = vld [vmem:[%s2131_s0 + $0x14] ss:$56 sps:$4 sm:$0xff]  }
  0x18   :  { %1451 = vmatprep.subr.bf16.mxu0 %v1617_v24  ;;  %v1665_v5 = vld [vmem:[%s2130_s1 + $0x180] sm:$0xff]   ;;  %v1666_v6 = vld [vmem:[%s2130_s1 + $0x278] sm:$0xff]   ;;  %v1673_v12 = vld [vmem:[%s2130_s1 + $0x270] sm:$0xff]  }
  0x19   :  { %1472 = vmatpush3.bf16.msra.mxu1 %v1616_v23  ;;  %v1667_v7 = vld [vmem:[%s2131_s0 + $0x18] ss:$56 sps:$4 sm:$0xff]   ;;  %v1669_v8 = vld [vmem:[%s2131_s0 + $0x1c] ss:$56 sps:$4 sm:$0xff]   ;;  %v1677_v16 = vld [vmem:[%s2130_s1 + $0x268] sm:$0xff]  }
  0x1a   :  { %1473 = vmatprep.subr.bf16.mxu1 %v1619_v26  ;;  %v1670_v9 = vld [vmem:[%s2130_s1 + $0x238] sm:$0xff]   ;;  %v1674_v13 = vld [vmem:[%s2130_s1 + $0x230] sm:$0xff]   ;;  %v1678_v17 = vld [vmem:[%s2130_s1 + $0x228] sm:$0xff]  }
  0x1b   :  { %1452 = vmatpush3.bf16.msra.mxu0 %v1618_v25  ;;  %v1671_v10 = vld [vmem:[%s2130_s1 + $0x2f8] sm:$0xff]   ;;  %v1675_v14 = vld [vmem:[%s2130_s1 + $0x2f0] sm:$0xff]   ;;  %v1679_v18 = vld [vmem:[%s2130_s1 + $0x2e8] sm:$0xff]  }
  0x1c   :  { %1453 = vmatprep.subr.bf16.mxu0 %v1621_v28  ;;  %v1672_v11 = vld [vmem:[%s2130_s1 + $0x2b8] sm:$0xff]   ;;  %v1676_v15 = vld [vmem:[%s2130_s1 + $0x2b0] sm:$0xff]   ;;  %v1680_v19 = vld [vmem:[%s2130_s1 + $0x2a8] sm:$0xff]  }
  0x1d   :  { %1474 = vmatpush3.bf16.msra.mxu1 %v1620_v27  ;;  %v1681_v20 = vld [vmem:[%s2130_s1 + $0x260] sm:$0xff]   ;;  %v1685_v24 = vld [vmem:[%s2130_s1 + $0x258] sm:$0xff]   ;;  %v1689_v28 = vld [vmem:[%s2130_s1 + $0x250] sm:$0xff]  }
  0x1e   :  { %1475 = vmatprep.subr.bf16.mxu1 %v1623_v30  ;;  %v1682_v21 = vld [vmem:[%s2130_s1 + $0x220] sm:$0xff]   ;;  %v1686_v25 = vld [vmem:[%s2130_s1 + $0x218] sm:$0xff]   ;;  %v1691_v30 = vld [vmem:[%s2130_s1 + $0x2d0] sm:$0xff]  }
  0x1f   :  { %1454 = vmatpush3.bf16.msra.mxu0 %v1622_v29  ;;  %v1683_v22 = vld [vmem:[%s2130_s1 + $0x2e0] sm:$0xff]   ;;  %v1687_v26 = vld [vmem:[%s2130_s1 + $0x2d8] sm:$0xff]   ;;  %v1690_v29 = vld [vmem:[%s2130_s1 + $0x210] sm:$0xff]  }
  0x20   :  { %1483 = vmatprep.subr.bf16.mxu0 %v1628_v34  ;;  %v1684_v23 = vld [vmem:[%s2130_s1 + $0x2a0] sm:$0xff]   ;;  %v1688_v27 = vld [vmem:[%s2130_s1 + $0x298] sm:$0xff]   ;;  %v1693_v32 = vld [vmem:[%s2130_s1 + $0x248] sm:$0xff]  }
  0x21   :  { %1476 = vmatpush3.bf16.msra.mxu1 %v1627_v33  ;;  %v1694_v33 = vld [vmem:[%s2130_s1 + $0x208] sm:$0xff]   ;;  %v1697_v36 = vld [vmem:[%s2130_s1 + $0x240] sm:$0xff]  }
  0x22   :  { %1035 = vmatmul.mubr.bf16.vlgmr.msra.gmra.mxu0 %v1624_v31  ;;  %1505 = vmatprep.subr.bf16.mxu1 %v1633_v38  ;;  %v1692_v31 = vld [vmem:[%s2130_s1 + $0x290] sm:$0xff]   ;;  %v1695_v34 = vld [vmem:[%s2130_s1 + $0x2c8] sm:$0xff]   ;;  %v1699_v38 = vld [vmem:[%s2130_s1 + $0x2c0] sm:$0xff]  }
  0x23   :  { %1484 = vmatpush3.bf16.msra.mxu0 %v1632_v37  ;;  %1116 = vmatprep.mubr.bf16.mxu0 %v1664_v4  ;;  %v1698_v37 = vld [vmem:[%s2130_s1 + $0x200] sm:$0xff]  }
  0x24   :  { %1076 = vmatmul.mubr.bf16.vlgmr.msra.gmra.mxu1 %v1629_v35  ;;  %1485 = vmatprep.subr.bf16.mxu0 %v1635_v40  ;;  %v1696_v35 = vld [vmem:[%s2130_s1 + $0x288] sm:$0xff]   ;;  %v1702_v40 = vld [vmem:[%s2131_s0 + $0x24] ss:$56 sps:$4 sm:$0xff]  }
  0x25   :  { %1506 = vmatpush3.bf16.msra.mxu1 %v1634_v39  ;;  %1157 = vmatprep.mubr.bf16.mxu1 %v1669_v8  ;;  %v1700_v39 = vld [vmem:[%s2131_s0 + $0x20] ss:$56 sps:$4 sm:$0xff]  }
  0x26   :  { %1507 = vmatprep.subr.bf16.mxu1 %v1637_v42  ;;  %v1704_v42 = vld [vmem:[%s2130_s1 + $0x378] sm:$0xff]  }
  0x27   :  { %1486 = vmatpush3.bf16.msra.mxu0 %v1636_v41  ;;  %v1703_v41 = vld [vmem:[%s2130_s1 + $0x280] sm:$0xff]  }
  0x28   :  { %1487 = vmatprep.subr.bf16.mxu0 %v1639_v44  ;;  %v1707_v44 = vld [vmem:[%s2131_s0 + $0x2c] ss:$56 sps:$4 sm:$0xff]  }
  0x29   :  { %1508 = vmatpush3.bf16.msra.mxu1 %v1638_v43  ;;  %v1705_v43 = vld [vmem:[%s2131_s0 + $0x28] ss:$56 sps:$4 sm:$0xff]  }
  0x2a   :  { %1509 = vmatprep.subr.bf16.mxu1 %v1641_v46  ;;  %v1709_v46 = vld [vmem:[%s2130_s1 + $0x370] sm:$0xff]  }
  0x2b   :  { %1488 = vmatpush3.bf16.msra.mxu0 %v1640_v45  ;;  %v1708_v45 = vld [vmem:[%s2130_s1 + $0x338] sm:$0xff]  }
  0x2c   :  { %1489 = vmatprep.subr.bf16.mxu0 %v1643_v48  ;;  %v1711_v48 = vld [vmem:[%s2130_s1 + $0x368] sm:$0xff]  }
  0x2d   :  { %1510 = vmatpush3.bf16.msra.mxu1 %v1642_v47  ;;  %v1710_v47 = vld [vmem:[%s2130_s1 + $0x330] sm:$0xff]  }
  0x2e   :  { %1511 = vmatprep.subr.bf16.mxu1 %v1645_v50  ;;  %v1713_v50 = vld [vmem:[%s2130_s1 + $0x360] sm:$0xff]  }
  0x2f   :  { %1490 = vmatpush3.bf16.msra.mxu0 %v1644_v49  ;;  %v1712_v49 = vld [vmem:[%s2130_s1 + $0x328] sm:$0xff]  }
  0x30   :  { %1491 = vmatprep.subr.bf16.mxu0 %v1647_v52  ;;  %v1715_v52 = vld [vmem:[%s2130_s1 + $0x358] sm:$0xff]  }
  0x31   :  { %1512 = vmatpush3.bf16.msra.mxu1 %v1646_v51  ;;  %v1714_v51 = vld [vmem:[%s2130_s1 + $0x320] sm:$0xff]  }
  0x32   :  { %1513 = vmatprep.subr.bf16.mxu1 %v1649_v54  ;;  %v1717_v54 = vld [vmem:[%s2130_s1 + $0x350] sm:$0xff]  }
  0x33   :  { %1492 = vmatpush3.bf16.msra.mxu0 %v1648_v53  ;;  %v1716_v53 = vld [vmem:[%s2130_s1 + $0x318] sm:$0xff]  }
  0x34   :  { %1493 = vmatprep.subr.bf16.mxu0 %v1651_v56  ;;  %v1718_v56 = vld [vmem:[%s2130_s1 + $0x310] sm:$0xff]  }
  0x35   :  { %1514 = vmatpush3.bf16.msra.mxu1 %v1650_v55  ;;  %v1725_v55 = vld [vmem:[%s2131_s0 + $0x34] ss:$56 sps:$4 sm:$0xff]  }
  0x36   :  { %1515 = vmatprep.subr.bf16.mxu1 %v1653_v58  ;;  %v1720_v58 = vld [vmem:[%s2130_s1 + $0x308] sm:$0xff]  }
  0x37   :  { %1494 = vmatpush3.bf16.msra.mxu0 %v1652_v57  ;;  %v1719_v57 = vld [vmem:[%s2130_s1 + $0x348] sm:$0xff]  }
  0x38   :  { %1495 = vmatprep.subr.bf16.mxu0 %v1655_v60  ;;  %v1722_v60 = vld [vmem:[%s2130_s1 + $0x300] sm:$0xff]  }
  0x39   :  { %1516 = vmatpush3.bf16.msra.mxu1 %v1654_v59  ;;  %v1721_v59 = vld [vmem:[%s2130_s1 + $0x340] sm:$0xff]  }
  0x3a   :  { %1517 = vmatprep.subr.bf16.mxu1 %v1657_v62 }
  0x3b   :  { %1496 = vmatpush3.bf16.msra.mxu0 %v1656_v61  ;;  %v1723_v61 = vld [vmem:[%s2131_s0 + $0x30] ss:$56 sps:$4 sm:$0xff]  }
  0x3c   :  { %1497 = vmatprep.subr.bf16.mxu0 %v1659_v0 }
  0x3d   :  { %1518 = vmatpush3.bf16.msra.mxu1 %v1658_v63 }
  0x3e   :  { %1519 = vmatprep.subr.bf16.mxu1 %v1661_v2 }
  0x3f   :  { %1498 = vmatpush3.bf16.msra.mxu0 %v1660_v1 }
  0x40   :  { %1527 = vmatprep.subr.bf16.mxu0 %v1666_v6 }
  0x41   :  { %1520 = vmatpush3.bf16.msra.mxu1 %v1665_v5 }
  0x42   :  { %1117 = vmatmul.mubr.bf16.vlgmr.msra.gmra.mxu0 %v1662_v3  ;;  %1549 = vmatprep.subr.bf16.mxu1 %v1671_v10 }
  0x43   :  { %1528 = vmatpush3.bf16.msra.mxu0 %v1670_v9  ;;  %1198 = vmatprep.mubr.bf16.mxu0 %v1702_v40 }
  0x44   :  { %1158 = vmatmul.mubr.bf16.vlgmr.msra.gmra.mxu1 %v1667_v7  ;;  %1529 = vmatprep.subr.bf16.mxu0 %v1673_v12 }
  0x45   :  { %1550 = vmatpush3.bf16.msra.mxu1 %v1672_v11  ;;  %1239 = vmatprep.mubr.bf16.mxu1 %v1707_v44 }
  0x46   :  { %1551 = vmatprep.subr.bf16.mxu1 %v1675_v14 }
  0x47   :  { %1530 = vmatpush3.bf16.msra.mxu0 %v1674_v13 }
  0x48   :  { %1531 = vmatprep.subr.bf16.mxu0 %v1677_v16 }
  0x49   :  { %1552 = vmatpush3.bf16.msra.mxu1 %v1676_v15 }
  0x4a   :  { %1553 = vmatprep.subr.bf16.mxu1 %v1679_v18 }
  0x4b   :  { %1532 = vmatpush3.bf16.msra.mxu0 %v1678_v17  ;;  %v1303_v17 = vld [vmem:[%s2132_s2] ss:$0 sm:$0xff] }
  0x4c   :  { %1533 = vmatprep.subr.bf16.mxu0 %v1681_v20 }
  0x4d   :  { %1554 = vmatpush3.bf16.msra.mxu1 %v1680_v19 }
  0x4e   :  { %1555 = vmatprep.subr.bf16.mxu1 %v1683_v22 }
  0x4f   :  { %1534 = vmatpush3.bf16.msra.mxu0 %v1682_v21 }
  0x50   :  { %1535 = vmatprep.subr.bf16.mxu0 %v1685_v24 }
  0x51   :  { %1556 = vmatpush3.bf16.msra.mxu1 %v1684_v23 }
  0x52   :  { %1557 = vmatprep.subr.bf16.mxu1 %v1687_v26 }
  0x53   :  { %1536 = vmatpush3.bf16.msra.mxu0 %v1686_v25 }
  0x54   :  { %1537 = vmatprep.subr.bf16.mxu0 %v1689_v28 }
  0x55   :  { %1558 = vmatpush3.bf16.msra.mxu1 %v1688_v27 }
  0x56   :  { %1559 = vmatprep.subr.bf16.mxu1 %v1691_v30 }
  0x57   :  { %1538 = vmatpush3.bf16.msra.mxu0 %v1690_v29 }
  0x58   :  { %1539 = vmatprep.subr.bf16.mxu0 %v1693_v32 }
  0x59   :  { %1560 = vmatpush3.bf16.msra.mxu1 %v1692_v31 }
  0x5a   :  { %1561 = vmatprep.subr.bf16.mxu1 %v1695_v34 }
  0x5b   :  { %1540 = vmatpush3.bf16.msra.mxu0 %v1694_v33 }
  0x5c   :  { %1541 = vmatprep.subr.bf16.mxu0 %v1697_v36 }
  0x5d   :  { %1562 = vmatpush3.bf16.msra.mxu1 %v1696_v35 }
  0x5e   :  { %1563 = vmatprep.subr.bf16.mxu1 %v1699_v38 }
  0x5f   :  { %1542 = vmatpush3.bf16.msra.mxu0 %v1698_v37 }
  0x60   :  { %1571 = vmatprep.subr.bf16.mxu0 %v1704_v42 }
  0x61   :  { %1564 = vmatpush3.bf16.msra.mxu1 %v1703_v41 }
  0x62   :  { %1199 = vmatmul.mubr.bf16.vlgmr.msra.gmra.mxu0 %v1700_v39 }
  0x63   :  { %1572 = vmatpush3.bf16.msra.mxu0 %v1708_v45  ;;  %1280 = vmatprep.mubr.bf16.mxu0 %v1725_v55 }
  0x64   :  { %1240 = vmatmul.mubr.bf16.vlgmr.msra.gmra.mxu1 %v1705_v43  ;;  %1573 = vmatprep.subr.bf16.mxu0 %v1709_v46 }
  0x67   :  { %1574 = vmatpush3.bf16.msra.mxu0 %v1710_v47 }
  0x68   :  { %1575 = vmatprep.subr.bf16.mxu0 %v1711_v48 }
  0x6b   :  { %1576 = vmatpush3.bf16.msra.mxu0 %v1712_v49 }
  0x6c   :  { %1577 = vmatprep.subr.bf16.mxu0 %v1713_v50 }
  0x6f   :  { %1578 = vmatpush3.bf16.msra.mxu0 %v1714_v51 }
  0x70   :  { %1579 = vmatprep.subr.bf16.mxu0 %v1715_v52 }
  0x73   :  { %1580 = vmatpush3.bf16.msra.mxu0 %v1716_v53 }
  0x74   :  { %1581 = vmatprep.subr.bf16.mxu0 %v1717_v54 }
  0x77   :  { %1582 = vmatpush3.bf16.msra.mxu0 %v1718_v56 }
  0x78   :  { %1583 = vmatprep.subr.bf16.mxu0 %v1719_v57 }
  0x7b   :  { %1584 = vmatpush3.bf16.msra.mxu0 %v1720_v58 }
  0x7c   :  { %1585 = vmatprep.subr.bf16.mxu0 %v1721_v59 }
  0x7f   :  { %1586 = vmatpush3.bf16.msra.mxu0 %v1722_v60 }
  0x82   :  { %1281 = vmatmul.mubr.bf16.vlgmr.msra.gmra.mxu0 %v1723_v61 }
  0xe2   :  { %v1455_v62 = vpop.f32.mrf.mxu0 }
  0xe4   :  { %v1456_v63 = vpop.f32.mrf.mxu0  ;;  %v1477_v0 = vpop.f32.mrf.mxu1 }
  0xe5   :  { %v1457_v15 = vadd.f32 %v1456_v63, %v1455_v62 }
  0xe6   :  { %v1458_v1 = vpop.f32.mrf.mxu0  ;;  %v1478_v2 = vpop.f32.mrf.mxu1 }
  0xe7   :  { %v1037_v20 = vadd.f32 %v1457_v15, %v1303_v17  ;;  %v1479_v21 = vadd.f32 %v1478_v2, %v1477_v0 }
  0xe8   :  { %v1459_v3 = vpop.f32.mrf.mxu0  ;;  %v1480_v4 = vpop.f32.mrf.mxu1 }
  0xe9   :  { %v1460_v16 = vadd.f32 %v1459_v3, %v1458_v1  ;;  %v1078_v28 = vadd.f32 %v1479_v21, %v1037_v20 }
  0xea   :  { %v1481_v6 = vpop.f32.mrf.mxu1 }
  0xeb   :  { %v1040_v22 = vadd.f32 %v1460_v16, %v1303_v17  ;;  %v1482_v23 = vadd.f32 %v1481_v6, %v1480_v4 }
  0xed   :  { %v1081_v29 = vadd.f32 %v1482_v23, %v1040_v22 }
 0x102   :  { %v1499_v5 = vpop.f32.mrf.mxu0 }
 0x104   :  { %v1500_v7 = vpop.f32.mrf.mxu0  ;;  %v1521_v8 = vpop.f32.mrf.mxu1 }
 0x105   :  { %v1501_v26 = vadd.f32 %v1500_v7, %v1499_v5 }
 0x106   :  { %v1502_v9 = vpop.f32.mrf.mxu0  ;;  %v1522_v10 = vpop.f32.mrf.mxu1 }
 0x107   :  { %v1119_v32 = vadd.f32 %v1501_v26, %v1078_v28  ;;  %v1523_v33 = vadd.f32 %v1522_v10, %v1521_v8 }
 0x108   :  { %v1503_v11 = vpop.f32.mrf.mxu0  ;;  %v1524_v12 = vpop.f32.mrf.mxu1 }
 0x109   :  { %v1504_v27 = vadd.f32 %v1503_v11, %v1502_v9  ;;  %v1160_v40 = vadd.f32 %v1523_v33, %v1119_v32 }
 0x10a   :  { %v1525_v14 = vpop.f32.mrf.mxu1 }
 0x10b   :  { %v1122_v34 = vadd.f32 %v1504_v27, %v1081_v29  ;;  %v1526_v35 = vadd.f32 %v1525_v14, %v1524_v12 }
 0x10d   :  { %v1163_v41 = vadd.f32 %v1526_v35, %v1122_v34 }
 0x122   :  { %v1543_v13 = vpop.f32.mrf.mxu0 }
 0x124   :  { %v1544_v18 = vpop.f32.mrf.mxu0  ;;  %v1565_v19 = vpop.f32.mrf.mxu1 }
 0x125   :  { %v1545_v36 = vadd.f32 %v1544_v18, %v1543_v13 }
 0x126   :  { %v1546_v24 = vpop.f32.mrf.mxu0  ;;  %v1566_v25 = vpop.f32.mrf.mxu1 }
 0x127   :  { %v1201_v43 = vadd.f32 %v1545_v36, %v1160_v40  ;;  %v1567_v44 = vadd.f32 %v1566_v25, %v1565_v19 }
 0x128   :  { %v1547_v30 = vpop.f32.mrf.mxu0  ;;  %v1568_v31 = vpop.f32.mrf.mxu1 }
 0x129   :  { %v1548_v37 = vadd.f32 %v1547_v30, %v1546_v24  ;;  %v1242_v50 = vadd.f32 %v1567_v44, %v1201_v43 }
 0x12a   :  { %v1569_v38 = vpop.f32.mrf.mxu1 }
 0x12b   :  { %v1204_v45 = vadd.f32 %v1548_v37, %v1163_v41  ;;  %v1570_v46 = vadd.f32 %v1569_v38, %v1568_v31 }
 0x12d   :  { %v1245_v51 = vadd.f32 %v1570_v46, %v1204_v45 }
 0x142   :  { %v1587_v39 = vpop.f32.mrf.mxu0 }
 0x144   :  { %v1588_v42 = vpop.f32.mrf.mxu0 }
 0x145   :  { %v1589_v48 = vadd.f32 %v1588_v42, %v1587_v39 }
 0x146   :  { %v1590_v47 = vpop.f32.mrf.mxu0 }
 0x147   :  { %v1283_v53 = vadd.f32 %v1589_v48, %v1242_v50 }
 0x148   :  { %v1591_v49 = vpop.f32.mrf.mxu0 }
 0x149   :  { %v1592_v52 = vadd.f32 %v1591_v49, %v1590_v47 }
 0x14b   :  { %v1286_v54 = vadd.f32 %v1592_v52, %v1245_v51 }
 0x14d   :  { %v1437_v55 = vpack.c.bf16 %v1286_v54, %v1283_v53 }
 0x14f   :  { %1438 = vst [vmem:[%s2133_s3] sm:$0xff] %v1437_v55  }

// kernel: alexsnn_forward_at_width.10
= control target key start
LH: loop header
LB: loop body
LE: loop exit
PB: predicated region body
PF: predicated region fallthrough
CT: control target
= control target key end

     0   :  { %vm1169_vm0 = vmmov 0   ;;  %s1439_s1 = inlined_call_operand.vmem [shape: bf16[1152,128], index: 1, kind: input, shape index: {}]   ;;  %s1440_s0 = inlined_call_operand.vmem [shape: bf16[16,1152], index: 0, kind: input, shape index: {}]   ;;  %s1441_s2 = inlined_call_operand.vmem [shape: f32[1,128], index: 2, kind: input, shape index: {}]   ;;  %s1442_s3 = inlined_call_operand.vmem [shape: bf16[16,128], index: 3, kind: output, shape index: {}]  }
   0x1   :  { %v1083_v0 = vld [vmem:[%s1439_s1 + $0x78] sm:$0xff]   ;;  %v1087_v4 = vld [vmem:[%s1439_s1 + $0x70] sm:$0xff]   ;;  %v1091_v8 = vld [vmem:[%s1439_s1 + $0x68] sm:$0xff]  }
   0x2   :  { %v1084_v1 = vld [vmem:[%s1439_s1 + $0x38] sm:$0xff]   ;;  %964 = vmatprep.subr.bf16.mxu0 %v1083_v0  ;;  %v1088_v5 = vld [vmem:[%s1439_s1 + $0x30] sm:$0xff]   ;;  %v1092_v9 = vld [vmem:[%s1439_s1 + $0x28] sm:$0xff]  }
   0x3   :  { %v1085_v2 = vld [vmem:[%s1439_s1 + $0xf8] sm:$0xff]   ;;  %965 = vmatpush3.bf16.msra.mxu0 %v1084_v1  ;;  %v1089_v6 = vld [vmem:[%s1439_s1 + $0xf0] sm:$0xff]   ;;  %v1093_v10 = vld [vmem:[%s1439_s1 + $0xe8] sm:$0xff]  }
   0x4   :  { %v1086_v3 = vld [vmem:[%s1439_s1 + $0xb8] sm:$0xff]   ;;  %986 = vmatprep.subr.bf16.mxu1 %v1085_v2  ;;  %966 = vmatprep.subr.bf16.mxu0 %v1087_v4  ;;  %v1090_v7 = vld [vmem:[%s1439_s1 + $0xb0] sm:$0xff]   ;;  %v1094_v11 = vld [vmem:[%s1439_s1 + $0xa8] sm:$0xff]  }
   0x5   :  { %987 = vmatpush3.bf16.msra.mxu1 %v1086_v3  ;;  %v1095_v12 = vld [vmem:[%s1439_s1 + $0x60] sm:$0xff]   ;;  %v1099_v16 = vld [vmem:[%s1439_s1 + $0x58] sm:$0xff]   ;;  %v1103_v20 = vld [vmem:[%s1439_s1 + $0x50] sm:$0xff]  }
   0x6   :  { %988 = vmatprep.subr.bf16.mxu1 %v1089_v6  ;;  %v1096_v13 = vld [vmem:[%s1439_s1 + $0x20] sm:$0xff]   ;;  %v1100_v17 = vld [vmem:[%s1439_s1 + $0x18] sm:$0xff]   ;;  %v1104_v21 = vld [vmem:[%s1439_s1 + $0x10] sm:$0xff]   ;;  %v1168_v6 = vmov 0.0  }
   0x7   :  { %967 = vmatpush3.bf16.msra.mxu0 %v1088_v5  ;;  %v1097_v14 = vld [vmem:[%s1439_s1 + $0xe0] sm:$0xff]   ;;  %v1101_v18 = vld [vmem:[%s1439_s1 + $0xd8] sm:$0xff]   ;;  %v1105_v22 = vld [vmem:[%s1439_s1 + $0xd0] sm:$0xff]  }
   0x8   :  { %968 = vmatprep.subr.bf16.mxu0 %v1091_v8  ;;  %v1098_v15 = vld [vmem:[%s1439_s1 + $0xa0] sm:$0xff]   ;;  %v1102_v19 = vld [vmem:[%s1439_s1 + $0x98] sm:$0xff]   ;;  %v1106_v23 = vld [vmem:[%s1439_s1 + $0x90] sm:$0xff]  }
   0x9   :  { %989 = vmatpush3.bf16.msra.mxu1 %v1090_v7  ;;  %v1107_v24 = vld [vmem:[%s1439_s1 + $0x48] sm:$0xff]   ;;  %v1111_v28 = vld [vmem:[%s1439_s1 + $0x40] sm:$0xff]   ;;  %v1118_v34 = vld [vmem:[%s1439_s1 + $0x178] sm:$0xff]  }
   0xa   :  { %990 = vmatprep.subr.bf16.mxu1 %v1093_v10  ;;  %v1108_v25 = vld [vmem:[%s1439_s1 + $0x8] sm:$0xff]   ;;  %v1112_v29 = vld [vmem:[%s1439_s1] sm:$0xff]   ;;  %v1122_v37 = vld [vmem:[%s1439_s1 + $0x138] sm:$0xff]  }
   0xb   :  { %969 = vmatpush3.bf16.msra.mxu0 %v1092_v9  ;;  %v1109_v26 = vld [vmem:[%s1439_s1 + $0xc8] sm:$0xff]   ;;  %v1113_v30 = vld [vmem:[%s1439_s1 + $0xc0] sm:$0xff]   ;;  %v1123_v38 = vld [vmem:[%s1439_s1 + $0x1f8] sm:$0xff]  }
   0xc   :  { %970 = vmatprep.subr.bf16.mxu0 %v1095_v12  ;;  %v1110_v27 = vld [vmem:[%s1439_s1 + $0x88] sm:$0xff]   ;;  %v1114_v31 = vld [vmem:[%s1440_s0] ss:$36 sps:$4 sm:$0xff]   ;;  %v1124_v39 = vld [vmem:[%s1439_s1 + $0x1b8] sm:$0xff]  }
   0xd   :  { %991 = vmatpush3.bf16.msra.mxu1 %v1094_v11  ;;  %v1116_v32 = vld [vmem:[%s1440_s0 + $0x4] ss:$36 sps:$4 sm:$0xff]   ;;  %v1121_v36 = vld [vmem:[%s1440_s0 + $0xc] ss:$36 sps:$4 sm:$0xff]   ;;  %v1137_v52 = vld [vmem:[%s1439_s1 + $0x158] sm:$0xff]  }
   0xe   :  { %992 = vmatprep.subr.bf16.mxu1 %v1097_v14  ;;  %v1117_v33 = vld [vmem:[%s1439_s1 + $0x80] sm:$0xff]   ;;  %686 = vmatprep.mubr.bf16.mxu0 %v1116_v32  ;;  %v1119_v35 = vld [vmem:[%s1440_s0 + $0x8] ss:$36 sps:$4 sm:$0xff]   ;;  %v1125_v40 = vld [vmem:[%s1439_s1 + $0x170] sm:$0xff]  }
   0xf   :  { %971 = vmatpush3.bf16.msra.mxu0 %v1096_v13  ;;  %727 = vmatprep.mubr.bf16.mxu1 %v1121_v36  ;;  %v1126_v41 = vld [vmem:[%s1439_s1 + $0x130] sm:$0xff]   ;;  %v1129_v44 = vld [vmem:[%s1439_s1 + $0x168] sm:$0xff]   ;;  %v1133_v48 = vld [vmem:[%s1439_s1 + $0x160] sm:$0xff]  }
  0x10   :  { %972 = vmatprep.subr.bf16.mxu0 %v1099_v16  ;;  %v1127_v42 = vld [vmem:[%s1439_s1 + $0x1f0] sm:$0xff]   ;;  %v1130_v45 = vld [vmem:[%s1439_s1 + $0x128] sm:$0xff]   ;;  %v1134_v49 = vld [vmem:[%s1439_s1 + $0x120] sm:$0xff]  }
  0x11   :  { %993 = vmatpush3.bf16.msra.mxu1 %v1098_v15  ;;  %v1128_v43 = vld [vmem:[%s1439_s1 + $0x1b0] sm:$0xff]   ;;  %v1131_v46 = vld [vmem:[%s1439_s1 + $0x1e8] sm:$0xff]   ;;  %v1135_v50 = vld [vmem:[%s1439_s1 + $0x1e0] sm:$0xff]  }
  0x12   :  { %994 = vmatprep.subr.bf16.mxu1 %v1101_v18  ;;  %v1132_v47 = vld [vmem:[%s1439_s1 + $0x1a8] sm:$0xff]   ;;  %v1136_v51 = vld [vmem:[%s1439_s1 + $0x1a0] sm:$0xff]   ;;  %v1138_v53 = vld [vmem:[%s1439_s1 + $0x118] sm:$0xff]  }
  0x13   :  { %973 = vmatpush3.bf16.msra.mxu0 %v1100_v17  ;;  %v1139_v54 = vld [vmem:[%s1439_s1 + $0x1d8] sm:$0xff]   ;;  %v1141_v56 = vld [vmem:[%s1439_s1 + $0x150] sm:$0xff]   ;;  %v1145_v60 = vld [vmem:[%s1439_s1 + $0x148] sm:$0xff]  }
  0x14   :  { %974 = vmatprep.subr.bf16.mxu0 %v1103_v20  ;;  %v1140_v55 = vld [vmem:[%s1439_s1 + $0x198] sm:$0xff]   ;;  %v1142_v57 = vld [vmem:[%s1439_s1 + $0x110] sm:$0xff]   ;;  %v1146_v61 = vld [vmem:[%s1439_s1 + $0x108] sm:$0xff]  }
  0x15   :  { %995 = vmatpush3.bf16.msra.mxu1 %v1102_v19  ;;  %v1143_v58 = vld [vmem:[%s1439_s1 + $0x1d0] sm:$0xff]   ;;  %v1147_v62 = vld [vmem:[%s1439_s1 + $0x1c8] sm:$0xff]   ;;  %v1149_v0 = vld [vmem:[%s1439_s1 + $0x140] sm:$0xff]  }
  0x16   :  { %996 = vmatprep.subr.bf16.mxu1 %v1105_v22  ;;  %v1144_v59 = vld [vmem:[%s1439_s1 + $0x190] sm:$0xff]   ;;  %v1148_v63 = vld [vmem:[%s1439_s1 + $0x188] sm:$0xff]   ;;  %v1150_v1 = vld [vmem:[%s1439_s1 + $0x100] sm:$0xff]  }
  0x17   :  { %975 = vmatpush3.bf16.msra.mxu0 %v1104_v21  ;;  %v1151_v2 = vld [vmem:[%s1439_s1 + $0x1c0] sm:$0xff]   ;;  %v1152_v3 = vld [vmem:[%s1440_s0 + $0x10] ss:$36 sps:$4 sm:$0xff]   ;;  %v1156_v7 = vld [vmem:[%s1440_s0 + $0x18] ss:$36 sps:$4 sm:$0xff]  }
  0x18   :  { %976 = vmatprep.subr.bf16.mxu0 %v1107_v24  ;;  %v1154_v4 = vld [vmem:[%s1440_s0 + $0x14] ss:$36 sps:$4 sm:$0xff]   ;;  %v1155_v5 = vld [vmem:[%s1439_s1 + $0x180] sm:$0xff]   ;;  %v1161_v11 = vld [vmem:[%s1439_s1 + $0x228] sm:$0xff]  }
  0x19   :  { %997 = vmatpush3.bf16.msra.mxu1 %v1106_v23  ;;  %v1158_v8 = vld [vmem:[%s1440_s0 + $0x1c] ss:$36 sps:$4 sm:$0xff]   ;;  %v1160_v10 = vld [vmem:[%s1439_s1 + $0x230] sm:$0xff]   ;;  %v1165_v15 = vld [vmem:[%s1439_s1 + $0x208] sm:$0xff]  }
  0x1a   :  { %998 = vmatprep.subr.bf16.mxu1 %v1109_v26  ;;  %v1159_v9 = vld [vmem:[%s1439_s1 + $0x238] sm:$0xff]   ;;  %v1162_v12 = vld [vmem:[%s1439_s1 + $0x220] sm:$0xff]   ;;  %v1164_v14 = vld [vmem:[%s1439_s1 + $0x210] sm:$0xff]  }
  0x1b   :  { %977 = vmatpush3.bf16.msra.mxu0 %v1108_v25  ;;  %v1163_v13 = vld [vmem:[%s1439_s1 + $0x218] sm:$0xff]   ;;  %v1166_v16 = vld [vmem:[%s1439_s1 + $0x200] sm:$0xff]  }
  0x1c   :  { %978 = vmatprep.subr.bf16.mxu0 %v1111_v28  ;;  %v1167_v17 = vld [vmem:[%s1440_s0 + $0x20] ss:$36 sps:$4 sm:$0xff]  }
  0x1d   :  { %999 = vmatpush3.bf16.msra.mxu1 %v1110_v27 }
  0x1e   :  { %1000 = vmatprep.subr.bf16.mxu1 %v1113_v30 }
  0x1f   :  { %979 = vmatpush3.bf16.msra.mxu0 %v1112_v29 }
  0x20   :  { %1008 = vmatprep.subr.bf16.mxu0 %v1118_v34 }
  0x21   :  { %1001 = vmatpush3.bf16.msra.mxu1 %v1117_v33  ;;  %v873_v33 = vld [vmem:[%s1441_s2] ss:$0 sm:$0xff] }
  0x22   :  { %687 = vmatmul.mubr.bf16.vlgmr.msra.gmra.mxu0 %v1114_v31  ;;  %1030 = vmatprep.subr.bf16.mxu1 %v1123_v38 }
  0x23   :  { %1009 = vmatpush3.bf16.msra.mxu0 %v1122_v37  ;;  %768 = vmatprep.mubr.bf16.mxu0 %v1154_v4 }
  0x24   :  { %728 = vmatmul.mubr.bf16.vlgmr.msra.gmra.mxu1 %v1119_v35  ;;  %1010 = vmatprep.subr.bf16.mxu0 %v1125_v40 }
  0x25   :  { %1031 = vmatpush3.bf16.msra.mxu1 %v1124_v39  ;;  %809 = vmatprep.mubr.bf16.mxu1 %v1158_v8 }
  0x26   :  { %1032 = vmatprep.subr.bf16.mxu1 %v1127_v42 }
  0x27   :  { %1011 = vmatpush3.bf16.msra.mxu0 %v1126_v41 }
  0x28   :  { %1012 = vmatprep.subr.bf16.mxu0 %v1129_v44 }
  0x29   :  { %1033 = vmatpush3.bf16.msra.mxu1 %v1128_v43 }
  0x2a   :  { %1034 = vmatprep.subr.bf16.mxu1 %v1131_v46 }
  0x2b   :  { %1013 = vmatpush3.bf16.msra.mxu0 %v1130_v45 }
  0x2c   :  { %1014 = vmatprep.subr.bf16.mxu0 %v1133_v48 }
  0x2d   :  { %1035 = vmatpush3.bf16.msra.mxu1 %v1132_v47 }
  0x2e   :  { %1036 = vmatprep.subr.bf16.mxu1 %v1135_v50 }
  0x2f   :  { %1015 = vmatpush3.bf16.msra.mxu0 %v1134_v49 }
  0x30   :  { %1016 = vmatprep.subr.bf16.mxu0 %v1137_v52 }
  0x31   :  { %1037 = vmatpush3.bf16.msra.mxu1 %v1136_v51 }
  0x32   :  { %1038 = vmatprep.subr.bf16.mxu1 %v1139_v54 }
  0x33   :  { %1017 = vmatpush3.bf16.msra.mxu0 %v1138_v53 }
  0x34   :  { %1018 = vmatprep.subr.bf16.mxu0 %v1141_v56 }
  0x35   :  { %1039 = vmatpush3.bf16.msra.mxu1 %v1140_v55 }
  0x36   :  { %1040 = vmatprep.subr.bf16.mxu1 %v1143_v58 }
  0x37   :  { %1019 = vmatpush3.bf16.msra.mxu0 %v1142_v57 }
  0x38   :  { %1020 = vmatprep.subr.bf16.mxu0 %v1145_v60 }
  0x39   :  { %1041 = vmatpush3.bf16.msra.mxu1 %v1144_v59 }
  0x3a   :  { %1042 = vmatprep.subr.bf16.mxu1 %v1147_v62 }
  0x3b   :  { %1021 = vmatpush3.bf16.msra.mxu0 %v1146_v61 }
  0x3c   :  { %1022 = vmatprep.subr.bf16.mxu0 %v1149_v0 }
  0x3d   :  { %1043 = vmatpush3.bf16.msra.mxu1 %v1148_v63 }
  0x3e   :  { %1044 = vmatprep.subr.bf16.mxu1 %v1151_v2 }
  0x3f   :  { %1023 = vmatpush3.bf16.msra.mxu0 %v1150_v1 }
  0x40   :  { %1061 = vmatprep.subr.bf16.mxu0 %v1168_v6 }
  0x41   :  { %1045 = vmatpush3.bf16.msra.mxu1 %v1155_v5 }
  0x42   :  { %769 = vmatmul.mubr.bf16.vlgmr.msra.gmra.mxu0 %v1152_v3 }
  0x43   :  { %1077 = vmatprep.mubr.msk.bf16.mxu0 %vm1169_vm0, %v1168_v6  ;;  %1062 = vmatpush3.bf16.msra.mxu0 %v1159_v9 }
  0x44   :  { %810 = vmatmul.mubr.bf16.vlgmr.msra.gmra.mxu1 %v1156_v7  ;;  %1063 = vmatprep.subr.bf16.mxu0 %v1168_v6 }
  0x47   :  { %1064 = vmatpush3.bf16.msra.mxu0 %v1160_v10 }
  0x48   :  { %1065 = vmatprep.subr.bf16.mxu0 %v1168_v6 }
  0x4b   :  { %1066 = vmatpush3.bf16.msra.mxu0 %v1161_v11 }
  0x4c   :  { %1067 = vmatprep.subr.bf16.mxu0 %v1168_v6 }
  0x4f   :  { %1068 = vmatpush3.bf16.msra.mxu0 %v1162_v12 }
  0x50   :  { %1069 = vmatprep.subr.bf16.mxu0 %v1168_v6 }
  0x53   :  { %1070 = vmatpush3.bf16.msra.mxu0 %v1163_v13 }
  0x54   :  { %1071 = vmatprep.subr.bf16.mxu0 %v1168_v6 }
  0x57   :  { %1072 = vmatpush3.bf16.msra.mxu0 %v1164_v14 }
  0x58   :  { %1073 = vmatprep.subr.bf16.mxu0 %v1168_v6 }
  0x5b   :  { %1074 = vmatpush3.bf16.msra.mxu0 %v1165_v15 }
  0x5c   :  { %1075 = vmatprep.subr.bf16.mxu0 %v1168_v6 }
  0x5f   :  { %1076 = vmatpush3.bf16.msra.mxu0 %v1166_v16 }
  0x62   :  { %1078 = vmatmul.mubr.bf16.vlgmr.msra.gmra.mxu0 %v1167_v17 }
  0xe2   :  { %v980_v18 = vpop.f32.mrf.mxu0 }
  0xe4   :  { %v981_v19 = vpop.f32.mrf.mxu0  ;;  %v1002_v20 = vpop.f32.mrf.mxu1 }
  0xe5   :  { %v982_v31 = vadd.f32 %v981_v19, %v980_v18 }
  0xe6   :  { %v983_v21 = vpop.f32.mrf.mxu0  ;;  %v1003_v22 = vpop.f32.mrf.mxu1 }
  0xe7   :  { %v689_v36 = vadd.f32 %v982_v31, %v873_v33  ;;  %v1004_v37 = vadd.f32 %v1003_v22, %v1002_v20 }
  0xe8   :  { %v984_v23 = vpop.f32.mrf.mxu0  ;;  %v1005_v24 = vpop.f32.mrf.mxu1 }
  0xe9   :  { %v985_v32 = vadd.f32 %v984_v23, %v983_v21  ;;  %v730_v43 = vadd.f32 %v1004_v37, %v689_v36 }
  0xea   :  { %v1006_v26 = vpop.f32.mrf.mxu1 }
  0xeb   :  { %v692_v38 = vadd.f32 %v985_v32, %v873_v33  ;;  %v1007_v39 = vadd.f32 %v1006_v26, %v1005_v24 }
  0xed   :  { %v733_v44 = vadd.f32 %v1007_v39, %v692_v38 }
 0x102   :  { %v1024_v25 = vpop.f32.mrf.mxu0 }
 0x104   :  { %v1025_v27 = vpop.f32.mrf.mxu0  ;;  %v1046_v28 = vpop.f32.mrf.mxu1 }
 0x105   :  { %v1026_v40 = vadd.f32 %v1025_v27, %v1024_v25 }
 0x106   :  { %v1027_v29 = vpop.f32.mrf.mxu0  ;;  %v1047_v30 = vpop.f32.mrf.mxu1 }
 0x107   :  { %v771_v45 = vadd.f32 %v1026_v40, %v730_v43  ;;  %v1048_v46 = vadd.f32 %v1047_v30, %v1046_v28 }
 0x108   :  { %v1028_v34 = vpop.f32.mrf.mxu0  ;;  %v1049_v35 = vpop.f32.mrf.mxu1 }
 0x109   :  { %v1029_v41 = vadd.f32 %v1028_v34, %v1027_v29  ;;  %v812_v51 = vadd.f32 %v1048_v46, %v771_v45 }
 0x10a   :  { %v1050_v42 = vpop.f32.mrf.mxu1 }
 0x10b   :  { %v774_v47 = vadd.f32 %v1029_v41, %v733_v44  ;;  %v1051_v48 = vadd.f32 %v1050_v42, %v1049_v35 }
 0x10d   :  { %v815_v52 = vadd.f32 %v1051_v48, %v774_v47 }
 0x122   :  { %v852_v49 = vpop.f32.mrf.mxu0 }
 0x123   :  { %v853_v54 = vadd.f32 %v852_v49, %v812_v51 }
 0x124   :  { %v1079_v50 = vpop.f32.mrf.mxu0 }
 0x126   :  { %v855_v53 = vpop.f32.mrf.mxu0 }
 0x127   :  { %v856_v55 = vadd.f32 %v855_v53, %v815_v52 }
 0x128   :  { %v1080_v56 = vpop.f32.mrf.mxu0 }
 0x129   :  { %v962_v57 = vpack.c.bf16 %v856_v55, %v853_v54 }
 0x12b   :  { %963 = vst [vmem:[%s1442_s3] sm:$0xff] %v962_v57  }

// kernel: alexsnn_forward_at_width.11
= control target key start
LH: loop header
LB: loop body
LE: loop exit
PB: predicated region body
PF: predicated region fallthrough
CT: control target
= control target key end

     0   :  { %s7434_s27 = smov 0   ;;  %s7436_s28 = smov 0   ;;  %s8640_s0 = inlined_call_operand.vmem [shape: bf16[16,128], index: 0, kind: input, shape index: {}]   ;;  %s8641_s1 = inlined_call_operand.vmem [shape: bf16[128,2048], index: 1, kind: input, shape index: {}]   ;;  %s8642_s2 = inlined_call_operand.vmem [shape: f32[1,2048], index: 2, kind: input, shape index: {}]   ;;  %s8643_s3 = inlined_call_operand.vmem [shape: bf16[2048,2048], index: 3, kind: input, shape index: {}]   ;;  %s8644_s4 = inlined_call_operand.vmem [shape: f32[1,2048], index: 4, kind: input, shape index: {}]   ;;  %s8645_s5 = inlined_call_operand.vmem [shape: bf16[2048,128], index: 5, kind: input, shape index: {}]   ;;  %s8646_s6 = inlined_call_operand.vmem [shape: f32[1,128], index: 6, kind: input, shape index: {}]   ;;  %s8647_s7 = inlined_call_operand.vmem [shape: f32[16,128], index: 7, kind: output, shape index: {0}]   ;;  %s8648_s8 = inlined_call_operand.vmem [shape: f32[16,128], index: 8, kind: output, shape index: {1}]  }
   0x1   :  { %s7438_s29 = smov 0  }
   0x2 LB: > { %s7450_s30 = sadd.s32 4294967295, %s7385_s29   ;;  %s7453_s9 = sadd.s32 1, %s7385_s29   ;;  %s7385_s29 = sphi %s7438_s29, %s8651_s29   ;;  %s7381_s28 = sphi %s7436_s28, %s8650_s28   ;;  %s7377_s27 = sphi %s7434_s27, %s8649_s27  }
   0x3   : > { %s44_s10 = ssub.s32 %s7385_s29, %s7453_s9  ;;  %s47_s11 = sadd.s32 1, %s7381_s28 }
   0x4   : > { %p45_p0 = scmp.eq.s32.totalorder %s44_s10, 0  ;;  %p54_p1 = scmp.ne.s32.totalorder %s7381_s28, %s7377_s27 }
   0x5   : > { %p55_p2 = scmp.eq.s32.totalorder %s7385_s29, 0  ;;  %p6286_p4 = scmp.ge.s32.totalorder %s7385_s29, 4 }
   0x6   : > { %s7462_s12 = scalar_select %p45_p0, %s7381_s28, %s47_s11  }
   0x7   : > { %p56_p3 = por %p55_p2, %p54_p1  ;;  %249 = sbr.rel (%p6286_p4) target bundleno = 32 (0x20), region = 32 }
   0xc   : > { %252 = sbr.rel (!%p56_p3) target bundleno = 32 (0x20), region = 36  ;;  %s254_s13 = sand.u32 (%p56_p3), 1, %s7381_s28  }
   0xd   : > { %s6974_s14 = sshll.u32 (%p56_p3), %s7385_s29, 4  ;;  %s6287_s15 = sshll.u32 (%p56_p3), %s254_s13, 8 }
   0xe   : > { %s7470_s18 = scalar_lea.vmem (%p56_p3), %s8641_s1, %s6974_s14  ;;  %s7475_s19 = scalar_lea.vmem (%p56_p3), [#allocation3], %s6287_s15 }
   0xf   : > { %v272_v0 = vld [vmem:[%s7470_s18] sm:$0xff] (%p56_p3)  ;;  %v274_v1 = vld [vmem:[%s7470_s18 + $0x8] sm:$0xff] (%p56_p3) }
  0x10   : > { %v276_v2 = vld [vmem:[%s7470_s18 + $0x40] sm:$0xff] (%p56_p3)  ;;  %273 = vst [vmem:[%s7475_s19] sm:$0xff] (%p56_p3), %v272_v0  ;;  %275 = vst [vmem:[%s7475_s19 + $0x8] sm:$0xff] (%p56_p3), %v274_v1  ;;  %v278_v3 = vld [vmem:[%s7470_s18 + $0x48] sm:$0xff] (%p56_p3) }
  0x11   : > { %277 = vst [vmem:[%s7475_s19 + $0x10] sm:$0xff] %v276_v2  ;;  %v280_v4 = vld [vmem:[%s7470_s18 + $0x80] sm:$0xff]  ;;  %v282_v5 = vld [vmem:[%s7470_s18 + $0x88] sm:$0xff]  ;;  %279 = vst [vmem:[%s7475_s19 + $0x18] sm:$0xff] %v278_v3 }
  0x12   : > { %281 = vst [vmem:[%s7475_s19 + $0x20] sm:$0xff] %v280_v4  ;;  %283 = vst [vmem:[%s7475_s19 + $0x28] sm:$0xff] %v282_v5  ;;  %v284_v6 = vld [vmem:[%s7470_s18 + $0xc0] sm:$0xff]  ;;  %v286_v7 = vld [vmem:[%s7470_s18 + $0xc8] sm:$0xff] }
  0x13   : > { %v288_v8 = vld [vmem:[%s7470_s18 + $0x100] sm:$0xff]  ;;  %285 = vst [vmem:[%s7475_s19 + $0x30] sm:$0xff] %v284_v6  ;;  %287 = vst [vmem:[%s7475_s19 + $0x38] sm:$0xff] %v286_v7  ;;  %v290_v9 = vld [vmem:[%s7470_s18 + $0x108] sm:$0xff] }
  0x14   : > { %289 = vst [vmem:[%s7475_s19 + $0x40] sm:$0xff] %v288_v8  ;;  %v292_v10 = vld [vmem:[%s7470_s18 + $0x140] sm:$0xff]  ;;  %v294_v11 = vld [vmem:[%s7470_s18 + $0x148] sm:$0xff]  ;;  %291 = vst [vmem:[%s7475_s19 + $0x48] sm:$0xff] %v290_v9 }
  0x15   : > { %293 = vst [vmem:[%s7475_s19 + $0x50] sm:$0xff] %v292_v10  ;;  %295 = vst [vmem:[%s7475_s19 + $0x58] sm:$0xff] %v294_v11  ;;  %v296_v12 = vld [vmem:[%s7470_s18 + $0x180] sm:$0xff]  ;;  %v298_v13 = vld [vmem:[%s7470_s18 + $0x188] sm:$0xff] }
  0x16   : > { %v300_v14 = vld [vmem:[%s7470_s18 + $0x1c0] sm:$0xff]  ;;  %297 = vst [vmem:[%s7475_s19 + $0x60] sm:$0xff] %v296_v12  ;;  %299 = vst [vmem:[%s7475_s19 + $0x68] sm:$0xff] %v298_v13  ;;  %v302_v15 = vld [vmem:[%s7470_s18 + $0x1c8] sm:$0xff] }
  0x17   : > { %301 = vst [vmem:[%s7475_s19 + $0x70] sm:$0xff] %v300_v14  ;;  %v304_v16 = vld [vmem:[%s7470_s18 + $0x200] sm:$0xff]  ;;  %v306_v17 = vld [vmem:[%s7470_s18 + $0x208] sm:$0xff]  ;;  %303 = vst [vmem:[%s7475_s19 + $0x78] sm:$0xff] %v302_v15 }
  0x18   : > { %305 = vst [vmem:[%s7475_s19 + $0x80] sm:$0xff] %v304_v16  ;;  %307 = vst [vmem:[%s7475_s19 + $0x88] sm:$0xff] %v306_v17  ;;  %v308_v18 = vld [vmem:[%s7470_s18 + $0x240] sm:$0xff]  ;;  %v310_v19 = vld [vmem:[%s7470_s18 + $0x248] sm:$0xff] }
  0x19   : > { %v312_v20 = vld [vmem:[%s7470_s18 + $0x280] sm:$0xff]  ;;  %309 = vst [vmem:[%s7475_s19 + $0x90] sm:$0xff] %v308_v18  ;;  %311 = vst [vmem:[%s7475_s19 + $0x98] sm:$0xff] %v310_v19  ;;  %v314_v21 = vld [vmem:[%s7470_s18 + $0x288] sm:$0xff] }
  0x1a   : > { %313 = vst [vmem:[%s7475_s19 + $0xa0] sm:$0xff] %v312_v20  ;;  %v316_v22 = vld [vmem:[%s7470_s18 + $0x2c0] sm:$0xff]  ;;  %v318_v23 = vld [vmem:[%s7470_s18 + $0x2c8] sm:$0xff]  ;;  %315 = vst [vmem:[%s7475_s19 + $0xa8] sm:$0xff] %v314_v21 }
  0x1b   : > { %317 = vst [vmem:[%s7475_s19 + $0xb0] sm:$0xff] %v316_v22  ;;  %319 = vst [vmem:[%s7475_s19 + $0xb8] sm:$0xff] %v318_v23  ;;  %v320_v24 = vld [vmem:[%s7470_s18 + $0x300] sm:$0xff]  ;;  %v322_v25 = vld [vmem:[%s7470_s18 + $0x308] sm:$0xff] }
  0x1c   : > { %v324_v26 = vld [vmem:[%s7470_s18 + $0x340] sm:$0xff]  ;;  %321 = vst [vmem:[%s7475_s19 + $0xc0] sm:$0xff] %v320_v24  ;;  %323 = vst [vmem:[%s7475_s19 + $0xc8] sm:$0xff] %v322_v25  ;;  %v326_v27 = vld [vmem:[%s7470_s18 + $0x348] sm:$0xff] }
  0x1d   : > { %325 = vst [vmem:[%s7475_s19 + $0xd0] sm:$0xff] %v324_v26  ;;  %v328_v28 = vld [vmem:[%s7470_s18 + $0x380] sm:$0xff]  ;;  %v330_v29 = vld [vmem:[%s7470_s18 + $0x388] sm:$0xff]  ;;  %327 = vst [vmem:[%s7475_s19 + $0xd8] sm:$0xff] %v326_v27 }
  0x1e   : > { %329 = vst [vmem:[%s7475_s19 + $0xe0] sm:$0xff] %v328_v28  ;;  %331 = vst [vmem:[%s7475_s19 + $0xe8] sm:$0xff] %v330_v29  ;;  %v332_v30 = vld [vmem:[%s7470_s18 + $0x3c0] sm:$0xff]  ;;  %v334_v31 = vld [vmem:[%s7470_s18 + $0x3c8] sm:$0xff] }
  0x1f   : > { %333 = vst [vmem:[%s7475_s19 + $0xf0] sm:$0xff] %v332_v30  ;;  %335 = vst [vmem:[%s7475_s19 + $0xf8] sm:$0xff] %v334_v31 }
  0x20 PF: > { %p6290_p5 = scmp.ge.s32.totalorder %s7385_s29, 1  ;;  %p358_p6 = scmp.lt.s32.totalorder %s7385_s29, 5 }
  0x22   : > { %p359_p7 = pnand %p6290_p5, %p358_p6 }
  0x23   : > { %s365_s20 = sand.u32 (!%p359_p7), 1, %s7377_s27   ;;  %s6292_s21 = sshll.u32 (!%p359_p7), %s7450_s30, 2 }
  0x24   : > { %362 = sbr.rel (%p359_p7) target bundleno = 2171 (0x87b), region = 67  ;;  %s6291_s22 = sshll.u32 (!%p359_p7), %s365_s20, 8 }
  0x25   : > { %p405_p8 = scmp.lt.s32.totalorder (!%p359_p7), %s6292_s21, 15  ;;  %s6293_s23 = sshll.u32 (!%p359_p7), %s7450_s30, 6 }
  0x26   : > { %p410_p9 = scmp.lt.s32.totalorder (!%p359_p7), %s6293_s23, 255  ;;  %s7554_s27 = scalar_lea.vmem (!%p359_p7), [#allocation3], %s6291_s22 }
  0x27   : > { %p6296_p10 = scmp.ne.s32.totalorder (!%p359_p7), %s7450_s30, 0 }
  0x29   : > { %s8653_s21 = smov (!%p405_p8, %s6292_s21), 15  ;;  %s8655_s23 = smov (!%p410_p9, %s6293_s23), 255 }
  0x2a   : > { %s407_s26 = scalar_lea.vmem %s8642_s2, %s8653_s21  ;;  %s6975_s29 = sshll.u32 %s8655_s23, 6 }
  0x2b   : > { %s7552_s13 = scalar_lea.vmem %s8643_s3, %s6975_s29  ;;  %420 = sbr.rel (%p6296_p10) target bundleno = 65 (0x41), region = 75 }
  0x30   : > { %v7387_v32 = vmov 0.0  }
  0x31   : > { %421 = vst [vmem:[#allocation2 + $0xb0] sm:$0xff] %v7387_v32  ;;  %422 = vst [vmem:[#allocation2] sm:$0xff] %v7387_v32 }
  0x32   : > { %423 = vst [vmem:[#allocation2 + $0xd8] sm:$0xff] %v7387_v32  ;;  %424 = vst [vmem:[#allocation2 + $0x18] sm:$0xff] %v7387_v32 }
  0x33   : > { %425 = vst [vmem:[#allocation2 + $0x50] sm:$0xff] %v7387_v32  ;;  %426 = vst [vmem:[#allocation2 + $0x68] sm:$0xff] %v7387_v32 }
  0x34   : > { %427 = vst [vmem:[#allocation2 + $0x30] sm:$0xff] %v7387_v32  ;;  %428 = vst [vmem:[#allocation2 + $0x48] sm:$0xff] %v7387_v32 }
  0x35   : > { %429 = vst [vmem:[#allocation2 + $0x80] sm:$0xff] %v7387_v32  ;;  %430 = vst [vmem:[#allocation2 + $0x88] sm:$0xff] %v7387_v32 }
  0x36   : > { %431 = vst [vmem:[#allocation2 + $0xe8] sm:$0xff] %v7387_v32  ;;  %432 = vst [vmem:[#allocation2 + $0xb8] sm:$0xff] %v7387_v32 }
  0x37   : > { %433 = vst [vmem:[#allocation2 + $0x60] sm:$0xff] %v7387_v32  ;;  %434 = vst [vmem:[#allocation2 + $0xf0] sm:$0xff] %v7387_v32 }
  0x38   : > { %435 = vst [vmem:[#allocation2 + $0x8] sm:$0xff] %v7387_v32  ;;  %436 = vst [vmem:[#allocation2 + $0x78] sm:$0xff] %v7387_v32 }
  0x39   : > { %437 = vst [vmem:[#allocation2 + $0x38] sm:$0xff] %v7387_v32  ;;  %438 = vst [vmem:[#allocation2 + $0x58] sm:$0xff] %v7387_v32 }
  0x3a   : > { %439 = vst [vmem:[#allocation2 + $0x40] sm:$0xff] %v7387_v32  ;;  %440 = vst [vmem:[#allocation2 + $0xc8] sm:$0xff] %v7387_v32 }
  0x3b   : > { %441 = vst [vmem:[#allocation2 + $0xe0] sm:$0xff] %v7387_v32  ;;  %442 = vst [vmem:[#allocation2 + $0x90] sm:$0xff] %v7387_v32 }
  0x3c   : > { %443 = vst [vmem:[#allocation2 + $0x70] sm:$0xff] %v7387_v32  ;;  %444 = vst [vmem:[#allocation2 + $0xc0] sm:$0xff] %v7387_v32 }
  0x3d   : > { %445 = vst [vmem:[#allocation2 + $0xa8] sm:$0xff] %v7387_v32  ;;  %446 = vst [vmem:[#allocation2 + $0xd0] sm:$0xff] %v7387_v32 }
  0x3e   : > { %447 = vst [vmem:[#allocation2 + $0x10] sm:$0xff] %v7387_v32  ;;  %448 = vst [vmem:[#allocation2 + $0x28] sm:$0xff] %v7387_v32 }
  0x3f   : > { %449 = vst [vmem:[#allocation2 + $0xa0] sm:$0xff] %v7387_v32  ;;  %450 = vst [vmem:[#allocation2 + $0xf8] sm:$0xff] %v7387_v32 }
  0x40   : > { %451 = vst [vmem:[#allocation2 + $0x20] sm:$0xff] %v7387_v32  ;;  %452 = vst [vmem:[#allocation2 + $0x98] sm:$0xff] %v7387_v32 }
  0x41 PF: > { %v7178_v33 = vld [vmem:[%s7554_s27 + $0xe4] ss:$16 sps:$4 sm:$0xff]   ;;  %v7180_v34 = vld [vmem:[%s7554_s27 + $0xec] ss:$16 sps:$4 sm:$0xff]   ;;  %v7388_v35 = vmov 0   ;;  %p6842_p11 = scmp.ne.s32.totalorder %s7450_s30, 3 }
  0x42   : > { %707 = vmatprep.mubr.bf16.mxu0 %v7388_v35  ;;  %750 = vmatprep.mubr.bf16.mxu1 %v7388_v35  ;;  %v7182_v36 = vld [vmem:[%s7554_s27 + $0xe0] ss:$16 sps:$4 sm:$0xff]   ;;  %v7183_v37 = vld [vmem:[%s7554_s27 + $0xe8] ss:$16 sps:$4 sm:$0xff]   ;;  %v7184_v38 = vld [vmem:[%s7554_s27 + $0xc4] ss:$16 sps:$4 sm:$0xff]  }
  0x43   : > { %675 = vmatprep.subr.bf16.mxu0 %v7178_v33  ;;  %718 = vmatprep.subr.bf16.mxu1 %v7180_v34  ;;  %v7186_v39 = vld [vmem:[%s7554_s27 + $0xcc] ss:$16 sps:$4 sm:$0xff]   ;;  %v7188_v40 = vld [vmem:[%s7554_s27 + $0xc0] ss:$16 sps:$4 sm:$0xff]   ;;  %v7189_v41 = vld [vmem:[%s7554_s27 + $0xc8] ss:$16 sps:$4 sm:$0xff]  }
  0x44   : > { %676 = vmatpush1.bf16.msra.mxu0 %v7182_v36  ;;  %719 = vmatpush1.bf16.msra.mxu1 %v7183_v37  ;;  %v7190_v42 = vld [vmem:[%s7554_s27 + $0xa4] ss:$16 sps:$4 sm:$0xff]   ;;  %v7192_v43 = vld [vmem:[%s7554_s27 + $0xac] ss:$16 sps:$4 sm:$0xff]   ;;  %v7194_v44 = vld [vmem:[%s7554_s27 + $0xa0] ss:$16 sps:$4 sm:$0xff]  }
  0x45   : > { %677 = vmatprep.subr.bf16.mxu0 %v7184_v38  ;;  %720 = vmatprep.subr.bf16.mxu1 %v7186_v39  ;;  %v7195_v45 = vld [vmem:[%s7554_s27 + $0xa8] ss:$16 sps:$4 sm:$0xff]   ;;  %v7196_v46 = vld [vmem:[%s7554_s27 + $0x84] ss:$16 sps:$4 sm:$0xff]   ;;  %v7198_v47 = vld [vmem:[%s7554_s27 + $0x8c] ss:$16 sps:$4 sm:$0xff]  }
  0x46   : > { %v7200_v48 = vld [vmem:[%s7554_s27 + $0x80] ss:$16 sps:$4 sm:$0xff]   ;;  %v7201_v49 = vld [vmem:[%s7554_s27 + $0x88] ss:$16 sps:$4 sm:$0xff]   ;;  %v7202_v50 = vld [vmem:[%s7554_s27 + $0x64] ss:$16 sps:$4 sm:$0xff]  }
  0x47   : > { %v7204_v51 = vld [vmem:[%s7554_s27 + $0x6c] ss:$16 sps:$4 sm:$0xff]   ;;  %v7206_v52 = vld [vmem:[%s7554_s27 + $0x60] ss:$16 sps:$4 sm:$0xff]   ;;  %v7207_v53 = vld [vmem:[%s7554_s27 + $0x68] ss:$16 sps:$4 sm:$0xff]  }
  0x48   : > { %678 = vmatpush1.bf16.msra.mxu0 %v7188_v40  ;;  %721 = vmatpush1.bf16.msra.mxu1 %v7189_v41  ;;  %v7208_v54 = vld [vmem:[%s7554_s27 + $0x44] ss:$16 sps:$4 sm:$0xff]   ;;  %v7210_v55 = vld [vmem:[%s7554_s27 + $0x4c] ss:$16 sps:$4 sm:$0xff]   ;;  %v7212_v56 = vld [vmem:[%s7554_s27 + $0x40] ss:$16 sps:$4 sm:$0xff]  }
  0x49   : > { %679 = vmatprep.subr.bf16.mxu0 %v7190_v42  ;;  %722 = vmatprep.subr.bf16.mxu1 %v7192_v43  ;;  %v7213_v57 = vld [vmem:[%s7554_s27 + $0x48] ss:$16 sps:$4 sm:$0xff]   ;;  %v7214_v58 = vld [vmem:[%s7554_s27 + $0x24] ss:$16 sps:$4 sm:$0xff]   ;;  %v7216_v59 = vld [vmem:[%s7554_s27 + $0x2c] ss:$16 sps:$4 sm:$0xff]  }
  0x4a   : > { %v7218_v60 = vld [vmem:[%s7554_s27 + $0x20] ss:$16 sps:$4 sm:$0xff]   ;;  %v7219_v61 = vld [vmem:[%s7554_s27 + $0x28] ss:$16 sps:$4 sm:$0xff]   ;;  %v7220_v62 = vld [vmem:[%s7554_s27 + $0x4] ss:$16 sps:$4 sm:$0xff]  }
  0x4b   : > { %v7222_v63 = vld [vmem:[%s7554_s27 + $0xc] ss:$16 sps:$4 sm:$0xff]   ;;  %v909_v0 = vld [vmem:[%s7552_s13 + $0x380] sm:$0xff]  ;;  %v7225_v5 = vld [vmem:[%s7554_s27 + $0x8] ss:$16 sps:$4 sm:$0xff]  }
  0x4c   : > { %680 = vmatpush1.bf16.msra.mxu0 %v7194_v44  ;;  %723 = vmatpush1.bf16.msra.mxu1 %v7195_v45  ;;  %v917_v1 = vld [vmem:[%s7552_s13 + $0x3c0] sm:$0xff] }
  0x4d   : > { %681 = vmatprep.subr.bf16.mxu0 %v7196_v46  ;;  %724 = vmatprep.subr.bf16.mxu1 %v7198_v47  ;;  %v1165_v2 = vld [vmem:[%s7552_s13 + $0xb80] sm:$0xff]  ;;  %v6443_v6 = vcombine.high %v909_v0, %v917_v1  ;;  %v6442_v13 = vcombine.low %v909_v0, %v917_v1 }
  0x4e   : > { %v1173_v3 = vld [vmem:[%s7552_s13 + $0xbc0] sm:$0xff] }
  0x4f   : > { %v7224_v4 = vld [vmem:[%s7554_s27] ss:$16 sps:$4 sm:$0xff]   ;;  %v6699_v7 = vcombine.high %v1165_v2, %v1173_v3  ;;  %v6698_v14 = vcombine.low %v1165_v2, %v1173_v3 }
  0x50   : > { %682 = vmatpush1.bf16.msra.mxu0 %v7200_v48  ;;  %725 = vmatpush1.bf16.msra.mxu1 %v7201_v49  ;;  %v893_v8 = vld [vmem:[%s7552_s13 + $0x300] sm:$0xff] }
  0x51   : > { %683 = vmatprep.subr.bf16.mxu0 %v7202_v50  ;;  %726 = vmatprep.subr.bf16.mxu1 %v7204_v51  ;;  %v901_v9 = vld [vmem:[%s7552_s13 + $0x340] sm:$0xff] }
  0x52   : > { %v1149_v10 = vld [vmem:[%s7552_s13 + $0xb00] sm:$0xff]  ;;  %v6427_v15 = vcombine.high %v893_v8, %v901_v9  ;;  %v6426_v21 = vcombine.low %v893_v8, %v901_v9 }
  0x53   : > { %v1157_v11 = vld [vmem:[%s7552_s13 + $0xb40] sm:$0xff] }
  0x54   : > { %684 = vmatpush1.bf16.msra.mxu0 %v7206_v52  ;;  %727 = vmatpush1.bf16.msra.mxu1 %v7207_v53  ;;  %v7226_v12 = vld [vmem:[%s8640_s0] sm:$0xff]   ;;  %v6683_v16 = vcombine.high %v1149_v10, %v1157_v11  ;;  %v6682_v22 = vcombine.low %v1149_v10, %v1157_v11 }
  0x55   : > { %685 = vmatprep.subr.bf16.mxu0 %v7208_v54  ;;  %728 = vmatprep.subr.bf16.mxu1 %v7210_v55  ;;  %v877_v17 = vld [vmem:[%s7552_s13 + $0x280] sm:$0xff] }
  0x56   : > { %v885_v18 = vld [vmem:[%s7552_s13 + $0x2c0] sm:$0xff] }
  0x57   : > { %v1133_v19 = vld [vmem:[%s7552_s13 + $0xa80] sm:$0xff]  ;;  %v6411_v23 = vcombine.high %v877_v17, %v885_v18  ;;  %v6410_v29 = vcombine.low %v877_v17, %v885_v18 }
  0x58   : > { %686 = vmatpush1.bf16.msra.mxu0 %v7212_v56  ;;  %729 = vmatpush1.bf16.msra.mxu1 %v7213_v57  ;;  %v1141_v20 = vld [vmem:[%s7552_s13 + $0xac0] sm:$0xff] }
  0x59   : > { %687 = vmatprep.subr.bf16.mxu0 %v7214_v58  ;;  %730 = vmatprep.subr.bf16.mxu1 %v7216_v59  ;;  %v6667_v24 = vcombine.high %v1133_v19, %v1141_v20  ;;  %v861_v25 = vld [vmem:[%s7552_s13 + $0x200] sm:$0xff]  ;;  %v6666_v30 = vcombine.low %v1133_v19, %v1141_v20 }
  0x5a   : > { %v869_v26 = vld [vmem:[%s7552_s13 + $0x240] sm:$0xff] }
  0x5b   : > { %v1117_v27 = vld [vmem:[%s7552_s13 + $0xa00] sm:$0xff]  ;;  %v6395_v31 = vcombine.high %v861_v25, %v869_v26  ;;  %v6394_v37 = vcombine.low %v861_v25, %v869_v26 }
  0x5c   : > { %688 = vmatpush1.bf16.msra.mxu0 %v7218_v60  ;;  %731 = vmatpush1.bf16.msra.mxu1 %v7219_v61  ;;  %v1125_v28 = vld [vmem:[%s7552_s13 + $0xa40] sm:$0xff] }
  0x5d   : > { %689 = vmatprep.subr.bf16.mxu0 %v7220_v62  ;;  %732 = vmatprep.subr.bf16.mxu1 %v7222_v63  ;;  %v6651_v32 = vcombine.high %v1117_v27, %v1125_v28  ;;  %v845_v33 = vld [vmem:[%s7552_s13 + $0x180] sm:$0xff]  ;;  %v6650_v38 = vcombine.low %v1117_v27, %v1125_v28 }
  0x5e   : > { %v853_v34 = vld [vmem:[%s7552_s13 + $0x1c0] sm:$0xff] }
  0x5f   : > { %v1101_v35 = vld [vmem:[%s7552_s13 + $0x980] sm:$0xff]  ;;  %v6379_v39 = vcombine.high %v845_v33, %v853_v34  ;;  %v6378_v45 = vcombine.low %v845_v33, %v853_v34 }
  0x60   : > { %690 = vmatpush1.bf16.msra.mxu0 %v7224_v4  ;;  %733 = vmatpush1.bf16.msra.mxu1 %v7225_v5  ;;  %v1109_v36 = vld [vmem:[%s7552_s13 + $0x9c0] sm:$0xff] }
  0x61   : > { %3869 = vmatprep.subr.bf16.mxu0 %v6443_v6  ;;  %3912 = vmatprep.subr.bf16.mxu1 %v6699_v7  ;;  %v6635_v40 = vcombine.high %v1101_v35, %v1109_v36  ;;  %v829_v41 = vld [vmem:[%s7552_s13 + $0x100] sm:$0xff]  ;;  %v6634_v46 = vcombine.low %v1101_v35, %v1109_v36 }
  0x62   : > { %v837_v42 = vld [vmem:[%s7552_s13 + $0x140] sm:$0xff] }
  0x63   : > { %708 = vmatmul.mubr.bf16.vlgmr.msra.gmra.mxu0 %v7226_v12  ;;  %751 = vmatmul.mubr.bf16.vlgmr.msra.gmra.mxu1 %v7226_v12  ;;  %v1085_v43 = vld [vmem:[%s7552_s13 + $0x900] sm:$0xff]  ;;  %v6363_v47 = vcombine.high %v829_v41, %v837_v42  ;;  %v6362_v53 = vcombine.low %v829_v41, %v837_v42 }
  0x64   : > { %3870 = vmatpush1.bf16.msra.mxu0 %v6442_v13  ;;  %3913 = vmatpush1.bf16.msra.mxu1 %v6698_v14  ;;  %v1093_v44 = vld [vmem:[%s7552_s13 + $0x940] sm:$0xff] }
  0x65   : > { %3871 = vmatprep.subr.bf16.mxu0 %v6427_v15  ;;  %3914 = vmatprep.subr.bf16.mxu1 %v6683_v16  ;;  %v6619_v48 = vcombine.high %v1085_v43, %v1093_v44  ;;  %v813_v49 = vld [vmem:[%s7552_s13 + $0x80] sm:$0xff]  ;;  %v6618_v54 = vcombine.low %v1085_v43, %v1093_v44 }
  0x66   : > { %v821_v50 = vld [vmem:[%s7552_s13 + $0xc0] sm:$0xff] }
  0x67   : > { %v1069_v51 = vld [vmem:[%s7552_s13 + $0x880] sm:$0xff]  ;;  %v6347_v55 = vcombine.high %v813_v49, %v821_v50  ;;  %v6346_v61 = vcombine.low %v813_v49, %v821_v50 }
  0x68   : > { %3872 = vmatpush1.bf16.msra.mxu0 %v6426_v21  ;;  %3915 = vmatpush1.bf16.msra.mxu1 %v6682_v22  ;;  %v1077_v52 = vld [vmem:[%s7552_s13 + $0x8c0] sm:$0xff] }
  0x69   : > { %3873 = vmatprep.subr.bf16.mxu0 %v6411_v23  ;;  %3916 = vmatprep.subr.bf16.mxu1 %v6667_v24  ;;  %v6603_v56 = vcombine.high %v1069_v51, %v1077_v52  ;;  %v797_v57 = vld [vmem:[%s7552_s13] sm:$0xff]  ;;  %v6602_v62 = vcombine.low %v1069_v51, %v1077_v52 }
  0x6a   : > { %v805_v58 = vld [vmem:[%s7552_s13 + $0x40] sm:$0xff] }
  0x6b   : > { %v1053_v59 = vld [vmem:[%s7552_s13 + $0x800] sm:$0xff]  ;;  %v6331_v63 = vcombine.high %v797_v57, %v805_v58  ;;  %v6330_v5 = vcombine.low %v797_v57, %v805_v58 }
  0x6c   : > { %3874 = vmatpush1.bf16.msra.mxu0 %v6410_v29  ;;  %3917 = vmatpush1.bf16.msra.mxu1 %v6666_v30  ;;  %v1061_v60 = vld [vmem:[%s7552_s13 + $0x840] sm:$0xff] }
  0x6d   : > { %3875 = vmatprep.subr.bf16.mxu0 %v6395_v31  ;;  %3918 = vmatprep.subr.bf16.mxu1 %v6651_v32  ;;  %v6587_v0 = vcombine.high %v1053_v59, %v1061_v60  ;;  %v1037_v1 = vld [vmem:[%s7552_s13 + $0x780] sm:$0xff]  ;;  %v6586_v6 = vcombine.low %v1053_v59, %v1061_v60 }
  0x6e   : > { %v1045_v2 = vld [vmem:[%s7552_s13 + $0x7c0] sm:$0xff] }
  0x6f   : > { %v1293_v3 = vld [vmem:[%s7552_s13 + $0xf80] sm:$0xff]  ;;  %v6571_v7 = vcombine.high %v1037_v1, %v1045_v2  ;;  %v6570_v13 = vcombine.low %v1037_v1, %v1045_v2 }
  0x70   : > { %3876 = vmatpush1.bf16.msra.mxu0 %v6394_v37  ;;  %3919 = vmatpush1.bf16.msra.mxu1 %v6650_v38  ;;  %v1301_v4 = vld [vmem:[%s7552_s13 + $0xfc0] sm:$0xff] }
  0x71   : > { %3877 = vmatprep.subr.bf16.mxu0 %v6379_v39  ;;  %3920 = vmatprep.subr.bf16.mxu1 %v6635_v40  ;;  %v6827_v8 = vcombine.high %v1293_v3, %v1301_v4  ;;  %v1021_v9 = vld [vmem:[%s7552_s13 + $0x700] sm:$0xff]  ;;  %v6826_v14 = vcombine.low %v1293_v3, %v1301_v4  ;;  %v910_v3 = vld [vmem:[%s7552_s13 + $0x388] sm:$0xff] }
  0x72   : > { %v1029_v10 = vld [vmem:[%s7552_s13 + $0x740] sm:$0xff]  ;;  %v918_v4 = vld [vmem:[%s7552_s13 + $0x3c8] sm:$0xff] }
  0x73   : > { %v1277_v11 = vld [vmem:[%s7552_s13 + $0xf00] sm:$0xff]  ;;  %v6555_v15 = vcombine.high %v1021_v9, %v1029_v10  ;;  %v6554_v21 = vcombine.low %v1021_v9, %v1029_v10 }
  0x74   : > { %3878 = vmatpush1.bf16.msra.mxu0 %v6378_v45  ;;  %3921 = vmatpush1.bf16.msra.mxu1 %v6634_v46  ;;  %v1285_v12 = vld [vmem:[%s7552_s13 + $0xf40] sm:$0xff] }
  0x75   : > { %3879 = vmatprep.subr.bf16.mxu0 %v6363_v47  ;;  %3922 = vmatprep.subr.bf16.mxu1 %v6619_v48  ;;  %v6811_v16 = vcombine.high %v1277_v11, %v1285_v12  ;;  %v1005_v17 = vld [vmem:[%s7552_s13 + $0x680] sm:$0xff]  ;;  %v6810_v22 = vcombine.low %v1277_v11, %v1285_v12  ;;  %v489_v11 = vlaneseq }
  0x76   : > { %v1013_v18 = vld [vmem:[%s7552_s13 + $0x6c0] sm:$0xff] }
  0x77   : > { %v1261_v19 = vld [vmem:[%s7552_s13 + $0xe80] sm:$0xff]  ;;  %v6539_v23 = vcombine.high %v1005_v17, %v1013_v18  ;;  %v6538_v29 = vcombine.low %v1005_v17, %v1013_v18  ;;  %v7661_v12 = vshrl.u32 %v489_v11, 7 }
  0x78   : > { %3880 = vmatpush1.bf16.msra.mxu0 %v6362_v53  ;;  %3923 = vmatpush1.bf16.msra.mxu1 %v6618_v54  ;;  %v1269_v20 = vld [vmem:[%s7552_s13 + $0xec0] sm:$0xff] }
  0x79   : > { %3881 = vmatprep.subr.bf16.mxu0 %v6347_v55  ;;  %3924 = vmatprep.subr.bf16.mxu1 %v6603_v56  ;;  %v6795_v24 = vcombine.high %v1261_v19, %v1269_v20  ;;  %v989_v25 = vld [vmem:[%s7552_s13 + $0x600] sm:$0xff]  ;;  %v6794_v30 = vcombine.low %v1261_v19, %v1269_v20  ;;  %v7673_v17 = vsub.s32 2, %v7661_v12 }
  0x7a   : > { %v997_v26 = vld [vmem:[%s7552_s13 + $0x640] sm:$0xff] }
  0x7b   : > { %v1245_v27 = vld [vmem:[%s7552_s13 + $0xe00] sm:$0xff]  ;;  %v6523_v31 = vcombine.high %v989_v25, %v997_v26  ;;  %v6522_v37 = vcombine.low %v989_v25, %v997_v26 }
  0x7c   : > { %3882 = vmatpush1.bf16.msra.mxu0 %v6346_v61  ;;  %3925 = vmatpush1.bf16.msra.mxu1 %v6602_v62  ;;  %v1253_v28 = vld [vmem:[%s7552_s13 + $0xe40] sm:$0xff] }
  0x7d   : > { %3883 = vmatprep.subr.bf16.mxu0 %v6331_v63  ;;  %3926 = vmatprep.subr.bf16.mxu1 %v6587_v0  ;;  %v6779_v32 = vcombine.high %v1245_v27, %v1253_v28  ;;  %v973_v33 = vld [vmem:[%s7552_s13 + $0x580] sm:$0xff]  ;;  %v6778_v38 = vcombine.low %v1245_v27, %v1253_v28 }
  0x7e   : > { %v981_v34 = vld [vmem:[%s7552_s13 + $0x5c0] sm:$0xff] }
  0x7f   : > { %v1229_v35 = vld [vmem:[%s7552_s13 + $0xd80] sm:$0xff]  ;;  %v6507_v39 = vcombine.high %v973_v33, %v981_v34  ;;  %v6506_v45 = vcombine.low %v973_v33, %v981_v34 }
  0x80   : > { %3884 = vmatpush1.bf16.msra.mxu0 %v6330_v5  ;;  %3927 = vmatpush1.bf16.msra.mxu1 %v6586_v6  ;;  %v1237_v36 = vld [vmem:[%s7552_s13 + $0xdc0] sm:$0xff]  ;;  %v1166_v5 = vld [vmem:[%s7552_s13 + $0xb88] sm:$0xff]  ;;  %v6445_v6 = vcombine.high %v910_v3, %v918_v4 }
  0x81   : > { %3885 = vmatprep.subr.bf16.mxu0 %v6571_v7  ;;  %3928 = vmatprep.subr.bf16.mxu1 %v6827_v8  ;;  %v6763_v40 = vcombine.high %v1229_v35, %v1237_v36  ;;  %v957_v41 = vld [vmem:[%s7552_s13 + $0x500] sm:$0xff]  ;;  %v6762_v46 = vcombine.low %v1229_v35, %v1237_v36  ;;  %v1174_v7 = vld [vmem:[%s7552_s13 + $0xbc8] sm:$0xff]  ;;  %v6444_v8 = vcombine.low %v910_v3, %v918_v4 }
  0x82   : > { %v965_v42 = vld [vmem:[%s7552_s13 + $0x540] sm:$0xff]  ;;  %v6700_v9 = vcombine.low %v1166_v5, %v1174_v7  ;;  %v6701_v10 = vcombine.high %v1166_v5, %v1174_v7  ;;  %v894_v36 = vld [vmem:[%s7552_s13 + $0x308] sm:$0xff] }
  0x83   : > { %v1213_v43 = vld [vmem:[%s7552_s13 + $0xd00] sm:$0xff]  ;;  %v6491_v47 = vcombine.high %v957_v41, %v965_v42  ;;  %v6490_v49 = vcombine.low %v957_v41, %v965_v42  ;;  %v1158_v41 = vld [vmem:[%s7552_s13 + $0xb48] sm:$0xff] }
  0x84   : > { %3886 = vmatpush2.bf16.msra.mxu0 %v6570_v13  ;;  %3929 = vmatpush2.bf16.msra.mxu1 %v6826_v14  ;;  %v1221_v44 = vld [vmem:[%s7552_s13 + $0xd40] sm:$0xff]  ;;  %v7664_v13 = vsub.s32 1, %v7661_v12  ;;  %v7667_v14 = vsub.s32 3, %v7661_v12  ;;  %v1110_v3 = vld [vmem:[%s7552_s13 + $0x9c8] sm:$0xff] }
  0x85   : > { %3887 = vmatprep.subr.bf16.mxu0 %v6555_v15  ;;  %3930 = vmatprep.subr.bf16.mxu1 %v6811_v16  ;;  %v6747_v48 = vcombine.high %v1213_v43, %v1221_v44  ;;  %v6746_v50 = vcombine.low %v1213_v43, %v1221_v44  ;;  %v941_v51 = vld [vmem:[%s7552_s13 + $0x480] sm:$0xff]  ;;  %v7670_v15 = vsub.s32 0, %v7661_v12 }
  0x86   : > { %v949_v52 = vld [vmem:[%s7552_s13 + $0x4c0] sm:$0xff] }
  0x87   : > { %v1197_v53 = vld [vmem:[%s7552_s13 + $0xc80] sm:$0xff]  ;;  %v6475_v54 = vcombine.high %v941_v51, %v949_v52  ;;  %v6474_v56 = vcombine.low %v941_v51, %v949_v52  ;;  %v1142_v51 = vld [vmem:[%s7552_s13 + $0xac8] sm:$0xff] }
  0x88   : > { %3888 = vmatpush2.bf16.msra.mxu0 %v6554_v21  ;;  %3931 = vmatpush2.bf16.msra.mxu1 %v6810_v22  ;;  %v1205_v55 = vld [vmem:[%s7552_s13 + $0xcc0] sm:$0xff] }
  0x89   : > { %3889 = vmatprep.subr.bf16.mxu0 %v6539_v23  ;;  %3932 = vmatprep.subr.bf16.mxu1 %v6795_v24  ;;  %v6730_v57 = vcombine.low %v1197_v53, %v1205_v55  ;;  %v6731_v58 = vcombine.high %v1197_v53, %v1205_v55  ;;  %v925_v59 = vld [vmem:[%s7552_s13 + $0x400] sm:$0xff] }
  0x8a   : > { %v933_v60 = vld [vmem:[%s7552_s13 + $0x440] sm:$0xff] }
  0x8b   : > { %v1181_v61 = vld [vmem:[%s7552_s13 + $0xc00] sm:$0xff]  ;;  %v6459_v62 = vcombine.high %v925_v59, %v933_v60  ;;  %v6458_v0 = vcombine.low %v925_v59, %v933_v60  ;;  %v1126_v59 = vld [vmem:[%s7552_s13 + $0xa48] sm:$0xff] }
  0x8c   : > { %3890 = vmatpush2.bf16.msra.mxu0 %v6538_v29  ;;  %3933 = vmatpush2.bf16.msra.mxu1 %v6794_v30  ;;  %v1189_v63 = vld [vmem:[%s7552_s13 + $0xc40] sm:$0xff] }
  0x8d   : > { %3891 = vmatprep.subr.bf16.mxu0 %v6523_v31  ;;  %3934 = vmatprep.subr.bf16.mxu1 %v6779_v32  ;;  %v6714_v1 = vcombine.low %v1181_v61, %v1189_v63  ;;  %v6715_v2 = vcombine.high %v1181_v61, %v1189_v63  ;;  %v487_v19 = vld [vmem:[%s407_s26] sm:$0xf] }
  0x8e   : > { %v496_v22 = vrot.slane %v487_v19, %v7664_v13  ;;  %v504_v23 = vrot.slane %v487_v19, %v7667_v14  ;;  %v492_v24 = vrot.slane %v487_v19, %v7670_v15  ;;  %v500_v25 = vrot.slane %v487_v19, %v7673_v17 }
  0x90   : > { %3892 = vmatpush2.bf16.msra.mxu0 %v6522_v37  ;;  %3935 = vmatpush2.bf16.msra.mxu1 %v6778_v38 }
  0x91   : > { %3893 = vmatprep.subr.bf16.mxu0 %v6507_v39  ;;  %3936 = vmatprep.subr.bf16.mxu1 %v6763_v40  ;;  %v902_v39 = vld [vmem:[%s7552_s13 + $0x348] sm:$0xff] }
  0x92   : > { %v1150_v40 = vld [vmem:[%s7552_s13 + $0xb08] sm:$0xff]  ;;  %v6428_v52 = vcombine.low %v894_v36, %v902_v39 }
  0x93   : > { %v6684_v53 = vcombine.low %v1150_v40, %v1158_v41 }
  0x94   : > { %3894 = vmatpush2.bf16.msra.mxu0 %v6506_v45  ;;  %3937 = vmatpush2.bf16.msra.mxu1 %v6762_v46  ;;  %v878_v46 = vld [vmem:[%s7552_s13 + $0x288] sm:$0xff] }
  0x95   : > { %3895 = vmatprep.subr.bf16.mxu0 %v6491_v47  ;;  %3938 = vmatprep.subr.bf16.mxu1 %v6747_v48  ;;  %v6429_v47 = vcombine.high %v894_v36, %v902_v39  ;;  %v6685_v48 = vcombine.high %v1150_v40, %v1158_v41  ;;  %v1046_v39 = vld [vmem:[%s7552_s13 + $0x7c8] sm:$0xff] }
  0x96   : > { %v1294_v40 = vld [vmem:[%s7552_s13 + $0xf88] sm:$0xff] }
  0x97   : > { %v1302_v41 = vld [vmem:[%s7552_s13 + $0xfc8] sm:$0xff] }
  0x98   : > { %3896 = vmatpush2.bf16.msra.mxu0 %v6490_v49  ;;  %3939 = vmatpush2.bf16.msra.mxu1 %v6746_v50  ;;  %v886_v49 = vld [vmem:[%s7552_s13 + $0x2c8] sm:$0xff] }
  0x99   : > { %3897 = vmatprep.subr.bf16.mxu0 %v6475_v54  ;;  %3940 = vmatprep.subr.bf16.mxu1 %v6731_v58  ;;  %v1134_v50 = vld [vmem:[%s7552_s13 + $0xa88] sm:$0xff]  ;;  %v6413_v54 = vcombine.high %v878_v46, %v886_v49  ;;  %v6412_v60 = vcombine.low %v878_v46, %v886_v49  ;;  %v6829_v49 = vcombine.high %v1294_v40, %v1302_v41 }
  0x9a   : > { %v6669_v55 = vcombine.high %v1134_v50, %v1142_v51  ;;  %v1118_v58 = vld [vmem:[%s7552_s13 + $0xa08] sm:$0xff]  ;;  %v6668_v61 = vcombine.low %v1134_v50, %v1142_v51 }
  0x9b   : > { %v6653_v63 = vcombine.high %v1118_v58, %v1126_v59  ;;  %v6652_v5 = vcombine.low %v1118_v58, %v1126_v59  ;;  %v1022_v50 = vld [vmem:[%s7552_s13 + $0x708] sm:$0xff] }
  0x9c   : > { %3898 = vmatpush2.bf16.msra.mxu0 %v6474_v56  ;;  %3941 = vmatpush2.bf16.msra.mxu1 %v6730_v57  ;;  %v862_v56 = vld [vmem:[%s7552_s13 + $0x208] sm:$0xff] }
  0x9d   : > { %3899 = vmatprep.subr.bf16.mxu0 %v6459_v62  ;;  %3942 = vmatprep.subr.bf16.mxu1 %v6715_v2  ;;  %v870_v57 = vld [vmem:[%s7552_s13 + $0x248] sm:$0xff] }
  0x9e   : > { %v6397_v62 = vcombine.high %v862_v56, %v870_v57  ;;  %v1102_v2 = vld [vmem:[%s7552_s13 + $0x988] sm:$0xff]  ;;  %v6396_v4 = vcombine.low %v862_v56, %v870_v57 }
  0x9f   : > { %v6637_v7 = vcombine.high %v1102_v2, %v1110_v3  ;;  %v6636_v19 = vcombine.low %v1102_v2, %v1110_v3  ;;  %v1030_v51 = vld [vmem:[%s7552_s13 + $0x748] sm:$0xff] }
  0xa0   : > { %3900 = vmatpush2.bf16.msra.mxu0 %v6458_v0  ;;  %3943 = vmatpush2.bf16.msra.mxu1 %v6714_v1  ;;  %v846_v0 = vld [vmem:[%s7552_s13 + $0x188] sm:$0xff]  ;;  %v6557_v56 = vcombine.high %v1022_v50, %v1030_v51 }
  0xa1   : > { %3955 = vmatprep.subr.bf16.mxu0 %v6445_v6  ;;  %3998 = vmatprep.subr.bf16.mxu1 %v6701_v10  ;;  %v854_v1 = vld [vmem:[%s7552_s13 + $0x1c8] sm:$0xff] }
  0xa2   : > { %v6381_v6 = vcombine.high %v846_v0, %v854_v1  ;;  %v1086_v10 = vld [vmem:[%s7552_s13 + $0x908] sm:$0xff] }
  0xa3   : > { %v1006_v58 = vld [vmem:[%s7552_s13 + $0x688] sm:$0xff] }
  0xa4   : > { %v1014_v59 = vld [vmem:[%s7552_s13 + $0x6c8] sm:$0xff] }
  0xa5   : > { %v990_v2 = vld [vmem:[%s7552_s13 + $0x608] sm:$0xff] }
  0xa6   : > { %v998_v3 = vld [vmem:[%s7552_s13 + $0x648] sm:$0xff] }
 0x123   : > { %v709_v16 = vpop.f32.mrf.mxu0  ;;  %v752_v18 = vpop.f32.mrf.mxu1 }
 0x124   : > { %v710_v37 = vadd.f32 %v709_v16, %v492_v24  ;;  %v753_v38 = vadd.f32 %v752_v18, %v500_v25  ;;  %v1094_v16 = vld [vmem:[%s7552_s13 + $0x948] sm:$0xff]  ;;  %v6380_v18 = vcombine.low %v846_v0, %v854_v1  ;;  %v6541_v0 = vcombine.high %v1006_v58, %v1014_v59 }
 0x125   : > { %v711_v20 = vpop.f32.mrf.mxu0  ;;  %v754_v21 = vpop.f32.mrf.mxu1 }
 0x126   : > { %v712_v32 = vadd.f32 %v711_v20, %v496_v22  ;;  %v755_v33 = vadd.f32 %v754_v21, %v504_v23  ;;  %v6621_v21 = vcombine.high %v1086_v10, %v1094_v16 }
 0x127   : > { %v713_v26 = vpop.f32.mrf.mxu0  ;;  %v756_v27 = vpop.f32.mrf.mxu1 }
 0x128   : > { %v714_v28 = vadd.f32 %v713_v26, %v492_v24  ;;  %v757_v29 = vadd.f32 %v756_v27, %v500_v25  ;;  %v1070_v24 = vld [vmem:[%s7552_s13 + $0x888] sm:$0xff]  ;;  %v6620_v27 = vcombine.low %v1086_v10, %v1094_v16 }
 0x129   : > { %v715_v30 = vpop.f32.mrf.mxu0  ;;  %v758_v31 = vpop.f32.mrf.mxu1  ;;  %v1078_v25 = vld [vmem:[%s7552_s13 + $0x8c8] sm:$0xff] }
 0x12a   : > { %v716_v34 = vadd.f32 %v715_v30, %v496_v22  ;;  %v759_v35 = vadd.f32 %v758_v31, %v504_v23  ;;  %v7692_v44 = vpack.c.bf16 %v714_v28, %v710_v37  ;;  %v7694_v45 = vpack.c.bf16 %v757_v29, %v753_v38  ;;  %v814_v22 = vld [vmem:[%s7552_s13 + $0x88] sm:$0xff] }
 0x12b   : > { %v822_v23 = vld [vmem:[%s7552_s13 + $0xc8] sm:$0xff]  ;;  %v6605_v29 = vcombine.high %v1070_v24, %v1078_v25 }
 0x12c   : > { %v7688_v42 = vpack.c.bf16 %v716_v34, %v712_v32  ;;  %v7690_v43 = vpack.c.bf16 %v759_v35, %v755_v33  ;;  %v6349_v28 = vcombine.high %v814_v22, %v822_v23  ;;  %v798_v30 = vld [vmem:[%s7552_s13 + $0x8] sm:$0xff]  ;;  %v6348_v34 = vcombine.low %v814_v22, %v822_v23 }
 0x12d   : > { %v806_v31 = vld [vmem:[%s7552_s13 + $0x48] sm:$0xff]  ;;  %v6604_v35 = vcombine.low %v1070_v24, %v1078_v25 }
 0x12e   : > { %3901 = vmatprep.mubr.bf16.mxu0 %v7688_v42  ;;  %3944 = vmatprep.mubr.bf16.mxu1 %v7690_v43  ;;  %v1054_v32 = vld [vmem:[%s7552_s13 + $0x808] sm:$0xff]  ;;  %v6333_v36 = vcombine.high %v798_v30, %v806_v31  ;;  %v6332_v46 = vcombine.low %v798_v30, %v806_v31 }
 0x12f   : > { %3902 = vmatmul.mubr.bf16.vlgmr.msra.gmra.mxu0 %v7692_v44  ;;  %3945 = vmatmul.mubr.bf16.vlgmr.msra.gmra.mxu1 %v7694_v45  ;;  %v1062_v33 = vld [vmem:[%s7552_s13 + $0x848] sm:$0xff] }
 0x130   : > { %3956 = vmatpush1.bf16.msra.mxu0 %v6444_v8  ;;  %3999 = vmatpush1.bf16.msra.mxu1 %v6700_v9  ;;  %v830_v8 = vld [vmem:[%s7552_s13 + $0x108] sm:$0xff]  ;;  %v6589_v37 = vcombine.high %v1054_v32, %v1062_v33 }
 0x131   : > { %3987 = vmatprep.mubr.bf16.mxu0 %v7688_v42  ;;  %4030 = vmatprep.mubr.bf16.mxu1 %v7690_v43  ;;  %v838_v9 = vld [vmem:[%s7552_s13 + $0x148] sm:$0xff] }
 0x132   : > { %3957 = vmatprep.subr.bf16.mxu0 %v6429_v47  ;;  %4000 = vmatprep.subr.bf16.mxu1 %v6685_v48  ;;  %v6365_v20 = vcombine.high %v830_v8, %v838_v9  ;;  %v6364_v26 = vcombine.low %v830_v8, %v838_v9  ;;  %v1038_v38 = vld [vmem:[%s7552_s13 + $0x788] sm:$0xff]  ;;  %v6588_v47 = vcombine.low %v1054_v32, %v1062_v33 }
 0x133   : > { %v6573_v48 = vcombine.high %v1038_v38, %v1046_v39  ;;  %v6525_v8 = vcombine.high %v990_v2, %v998_v3  ;;  %v974_v10 = vld [vmem:[%s7552_s13 + $0x588] sm:$0xff] }
 0x134   : > { %3958 = vmatpush1.bf16.msra.mxu0 %v6428_v52  ;;  %4001 = vmatpush1.bf16.msra.mxu1 %v6684_v53  ;;  %v1278_v52 = vld [vmem:[%s7552_s13 + $0xf08] sm:$0xff] }
 0x135   : > { %3959 = vmatprep.subr.bf16.mxu0 %v6413_v54  ;;  %4002 = vmatprep.subr.bf16.mxu1 %v6669_v55  ;;  %v1286_v53 = vld [vmem:[%s7552_s13 + $0xf48] sm:$0xff]  ;;  %v6572_v54 = vcombine.low %v1038_v38, %v1046_v39  ;;  %v6828_v55 = vcombine.low %v1294_v40, %v1302_v41 }
 0x136   : > { %v6813_v57 = vcombine.high %v1278_v52, %v1286_v53  ;;  %v982_v16 = vld [vmem:[%s7552_s13 + $0x5c8] sm:$0xff] }
 0x137   : > { %v6509_v22 = vcombine.high %v974_v10, %v982_v16  ;;  %v958_v24 = vld [vmem:[%s7552_s13 + $0x508] sm:$0xff] }
 0x138   : > { %3960 = vmatpush1.bf16.msra.mxu0 %v6412_v60  ;;  %4003 = vmatpush1.bf16.msra.mxu1 %v6668_v61  ;;  %v1262_v60 = vld [vmem:[%s7552_s13 + $0xe88] sm:$0xff] }
 0x139   : > { %3961 = vmatprep.subr.bf16.mxu0 %v6397_v62  ;;  %4004 = vmatprep.subr.bf16.mxu1 %v6653_v63  ;;  %v1270_v61 = vld [vmem:[%s7552_s13 + $0xec8] sm:$0xff]  ;;  %v6556_v62 = vcombine.low %v1022_v50, %v1030_v51  ;;  %v6812_v63 = vcombine.low %v1278_v52, %v1286_v53  ;;  %v911_v52 = vld [vmem:[%s7552_s13 + $0x390] sm:$0xff] }
 0x13a   : > { %v6797_v1 = vcombine.high %v1262_v60, %v1270_v61  ;;  %v966_v25 = vld [vmem:[%s7552_s13 + $0x548] sm:$0xff]  ;;  %v919_v53 = vld [vmem:[%s7552_s13 + $0x3d0] sm:$0xff] }
 0x13b   : > { %v6493_v30 = vcombine.high %v958_v24, %v966_v25  ;;  %v942_v32 = vld [vmem:[%s7552_s13 + $0x488] sm:$0xff] }
 0x13c   : > { %3962 = vmatpush1.bf16.msra.mxu0 %v6396_v4  ;;  %4005 = vmatpush1.bf16.msra.mxu1 %v6652_v5  ;;  %v1246_v4 = vld [vmem:[%s7552_s13 + $0xe08] sm:$0xff] }
 0x13d   : > { %3963 = vmatprep.subr.bf16.mxu0 %v6381_v6  ;;  %4006 = vmatprep.subr.bf16.mxu1 %v6637_v7  ;;  %v1254_v5 = vld [vmem:[%s7552_s13 + $0xe48] sm:$0xff]  ;;  %v6540_v6 = vcombine.low %v1006_v58, %v1014_v59  ;;  %v6796_v7 = vcombine.low %v1262_v60, %v1270_v61  ;;  %v6447_v58 = vcombine.high %v911_v52, %v919_v53  ;;  %v895_v60 = vld [vmem:[%s7552_s13 + $0x310] sm:$0xff] }
 0x13e   : > { %v6781_v9 = vcombine.high %v1246_v4, %v1254_v5  ;;  %v950_v33 = vld [vmem:[%s7552_s13 + $0x4c8] sm:$0xff]  ;;  %v903_v61 = vld [vmem:[%s7552_s13 + $0x350] sm:$0xff] }
 0x13f   : > { %v6477_v38 = vcombine.high %v942_v32, %v950_v33  ;;  %v926_v40 = vld [vmem:[%s7552_s13 + $0x408] sm:$0xff] }
 0x140   : > { %3964 = vmatpush1.bf16.msra.mxu0 %v6380_v18  ;;  %4007 = vmatpush1.bf16.msra.mxu1 %v6636_v19  ;;  %v1230_v18 = vld [vmem:[%s7552_s13 + $0xd88] sm:$0xff] }
 0x141   : > { %3965 = vmatprep.subr.bf16.mxu0 %v6365_v20  ;;  %4008 = vmatprep.subr.bf16.mxu1 %v6621_v21  ;;  %v1238_v19 = vld [vmem:[%s7552_s13 + $0xdc8] sm:$0xff]  ;;  %v6524_v20 = vcombine.low %v990_v2, %v998_v3  ;;  %v6780_v21 = vcombine.low %v1246_v4, %v1254_v5  ;;  %v6431_v2 = vcombine.high %v895_v60, %v903_v61  ;;  %v879_v4 = vld [vmem:[%s7552_s13 + $0x290] sm:$0xff] }
 0x142   : > { %v6765_v23 = vcombine.high %v1230_v18, %v1238_v19  ;;  %v934_v41 = vld [vmem:[%s7552_s13 + $0x448] sm:$0xff]  ;;  %v887_v5 = vld [vmem:[%s7552_s13 + $0x2d0] sm:$0xff] }
 0x143   : > { %v6461_v50 = vcombine.high %v926_v40, %v934_v41 }
 0x144   : > { %3966 = vmatpush1.bf16.msra.mxu0 %v6364_v26  ;;  %4009 = vmatpush1.bf16.msra.mxu1 %v6620_v27  ;;  %v1214_v26 = vld [vmem:[%s7552_s13 + $0xd08] sm:$0xff] }
 0x145   : > { %3967 = vmatprep.subr.bf16.mxu0 %v6349_v28  ;;  %4010 = vmatprep.subr.bf16.mxu1 %v6605_v29  ;;  %v1222_v27 = vld [vmem:[%s7552_s13 + $0xd48] sm:$0xff]  ;;  %v6508_v28 = vcombine.low %v974_v10, %v982_v16  ;;  %v6764_v29 = vcombine.low %v1230_v18, %v1238_v19  ;;  %v6415_v10 = vcombine.high %v879_v4, %v887_v5  ;;  %v863_v18 = vld [vmem:[%s7552_s13 + $0x210] sm:$0xff] }
 0x146   : > { %v6749_v31 = vcombine.high %v1214_v26, %v1222_v27  ;;  %v871_v19 = vld [vmem:[%s7552_s13 + $0x250] sm:$0xff] }
 0x148   : > { %3968 = vmatpush1.bf16.msra.mxu0 %v6348_v34  ;;  %4011 = vmatpush1.bf16.msra.mxu1 %v6604_v35  ;;  %v1198_v34 = vld [vmem:[%s7552_s13 + $0xc88] sm:$0xff] }
 0x149   : > { %3969 = vmatprep.subr.bf16.mxu0 %v6333_v36  ;;  %4012 = vmatprep.subr.bf16.mxu1 %v6589_v37  ;;  %v1206_v35 = vld [vmem:[%s7552_s13 + $0xcc8] sm:$0xff]  ;;  %v6492_v36 = vcombine.low %v958_v24, %v966_v25  ;;  %v6748_v37 = vcombine.low %v1214_v26, %v1222_v27  ;;  %v6399_v24 = vcombine.high %v863_v18, %v871_v19  ;;  %v847_v26 = vld [vmem:[%s7552_s13 + $0x190] sm:$0xff] }
 0x14a   : > { %v6733_v39 = vcombine.high %v1198_v34, %v1206_v35  ;;  %v855_v27 = vld [vmem:[%s7552_s13 + $0x1d0] sm:$0xff] }
 0x14c   : > { %3970 = vmatpush1.bf16.msra.mxu0 %v6332_v46  ;;  %4013 = vmatpush1.bf16.msra.mxu1 %v6588_v47  ;;  %v1182_v46 = vld [vmem:[%s7552_s13 + $0xc08] sm:$0xff] }
 0x14d   : > { %3971 = vmatprep.subr.bf16.mxu0 %v6573_v48  ;;  %4014 = vmatprep.subr.bf16.mxu1 %v6829_v49  ;;  %v1190_v47 = vld [vmem:[%s7552_s13 + $0xc48] sm:$0xff]  ;;  %v6476_v48 = vcombine.low %v942_v32, %v950_v33  ;;  %v6732_v49 = vcombine.low %v1198_v34, %v1206_v35  ;;  %v6383_v32 = vcombine.high %v847_v26, %v855_v27  ;;  %v831_v34 = vld [vmem:[%s7552_s13 + $0x110] sm:$0xff] }
 0x14e   : > { %v6717_v51 = vcombine.high %v1182_v46, %v1190_v47  ;;  %v839_v35 = vld [vmem:[%s7552_s13 + $0x150] sm:$0xff] }
 0x150   : > { %3972 = vmatpush2.bf16.msra.mxu0 %v6572_v54  ;;  %4015 = vmatpush2.bf16.msra.mxu1 %v6828_v55  ;;  %v1167_v54 = vld [vmem:[%s7552_s13 + $0xb90] sm:$0xff] }
 0x151   : > { %3973 = vmatprep.subr.bf16.mxu0 %v6557_v56  ;;  %4016 = vmatprep.subr.bf16.mxu1 %v6813_v57  ;;  %v1175_v55 = vld [vmem:[%s7552_s13 + $0xbd0] sm:$0xff]  ;;  %v6460_v56 = vcombine.low %v926_v40, %v934_v41  ;;  %v6716_v57 = vcombine.low %v1182_v46, %v1190_v47  ;;  %v6367_v40 = vcombine.high %v831_v34, %v839_v35 }
 0x152   : > { %v6703_v59 = vcombine.high %v1167_v54, %v1175_v55  ;;  %v815_v46 = vld [vmem:[%s7552_s13 + $0x90] sm:$0xff] }
 0x153   : > { %v823_v47 = vld [vmem:[%s7552_s13 + $0xd0] sm:$0xff] }
 0x154   : > { %3974 = vmatpush2.bf16.msra.mxu0 %v6556_v62  ;;  %4017 = vmatpush2.bf16.msra.mxu1 %v6812_v63  ;;  %v1151_v62 = vld [vmem:[%s7552_s13 + $0xb10] sm:$0xff] }
 0x155   : > { %3975 = vmatprep.subr.bf16.mxu0 %v6541_v0  ;;  %4018 = vmatprep.subr.bf16.mxu1 %v6797_v1  ;;  %v1159_v63 = vld [vmem:[%s7552_s13 + $0xb50] sm:$0xff]  ;;  %v6446_v0 = vcombine.low %v911_v52, %v919_v53  ;;  %v6702_v1 = vcombine.low %v1167_v54, %v1175_v55  ;;  %v6351_v52 = vcombine.high %v815_v46, %v823_v47 }
 0x156   : > { %v6687_v3 = vcombine.high %v1151_v62, %v1159_v63  ;;  %v799_v54 = vld [vmem:[%s7552_s13 + $0x10] sm:$0xff] }
 0x157   : > { %v807_v55 = vld [vmem:[%s7552_s13 + $0x50] sm:$0xff] }
 0x158   : > { %3976 = vmatpush2.bf16.msra.mxu0 %v6540_v6  ;;  %4019 = vmatpush2.bf16.msra.mxu1 %v6796_v7  ;;  %v1135_v6 = vld [vmem:[%s7552_s13 + $0xa90] sm:$0xff] }
 0x159   : > { %3977 = vmatprep.subr.bf16.mxu0 %v6525_v8  ;;  %4020 = vmatprep.subr.bf16.mxu1 %v6781_v9  ;;  %v1143_v7 = vld [vmem:[%s7552_s13 + $0xad0] sm:$0xff]  ;;  %v6430_v8 = vcombine.low %v895_v60, %v903_v61  ;;  %v6686_v9 = vcombine.low %v1151_v62, %v1159_v63  ;;  %v6335_v60 = vcombine.high %v799_v54, %v807_v55 }
 0x15a   : > { %v6671_v16 = vcombine.high %v1135_v6, %v1143_v7  ;;  %v1039_v62 = vld [vmem:[%s7552_s13 + $0x790] sm:$0xff] }
 0x15b   : > { %v1047_v63 = vld [vmem:[%s7552_s13 + $0x7d0] sm:$0xff] }
 0x15c   : > { %3978 = vmatpush2.bf16.msra.mxu0 %v6524_v20  ;;  %4021 = vmatpush2.bf16.msra.mxu1 %v6780_v21  ;;  %v1119_v20 = vld [vmem:[%s7552_s13 + $0xa10] sm:$0xff] }
 0x15d   : > { %3979 = vmatprep.subr.bf16.mxu0 %v6509_v22  ;;  %4022 = vmatprep.subr.bf16.mxu1 %v6765_v23  ;;  %v1127_v21 = vld [vmem:[%s7552_s13 + $0xa50] sm:$0xff]  ;;  %v6414_v22 = vcombine.low %v879_v4, %v887_v5  ;;  %v6670_v23 = vcombine.low %v1135_v6, %v1143_v7  ;;  %v6575_v4 = vcombine.high %v1039_v62, %v1047_v63 }
 0x15e   : > { %v6655_v25 = vcombine.high %v1119_v20, %v1127_v21  ;;  %v1023_v6 = vld [vmem:[%s7552_s13 + $0x710] sm:$0xff] }
 0x15f   : > { %v1031_v7 = vld [vmem:[%s7552_s13 + $0x750] sm:$0xff] }
 0x160   : > { %3980 = vmatpush2.bf16.msra.mxu0 %v6508_v28  ;;  %4023 = vmatpush2.bf16.msra.mxu1 %v6764_v29  ;;  %v1103_v28 = vld [vmem:[%s7552_s13 + $0x990] sm:$0xff] }
 0x161   : > { %3981 = vmatprep.subr.bf16.mxu0 %v6493_v30  ;;  %4024 = vmatprep.subr.bf16.mxu1 %v6749_v31  ;;  %v1111_v29 = vld [vmem:[%s7552_s13 + $0x9d0] sm:$0xff]  ;;  %v6398_v30 = vcombine.low %v863_v18, %v871_v19  ;;  %v6654_v31 = vcombine.low %v1119_v20, %v1127_v21  ;;  %v6559_v18 = vcombine.high %v1023_v6, %v1031_v7 }
 0x162   : > { %v6639_v33 = vcombine.high %v1103_v28, %v1111_v29  ;;  %v1007_v20 = vld [vmem:[%s7552_s13 + $0x690] sm:$0xff] }
 0x163   : > { %v1015_v21 = vld [vmem:[%s7552_s13 + $0x6d0] sm:$0xff] }
 0x164   : > { %3982 = vmatpush2.bf16.msra.mxu0 %v6492_v36  ;;  %4025 = vmatpush2.bf16.msra.mxu1 %v6748_v37  ;;  %v1087_v36 = vld [vmem:[%s7552_s13 + $0x910] sm:$0xff] }
 0x165   : > { %3983 = vmatprep.subr.bf16.mxu0 %v6477_v38  ;;  %4026 = vmatprep.subr.bf16.mxu1 %v6733_v39  ;;  %v1095_v37 = vld [vmem:[%s7552_s13 + $0x950] sm:$0xff]  ;;  %v6382_v38 = vcombine.low %v847_v26, %v855_v27  ;;  %v6638_v39 = vcombine.low %v1103_v28, %v1111_v29  ;;  %v6543_v26 = vcombine.high %v1007_v20, %v1015_v21 }
 0x166   : > { %v6623_v41 = vcombine.high %v1087_v36, %v1095_v37  ;;  %v991_v28 = vld [vmem:[%s7552_s13 + $0x610] sm:$0xff] }
 0x167   : > { %v999_v29 = vld [vmem:[%s7552_s13 + $0x650] sm:$0xff] }
 0x168   : > { %3984 = vmatpush2.bf16.msra.mxu0 %v6476_v48  ;;  %4027 = vmatpush2.bf16.msra.mxu1 %v6732_v49  ;;  %v1071_v48 = vld [vmem:[%s7552_s13 + $0x890] sm:$0xff] }
 0x169   : > { %3985 = vmatprep.subr.bf16.mxu0 %v6461_v50  ;;  %4028 = vmatprep.subr.bf16.mxu1 %v6717_v51  ;;  %v1079_v49 = vld [vmem:[%s7552_s13 + $0x8d0] sm:$0xff]  ;;  %v6366_v50 = vcombine.low %v831_v34, %v839_v35  ;;  %v6622_v51 = vcombine.low %v1087_v36, %v1095_v37  ;;  %v6527_v34 = vcombine.high %v991_v28, %v999_v29 }
 0x16a   : > { %v6607_v53 = vcombine.high %v1071_v48, %v1079_v49  ;;  %v975_v36 = vld [vmem:[%s7552_s13 + $0x590] sm:$0xff] }
 0x16b   : > { %v983_v37 = vld [vmem:[%s7552_s13 + $0x5d0] sm:$0xff] }
 0x16c   : > { %3986 = vmatpush2.bf16.msra.mxu0 %v6460_v56  ;;  %4029 = vmatpush2.bf16.msra.mxu1 %v6716_v57  ;;  %v1055_v56 = vld [vmem:[%s7552_s13 + $0x810] sm:$0xff] }
 0x16d   : > { %4041 = vmatprep.subr.bf16.mxu0 %v6447_v58  ;;  %4084 = vmatprep.subr.bf16.mxu1 %v6703_v59  ;;  %v1063_v57 = vld [vmem:[%s7552_s13 + $0x850] sm:$0xff]  ;;  %v6350_v58 = vcombine.low %v815_v46, %v823_v47  ;;  %v6606_v59 = vcombine.low %v1071_v48, %v1079_v49  ;;  %v6511_v46 = vcombine.high %v975_v36, %v983_v37 }
 0x16e   : > { %v6591_v61 = vcombine.high %v1055_v56, %v1063_v57  ;;  %v959_v48 = vld [vmem:[%s7552_s13 + $0x510] sm:$0xff] }
 0x16f   : > { %3988 = vmatmul.mubr.bf16.vlgmr.msra.gmra.mxu0 %v7692_v44  ;;  %4031 = vmatmul.mubr.bf16.vlgmr.msra.gmra.mxu1 %v7694_v45  ;;  %v967_v49 = vld [vmem:[%s7552_s13 + $0x550] sm:$0xff] }
 0x170   : > { %4042 = vmatpush1.bf16.msra.mxu0 %v6446_v0  ;;  %4073 = vmatprep.mubr.bf16.mxu0 %v7688_v42  ;;  %v1295_v0 = vld [vmem:[%s7552_s13 + $0xf90] sm:$0xff] }
 0x171   : > { %4085 = vmatpush1.bf16.msra.mxu1 %v6702_v1  ;;  %4116 = vmatprep.mubr.bf16.mxu1 %v7690_v43  ;;  %v1303_v1 = vld [vmem:[%s7552_s13 + $0xfd0] sm:$0xff] }
 0x172   : > { %4043 = vmatprep.subr.bf16.mxu0 %v6431_v2  ;;  %4086 = vmatprep.subr.bf16.mxu1 %v6687_v3  ;;  %v6334_v2 = vcombine.low %v799_v54, %v807_v55  ;;  %v6590_v3 = vcombine.low %v1055_v56, %v1063_v57  ;;  %v6831_v5 = vcombine.high %v1295_v0, %v1303_v1  ;;  %v943_v56 = vld [vmem:[%s7552_s13 + $0x490] sm:$0xff] }
 0x173   : > { %v6495_v54 = vcombine.high %v959_v48, %v967_v49  ;;  %v951_v57 = vld [vmem:[%s7552_s13 + $0x4d0] sm:$0xff] }
 0x174   : > { %4044 = vmatpush1.bf16.msra.mxu0 %v6430_v8  ;;  %v1279_v8 = vld [vmem:[%s7552_s13 + $0xf10] sm:$0xff] }
 0x175   : > { %4087 = vmatpush1.bf16.msra.mxu1 %v6686_v9  ;;  %4045 = vmatprep.subr.bf16.mxu0 %v6415_v10  ;;  %v1287_v9 = vld [vmem:[%s7552_s13 + $0xf50] sm:$0xff]  ;;  %v6574_v10 = vcombine.low %v1039_v62, %v1047_v63  ;;  %v6479_v62 = vcombine.high %v943_v56, %v951_v57 }
 0x176   : > { %4088 = vmatprep.subr.bf16.mxu1 %v6671_v16  ;;  %v6830_v16 = vcombine.low %v1295_v0, %v1303_v1  ;;  %v6815_v19 = vcombine.high %v1279_v8, %v1287_v9  ;;  %v927_v0 = vld [vmem:[%s7552_s13 + $0x410] sm:$0xff] }
 0x177   : > { %v935_v1 = vld [vmem:[%s7552_s13 + $0x450] sm:$0xff] }
 0x178   : > { %4046 = vmatpush1.bf16.msra.mxu0 %v6414_v22  ;;  %v1263_v22 = vld [vmem:[%s7552_s13 + $0xe90] sm:$0xff] }
 0x179   : > { %4089 = vmatpush1.bf16.msra.mxu1 %v6670_v23  ;;  %4047 = vmatprep.subr.bf16.mxu0 %v6399_v24  ;;  %v1271_v23 = vld [vmem:[%s7552_s13 + $0xed0] sm:$0xff]  ;;  %v6558_v24 = vcombine.low %v1023_v6, %v1031_v7  ;;  %v6463_v6 = vcombine.high %v927_v0, %v935_v1 }
 0x17a   : > { %4090 = vmatprep.subr.bf16.mxu1 %v6655_v25  ;;  %v6814_v25 = vcombine.low %v1279_v8, %v1287_v9  ;;  %v6799_v27 = vcombine.high %v1263_v22, %v1271_v23  ;;  %v912_v8 = vld [vmem:[%s7552_s13 + $0x398] sm:$0xff] }
 0x17b   : > { %v920_v9 = vld [vmem:[%s7552_s13 + $0x3d8] sm:$0xff] }
 0x17c   : > { %4048 = vmatpush1.bf16.msra.mxu0 %v6398_v30  ;;  %v1247_v30 = vld [vmem:[%s7552_s13 + $0xe10] sm:$0xff] }
 0x17d   : > { %4091 = vmatpush1.bf16.msra.mxu1 %v6654_v31  ;;  %4049 = vmatprep.subr.bf16.mxu0 %v6383_v32  ;;  %v1255_v31 = vld [vmem:[%s7552_s13 + $0xe50] sm:$0xff]  ;;  %v6542_v32 = vcombine.low %v1007_v20, %v1015_v21  ;;  %v6449_v20 = vcombine.high %v912_v8, %v920_v9 }
 0x17e   : > { %4092 = vmatprep.subr.bf16.mxu1 %v6639_v33  ;;  %v6798_v33 = vcombine.low %v1263_v22, %v1271_v23  ;;  %v6783_v35 = vcombine.high %v1247_v30, %v1255_v31  ;;  %v896_v22 = vld [vmem:[%s7552_s13 + $0x318] sm:$0xff] }
 0x17f   : > { %v904_v23 = vld [vmem:[%s7552_s13 + $0x358] sm:$0xff] }
 0x180   : > { %4050 = vmatpush1.bf16.msra.mxu0 %v6382_v38  ;;  %v1231_v38 = vld [vmem:[%s7552_s13 + $0xd90] sm:$0xff] }
 0x181   : > { %4093 = vmatpush1.bf16.msra.mxu1 %v6638_v39  ;;  %4051 = vmatprep.subr.bf16.mxu0 %v6367_v40  ;;  %v1239_v39 = vld [vmem:[%s7552_s13 + $0xdd0] sm:$0xff]  ;;  %v6526_v40 = vcombine.low %v991_v28, %v999_v29  ;;  %v6433_v28 = vcombine.high %v896_v22, %v904_v23  ;;  %v880_v29 = vld [vmem:[%s7552_s13 + $0x298] sm:$0xff] }
 0x182   : > { %4094 = vmatprep.subr.bf16.mxu1 %v6623_v41  ;;  %v6782_v41 = vcombine.low %v1247_v30, %v1255_v31  ;;  %v6767_v47 = vcombine.high %v1231_v38, %v1239_v39  ;;  %v888_v30 = vld [vmem:[%s7552_s13 + $0x2d8] sm:$0xff] }
 0x184   : > { %4052 = vmatpush1.bf16.msra.mxu0 %v6366_v50  ;;  %v1215_v50 = vld [vmem:[%s7552_s13 + $0xd10] sm:$0xff] }
 0x185   : > { %4095 = vmatpush1.bf16.msra.mxu1 %v6622_v51  ;;  %4053 = vmatprep.subr.bf16.mxu0 %v6351_v52  ;;  %v1223_v51 = vld [vmem:[%s7552_s13 + $0xd50] sm:$0xff]  ;;  %v6510_v52 = vcombine.low %v975_v36, %v983_v37  ;;  %v6417_v36 = vcombine.high %v880_v29, %v888_v30 }
 0x186   : > { %4096 = vmatprep.subr.bf16.mxu1 %v6607_v53  ;;  %v6766_v53 = vcombine.low %v1231_v38, %v1239_v39  ;;  %v6751_v55 = vcombine.high %v1215_v50, %v1223_v51  ;;  %v864_v38 = vld [vmem:[%s7552_s13 + $0x218] sm:$0xff] }
 0x187   : > { %v872_v39 = vld [vmem:[%s7552_s13 + $0x258] sm:$0xff] }
 0x188   : > { %4054 = vmatpush1.bf16.msra.mxu0 %v6350_v58  ;;  %v1199_v58 = vld [vmem:[%s7552_s13 + $0xc90] sm:$0xff] }
 0x189   : > { %4097 = vmatpush1.bf16.msra.mxu1 %v6606_v59  ;;  %4055 = vmatprep.subr.bf16.mxu0 %v6335_v60  ;;  %v1207_v59 = vld [vmem:[%s7552_s13 + $0xcd0] sm:$0xff]  ;;  %v6494_v60 = vcombine.low %v959_v48, %v967_v49  ;;  %v6401_v48 = vcombine.high %v864_v38, %v872_v39 }
 0x18a   : > { %4098 = vmatprep.subr.bf16.mxu1 %v6591_v61  ;;  %v6750_v61 = vcombine.low %v1215_v50, %v1223_v51  ;;  %v6735_v63 = vcombine.high %v1199_v58, %v1207_v59  ;;  %v848_v50 = vld [vmem:[%s7552_s13 + $0x198] sm:$0xff] }
 0x18b   : > { %v856_v51 = vld [vmem:[%s7552_s13 + $0x1d8] sm:$0xff] }
 0x18c   : > { %4056 = vmatpush1.bf16.msra.mxu0 %v6334_v2  ;;  %v1183_v2 = vld [vmem:[%s7552_s13 + $0xc10] sm:$0xff] }
 0x18d   : > { %4099 = vmatpush1.bf16.msra.mxu1 %v6590_v3  ;;  %4057 = vmatprep.subr.bf16.mxu0 %v6575_v4  ;;  %v1191_v3 = vld [vmem:[%s7552_s13 + $0xc50] sm:$0xff]  ;;  %v6478_v4 = vcombine.low %v943_v56, %v951_v57  ;;  %v6385_v56 = vcombine.high %v848_v50, %v856_v51 }
 0x18e   : > { %4100 = vmatprep.subr.bf16.mxu1 %v6831_v5  ;;  %v6734_v5 = vcombine.low %v1199_v58, %v1207_v59  ;;  %v6719_v7 = vcombine.high %v1183_v2, %v1191_v3  ;;  %v832_v58 = vld [vmem:[%s7552_s13 + $0x118] sm:$0xff] }
 0x18f   : > { %v840_v59 = vld [vmem:[%s7552_s13 + $0x158] sm:$0xff] }
 0x190   : > { %4058 = vmatpush2.bf16.msra.mxu0 %v6574_v10  ;;  %v1168_v10 = vld [vmem:[%s7552_s13 + $0xb98] sm:$0xff] }
 0x191   : > { %4101 = vmatpush2.bf16.msra.mxu1 %v6830_v16  ;;  %4059 = vmatprep.subr.bf16.mxu0 %v6559_v18  ;;  %v1176_v16 = vld [vmem:[%s7552_s13 + $0xbd8] sm:$0xff]  ;;  %v6462_v18 = vcombine.low %v927_v0, %v935_v1  ;;  %v6369_v0 = vcombine.high %v832_v58, %v840_v59 }
 0x192   : > { %4102 = vmatprep.subr.bf16.mxu1 %v6815_v19  ;;  %v6718_v19 = vcombine.low %v1183_v2, %v1191_v3  ;;  %v6705_v21 = vcombine.high %v1168_v10, %v1176_v16  ;;  %v816_v2 = vld [vmem:[%s7552_s13 + $0x98] sm:$0xff] }
 0x193   : > { %v824_v3 = vld [vmem:[%s7552_s13 + $0xd8] sm:$0xff] }
 0x194   : > { %4060 = vmatpush2.bf16.msra.mxu0 %v6558_v24  ;;  %v6448_v24 = vcombine.low %v912_v8, %v920_v9  ;;  %v6353_v8 = vcombine.high %v816_v2, %v824_v3 }
 0x195   : > { %4103 = vmatpush2.bf16.msra.mxu1 %v6814_v25  ;;  %4061 = vmatprep.subr.bf16.mxu0 %v6543_v26  ;;  %v1152_v25 = vld [vmem:[%s7552_s13 + $0xb18] sm:$0xff] }
 0x196   : > { %4104 = vmatprep.subr.bf16.mxu1 %v6799_v27  ;;  %v1160_v26 = vld [vmem:[%s7552_s13 + $0xb58] sm:$0xff]  ;;  %v6704_v27 = vcombine.low %v1168_v10, %v1176_v16 }
 0x197   : > { %v6689_v31 = vcombine.high %v1152_v25, %v1160_v26  ;;  %v800_v10 = vld [vmem:[%s7552_s13 + $0x18] sm:$0xff] }
 0x198   : > { %4062 = vmatpush2.bf16.msra.mxu0 %v6542_v32  ;;  %v1136_v32 = vld [vmem:[%s7552_s13 + $0xa98] sm:$0xff] }
 0x199   : > { %4105 = vmatpush2.bf16.msra.mxu1 %v6798_v33  ;;  %4063 = vmatprep.subr.bf16.mxu0 %v6527_v34  ;;  %v1144_v33 = vld [vmem:[%s7552_s13 + $0xad8] sm:$0xff]  ;;  %v6432_v34 = vcombine.low %v896_v22, %v904_v23 }
 0x19a   : > { %4106 = vmatprep.subr.bf16.mxu1 %v6783_v35  ;;  %v6688_v35 = vcombine.low %v1152_v25, %v1160_v26  ;;  %v6673_v37 = vcombine.high %v1136_v32, %v1144_v33  ;;  %v808_v16 = vld [vmem:[%s7552_s13 + $0x58] sm:$0xff] }
 0x19b   : > { %v6337_v22 = vcombine.high %v800_v10, %v808_v16  ;;  %v1048_v25 = vld [vmem:[%s7552_s13 + $0x7d8] sm:$0xff] }
 0x19c   : > { %4064 = vmatpush2.bf16.msra.mxu0 %v6526_v40  ;;  %v1120_v40 = vld [vmem:[%s7552_s13 + $0xa18] sm:$0xff] }
 0x19d   : > { %4107 = vmatpush2.bf16.msra.mxu1 %v6782_v41  ;;  %4065 = vmatprep.subr.bf16.mxu0 %v6511_v46  ;;  %v1128_v41 = vld [vmem:[%s7552_s13 + $0xa58] sm:$0xff]  ;;  %v6416_v46 = vcombine.low %v880_v29, %v888_v30 }
 0x19e   : > { %4108 = vmatprep.subr.bf16.mxu1 %v6767_v47  ;;  %v6672_v47 = vcombine.low %v1136_v32, %v1144_v33  ;;  %v6657_v49 = vcombine.high %v1120_v40, %v1128_v41  ;;  %v1296_v26 = vld [vmem:[%s7552_s13 + $0xf98] sm:$0xff] }
 0x19f   : > { %v1024_v32 = vld [vmem:[%s7552_s13 + $0x718] sm:$0xff] }
 0x1a0   : > { %4066 = vmatpush2.bf16.msra.mxu0 %v6510_v52  ;;  %v1104_v52 = vld [vmem:[%s7552_s13 + $0x998] sm:$0xff] }
 0x1a1   : > { %4109 = vmatpush2.bf16.msra.mxu1 %v6766_v53  ;;  %4067 = vmatprep.subr.bf16.mxu0 %v6495_v54  ;;  %v1112_v53 = vld [vmem:[%s7552_s13 + $0x9d8] sm:$0xff]  ;;  %v6400_v54 = vcombine.low %v864_v38, %v872_v39 }
 0x1a2   : > { %4110 = vmatprep.subr.bf16.mxu1 %v6751_v55  ;;  %v6656_v55 = vcombine.low %v1120_v40, %v1128_v41  ;;  %v6641_v57 = vcombine.high %v1104_v52, %v1112_v53  ;;  %v1032_v33 = vld [vmem:[%s7552_s13 + $0x758] sm:$0xff] }
 0x1a3   : > { %v6561_v38 = vcombine.high %v1024_v32, %v1032_v33  ;;  %v1008_v40 = vld [vmem:[%s7552_s13 + $0x698] sm:$0xff] }
 0x1a4   : > { %4068 = vmatpush2.bf16.msra.mxu0 %v6494_v60  ;;  %v1088_v60 = vld [vmem:[%s7552_s13 + $0x918] sm:$0xff] }
 0x1a5   : > { %4111 = vmatpush2.bf16.msra.mxu1 %v6750_v61  ;;  %4069 = vmatprep.subr.bf16.mxu0 %v6479_v62  ;;  %v1096_v61 = vld [vmem:[%s7552_s13 + $0x958] sm:$0xff]  ;;  %v6384_v62 = vcombine.low %v848_v50, %v856_v51 }
 0x1a6   : > { %4112 = vmatprep.subr.bf16.mxu1 %v6735_v63  ;;  %v6640_v63 = vcombine.low %v1104_v52, %v1112_v53  ;;  %v6625_v1 = vcombine.high %v1088_v60, %v1096_v61  ;;  %v1016_v41 = vld [vmem:[%s7552_s13 + $0x6d8] sm:$0xff] }
 0x1a7   : > { %v6545_v50 = vcombine.high %v1008_v40, %v1016_v41  ;;  %v992_v52 = vld [vmem:[%s7552_s13 + $0x618] sm:$0xff] }
 0x1a8   : > { %4070 = vmatpush2.bf16.msra.mxu0 %v6478_v4  ;;  %v1072_v4 = vld [vmem:[%s7552_s13 + $0x898] sm:$0xff] }
 0x1a9   : > { %4113 = vmatpush2.bf16.msra.mxu1 %v6734_v5  ;;  %4071 = vmatprep.subr.bf16.mxu0 %v6463_v6  ;;  %v1080_v5 = vld [vmem:[%s7552_s13 + $0x8d8] sm:$0xff]  ;;  %v6368_v6 = vcombine.low %v832_v58, %v840_v59 }
 0x1aa   : > { %4114 = vmatprep.subr.bf16.mxu1 %v6719_v7  ;;  %v6624_v7 = vcombine.low %v1088_v60, %v1096_v61  ;;  %v6609_v9 = vcombine.high %v1072_v4, %v1080_v5  ;;  %v1000_v53 = vld [vmem:[%s7552_s13 + $0x658] sm:$0xff] }
 0x1ab   : > { %v6529_v58 = vcombine.high %v992_v52, %v1000_v53  ;;  %v976_v60 = vld [vmem:[%s7552_s13 + $0x598] sm:$0xff] }
 0x1ac   : > { %4072 = vmatpush2.bf16.msra.mxu0 %v6462_v18  ;;  %v1056_v18 = vld [vmem:[%s7552_s13 + $0x818] sm:$0xff] }
 0x1ad   : > { %4115 = vmatpush2.bf16.msra.mxu1 %v6718_v19  ;;  %4127 = vmatprep.subr.bf16.mxu0 %v6449_v20  ;;  %v1064_v19 = vld [vmem:[%s7552_s13 + $0x858] sm:$0xff]  ;;  %v6352_v20 = vcombine.low %v816_v2, %v824_v3 }
 0x1ae   : > { %4170 = vmatprep.subr.bf16.mxu1 %v6705_v21  ;;  %v6608_v21 = vcombine.low %v1072_v4, %v1080_v5  ;;  %v6593_v23 = vcombine.high %v1056_v18, %v1064_v19  ;;  %v6592_v29 = vcombine.low %v1056_v18, %v1064_v19  ;;  %v984_v61 = vld [vmem:[%s7552_s13 + $0x5d8] sm:$0xff] }
 0x1af   : > { %4074 = vmatmul.mubr.bf16.vlgmr.msra.gmra.mxu0 %v7692_v44  ;;  %v6513_v2 = vcombine.high %v976_v60, %v984_v61  ;;  %v960_v4 = vld [vmem:[%s7552_s13 + $0x518] sm:$0xff] }
 0x1b0   : > { %4117 = vmatmul.mubr.bf16.vlgmr.msra.gmra.mxu1 %v7694_v45  ;;  %4128 = vmatpush1.bf16.msra.mxu0 %v6448_v24  ;;  %v1040_v24 = vld [vmem:[%s7552_s13 + $0x798] sm:$0xff] }
 0x1b1   : > { %4159 = vmatprep.mubr.bf16.mxu0 %v7688_v42  ;;  %4171 = vmatpush1.bf16.msra.mxu1 %v6704_v27  ;;  %v1304_v27 = vld [vmem:[%s7552_s13 + $0xfd8] sm:$0xff]  ;;  %v6577_v30 = vcombine.high %v1040_v24, %v1048_v25 }
 0x1b2   : > { %4202 = vmatprep.mubr.bf16.mxu1 %v7690_v43  ;;  %4129 = vmatprep.subr.bf16.mxu0 %v6433_v28  ;;  %v6336_v28 = vcombine.low %v800_v10, %v808_v16  ;;  %v968_v5 = vld [vmem:[%s7552_s13 + $0x558] sm:$0xff] }
 0x1b3   : > { %4172 = vmatprep.subr.bf16.mxu1 %v6689_v31  ;;  %v6833_v31 = vcombine.high %v1296_v26, %v1304_v27  ;;  %v6497_v10 = vcombine.high %v960_v4, %v968_v5  ;;  %v944_v18 = vld [vmem:[%s7552_s13 + $0x498] sm:$0xff] }
 0x1b4   : > { %4130 = vmatpush1.bf16.msra.mxu0 %v6432_v34  ;;  %v1280_v34 = vld [vmem:[%s7552_s13 + $0xf18] sm:$0xff] }
 0x1b5   : > { %4173 = vmatpush1.bf16.msra.mxu1 %v6688_v35  ;;  %4131 = vmatprep.subr.bf16.mxu0 %v6417_v36  ;;  %v1288_v35 = vld [vmem:[%s7552_s13 + $0xf58] sm:$0xff]  ;;  %v6576_v36 = vcombine.low %v1040_v24, %v1048_v25 }
 0x1b6   : > { %4174 = vmatprep.subr.bf16.mxu1 %v6673_v37  ;;  %v6832_v37 = vcombine.low %v1296_v26, %v1304_v27  ;;  %v6817_v39 = vcombine.high %v1280_v34, %v1288_v35  ;;  %v952_v19 = vld [vmem:[%s7552_s13 + $0x4d8] sm:$0xff] }
 0x1b7   : > { %v6481_v24 = vcombine.high %v944_v18, %v952_v19  ;;  %v928_v26 = vld [vmem:[%s7552_s13 + $0x418] sm:$0xff] }
 0x1b8   : > { %4132 = vmatpush1.bf16.msra.mxu0 %v6416_v46  ;;  %v1264_v46 = vld [vmem:[%s7552_s13 + $0xe98] sm:$0xff] }
 0x1b9   : > { %4175 = vmatpush1.bf16.msra.mxu1 %v6672_v47  ;;  %4133 = vmatprep.subr.bf16.mxu0 %v6401_v48  ;;  %v1272_v47 = vld [vmem:[%s7552_s13 + $0xed8] sm:$0xff]  ;;  %v6560_v48 = vcombine.low %v1024_v32, %v1032_v33 }
 0x1ba   : > { %4176 = vmatprep.subr.bf16.mxu1 %v6657_v49  ;;  %v6816_v49 = vcombine.low %v1280_v34, %v1288_v35  ;;  %v6801_v51 = vcombine.high %v1264_v46, %v1272_v47  ;;  %v936_v27 = vld [vmem:[%s7552_s13 + $0x458] sm:$0xff]  ;;  %v913_v34 = vld [vmem:[%s7552_s13 + $0x3a0] sm:$0xff] }
 0x1bb   : > { %v6465_v32 = vcombine.high %v928_v26, %v936_v27  ;;  %v921_v35 = vld [vmem:[%s7552_s13 + $0x3e0] sm:$0xff] }
 0x1bc   : > { %4134 = vmatpush1.bf16.msra.mxu0 %v6400_v54  ;;  %v1248_v54 = vld [vmem:[%s7552_s13 + $0xe18] sm:$0xff] }
 0x1bd   : > { %4177 = vmatpush1.bf16.msra.mxu1 %v6656_v55  ;;  %4135 = vmatprep.subr.bf16.mxu0 %v6385_v56  ;;  %v1256_v55 = vld [vmem:[%s7552_s13 + $0xe58] sm:$0xff]  ;;  %v6544_v56 = vcombine.low %v1008_v40, %v1016_v41  ;;  %v6451_v40 = vcombine.high %v913_v34, %v921_v35 }
 0x1be   : > { %4178 = vmatprep.subr.bf16.mxu1 %v6641_v57  ;;  %v6800_v57 = vcombine.low %v1264_v46, %v1272_v47  ;;  %v6785_v59 = vcombine.high %v1248_v54, %v1256_v55  ;;  %v897_v46 = vld [vmem:[%s7552_s13 + $0x320] sm:$0xff] }
 0x1bf   : > { %v905_v47 = vld [vmem:[%s7552_s13 + $0x360] sm:$0xff] }
 0x1c0   : > { %4136 = vmatpush1.bf16.msra.mxu0 %v6384_v62  ;;  %v1232_v62 = vld [vmem:[%s7552_s13 + $0xd98] sm:$0xff] }
 0x1c1   : > { %4179 = vmatpush1.bf16.msra.mxu1 %v6640_v63  ;;  %4137 = vmatprep.subr.bf16.mxu0 %v6369_v0  ;;  %v1240_v63 = vld [vmem:[%s7552_s13 + $0xdd8] sm:$0xff]  ;;  %v6528_v0 = vcombine.low %v992_v52, %v1000_v53  ;;  %v6435_v52 = vcombine.high %v897_v46, %v905_v47  ;;  %v881_v53 = vld [vmem:[%s7552_s13 + $0x2a0] sm:$0xff] }
 0x1c2   : > { %4180 = vmatprep.subr.bf16.mxu1 %v6625_v1  ;;  %v6784_v1 = vcombine.low %v1248_v54, %v1256_v55  ;;  %v6769_v3 = vcombine.high %v1232_v62, %v1240_v63  ;;  %v889_v54 = vld [vmem:[%s7552_s13 + $0x2e0] sm:$0xff] }
 0x1c4   : > { %4138 = vmatpush1.bf16.msra.mxu0 %v6368_v6  ;;  %v1216_v6 = vld [vmem:[%s7552_s13 + $0xd18] sm:$0xff] }
 0x1c5   : > { %4181 = vmatpush1.bf16.msra.mxu1 %v6624_v7  ;;  %4139 = vmatprep.subr.bf16.mxu0 %v6353_v8  ;;  %v1224_v7 = vld [vmem:[%s7552_s13 + $0xd58] sm:$0xff]  ;;  %v6512_v8 = vcombine.low %v976_v60, %v984_v61  ;;  %v1145_v60 = vld [vmem:[%s7552_s13 + $0xae0] sm:$0xff] }
 0x1c6   : > { %4182 = vmatprep.subr.bf16.mxu1 %v6609_v9  ;;  %v6768_v9 = vcombine.low %v1232_v62, %v1240_v63  ;;  %v6753_v16 = vcombine.high %v1216_v6, %v1224_v7  ;;  %v6434_v62 = vcombine.low %v897_v46, %v905_v47  ;;  %v1089_v46 = vld [vmem:[%s7552_s13 + $0x920] sm:$0xff] }
 0x1c7   : > { %v1097_v47 = vld [vmem:[%s7552_s13 + $0x960] sm:$0xff] }
 0x1c8   : > { %4140 = vmatpush1.bf16.msra.mxu0 %v6352_v20  ;;  %v1200_v20 = vld [vmem:[%s7552_s13 + $0xc98] sm:$0xff] }
 0x1c9   : > { %4183 = vmatpush1.bf16.msra.mxu1 %v6608_v21  ;;  %4141 = vmatprep.subr.bf16.mxu0 %v6337_v22  ;;  %v1208_v21 = vld [vmem:[%s7552_s13 + $0xcd8] sm:$0xff]  ;;  %v6496_v22 = vcombine.low %v960_v4, %v968_v5 }
 0x1ca   : > { %4184 = vmatprep.subr.bf16.mxu1 %v6593_v23  ;;  %v6752_v23 = vcombine.low %v1216_v6, %v1224_v7  ;;  %v6737_v25 = vcombine.high %v1200_v20, %v1208_v21  ;;  %v865_v7 = vld [vmem:[%s7552_s13 + $0x220] sm:$0xff] }
 0x1cc   : > { %4142 = vmatpush1.bf16.msra.mxu0 %v6336_v28  ;;  %v1184_v28 = vld [vmem:[%s7552_s13 + $0xc18] sm:$0xff] }
 0x1cd   : > { %4185 = vmatpush1.bf16.msra.mxu1 %v6592_v29  ;;  %4143 = vmatprep.subr.bf16.mxu0 %v6577_v30  ;;  %v1192_v29 = vld [vmem:[%s7552_s13 + $0xc58] sm:$0xff]  ;;  %v6480_v30 = vcombine.low %v944_v18, %v952_v19  ;;  %v1121_v18 = vld [vmem:[%s7552_s13 + $0xa20] sm:$0xff] }
 0x1ce   : > { %4186 = vmatprep.subr.bf16.mxu1 %v6833_v31  ;;  %v6736_v31 = vcombine.low %v1200_v20, %v1208_v21  ;;  %v6721_v33 = vcombine.high %v1184_v28, %v1192_v29  ;;  %v1129_v19 = vld [vmem:[%s7552_s13 + $0xa60] sm:$0xff] }
 0x1d0   : > { %4144 = vmatpush2.bf16.msra.mxu0 %v6576_v36  ;;  %v1169_v36 = vld [vmem:[%s7552_s13 + $0xba0] sm:$0xff] }
 0x1d1   : > { %4187 = vmatpush2.bf16.msra.mxu1 %v6832_v37  ;;  %4145 = vmatprep.subr.bf16.mxu0 %v6561_v38  ;;  %v1177_v37 = vld [vmem:[%s7552_s13 + $0xbe0] sm:$0xff]  ;;  %v6464_v38 = vcombine.low %v928_v26, %v936_v27 }
 0x1d2   : > { %4188 = vmatprep.subr.bf16.mxu1 %v6817_v39  ;;  %v6720_v39 = vcombine.low %v1184_v28, %v1192_v29  ;;  %v6707_v41 = vcombine.high %v1169_v36, %v1177_v37 }
 0x1d4   : > { %4146 = vmatpush2.bf16.msra.mxu0 %v6560_v48  ;;  %v6450_v48 = vcombine.low %v913_v34, %v921_v35  ;;  %v1113_v34 = vld [vmem:[%s7552_s13 + $0x9e0] sm:$0xff] }
 0x1d5   : > { %4189 = vmatpush2.bf16.msra.mxu1 %v6816_v49  ;;  %4147 = vmatprep.subr.bf16.mxu0 %v6545_v50  ;;  %v1153_v49 = vld [vmem:[%s7552_s13 + $0xb20] sm:$0xff] }
 0x1d6   : > { %4190 = vmatprep.subr.bf16.mxu1 %v6801_v51  ;;  %v1161_v50 = vld [vmem:[%s7552_s13 + $0xb60] sm:$0xff]  ;;  %v6706_v51 = vcombine.low %v1169_v36, %v1177_v37  ;;  %v6658_v37 = vcombine.low %v1121_v18, %v1129_v19 }
 0x1d8   : > { %4148 = vmatpush2.bf16.msra.mxu0 %v6544_v56  ;;  %v761_v56 = vld [vmem:[#allocation2 + $0xb0] sm:$0xff] }
 0x1d9   : > { %4191 = vmatpush2.bf16.msra.mxu1 %v6800_v57  ;;  %4149 = vmatprep.subr.bf16.mxu0 %v6529_v58  ;;  %v6691_v58 = vcombine.high %v1153_v49, %v1161_v50 }
 0x1da   : > { %4192 = vmatprep.subr.bf16.mxu1 %v6785_v59  ;;  %v1137_v59 = vld [vmem:[%s7552_s13 + $0xaa0] sm:$0xff] }
 0x1db   : > { %v6675_v6 = vcombine.high %v1137_v59, %v1145_v60  ;;  %v6674_v26 = vcombine.low %v1137_v59, %v1145_v60  ;;  %v801_v60 = vld [vmem:[%s7552_s13 + $0x20] sm:$0xff] }
 0x1dc   : > { %4150 = vmatpush2.bf16.msra.mxu0 %v6528_v0  ;;  %v762_v0 = vld [vmem:[#allocation2] sm:$0xff] }
 0x1dd   : > { %4193 = vmatpush2.bf16.msra.mxu1 %v6784_v1  ;;  %4151 = vmatprep.subr.bf16.mxu0 %v6513_v2  ;;  %v6690_v2 = vcombine.low %v1153_v49, %v1161_v50 }
 0x1de   : > { %4194 = vmatprep.subr.bf16.mxu1 %v6769_v3  ;;  %v6419_v3 = vcombine.high %v881_v53, %v889_v54 }
 0x1e0   : > { %4152 = vmatpush2.bf16.msra.mxu0 %v6512_v8  ;;  %v873_v8 = vld [vmem:[%s7552_s13 + $0x260] sm:$0xff] }
 0x1e1   : > { %4195 = vmatpush2.bf16.msra.mxu1 %v6768_v9  ;;  %4153 = vmatprep.subr.bf16.mxu0 %v6497_v10  ;;  %v777_v10 = vld [vmem:[#allocation2 + $0x38] sm:$0xff]  ;;  %v6403_v27 = vcombine.high %v865_v7, %v873_v8  ;;  %v6402_v36 = vcombine.low %v865_v7, %v873_v8  ;;  %v1305_v7 = vld [vmem:[%s7552_s13 + $0xfe0] sm:$0xff] }
 0x1e2   : > { %4196 = vmatprep.subr.bf16.mxu1 %v6753_v16 }
 0x1e4   : > { %4154 = vmatpush2.bf16.msra.mxu0 %v6496_v22  ;;  %v6418_v22 = vcombine.low %v881_v53, %v889_v54  ;;  %v825_v53 = vld [vmem:[%s7552_s13 + $0xe0] sm:$0xff] }
 0x1e5   : > { %4197 = vmatpush2.bf16.msra.mxu1 %v6752_v23  ;;  %4155 = vmatprep.subr.bf16.mxu0 %v6481_v24  ;;  %v778_v24 = vld [vmem:[#allocation2 + $0x58] sm:$0xff]  ;;  %v1073_v54 = vld [vmem:[%s7552_s13 + $0x8a0] sm:$0xff] }
 0x1e6   : > { %4198 = vmatprep.subr.bf16.mxu1 %v6737_v25 }
 0x1e8   : > { %4156 = vmatpush2.bf16.msra.mxu0 %v6480_v30  ;;  %v6659_v30 = vcombine.high %v1121_v18, %v1129_v19  ;;  %v1025_v18 = vld [vmem:[%s7552_s13 + $0x720] sm:$0xff] }
 0x1e9   : > { %4199 = vmatpush2.bf16.msra.mxu1 %v6736_v31  ;;  %4157 = vmatprep.subr.bf16.mxu0 %v6465_v32  ;;  %v849_v31 = vld [vmem:[%s7552_s13 + $0x1a0] sm:$0xff] }
 0x1ea   : > { %4200 = vmatprep.subr.bf16.mxu1 %v6721_v33  ;;  %v857_v32 = vld [vmem:[%s7552_s13 + $0x1e0] sm:$0xff] }
 0x1eb   : > { %v1105_v33 = vld [vmem:[%s7552_s13 + $0x9a0] sm:$0xff] }
 0x1ec   : > { %4158 = vmatpush2.bf16.msra.mxu0 %v6464_v38  ;;  %v6387_v38 = vcombine.high %v849_v31, %v857_v32  ;;  %v6642_v49 = vcombine.low %v1105_v33, %v1113_v34  ;;  %v1033_v19 = vld [vmem:[%s7552_s13 + $0x760] sm:$0xff] }
 0x1ed   : > { %4201 = vmatpush2.bf16.msra.mxu1 %v6720_v39  ;;  %4213 = vmatprep.subr.bf16.mxu0 %v6451_v40  ;;  %v6643_v39 = vcombine.high %v1105_v33, %v1113_v34  ;;  %v833_v40 = vld [vmem:[%s7552_s13 + $0x120] sm:$0xff] }
 0x1ee   : > { %4256 = vmatprep.subr.bf16.mxu1 %v6707_v41  ;;  %v841_v41 = vld [vmem:[%s7552_s13 + $0x160] sm:$0xff] }
 0x1ef   : > { %4160 = vmatmul.mubr.bf16.vlgmr.msra.gmra.mxu0 %v7692_v44  ;;  %v3903_v55 = vpop.f32.mrf.mxu0  ;;  %v3946_v57 = vpop.f32.mrf.mxu1  ;;  %v6371_v50 = vcombine.high %v833_v40, %v841_v41  ;;  %v993_v34 = vld [vmem:[%s7552_s13 + $0x620] sm:$0xff] }
 0x1f0   : > { %4203 = vmatmul.mubr.bf16.vlgmr.msra.gmra.mxu1 %v7694_v45  ;;  %v3947_v61 = vadd.f32 %v3946_v57, %v3903_v55  ;;  %4214 = vmatpush1.bf16.msra.mxu0 %v6450_v48  ;;  %v6386_v48 = vcombine.low %v849_v31, %v857_v32  ;;  %v1081_v55 = vld [vmem:[%s7552_s13 + $0x8e0] sm:$0xff]  ;;  %v6626_v57 = vcombine.low %v1089_v46, %v1097_v47 }
 0x1f1   : > { %4245 = vmatprep.mubr.bf16.mxu0 %v7688_v42  ;;  %4257 = vmatpush1.bf16.msra.mxu1 %v6706_v51  ;;  %v3905_v63 = vpop.f32.mrf.mxu0  ;;  %v3948_v1 = vpop.f32.mrf.mxu1  ;;  %v6627_v51 = vcombine.high %v1089_v46, %v1097_v47  ;;  %v6611_v59 = vcombine.high %v1073_v54, %v1081_v55  ;;  %v977_v46 = vld [vmem:[%s7552_s13 + $0x5a0] sm:$0xff] }
 0x1f2   : > { %v4557_v4 = vadd.f32 %v3947_v61, %v761_v56  ;;  %4288 = vmatprep.mubr.bf16.mxu1 %v7690_v43  ;;  %v3949_v5 = vadd.f32 %v3948_v1, %v3905_v63  ;;  %4215 = vmatprep.subr.bf16.mxu0 %v6435_v52  ;;  %v817_v52 = vld [vmem:[%s7552_s13 + $0xa0] sm:$0xff]  ;;  %v6370_v56 = vcombine.low %v833_v40, %v841_v41 }
 0x1f3   : > { %4258 = vmatprep.subr.bf16.mxu1 %v6691_v58  ;;  %v3907_v9 = vpop.f32.mrf.mxu0  ;;  %v3950_v16 = vpop.f32.mrf.mxu1  ;;  %v6355_v58 = vcombine.high %v817_v52, %v825_v53  ;;  %v809_v61 = vld [vmem:[%s7552_s13 + $0x60] sm:$0xff]  ;;  %v6610_v1 = vcombine.low %v1073_v54, %v1081_v55 }
 0x1f4   : > { %4589 = vst [vmem:[#allocation2 + $0xb0] sm:$0xff] %v4557_v4  ;;  %v4558_v20 = vadd.f32 %v3949_v5, %v762_v0  ;;  %v3951_v21 = vadd.f32 %v3950_v16, %v3907_v9  ;;  %4216 = vmatpush1.bf16.msra.mxu0 %v6434_v62  ;;  %v1057_v62 = vld [vmem:[%s7552_s13 + $0x820] sm:$0xff]  ;;  %v6354_v0 = vcombine.low %v817_v52, %v825_v53 }
 0x1f5   : > { %4259 = vmatpush1.bf16.msra.mxu1 %v6690_v2  ;;  %v3909_v23 = vpop.f32.mrf.mxu0  ;;  %v3952_v25 = vpop.f32.mrf.mxu1  ;;  %4217 = vmatprep.subr.bf16.mxu0 %v6419_v3  ;;  %v1065_v63 = vld [vmem:[%s7552_s13 + $0x860] sm:$0xff]  ;;  %v6339_v2 = vcombine.high %v801_v60, %v809_v61  ;;  %v6338_v8 = vcombine.low %v801_v60, %v809_v61 }
 0x1f6   : > { %4590 = vst [vmem:[#allocation2] sm:$0xff] %v4558_v20  ;;  %v4573_v28 = vadd.f32 %v3951_v21, %v777_v10  ;;  %v3953_v29 = vadd.f32 %v3952_v25, %v3909_v23  ;;  %4260 = vmatprep.subr.bf16.mxu1 %v6675_v6  ;;  %v6595_v3 = vcombine.high %v1057_v62, %v1065_v63  ;;  %v1041_v4 = vld [vmem:[%s7552_s13 + $0x7a0] sm:$0xff] }
 0x1f7   : > { %v1049_v5 = vld [vmem:[%s7552_s13 + $0x7e0] sm:$0xff]  ;;  %v6594_v9 = vcombine.low %v1057_v62, %v1065_v63 }
 0x1f8   : > { %4605 = vst [vmem:[#allocation2 + $0x38] sm:$0xff] %v4573_v28  ;;  %v4574_v35 = vadd.f32 %v3953_v29, %v778_v24  ;;  %4218 = vmatpush1.bf16.msra.mxu0 %v6418_v22  ;;  %v1297_v6 = vld [vmem:[%s7552_s13 + $0xfa0] sm:$0xff]  ;;  %v6579_v10 = vcombine.high %v1041_v4, %v1049_v5  ;;  %v6578_v22 = vcombine.low %v1041_v4, %v1049_v5 }
 0x1f9   : > { %4261 = vmatpush1.bf16.msra.mxu1 %v6674_v26  ;;  %4219 = vmatprep.subr.bf16.mxu0 %v6403_v27  ;;  %v6835_v16 = vcombine.high %v1297_v6, %v1305_v7  ;;  %v1281_v20 = vld [vmem:[%s7552_s13 + $0xf20] sm:$0xff]  ;;  %v6834_v23 = vcombine.low %v1297_v6, %v1305_v7  ;;  %v6563_v24 = vcombine.high %v1025_v18, %v1033_v19 }
 0x1fa   : > { %4606 = vst [vmem:[#allocation2 + $0x58] sm:$0xff] %v4574_v35  ;;  %4262 = vmatprep.subr.bf16.mxu1 %v6659_v30  ;;  %v1289_v21 = vld [vmem:[%s7552_s13 + $0xf60] sm:$0xff]  ;;  %v6562_v30 = vcombine.low %v1025_v18, %v1033_v19 }
 0x1fb   : > { %v6819_v25 = vcombine.high %v1281_v20, %v1289_v21  ;;  %v1009_v26 = vld [vmem:[%s7552_s13 + $0x6a0] sm:$0xff]  ;;  %v6818_v31 = vcombine.low %v1281_v20, %v1289_v21  ;;  %v914_v20 = vld [vmem:[%s7552_s13 + $0x3a8] sm:$0xff] }
 0x1fc   : > { %4220 = vmatpush1.bf16.msra.mxu0 %v6402_v36  ;;  %v1017_v27 = vld [vmem:[%s7552_s13 + $0x6e0] sm:$0xff]  ;;  %v922_v21 = vld [vmem:[%s7552_s13 + $0x3e8] sm:$0xff] }
 0x1fd   : > { %4263 = vmatpush1.bf16.msra.mxu1 %v6658_v37  ;;  %4221 = vmatprep.subr.bf16.mxu0 %v6387_v38  ;;  %v1265_v28 = vld [vmem:[%s7552_s13 + $0xea0] sm:$0xff]  ;;  %v6547_v32 = vcombine.high %v1009_v26, %v1017_v27  ;;  %v6546_v38 = vcombine.low %v1009_v26, %v1017_v27  ;;  %v6453_v26 = vcombine.high %v914_v20, %v922_v21 }
 0x1fe   : > { %4264 = vmatprep.subr.bf16.mxu1 %v6643_v39  ;;  %v1273_v29 = vld [vmem:[%s7552_s13 + $0xee0] sm:$0xff] }
 0x1ff   : > { %v6803_v33 = vcombine.high %v1265_v28, %v1273_v29  ;;  %v1001_v35 = vld [vmem:[%s7552_s13 + $0x660] sm:$0xff]  ;;  %v6802_v39 = vcombine.low %v1265_v28, %v1273_v29  ;;  %v898_v28 = vld [vmem:[%s7552_s13 + $0x328] sm:$0xff] }
 0x200   : > { %4222 = vmatpush1.bf16.msra.mxu0 %v6386_v48  ;;  %v1249_v36 = vld [vmem:[%s7552_s13 + $0xe20] sm:$0xff]  ;;  %v6531_v40 = vcombine.high %v993_v34, %v1001_v35  ;;  %v906_v29 = vld [vmem:[%s7552_s13 + $0x368] sm:$0xff] }
 0x201   : > { %4265 = vmatpush1.bf16.msra.mxu1 %v6642_v49  ;;  %4223 = vmatprep.subr.bf16.mxu0 %v6371_v50  ;;  %v1257_v37 = vld [vmem:[%s7552_s13 + $0xe60] sm:$0xff]  ;;  %v6530_v50 = vcombine.low %v993_v34, %v1001_v35  ;;  %v6437_v34 = vcombine.high %v898_v28, %v906_v29  ;;  %v882_v35 = vld [vmem:[%s7552_s13 + $0x2a8] sm:$0xff] }
 0x202   : > { %4266 = vmatprep.subr.bf16.mxu1 %v6627_v51  ;;  %v6787_v41 = vcombine.high %v1249_v36, %v1257_v37  ;;  %v985_v47 = vld [vmem:[%s7552_s13 + $0x5e0] sm:$0xff]  ;;  %v6786_v51 = vcombine.low %v1249_v36, %v1257_v37  ;;  %v890_v36 = vld [vmem:[%s7552_s13 + $0x2e8] sm:$0xff] }
 0x203   : > { %v1233_v48 = vld [vmem:[%s7552_s13 + $0xda0] sm:$0xff]  ;;  %v6515_v52 = vcombine.high %v977_v46, %v985_v47 }
 0x204   : > { %4224 = vmatpush1.bf16.msra.mxu0 %v6370_v56  ;;  %v1241_v49 = vld [vmem:[%s7552_s13 + $0xde0] sm:$0xff] }
 0x205   : > { %4267 = vmatpush1.bf16.msra.mxu1 %v6626_v57  ;;  %4225 = vmatprep.subr.bf16.mxu0 %v6355_v58  ;;  %v6771_v53 = vcombine.high %v1233_v48, %v1241_v49  ;;  %v961_v54 = vld [vmem:[%s7552_s13 + $0x520] sm:$0xff]  ;;  %v6514_v58 = vcombine.low %v977_v46, %v985_v47  ;;  %v1146_v46 = vld [vmem:[%s7552_s13 + $0xae8] sm:$0xff] }
 0x206   : > { %4268 = vmatprep.subr.bf16.mxu1 %v6611_v59  ;;  %v969_v55 = vld [vmem:[%s7552_s13 + $0x560] sm:$0xff]  ;;  %v6770_v59 = vcombine.low %v1233_v48, %v1241_v49  ;;  %v6436_v48 = vcombine.low %v898_v28, %v906_v29  ;;  %v1090_v28 = vld [vmem:[%s7552_s13 + $0x928] sm:$0xff] }
 0x207   : > { %v1217_v56 = vld [vmem:[%s7552_s13 + $0xd20] sm:$0xff]  ;;  %v6499_v60 = vcombine.high %v961_v54, %v969_v55  ;;  %v1098_v29 = vld [vmem:[%s7552_s13 + $0x968] sm:$0xff] }
 0x208   : > { %4226 = vmatpush1.bf16.msra.mxu0 %v6354_v0  ;;  %v1225_v57 = vld [vmem:[%s7552_s13 + $0xd60] sm:$0xff] }
 0x209   : > { %4269 = vmatpush1.bf16.msra.mxu1 %v6610_v1  ;;  %4227 = vmatprep.subr.bf16.mxu0 %v6339_v2  ;;  %v6755_v61 = vcombine.high %v1217_v56, %v1225_v57  ;;  %v945_v62 = vld [vmem:[%s7552_s13 + $0x4a0] sm:$0xff]  ;;  %v6498_v2 = vcombine.low %v961_v54, %v969_v55 }
 0x20a   : > { %4270 = vmatprep.subr.bf16.mxu1 %v6595_v3  ;;  %v953_v63 = vld [vmem:[%s7552_s13 + $0x4e0] sm:$0xff]  ;;  %v6754_v3 = vcombine.low %v1217_v56, %v1225_v57  ;;  %v866_v57 = vld [vmem:[%s7552_s13 + $0x228] sm:$0xff] }
 0x20b   : > { %v1201_v0 = vld [vmem:[%s7552_s13 + $0xca0] sm:$0xff]  ;;  %v6483_v4 = vcombine.high %v945_v62, %v953_v63 }
 0x20c   : > { %4228 = vmatpush1.bf16.msra.mxu0 %v6338_v8  ;;  %v1209_v1 = vld [vmem:[%s7552_s13 + $0xce0] sm:$0xff] }
 0x20d   : > { %4271 = vmatpush1.bf16.msra.mxu1 %v6594_v9  ;;  %4229 = vmatprep.subr.bf16.mxu0 %v6579_v10  ;;  %v6739_v5 = vcombine.high %v1201_v0, %v1209_v1  ;;  %v929_v6 = vld [vmem:[%s7552_s13 + $0x420] sm:$0xff]  ;;  %v6482_v10 = vcombine.low %v945_v62, %v953_v63  ;;  %v1122_v62 = vld [vmem:[%s7552_s13 + $0xa28] sm:$0xff] }
 0x20e   : > { %4272 = vmatprep.subr.bf16.mxu1 %v6835_v16  ;;  %v937_v7 = vld [vmem:[%s7552_s13 + $0x460] sm:$0xff]  ;;  %v6738_v16 = vcombine.low %v1201_v0, %v1209_v1  ;;  %v1130_v63 = vld [vmem:[%s7552_s13 + $0xa68] sm:$0xff] }
 0x20f   : > { %v1185_v8 = vld [vmem:[%s7552_s13 + $0xc20] sm:$0xff]  ;;  %v6467_v18 = vcombine.high %v929_v6, %v937_v7 }
 0x210   : > { %4230 = vmatpush2.bf16.msra.mxu0 %v6578_v22  ;;  %v1193_v9 = vld [vmem:[%s7552_s13 + $0xc60] sm:$0xff]  ;;  %v1170_v22 = vld [vmem:[%s7552_s13 + $0xba8] sm:$0xff] }
 0x211   : > { %4273 = vmatpush2.bf16.msra.mxu1 %v6834_v23  ;;  %4231 = vmatprep.subr.bf16.mxu0 %v6563_v24  ;;  %v6723_v19 = vcombine.high %v1185_v8, %v1193_v9  ;;  %v1178_v23 = vld [vmem:[%s7552_s13 + $0xbe8] sm:$0xff]  ;;  %v6466_v24 = vcombine.low %v929_v6, %v937_v7 }
 0x212   : > { %4274 = vmatprep.subr.bf16.mxu1 %v6819_v25  ;;  %v6722_v25 = vcombine.low %v1185_v8, %v1193_v9  ;;  %v6709_v27 = vcombine.high %v1170_v22, %v1178_v23 }
 0x214   : > { %4232 = vmatpush2.bf16.msra.mxu0 %v6562_v30  ;;  %v6452_v30 = vcombine.low %v914_v20, %v922_v21  ;;  %v1114_v20 = vld [vmem:[%s7552_s13 + $0x9e8] sm:$0xff] }
 0x215   : > { %4275 = vmatpush2.bf16.msra.mxu1 %v6818_v31  ;;  %4233 = vmatprep.subr.bf16.mxu0 %v6547_v32  ;;  %v1154_v31 = vld [vmem:[%s7552_s13 + $0xb28] sm:$0xff] }
 0x216   : > { %4276 = vmatprep.subr.bf16.mxu1 %v6803_v33  ;;  %v1162_v32 = vld [vmem:[%s7552_s13 + $0xb68] sm:$0xff]  ;;  %v6708_v33 = vcombine.low %v1170_v22, %v1178_v23  ;;  %v6660_v23 = vcombine.low %v1122_v62, %v1130_v63 }
 0x218   : > { %4234 = vmatpush2.bf16.msra.mxu0 %v6546_v38  ;;  %v763_v38 = vld [vmem:[#allocation2 + $0xd8] sm:$0xff] }
 0x219   : > { %4277 = vmatpush2.bf16.msra.mxu1 %v6802_v39  ;;  %4235 = vmatprep.subr.bf16.mxu0 %v6531_v40  ;;  %v6693_v40 = vcombine.high %v1154_v31, %v1162_v32 }
 0x21a   : > { %4278 = vmatprep.subr.bf16.mxu1 %v6787_v41  ;;  %v1138_v41 = vld [vmem:[%s7552_s13 + $0xaa8] sm:$0xff] }
 0x21b   : > { %v6677_v56 = vcombine.high %v1138_v41, %v1146_v46  ;;  %v6676_v6 = vcombine.low %v1138_v41, %v1146_v46  ;;  %v802_v46 = vld [vmem:[%s7552_s13 + $0x28] sm:$0xff] }
 0x21c   : > { %4236 = vmatpush2.bf16.msra.mxu0 %v6530_v50  ;;  %v764_v50 = vld [vmem:[#allocation2 + $0x18] sm:$0xff] }
 0x21d   : > { %4279 = vmatpush2.bf16.msra.mxu1 %v6786_v51  ;;  %4237 = vmatprep.subr.bf16.mxu0 %v6515_v52  ;;  %v6692_v52 = vcombine.low %v1154_v31, %v1162_v32 }
 0x21e   : > { %4280 = vmatprep.subr.bf16.mxu1 %v6771_v53  ;;  %v6421_v53 = vcombine.high %v882_v35, %v890_v36 }
 0x220   : > { %4238 = vmatpush2.bf16.msra.mxu0 %v6514_v58  ;;  %v874_v58 = vld [vmem:[%s7552_s13 + $0x268] sm:$0xff] }
 0x221   : > { %4281 = vmatpush2.bf16.msra.mxu1 %v6770_v59  ;;  %4239 = vmatprep.subr.bf16.mxu0 %v6499_v60  ;;  %v779_v60 = vld [vmem:[#allocation2 + $0x40] sm:$0xff]  ;;  %v6405_v7 = vcombine.high %v866_v57, %v874_v58  ;;  %v6404_v22 = vcombine.low %v866_v57, %v874_v58  ;;  %v1306_v57 = vld [vmem:[%s7552_s13 + $0xfe8] sm:$0xff] }
 0x222   : > { %4282 = vmatprep.subr.bf16.mxu1 %v6755_v61 }
 0x224   : > { %4240 = vmatpush2.bf16.msra.mxu0 %v6498_v2  ;;  %v6420_v2 = vcombine.low %v882_v35, %v890_v36  ;;  %v826_v35 = vld [vmem:[%s7552_s13 + $0xe8] sm:$0xff] }
 0x225   : > { %4283 = vmatpush2.bf16.msra.mxu1 %v6754_v3  ;;  %4241 = vmatprep.subr.bf16.mxu0 %v6483_v4  ;;  %v780_v4 = vld [vmem:[#allocation2 + $0xc8] sm:$0xff] }
 0x226   : > { %4284 = vmatprep.subr.bf16.mxu1 %v6739_v5  ;;  %v1074_v36 = vld [vmem:[%s7552_s13 + $0x8a8] sm:$0xff] }
 0x228   : > { %4242 = vmatpush2.bf16.msra.mxu0 %v6482_v10  ;;  %v6661_v10 = vcombine.high %v1122_v62, %v1130_v63  ;;  %v1026_v62 = vld [vmem:[%s7552_s13 + $0x728] sm:$0xff] }
 0x229   : > { %4285 = vmatpush2.bf16.msra.mxu1 %v6738_v16  ;;  %4243 = vmatprep.subr.bf16.mxu0 %v6467_v18  ;;  %v850_v16 = vld [vmem:[%s7552_s13 + $0x1a8] sm:$0xff] }
 0x22a   : > { %4286 = vmatprep.subr.bf16.mxu1 %v6723_v19  ;;  %v858_v18 = vld [vmem:[%s7552_s13 + $0x1e8] sm:$0xff] }
 0x22b   : > { %v1106_v19 = vld [vmem:[%s7552_s13 + $0x9a8] sm:$0xff] }
 0x22c   : > { %4244 = vmatpush2.bf16.msra.mxu0 %v6466_v24  ;;  %v6389_v24 = vcombine.high %v850_v16, %v858_v18  ;;  %v6644_v31 = vcombine.low %v1106_v19, %v1114_v20  ;;  %v1034_v63 = vld [vmem:[%s7552_s13 + $0x768] sm:$0xff] }
 0x22d   : > { %4287 = vmatpush2.bf16.msra.mxu1 %v6722_v25  ;;  %4299 = vmatprep.subr.bf16.mxu0 %v6453_v26  ;;  %v6645_v25 = vcombine.high %v1106_v19, %v1114_v20  ;;  %v834_v26 = vld [vmem:[%s7552_s13 + $0x128] sm:$0xff] }
 0x22e   : > { %4342 = vmatprep.subr.bf16.mxu1 %v6709_v27  ;;  %v842_v27 = vld [vmem:[%s7552_s13 + $0x168] sm:$0xff] }
 0x22f   : > { %v3989_v37 = vpop.f32.mrf.mxu0  ;;  %v4032_v39 = vpop.f32.mrf.mxu1  ;;  %4246 = vmatmul.mubr.bf16.vlgmr.msra.gmra.mxu0 %v7692_v44  ;;  %v6373_v32 = vcombine.high %v834_v26, %v842_v27  ;;  %v994_v20 = vld [vmem:[%s7552_s13 + $0x628] sm:$0xff] }
 0x230   : > { %v4033_v47 = vadd.f32 %v4032_v39, %v3989_v37  ;;  %4289 = vmatmul.mubr.bf16.vlgmr.msra.gmra.mxu1 %v7694_v45  ;;  %4300 = vmatpush1.bf16.msra.mxu0 %v6452_v30  ;;  %v6388_v30 = vcombine.low %v850_v16, %v858_v18  ;;  %v1082_v37 = vld [vmem:[%s7552_s13 + $0x8e8] sm:$0xff]  ;;  %v6628_v39 = vcombine.low %v1090_v28, %v1098_v29 }
 0x231   : > { %4331 = vmatprep.mubr.bf16.mxu0 %v7688_v42  ;;  %4343 = vmatpush1.bf16.msra.mxu1 %v6708_v33  ;;  %v3991_v49 = vpop.f32.mrf.mxu0  ;;  %v4034_v51 = vpop.f32.mrf.mxu1  ;;  %v6629_v33 = vcombine.high %v1090_v28, %v1098_v29  ;;  %v6613_v41 = vcombine.high %v1074_v36, %v1082_v37  ;;  %v978_v28 = vld [vmem:[%s7552_s13 + $0x5a8] sm:$0xff] }
 0x232   : > { %v4559_v54 = vadd.f32 %v4033_v47, %v763_v38  ;;  %4374 = vmatprep.mubr.bf16.mxu1 %v7690_v43  ;;  %v4035_v55 = vadd.f32 %v4034_v51, %v3991_v49  ;;  %4301 = vmatprep.subr.bf16.mxu0 %v6437_v34  ;;  %v818_v34 = vld [vmem:[%s7552_s13 + $0xa8] sm:$0xff]  ;;  %v6372_v38 = vcombine.low %v834_v26, %v842_v27 }
 0x233   : > { %v3993_v59 = vpop.f32.mrf.mxu0  ;;  %v4036_v61 = vpop.f32.mrf.mxu1  ;;  %4344 = vmatprep.subr.bf16.mxu1 %v6693_v40  ;;  %v6357_v40 = vcombine.high %v818_v34, %v826_v35  ;;  %v810_v47 = vld [vmem:[%s7552_s13 + $0x68] sm:$0xff]  ;;  %v6612_v51 = vcombine.low %v1074_v36, %v1082_v37 }
 0x234   : > { %4591 = vst [vmem:[#allocation2 + $0xd8] sm:$0xff] %v4559_v54  ;;  %v4560_v0 = vadd.f32 %v4035_v55, %v764_v50  ;;  %v4037_v1 = vadd.f32 %v4036_v61, %v3993_v59  ;;  %4302 = vmatpush1.bf16.msra.mxu0 %v6436_v48  ;;  %v1058_v48 = vld [vmem:[%s7552_s13 + $0x828] sm:$0xff]  ;;  %v6356_v50 = vcombine.low %v818_v34, %v826_v35 }
 0x235   : > { %4345 = vmatpush1.bf16.msra.mxu1 %v6692_v52  ;;  %v3995_v3 = vpop.f32.mrf.mxu0  ;;  %v4038_v5 = vpop.f32.mrf.mxu1  ;;  %4303 = vmatprep.subr.bf16.mxu0 %v6421_v53  ;;  %v1066_v49 = vld [vmem:[%s7552_s13 + $0x868] sm:$0xff]  ;;  %v6341_v52 = vcombine.high %v802_v46, %v810_v47  ;;  %v6340_v58 = vcombine.low %v802_v46, %v810_v47 }
 0x236   : > { %4592 = vst [vmem:[#allocation2 + $0x18] sm:$0xff] %v4560_v0  ;;  %v4575_v8 = vadd.f32 %v4037_v1, %v779_v60  ;;  %v4039_v9 = vadd.f32 %v4038_v5, %v3995_v3  ;;  %4346 = vmatprep.subr.bf16.mxu1 %v6677_v56  ;;  %v6597_v53 = vcombine.high %v1058_v48, %v1066_v49  ;;  %v1042_v54 = vld [vmem:[%s7552_s13 + $0x7a8] sm:$0xff] }
 0x237   : > { %v1050_v55 = vld [vmem:[%s7552_s13 + $0x7e8] sm:$0xff]  ;;  %v6596_v59 = vcombine.low %v1058_v48, %v1066_v49 }
 0x238   : > { %4607 = vst [vmem:[#allocation2 + $0x40] sm:$0xff] %v4575_v8  ;;  %v4576_v21 = vadd.f32 %v4039_v9, %v780_v4  ;;  %4304 = vmatpush1.bf16.msra.mxu0 %v6420_v2  ;;  %v1298_v56 = vld [vmem:[%s7552_s13 + $0xfa8] sm:$0xff]  ;;  %v6581_v60 = vcombine.high %v1042_v54, %v1050_v55  ;;  %v6580_v2 = vcombine.low %v1042_v54, %v1050_v55 }
 0x239   : > { %4347 = vmatpush1.bf16.msra.mxu1 %v6676_v6  ;;  %4305 = vmatprep.subr.bf16.mxu0 %v6405_v7  ;;  %v6837_v61 = vcombine.high %v1298_v56, %v1306_v57  ;;  %v1282_v0 = vld [vmem:[%s7552_s13 + $0xf28] sm:$0xff]  ;;  %v6836_v3 = vcombine.low %v1298_v56, %v1306_v57  ;;  %v6565_v4 = vcombine.high %v1026_v62, %v1034_v63 }
 0x23a   : > { %4608 = vst [vmem:[#allocation2 + $0xc8] sm:$0xff] %v4576_v21  ;;  %4348 = vmatprep.subr.bf16.mxu1 %v6661_v10  ;;  %v1290_v1 = vld [vmem:[%s7552_s13 + $0xf68] sm:$0xff]  ;;  %v6564_v10 = vcombine.low %v1026_v62, %v1034_v63 }
 0x23b   : > { %v6821_v5 = vcombine.high %v1282_v0, %v1290_v1  ;;  %v1010_v6 = vld [vmem:[%s7552_s13 + $0x6a8] sm:$0xff]  ;;  %v6820_v16 = vcombine.low %v1282_v0, %v1290_v1  ;;  %v915_v0 = vld [vmem:[%s7552_s13 + $0x3b0] sm:$0xff] }
 0x23c   : > { %4306 = vmatpush1.bf16.msra.mxu0 %v6404_v22  ;;  %v1018_v7 = vld [vmem:[%s7552_s13 + $0x6e8] sm:$0xff]  ;;  %v923_v1 = vld [vmem:[%s7552_s13 + $0x3f0] sm:$0xff] }
 0x23d   : > { %4349 = vmatpush1.bf16.msra.mxu1 %v6660_v23  ;;  %4307 = vmatprep.subr.bf16.mxu0 %v6389_v24  ;;  %v1266_v8 = vld [vmem:[%s7552_s13 + $0xea8] sm:$0xff]  ;;  %v6549_v18 = vcombine.high %v1010_v6, %v1018_v7  ;;  %v6548_v24 = vcombine.low %v1010_v6, %v1018_v7  ;;  %v6455_v6 = vcombine.high %v915_v0, %v923_v1 }
 0x23e   : > { %4350 = vmatprep.subr.bf16.mxu1 %v6645_v25  ;;  %v1274_v9 = vld [vmem:[%s7552_s13 + $0xee8] sm:$0xff] }
 0x23f   : > { %v6805_v19 = vcombine.high %v1266_v8, %v1274_v9  ;;  %v1002_v21 = vld [vmem:[%s7552_s13 + $0x668] sm:$0xff]  ;;  %v6804_v25 = vcombine.low %v1266_v8, %v1274_v9  ;;  %v899_v8 = vld [vmem:[%s7552_s13 + $0x330] sm:$0xff] }
 0x240   : > { %4308 = vmatpush1.bf16.msra.mxu0 %v6388_v30  ;;  %v1250_v22 = vld [vmem:[%s7552_s13 + $0xe28] sm:$0xff]  ;;  %v6533_v26 = vcombine.high %v994_v20, %v1002_v21  ;;  %v907_v9 = vld [vmem:[%s7552_s13 + $0x370] sm:$0xff] }
 0x241   : > { %4351 = vmatpush1.bf16.msra.mxu1 %v6644_v31  ;;  %4309 = vmatprep.subr.bf16.mxu0 %v6373_v32  ;;  %v1258_v23 = vld [vmem:[%s7552_s13 + $0xe68] sm:$0xff]  ;;  %v6532_v32 = vcombine.low %v994_v20, %v1002_v21  ;;  %v6439_v20 = vcombine.high %v899_v8, %v907_v9  ;;  %v883_v21 = vld [vmem:[%s7552_s13 + $0x2b0] sm:$0xff] }
 0x242   : > { %4352 = vmatprep.subr.bf16.mxu1 %v6629_v33  ;;  %v6789_v27 = vcombine.high %v1250_v22, %v1258_v23  ;;  %v986_v29 = vld [vmem:[%s7552_s13 + $0x5e8] sm:$0xff]  ;;  %v6788_v33 = vcombine.low %v1250_v22, %v1258_v23  ;;  %v891_v22 = vld [vmem:[%s7552_s13 + $0x2f0] sm:$0xff] }
 0x243   : > { %v1234_v30 = vld [vmem:[%s7552_s13 + $0xda8] sm:$0xff]  ;;  %v6517_v34 = vcombine.high %v978_v28, %v986_v29 }
 0x244   : > { %4310 = vmatpush1.bf16.msra.mxu0 %v6372_v38  ;;  %v1242_v31 = vld [vmem:[%s7552_s13 + $0xde8] sm:$0xff] }
 0x245   : > { %4353 = vmatpush1.bf16.msra.mxu1 %v6628_v39  ;;  %4311 = vmatprep.subr.bf16.mxu0 %v6357_v40  ;;  %v6773_v35 = vcombine.high %v1234_v30, %v1242_v31  ;;  %v962_v36 = vld [vmem:[%s7552_s13 + $0x528] sm:$0xff]  ;;  %v6516_v40 = vcombine.low %v978_v28, %v986_v29  ;;  %v6438_v29 = vcombine.low %v899_v8, %v907_v9  ;;  %v1091_v8 = vld [vmem:[%s7552_s13 + $0x930] sm:$0xff] }
 0x246   : > { %4354 = vmatprep.subr.bf16.mxu1 %v6613_v41  ;;  %v970_v37 = vld [vmem:[%s7552_s13 + $0x568] sm:$0xff]  ;;  %v6772_v41 = vcombine.low %v1234_v30, %v1242_v31  ;;  %v1099_v9 = vld [vmem:[%s7552_s13 + $0x970] sm:$0xff] }
 0x247   : > { %v1218_v38 = vld [vmem:[%s7552_s13 + $0xd28] sm:$0xff]  ;;  %v6501_v46 = vcombine.high %v962_v36, %v970_v37 }
 0x248   : > { %4312 = vmatpush1.bf16.msra.mxu0 %v6356_v50  ;;  %v1226_v39 = vld [vmem:[%s7552_s13 + $0xd68] sm:$0xff] }
 0x249   : > { %4355 = vmatpush1.bf16.msra.mxu1 %v6612_v51  ;;  %4313 = vmatprep.subr.bf16.mxu0 %v6341_v52  ;;  %v6757_v47 = vcombine.high %v1218_v38, %v1226_v39  ;;  %v946_v48 = vld [vmem:[%s7552_s13 + $0x4a8] sm:$0xff]  ;;  %v6500_v52 = vcombine.low %v962_v36, %v970_v37  ;;  %v867_v37 = vld [vmem:[%s7552_s13 + $0x230] sm:$0xff] }
 0x24a   : > { %4356 = vmatprep.subr.bf16.mxu1 %v6597_v53  ;;  %v954_v49 = vld [vmem:[%s7552_s13 + $0x4e8] sm:$0xff]  ;;  %v6756_v53 = vcombine.low %v1218_v38, %v1226_v39  ;;  %v875_v38 = vld [vmem:[%s7552_s13 + $0x270] sm:$0xff] }
 0x24b   : > { %v1202_v50 = vld [vmem:[%s7552_s13 + $0xca8] sm:$0xff]  ;;  %v6485_v54 = vcombine.high %v946_v48, %v954_v49 }
 0x24c   : > { %4314 = vmatpush1.bf16.msra.mxu0 %v6340_v58  ;;  %v1210_v51 = vld [vmem:[%s7552_s13 + $0xce8] sm:$0xff] }
 0x24d   : > { %4357 = vmatpush1.bf16.msra.mxu1 %v6596_v59  ;;  %4315 = vmatprep.subr.bf16.mxu0 %v6581_v60  ;;  %v6741_v55 = vcombine.high %v1202_v50, %v1210_v51  ;;  %v930_v56 = vld [vmem:[%s7552_s13 + $0x428] sm:$0xff]  ;;  %v6484_v60 = vcombine.low %v946_v48, %v954_v49  ;;  %v781_v48 = vld [vmem:[#allocation2 + $0xe0] sm:$0xff] }
 0x24e   : > { %4358 = vmatprep.subr.bf16.mxu1 %v6837_v61  ;;  %v938_v57 = vld [vmem:[%s7552_s13 + $0x468] sm:$0xff]  ;;  %v6740_v61 = vcombine.low %v1202_v50, %v1210_v51  ;;  %v6422_v50 = vcombine.low %v883_v21, %v891_v22 }
 0x24f   : > { %v1186_v58 = vld [vmem:[%s7552_s13 + $0xc28] sm:$0xff]  ;;  %v6469_v62 = vcombine.high %v930_v56, %v938_v57 }
 0x250   : > { %4316 = vmatpush2.bf16.msra.mxu0 %v6580_v2  ;;  %v1194_v59 = vld [vmem:[%s7552_s13 + $0xc68] sm:$0xff]  ;;  %v1171_v2 = vld [vmem:[%s7552_s13 + $0xbb0] sm:$0xff] }
 0x251   : > { %4359 = vmatpush2.bf16.msra.mxu1 %v6836_v3  ;;  %4317 = vmatprep.subr.bf16.mxu0 %v6565_v4  ;;  %v6725_v63 = vcombine.high %v1186_v58, %v1194_v59  ;;  %v1179_v3 = vld [vmem:[%s7552_s13 + $0xbf0] sm:$0xff]  ;;  %v6468_v4 = vcombine.low %v930_v56, %v938_v57 }
 0x252   : > { %4360 = vmatprep.subr.bf16.mxu1 %v6821_v5  ;;  %v6724_v5 = vcombine.low %v1186_v58, %v1194_v59  ;;  %v6711_v7 = vcombine.high %v1171_v2, %v1179_v3  ;;  %v782_v56 = vld [vmem:[#allocation2 + $0x90] sm:$0xff] }
 0x253   : > { %v851_v59 = vld [vmem:[%s7552_s13 + $0x1b0] sm:$0xff] }
 0x254   : > { %4318 = vmatpush2.bf16.msra.mxu0 %v6564_v10  ;;  %v6454_v10 = vcombine.low %v915_v0, %v923_v1  ;;  %v1115_v0 = vld [vmem:[%s7552_s13 + $0x9f0] sm:$0xff]  ;;  %v6406_v1 = vcombine.low %v867_v37, %v875_v38 }
 0x255   : > { %4361 = vmatpush2.bf16.msra.mxu1 %v6820_v16  ;;  %4319 = vmatprep.subr.bf16.mxu0 %v6549_v18  ;;  %v1155_v16 = vld [vmem:[%s7552_s13 + $0xb30] sm:$0xff] }
 0x256   : > { %4362 = vmatprep.subr.bf16.mxu1 %v6805_v19  ;;  %v1163_v18 = vld [vmem:[%s7552_s13 + $0xb70] sm:$0xff]  ;;  %v6710_v19 = vcombine.low %v1171_v2, %v1179_v3 }
 0x258   : > { %4320 = vmatpush2.bf16.msra.mxu0 %v6548_v24  ;;  %v6695_v24 = vcombine.high %v1155_v16, %v1163_v18 }
 0x259   : > { %4363 = vmatpush2.bf16.msra.mxu1 %v6804_v25  ;;  %4321 = vmatprep.subr.bf16.mxu0 %v6533_v26  ;;  %v1139_v25 = vld [vmem:[%s7552_s13 + $0xab0] sm:$0xff] }
 0x25a   : > { %4364 = vmatprep.subr.bf16.mxu1 %v6789_v27  ;;  %v1147_v26 = vld [vmem:[%s7552_s13 + $0xaf0] sm:$0xff] }
 0x25b   : > { %v765_v27 = vld [vmem:[#allocation2 + $0x50] sm:$0xff]  ;;  %v6679_v36 = vcombine.high %v1139_v25, %v1147_v26  ;;  %v6678_v51 = vcombine.low %v1139_v25, %v1147_v26  ;;  %v6630_v25 = vcombine.low %v1091_v8, %v1099_v9 }
 0x25c   : > { %4322 = vmatpush2.bf16.msra.mxu0 %v6532_v32  ;;  %v6694_v32 = vcombine.low %v1155_v16, %v1163_v18 }
 0x25d   : > { %4365 = vmatpush2.bf16.msra.mxu1 %v6788_v33  ;;  %4323 = vmatprep.subr.bf16.mxu0 %v6517_v34  ;;  %v6423_v33 = vcombine.high %v883_v21, %v891_v22  ;;  %v766_v34 = vld [vmem:[#allocation2 + $0x68] sm:$0xff]  ;;  %v827_v21 = vld [vmem:[%s7552_s13 + $0xf0] sm:$0xff] }
 0x25e   : > { %4366 = vmatprep.subr.bf16.mxu1 %v6773_v35  ;;  %v1075_v22 = vld [vmem:[%s7552_s13 + $0x8b0] sm:$0xff] }
 0x260   : > { %4324 = vmatpush2.bf16.msra.mxu0 %v6516_v40 }
 0x261   : > { %4367 = vmatpush2.bf16.msra.mxu1 %v6772_v41  ;;  %4325 = vmatprep.subr.bf16.mxu0 %v6501_v46  ;;  %v1123_v46 = vld [vmem:[%s7552_s13 + $0xa30] sm:$0xff] }
 0x262   : > { %4368 = vmatprep.subr.bf16.mxu1 %v6757_v47  ;;  %v1131_v47 = vld [vmem:[%s7552_s13 + $0xa70] sm:$0xff] }
 0x263   : > { %v6663_v58 = vcombine.high %v1123_v46, %v1131_v47  ;;  %v6662_v3 = vcombine.low %v1123_v46, %v1131_v47 }
 0x264   : > { %4326 = vmatpush2.bf16.msra.mxu0 %v6500_v52 }
 0x265   : > { %4369 = vmatpush2.bf16.msra.mxu1 %v6756_v53  ;;  %4327 = vmatprep.subr.bf16.mxu0 %v6485_v54 }
 0x266   : > { %4370 = vmatprep.subr.bf16.mxu1 %v6741_v55  ;;  %v6407_v55 = vcombine.high %v867_v37, %v875_v38  ;;  %v1051_v37 = vld [vmem:[%s7552_s13 + $0x7f0] sm:$0xff] }
 0x267   : > { %v1299_v38 = vld [vmem:[%s7552_s13 + $0xfb0] sm:$0xff] }
 0x268   : > { %4328 = vmatpush2.bf16.msra.mxu0 %v6484_v60  ;;  %v859_v60 = vld [vmem:[%s7552_s13 + $0x1f0] sm:$0xff] }
 0x269   : > { %4371 = vmatpush2.bf16.msra.mxu1 %v6740_v61  ;;  %4329 = vmatprep.subr.bf16.mxu0 %v6469_v62 }
 0x26a   : > { %4372 = vmatprep.subr.bf16.mxu1 %v6725_v63  ;;  %v1107_v63 = vld [vmem:[%s7552_s13 + $0x9b0] sm:$0xff] }
 0x26b   : > { %v6646_v16 = vcombine.low %v1107_v63, %v1115_v0 }
 0x26c   : > { %4330 = vmatpush2.bf16.msra.mxu0 %v6468_v4  ;;  %v6391_v4 = vcombine.high %v851_v59, %v859_v60 }
 0x26d   : > { %4373 = vmatpush2.bf16.msra.mxu1 %v6724_v5  ;;  %4385 = vmatprep.subr.bf16.mxu0 %v6455_v6  ;;  %v6647_v5 = vcombine.high %v1107_v63, %v1115_v0  ;;  %v835_v6 = vld [vmem:[%s7552_s13 + $0x130] sm:$0xff] }
 0x26e   : > { %4428 = vmatprep.subr.bf16.mxu1 %v6711_v7  ;;  %v843_v7 = vld [vmem:[%s7552_s13 + $0x170] sm:$0xff] }
 0x26f   : > { %v4075_v23 = vpop.f32.mrf.mxu0  ;;  %4332 = vmatmul.mubr.bf16.vlgmr.msra.gmra.mxu0 %v7692_v44  ;;  %v6375_v18 = vcombine.high %v835_v6, %v843_v7  ;;  %v995_v0 = vld [vmem:[%s7552_s13 + $0x630] sm:$0xff] }
 0x270   : > { %v4118_v28 = vpop.f32.mrf.mxu1  ;;  %4375 = vmatmul.mubr.bf16.vlgmr.msra.gmra.mxu1 %v7694_v45  ;;  %4386 = vmatpush1.bf16.msra.mxu0 %v6454_v10  ;;  %v6390_v10 = vcombine.low %v851_v59, %v859_v60  ;;  %v1275_v59 = vld [vmem:[%s7552_s13 + $0xef0] sm:$0xff] }
 0x271   : > { %v4119_v30 = vadd.f32 %v4118_v28, %v4075_v23  ;;  %4417 = vmatprep.mubr.bf16.mxu0 %v7688_v42  ;;  %4429 = vmatpush1.bf16.msra.mxu1 %v6710_v19  ;;  %v4077_v31 = vpop.f32.mrf.mxu0  ;;  %v6631_v19 = vcombine.high %v1091_v8, %v1099_v9  ;;  %v1083_v23 = vld [vmem:[%s7552_s13 + $0x8f0] sm:$0xff] }
 0x272   : > { %4460 = vmatprep.mubr.bf16.mxu1 %v7690_v43  ;;  %v4120_v35 = vpop.f32.mrf.mxu1  ;;  %4387 = vmatprep.subr.bf16.mxu0 %v6439_v20  ;;  %v819_v20 = vld [vmem:[%s7552_s13 + $0xb0] sm:$0xff] }
 0x273   : > { %v4561_v39 = vadd.f32 %v4119_v30, %v765_v27  ;;  %v4121_v40 = vadd.f32 %v4120_v35, %v4077_v31  ;;  %v4079_v41 = vpop.f32.mrf.mxu0  ;;  %4430 = vmatprep.subr.bf16.mxu1 %v6695_v24  ;;  %v6374_v24 = vcombine.low %v835_v6, %v843_v7  ;;  %v6359_v26 = vcombine.high %v819_v20, %v827_v21  ;;  %v803_v28 = vld [vmem:[%s7552_s13 + $0x30] sm:$0xff] }
 0x274   : > { %v4122_v49 = vpop.f32.mrf.mxu1  ;;  %4388 = vmatpush1.bf16.msra.mxu0 %v6438_v29  ;;  %v6615_v27 = vcombine.high %v1075_v22, %v1083_v23  ;;  %v811_v29 = vld [vmem:[%s7552_s13 + $0x70] sm:$0xff] }
 0x275   : > { %4593 = vst [vmem:[#allocation2 + $0x50] sm:$0xff] %v4561_v39  ;;  %v4562_v52 = vadd.f32 %v4121_v40, %v766_v34  ;;  %v4123_v53 = vadd.f32 %v4122_v49, %v4079_v41  ;;  %4431 = vmatpush1.bf16.msra.mxu1 %v6694_v32  ;;  %v4081_v54 = vpop.f32.mrf.mxu0  ;;  %4389 = vmatprep.subr.bf16.mxu0 %v6423_v33  ;;  %v1059_v30 = vld [vmem:[%s7552_s13 + $0x830] sm:$0xff] }
 0x276   : > { %v4124_v57 = vpop.f32.mrf.mxu1  ;;  %4432 = vmatprep.subr.bf16.mxu1 %v6679_v36  ;;  %v1067_v31 = vld [vmem:[%s7552_s13 + $0x870] sm:$0xff]  ;;  %v6358_v32 = vcombine.low %v819_v20, %v827_v21  ;;  %v6614_v33 = vcombine.low %v1075_v22, %v1083_v23  ;;  %v6343_v34 = vcombine.high %v803_v28, %v811_v29  ;;  %v6342_v40 = vcombine.low %v803_v28, %v811_v29 }
 0x277   : > { %4594 = vst [vmem:[#allocation2 + $0x68] sm:$0xff] %v4562_v52  ;;  %v4577_v61 = vadd.f32 %v4123_v53, %v781_v48  ;;  %v4125_v62 = vadd.f32 %v4124_v57, %v4081_v54  ;;  %v6599_v35 = vcombine.high %v1059_v30, %v1067_v31  ;;  %v1043_v36 = vld [vmem:[%s7552_s13 + $0x7b0] sm:$0xff]  ;;  %v6598_v41 = vcombine.low %v1059_v30, %v1067_v31 }
 0x278   : > { %4390 = vmatpush1.bf16.msra.mxu0 %v6422_v50  ;;  %v1307_v39 = vld [vmem:[%s7552_s13 + $0xff0] sm:$0xff]  ;;  %v6583_v46 = vcombine.high %v1043_v36, %v1051_v37  ;;  %v6582_v52 = vcombine.low %v1043_v36, %v1051_v37 }
 0x279   : > { %4609 = vst [vmem:[#allocation2 + $0xe0] sm:$0xff] %v4577_v61  ;;  %v4578_v2 = vadd.f32 %v4125_v62, %v782_v56  ;;  %4433 = vmatpush1.bf16.msra.mxu1 %v6678_v51  ;;  %4391 = vmatprep.subr.bf16.mxu0 %v6407_v55  ;;  %v6839_v47 = vcombine.high %v1299_v38, %v1307_v39  ;;  %v1027_v48 = vld [vmem:[%s7552_s13 + $0x730] sm:$0xff] }
 0x27a   : > { %4434 = vmatprep.subr.bf16.mxu1 %v6663_v58  ;;  %v1035_v49 = vld [vmem:[%s7552_s13 + $0x770] sm:$0xff]  ;;  %v6838_v53 = vcombine.low %v1299_v38, %v1307_v39 }
 0x27b   : > { %4610 = vst [vmem:[#allocation2 + $0x90] sm:$0xff] %v4578_v2  ;;  %v1283_v50 = vld [vmem:[%s7552_s13 + $0xf30] sm:$0xff]  ;;  %v6567_v54 = vcombine.high %v1027_v48, %v1035_v49  ;;  %v6566_v60 = vcombine.low %v1027_v48, %v1035_v49 }
 0x27c   : > { %4392 = vmatpush1.bf16.msra.mxu0 %v6406_v1  ;;  %v1291_v51 = vld [vmem:[%s7552_s13 + $0xf70] sm:$0xff] }
 0x27d   : > { %4435 = vmatpush1.bf16.msra.mxu1 %v6662_v3  ;;  %4393 = vmatprep.subr.bf16.mxu0 %v6391_v4  ;;  %v6823_v55 = vcombine.high %v1283_v50, %v1291_v51  ;;  %v1011_v56 = vld [vmem:[%s7552_s13 + $0x6b0] sm:$0xff]  ;;  %v6822_v61 = vcombine.low %v1283_v50, %v1291_v51  ;;  %v916_v50 = vld [vmem:[%s7552_s13 + $0x3b8] sm:$0xff] }
 0x27e   : > { %4436 = vmatprep.subr.bf16.mxu1 %v6647_v5  ;;  %v1019_v57 = vld [vmem:[%s7552_s13 + $0x6f0] sm:$0xff]  ;;  %v924_v51 = vld [vmem:[%s7552_s13 + $0x3f8] sm:$0xff] }
 0x27f   : > { %v1267_v58 = vld [vmem:[%s7552_s13 + $0xeb0] sm:$0xff]  ;;  %v6551_v62 = vcombine.high %v1011_v56, %v1019_v57  ;;  %v6550_v4 = vcombine.low %v1011_v56, %v1019_v57  ;;  %v6457_v56 = vcombine.high %v916_v50, %v924_v51 }
 0x280   : > { %4394 = vmatpush1.bf16.msra.mxu0 %v6390_v10  ;;  %v6807_v63 = vcombine.high %v1267_v58, %v1275_v59  ;;  %v1003_v1 = vld [vmem:[%s7552_s13 + $0x670] sm:$0xff]  ;;  %v6806_v5 = vcombine.low %v1267_v58, %v1275_v59  ;;  %v900_v58 = vld [vmem:[%s7552_s13 + $0x338] sm:$0xff] }
 0x281   : > { %4437 = vmatpush1.bf16.msra.mxu1 %v6646_v16  ;;  %4395 = vmatprep.subr.bf16.mxu0 %v6375_v18  ;;  %v1251_v2 = vld [vmem:[%s7552_s13 + $0xe30] sm:$0xff]  ;;  %v6535_v6 = vcombine.high %v995_v0, %v1003_v1  ;;  %v6534_v18 = vcombine.low %v995_v0, %v1003_v1  ;;  %v908_v59 = vld [vmem:[%s7552_s13 + $0x378] sm:$0xff] }
 0x282   : > { %4438 = vmatprep.subr.bf16.mxu1 %v6631_v19  ;;  %v1259_v3 = vld [vmem:[%s7552_s13 + $0xe70] sm:$0xff]  ;;  %v6441_v0 = vcombine.high %v900_v58, %v908_v59  ;;  %v884_v1 = vld [vmem:[%s7552_s13 + $0x2b8] sm:$0xff] }
 0x283   : > { %v6791_v7 = vcombine.high %v1251_v2, %v1259_v3  ;;  %v979_v8 = vld [vmem:[%s7552_s13 + $0x5b0] sm:$0xff]  ;;  %v6790_v19 = vcombine.low %v1251_v2, %v1259_v3  ;;  %v892_v2 = vld [vmem:[%s7552_s13 + $0x2f8] sm:$0xff] }
 0x284   : > { %4396 = vmatpush1.bf16.msra.mxu0 %v6374_v24  ;;  %v987_v9 = vld [vmem:[%s7552_s13 + $0x5f0] sm:$0xff] }
 0x285   : > { %4439 = vmatpush1.bf16.msra.mxu1 %v6630_v25  ;;  %4397 = vmatprep.subr.bf16.mxu0 %v6359_v26  ;;  %v1235_v10 = vld [vmem:[%s7552_s13 + $0xdb0] sm:$0xff]  ;;  %v6519_v20 = vcombine.high %v979_v8, %v987_v9  ;;  %v6518_v26 = vcombine.low %v979_v8, %v987_v9  ;;  %v6440_v9 = vcombine.low %v900_v58, %v908_v59 }
 0x286   : > { %4440 = vmatprep.subr.bf16.mxu1 %v6615_v27  ;;  %v1243_v16 = vld [vmem:[%s7552_s13 + $0xdf0] sm:$0xff] }
 0x287   : > { %v6775_v21 = vcombine.high %v1235_v10, %v1243_v16  ;;  %v963_v22 = vld [vmem:[%s7552_s13 + $0x530] sm:$0xff]  ;;  %v6774_v27 = vcombine.low %v1235_v10, %v1243_v16 }
 0x288   : > { %4398 = vmatpush1.bf16.msra.mxu0 %v6358_v32  ;;  %v971_v23 = vld [vmem:[%s7552_s13 + $0x570] sm:$0xff] }
 0x289   : > { %4441 = vmatpush1.bf16.msra.mxu1 %v6614_v33  ;;  %4399 = vmatprep.subr.bf16.mxu0 %v6343_v34  ;;  %v1219_v24 = vld [vmem:[%s7552_s13 + $0xd30] sm:$0xff]  ;;  %v6503_v28 = vcombine.high %v963_v22, %v971_v23  ;;  %v6502_v34 = vcombine.low %v963_v22, %v971_v23  ;;  %v868_v23 = vld [vmem:[%s7552_s13 + $0x238] sm:$0xff] }
 0x28a   : > { %4442 = vmatprep.subr.bf16.mxu1 %v6599_v35  ;;  %v1227_v25 = vld [vmem:[%s7552_s13 + $0xd70] sm:$0xff] }
 0x28b   : > { %v6759_v29 = vcombine.high %v1219_v24, %v1227_v25  ;;  %v947_v30 = vld [vmem:[%s7552_s13 + $0x4b0] sm:$0xff]  ;;  %v6758_v35 = vcombine.low %v1219_v24, %v1227_v25  ;;  %v876_v24 = vld [vmem:[%s7552_s13 + $0x278] sm:$0xff] }
 0x28c   : > { %4400 = vmatpush1.bf16.msra.mxu0 %v6342_v40  ;;  %v955_v31 = vld [vmem:[%s7552_s13 + $0x4f0] sm:$0xff] }
 0x28d   : > { %4443 = vmatpush1.bf16.msra.mxu1 %v6598_v41  ;;  %4401 = vmatprep.subr.bf16.mxu0 %v6583_v46  ;;  %v1203_v32 = vld [vmem:[%s7552_s13 + $0xcb0] sm:$0xff]  ;;  %v6487_v36 = vcombine.high %v947_v30, %v955_v31  ;;  %v6486_v46 = vcombine.low %v947_v30, %v955_v31  ;;  %v6424_v31 = vcombine.low %v884_v1, %v892_v2 }
 0x28e   : > { %4444 = vmatprep.subr.bf16.mxu1 %v6839_v47  ;;  %v1211_v33 = vld [vmem:[%s7552_s13 + $0xcf0] sm:$0xff] }
 0x28f   : > { %v6743_v37 = vcombine.high %v1203_v32, %v1211_v33  ;;  %v931_v38 = vld [vmem:[%s7552_s13 + $0x430] sm:$0xff]  ;;  %v6742_v47 = vcombine.low %v1203_v32, %v1211_v33 }
 0x290   : > { %4402 = vmatpush2.bf16.msra.mxu0 %v6582_v52  ;;  %v939_v39 = vld [vmem:[%s7552_s13 + $0x470] sm:$0xff]  ;;  %v1172_v52 = vld [vmem:[%s7552_s13 + $0xbb8] sm:$0xff] }
 0x291   : > { %4445 = vmatpush2.bf16.msra.mxu1 %v6838_v53  ;;  %4403 = vmatprep.subr.bf16.mxu0 %v6567_v54  ;;  %v1187_v40 = vld [vmem:[%s7552_s13 + $0xc30] sm:$0xff]  ;;  %v6471_v48 = vcombine.high %v931_v38, %v939_v39  ;;  %v1180_v53 = vld [vmem:[%s7552_s13 + $0xbf8] sm:$0xff]  ;;  %v6470_v54 = vcombine.low %v931_v38, %v939_v39 }
 0x292   : > { %4446 = vmatprep.subr.bf16.mxu1 %v6823_v55  ;;  %v1195_v41 = vld [vmem:[%s7552_s13 + $0xc70] sm:$0xff]  ;;  %v6713_v57 = vcombine.high %v1172_v52, %v1180_v53  ;;  %v852_v39 = vld [vmem:[%s7552_s13 + $0x1b8] sm:$0xff] }
 0x293   : > { %v6727_v49 = vcombine.high %v1187_v40, %v1195_v41  ;;  %v6726_v55 = vcombine.low %v1187_v40, %v1195_v41  ;;  %v860_v40 = vld [vmem:[%s7552_s13 + $0x1f8] sm:$0xff] }
 0x294   : > { %4404 = vmatpush2.bf16.msra.mxu0 %v6566_v60  ;;  %v6456_v60 = vcombine.low %v916_v50, %v924_v51  ;;  %v6392_v58 = vcombine.low %v852_v39, %v860_v40 }
 0x295   : > { %4447 = vmatpush2.bf16.msra.mxu1 %v6822_v61  ;;  %4405 = vmatprep.subr.bf16.mxu0 %v6551_v62  ;;  %v1156_v61 = vld [vmem:[%s7552_s13 + $0xb38] sm:$0xff] }
 0x296   : > { %4448 = vmatprep.subr.bf16.mxu1 %v6807_v63  ;;  %v1164_v62 = vld [vmem:[%s7552_s13 + $0xb78] sm:$0xff]  ;;  %v6712_v63 = vcombine.low %v1172_v52, %v1180_v53  ;;  %v6393_v52 = vcombine.high %v852_v39, %v860_v40 }
 0x298   : > { %4406 = vmatpush2.bf16.msra.mxu0 %v6550_v4  ;;  %v6697_v4 = vcombine.high %v1156_v61, %v1164_v62 }
 0x299   : > { %4449 = vmatpush2.bf16.msra.mxu1 %v6806_v5  ;;  %4407 = vmatprep.subr.bf16.mxu0 %v6535_v6  ;;  %v1140_v5 = vld [vmem:[%s7552_s13 + $0xab8] sm:$0xff] }
 0x29a   : > { %4450 = vmatprep.subr.bf16.mxu1 %v6791_v7  ;;  %v1148_v6 = vld [vmem:[%s7552_s13 + $0xaf8] sm:$0xff]  ;;  %v767_v7 = vld [vmem:[#allocation2 + $0x30] sm:$0xff] }
 0x29b   : > { %v6681_v22 = vcombine.high %v1140_v5, %v1148_v6  ;;  %v6680_v32 = vcombine.low %v1140_v5, %v1148_v6  ;;  %v804_v6 = vld [vmem:[%s7552_s13 + $0x38] sm:$0xff] }
 0x29c   : > { %4408 = vmatpush2.bf16.msra.mxu0 %v6534_v18  ;;  %v6696_v18 = vcombine.low %v1156_v61, %v1164_v62  ;;  %v820_v62 = vld [vmem:[%s7552_s13 + $0xb8] sm:$0xff] }
 0x29d   : > { %4451 = vmatpush2.bf16.msra.mxu1 %v6790_v19  ;;  %4409 = vmatprep.subr.bf16.mxu0 %v6519_v20  ;;  %v6425_v19 = vcombine.high %v884_v1, %v892_v2  ;;  %v768_v20 = vld [vmem:[#allocation2 + $0x48] sm:$0xff]  ;;  %v1084_v1 = vld [vmem:[%s7552_s13 + $0x8f8] sm:$0xff] }
 0x29e   : > { %4452 = vmatprep.subr.bf16.mxu1 %v6775_v21 }
 0x2a0   : > { %4410 = vmatpush2.bf16.msra.mxu0 %v6518_v26 }
 0x2a1   : > { %4453 = vmatpush2.bf16.msra.mxu1 %v6774_v27  ;;  %4411 = vmatprep.subr.bf16.mxu0 %v6503_v28  ;;  %v1124_v28 = vld [vmem:[%s7552_s13 + $0xa38] sm:$0xff] }
 0x2a2   : > { %4454 = vmatprep.subr.bf16.mxu1 %v6759_v29  ;;  %v783_v29 = vld [vmem:[#allocation2 + $0x70] sm:$0xff] }
 0x2a4   : > { %4412 = vmatpush2.bf16.msra.mxu0 %v6502_v34 }
 0x2a5   : > { %4455 = vmatpush2.bf16.msra.mxu1 %v6758_v35  ;;  %4413 = vmatprep.subr.bf16.mxu0 %v6487_v36  ;;  %v6409_v35 = vcombine.high %v868_v23, %v876_v24  ;;  %v784_v36 = vld [vmem:[#allocation2 + $0xc0] sm:$0xff] }
 0x2a6   : > { %4456 = vmatprep.subr.bf16.mxu1 %v6743_v37 }
 0x2a8   : > { %4414 = vmatpush2.bf16.msra.mxu0 %v6486_v46 }
 0x2a9   : > { %4457 = vmatpush2.bf16.msra.mxu1 %v6742_v47  ;;  %4415 = vmatprep.subr.bf16.mxu0 %v6471_v48  ;;  %v1108_v47 = vld [vmem:[%s7552_s13 + $0x9b8] sm:$0xff] }
 0x2aa   : > { %4458 = vmatprep.subr.bf16.mxu1 %v6727_v49  ;;  %v1116_v48 = vld [vmem:[%s7552_s13 + $0x9f8] sm:$0xff]  ;;  %v6408_v49 = vcombine.low %v868_v23, %v876_v24 }
 0x2ab   : > { %v6649_v53 = vcombine.high %v1108_v47, %v1116_v48  ;;  %v6648_v59 = vcombine.low %v1108_v47, %v1116_v48  ;;  %v1308_v23 = vld [vmem:[%s7552_s13 + $0xff8] sm:$0xff] }
 0x2ac   : > { %4416 = vmatpush2.bf16.msra.mxu0 %v6470_v54  ;;  %v836_v54 = vld [vmem:[%s7552_s13 + $0x138] sm:$0xff] }
 0x2ad   : > { %4459 = vmatpush2.bf16.msra.mxu1 %v6726_v55  ;;  %4471 = vmatprep.subr.bf16.mxu0 %v6457_v56  ;;  %v844_v55 = vld [vmem:[%s7552_s13 + $0x178] sm:$0xff] }
 0x2ae   : > { %4514 = vmatprep.subr.bf16.mxu1 %v6713_v57  ;;  %v1092_v56 = vld [vmem:[%s7552_s13 + $0x938] sm:$0xff]  ;;  %v6376_v2 = vcombine.low %v836_v54, %v844_v55 }
 0x2af   : > { %v4161_v3 = vpop.f32.mrf.mxu0  ;;  %4418 = vmatmul.mubr.bf16.vlgmr.msra.gmra.mxu0 %v7692_v44  ;;  %v1100_v57 = vld [vmem:[%s7552_s13 + $0x978] sm:$0xff] }
 0x2b0   : > { %v4204_v8 = vpop.f32.mrf.mxu1  ;;  %4461 = vmatmul.mubr.bf16.vlgmr.msra.gmra.mxu1 %v7694_v45  ;;  %4472 = vmatpush1.bf16.msra.mxu0 %v6456_v60  ;;  %v6377_v60 = vcombine.high %v836_v54, %v844_v55  ;;  %v6633_v61 = vcombine.high %v1092_v56, %v1100_v57  ;;  %v1004_v47 = vld [vmem:[%s7552_s13 + $0x678] sm:$0xff] }
 0x2b1   : > { %v4205_v10 = vadd.f32 %v4204_v8, %v4161_v3  ;;  %4503 = vmatprep.mubr.bf16.mxu0 %v7688_v42  ;;  %4515 = vmatpush1.bf16.msra.mxu1 %v6712_v63  ;;  %v4163_v16 = vpop.f32.mrf.mxu0  ;;  %v1132_v42 = vld [vmem:[%s7552_s13 + $0xa78] sm:$0xff]  ;;  %v6632_v3 = vcombine.low %v1092_v56, %v1100_v57 }
 0x2b2   : > { %4546 = vmatprep.mubr.bf16.mxu1 %v7690_v43  ;;  %v4206_v21 = vpop.f32.mrf.mxu1  ;;  %4473 = vmatprep.subr.bf16.mxu0 %v6441_v0  ;;  %v6665_v38 = vcombine.high %v1124_v28, %v1132_v42  ;;  %v6664_v51 = vcombine.low %v1124_v28, %v1132_v42  ;;  %v828_v63 = vld [vmem:[%s7552_s13 + $0xf8] sm:$0xff] }
 0x2b3   : > { %v4563_v25 = vadd.f32 %v4205_v10, %v767_v7  ;;  %v4207_v26 = vadd.f32 %v4206_v21, %v4163_v16  ;;  %v4165_v27 = vpop.f32.mrf.mxu0  ;;  %4516 = vmatprep.subr.bf16.mxu1 %v6697_v4  ;;  %v1076_v0 = vld [vmem:[%s7552_s13 + $0x8b8] sm:$0xff]  ;;  %v6361_v4 = vcombine.high %v820_v62, %v828_v63  ;;  %v6360_v10 = vcombine.low %v820_v62, %v828_v63 }
 0x2b4   : > { %v4208_v30 = vpop.f32.mrf.mxu1  ;;  %4474 = vmatpush1.bf16.msra.mxu0 %v6440_v9  ;;  %v6617_v5 = vcombine.high %v1076_v0, %v1084_v1  ;;  %v812_v7 = vld [vmem:[%s7552_s13 + $0x78] sm:$0xff]  ;;  %v6616_v16 = vcombine.low %v1076_v0, %v1084_v1 }
 0x2b5   : > { %4595 = vst [vmem:[#allocation2 + $0x30] sm:$0xff] %v4563_v25  ;;  %v4564_v43 = vadd.f32 %v4207_v26, %v768_v20  ;;  %v4209_v33 = vadd.f32 %v4208_v30, %v4165_v27  ;;  %4517 = vmatpush1.bf16.msra.mxu1 %v6696_v18  ;;  %v4167_v34 = vpop.f32.mrf.mxu0  ;;  %4475 = vmatprep.subr.bf16.mxu0 %v6425_v19  ;;  %v1060_v8 = vld [vmem:[%s7552_s13 + $0x838] sm:$0xff] }
 0x2b6   : > { %v4210_v37 = vpop.f32.mrf.mxu1  ;;  %4518 = vmatprep.subr.bf16.mxu1 %v6681_v22  ;;  %v1068_v9 = vld [vmem:[%s7552_s13 + $0x878] sm:$0xff]  ;;  %v6345_v18 = vcombine.high %v804_v6, %v812_v7  ;;  %v6344_v24 = vcombine.low %v804_v6, %v812_v7 }
 0x2b7   : > { %4596 = vst [vmem:[#allocation2 + $0x48] sm:$0xff] %v4564_v43  ;;  %v4579_v41 = vadd.f32 %v4209_v33, %v783_v29  ;;  %v4211_v46 = vadd.f32 %v4210_v37, %v4167_v34  ;;  %v6601_v19 = vcombine.high %v1060_v8, %v1068_v9  ;;  %v1044_v20 = vld [vmem:[%s7552_s13 + $0x7b8] sm:$0xff]  ;;  %v6600_v25 = vcombine.low %v1060_v8, %v1068_v9 }
 0x2b8   : > { %4476 = vmatpush1.bf16.msra.mxu0 %v6424_v31  ;;  %v1052_v21 = vld [vmem:[%s7552_s13 + $0x7f8] sm:$0xff] }
 0x2b9   : > { %4611 = vst [vmem:[#allocation2 + $0x70] sm:$0xff] %v4579_v41  ;;  %v4580_v50 = vadd.f32 %v4211_v46, %v784_v36  ;;  %4519 = vmatpush1.bf16.msra.mxu1 %v6680_v32  ;;  %4477 = vmatprep.subr.bf16.mxu0 %v6409_v35  ;;  %v1300_v22 = vld [vmem:[%s7552_s13 + $0xfb8] sm:$0xff]  ;;  %v6585_v26 = vcombine.high %v1044_v20, %v1052_v21 }
 0x2ba   : > { %4520 = vmatprep.subr.bf16.mxu1 %v6665_v38  ;;  %v6841_v27 = vcombine.high %v1300_v22, %v1308_v23  ;;  %v1028_v28 = vld [vmem:[%s7552_s13 + $0x738] sm:$0xff]  ;;  %v6584_v31 = vcombine.low %v1044_v20, %v1052_v21  ;;  %v6840_v32 = vcombine.low %v1300_v22, %v1308_v23 }
 0x2bb   : > { %4612 = vst [vmem:[#allocation2 + $0xc0] sm:$0xff] %v4580_v50  ;;  %v1036_v42 = vld [vmem:[%s7552_s13 + $0x778] sm:$0xff] }
 0x2bc   : > { %4478 = vmatpush1.bf16.msra.mxu0 %v6408_v49  ;;  %v1284_v29 = vld [vmem:[%s7552_s13 + $0xf38] sm:$0xff]  ;;  %v6569_v43 = vcombine.high %v1028_v28, %v1036_v42  ;;  %v6568_v38 = vcombine.low %v1028_v28, %v1036_v42 }
 0x2bd   : > { %4521 = vmatpush1.bf16.msra.mxu1 %v6664_v51  ;;  %4479 = vmatprep.subr.bf16.mxu0 %v6393_v52  ;;  %v1292_v30 = vld [vmem:[%s7552_s13 + $0xf78] sm:$0xff] }
 0x2be   : > { %4522 = vmatprep.subr.bf16.mxu1 %v6649_v53  ;;  %v6825_v33 = vcombine.high %v1284_v29, %v1292_v30  ;;  %v1012_v34 = vld [vmem:[%s7552_s13 + $0x6b8] sm:$0xff]  ;;  %v6824_v39 = vcombine.low %v1284_v29, %v1292_v30  ;;  %v769_v30 = vld [vmem:[#allocation2 + $0x80] sm:$0xff] }
 0x2bf   : > { %v1020_v35 = vld [vmem:[%s7552_s13 + $0x6f8] sm:$0xff] }
 0x2c0   : > { %4480 = vmatpush1.bf16.msra.mxu0 %v6392_v58  ;;  %v1268_v36 = vld [vmem:[%s7552_s13 + $0xeb8] sm:$0xff]  ;;  %v6553_v40 = vcombine.high %v1012_v34, %v1020_v35  ;;  %v6552_v50 = vcombine.low %v1012_v34, %v1020_v35 }
 0x2c1   : > { %4523 = vmatpush1.bf16.msra.mxu1 %v6648_v59  ;;  %4481 = vmatprep.subr.bf16.mxu0 %v6377_v60  ;;  %v1276_v37 = vld [vmem:[%s7552_s13 + $0xef8] sm:$0xff] }
 0x2c2   : > { %4524 = vmatprep.subr.bf16.mxu1 %v6633_v61  ;;  %v6809_v41 = vcombine.high %v1268_v36, %v1276_v37  ;;  %v996_v46 = vld [vmem:[%s7552_s13 + $0x638] sm:$0xff]  ;;  %v6808_v51 = vcombine.low %v1268_v36, %v1276_v37 }
 0x2c3   : > { %v1252_v48 = vld [vmem:[%s7552_s13 + $0xe38] sm:$0xff]  ;;  %v6537_v52 = vcombine.high %v996_v46, %v1004_v47  ;;  %v6536_v58 = vcombine.low %v996_v46, %v1004_v47  ;;  %v786_v47 = vld [vmem:[#allocation2 + $0xd0] sm:$0xff] }
 0x2c4   : > { %4482 = vmatpush1.bf16.msra.mxu0 %v6376_v2  ;;  %v1260_v49 = vld [vmem:[%s7552_s13 + $0xe78] sm:$0xff] }
 0x2c5   : > { %4525 = vmatpush1.bf16.msra.mxu1 %v6632_v3  ;;  %4483 = vmatprep.subr.bf16.mxu0 %v6361_v4  ;;  %v6793_v53 = vcombine.high %v1252_v48, %v1260_v49  ;;  %v980_v54 = vld [vmem:[%s7552_s13 + $0x5b8] sm:$0xff]  ;;  %v6792_v59 = vcombine.low %v1252_v48, %v1260_v49 }
 0x2c6   : > { %4526 = vmatprep.subr.bf16.mxu1 %v6617_v5  ;;  %v988_v55 = vld [vmem:[%s7552_s13 + $0x5f8] sm:$0xff] }
 0x2c7   : > { %v1236_v56 = vld [vmem:[%s7552_s13 + $0xdb8] sm:$0xff]  ;;  %v6521_v60 = vcombine.high %v980_v54, %v988_v55  ;;  %v6520_v2 = vcombine.low %v980_v54, %v988_v55 }
 0x2c8   : > { %4484 = vmatpush1.bf16.msra.mxu0 %v6360_v10  ;;  %v1244_v57 = vld [vmem:[%s7552_s13 + $0xdf8] sm:$0xff] }
 0x2c9   : > { %4527 = vmatpush1.bf16.msra.mxu1 %v6616_v16  ;;  %4485 = vmatprep.subr.bf16.mxu0 %v6345_v18  ;;  %v6777_v61 = vcombine.high %v1236_v56, %v1244_v57  ;;  %v964_v62 = vld [vmem:[%s7552_s13 + $0x538] sm:$0xff]  ;;  %v6776_v3 = vcombine.low %v1236_v56, %v1244_v57 }
 0x2ca   : > { %4528 = vmatprep.subr.bf16.mxu1 %v6601_v19  ;;  %v972_v63 = vld [vmem:[%s7552_s13 + $0x578] sm:$0xff] }
 0x2cb   : > { %v1220_v0 = vld [vmem:[%s7552_s13 + $0xd38] sm:$0xff]  ;;  %v6505_v4 = vcombine.high %v964_v62, %v972_v63  ;;  %v6504_v10 = vcombine.low %v964_v62, %v972_v63 }
 0x2cc   : > { %4486 = vmatpush1.bf16.msra.mxu0 %v6344_v24  ;;  %v1228_v1 = vld [vmem:[%s7552_s13 + $0xd78] sm:$0xff] }
 0x2cd   : > { %4529 = vmatpush1.bf16.msra.mxu1 %v6600_v25  ;;  %4487 = vmatprep.subr.bf16.mxu0 %v6585_v26  ;;  %v6761_v5 = vcombine.high %v1220_v0, %v1228_v1  ;;  %v948_v6 = vld [vmem:[%s7552_s13 + $0x4b8] sm:$0xff]  ;;  %v6760_v16 = vcombine.low %v1220_v0, %v1228_v1  ;;  %v788_v1 = vld [vmem:[#allocation2 + $0x28] sm:$0xff] }
 0x2ce   : > { %4530 = vmatprep.subr.bf16.mxu1 %v6841_v27  ;;  %v956_v7 = vld [vmem:[%s7552_s13 + $0x4f8] sm:$0xff] }
 0x2cf   : > { %v1204_v8 = vld [vmem:[%s7552_s13 + $0xcb8] sm:$0xff]  ;;  %v6489_v18 = vcombine.high %v948_v6, %v956_v7  ;;  %v6488_v24 = vcombine.low %v948_v6, %v956_v7  ;;  %v773_v7 = vld [vmem:[#allocation2 + $0x60] sm:$0xff] }
 0x2d0   : > { %4488 = vmatpush2.bf16.msra.mxu0 %v6584_v31  ;;  %v1212_v9 = vld [vmem:[%s7552_s13 + $0xcf8] sm:$0xff] }
 0x2d1   : > { %4531 = vmatpush2.bf16.msra.mxu1 %v6840_v32  ;;  %4489 = vmatprep.subr.bf16.mxu0 %v6569_v43  ;;  %v6745_v19 = vcombine.high %v1204_v8, %v1212_v9  ;;  %v932_v20 = vld [vmem:[%s7552_s13 + $0x438] sm:$0xff]  ;;  %v6744_v25 = vcombine.low %v1204_v8, %v1212_v9 }
 0x2d2   : > { %4532 = vmatprep.subr.bf16.mxu1 %v6825_v33  ;;  %v940_v21 = vld [vmem:[%s7552_s13 + $0x478] sm:$0xff]  ;;  %v770_v33 = vld [vmem:[#allocation2 + $0x88] sm:$0xff] }
 0x2d3   : > { %v1188_v22 = vld [vmem:[%s7552_s13 + $0xc38] sm:$0xff]  ;;  %v6473_v26 = vcombine.high %v932_v20, %v940_v21  ;;  %v6472_v28 = vcombine.low %v932_v20, %v940_v21 }
 0x2d4   : > { %4490 = vmatpush2.bf16.msra.mxu0 %v6568_v38  ;;  %v1196_v23 = vld [vmem:[%s7552_s13 + $0xc78] sm:$0xff]  ;;  %v785_v38 = vld [vmem:[#allocation2 + $0xa8] sm:$0xff] }
 0x2d5   : > { %4533 = vmatpush2.bf16.msra.mxu1 %v6824_v39  ;;  %4491 = vmatprep.subr.bf16.mxu0 %v6553_v40  ;;  %v6729_v27 = vcombine.high %v1188_v22, %v1196_v23  ;;  %v6728_v42 = vcombine.low %v1188_v22, %v1196_v23  ;;  %v772_v55 = vld [vmem:[#allocation2 + $0xb8] sm:$0xff]  ;;  %v789_v22 = vld [vmem:[#allocation2 + $0xa0] sm:$0xff] }
 0x2d6   : > { %4534 = vmatprep.subr.bf16.mxu1 %v6809_v41 }
 0x2d8   : > { %4492 = vmatpush2.bf16.msra.mxu0 %v6552_v50 }
 0x2d9   : > { %4535 = vmatpush2.bf16.msra.mxu1 %v6808_v51  ;;  %4493 = vmatprep.subr.bf16.mxu0 %v6537_v52  ;;  %v771_v51 = vld [vmem:[#allocation2 + $0xe8] sm:$0xff] }
 0x2da   : > { %4536 = vmatprep.subr.bf16.mxu1 %v6793_v53 }
 0x2dc   : > { %4494 = vmatpush2.bf16.msra.mxu0 %v6536_v58 }
 0x2dd   : > { %4537 = vmatpush2.bf16.msra.mxu1 %v6792_v59  ;;  %4495 = vmatprep.subr.bf16.mxu0 %v6521_v60  ;;  %v787_v60 = vld [vmem:[#allocation2 + $0x10] sm:$0xff] }
 0x2de   : > { %4538 = vmatprep.subr.bf16.mxu1 %v6777_v61 }
 0x2e0   : > { %4496 = vmatpush2.bf16.msra.mxu0 %v6520_v2 }
 0x2e1   : > { %4539 = vmatpush2.bf16.msra.mxu1 %v6776_v3  ;;  %4497 = vmatprep.subr.bf16.mxu0 %v6505_v4 }
 0x2e2   : > { %4540 = vmatprep.subr.bf16.mxu1 %v6761_v5 }
 0x2e4   : > { %4498 = vmatpush2.bf16.msra.mxu0 %v6504_v10 }
 0x2e5   : > { %4541 = vmatpush2.bf16.msra.mxu1 %v6760_v16  ;;  %4499 = vmatprep.subr.bf16.mxu0 %v6489_v18  ;;  %v774_v16 = vld [vmem:[#allocation2 + $0xf0] sm:$0xff] }
 0x2e6   : > { %4542 = vmatprep.subr.bf16.mxu1 %v6745_v19 }
 0x2e8   : > { %4500 = vmatpush2.bf16.msra.mxu0 %v6488_v24 }
 0x2e9   : > { %4543 = vmatpush2.bf16.msra.mxu1 %v6744_v25  ;;  %4501 = vmatprep.subr.bf16.mxu0 %v6473_v26 }
 0x2ea   : > { %4544 = vmatprep.subr.bf16.mxu1 %v6729_v27  ;;  %v790_v27 = vld [vmem:[#allocation2 + $0xf8] sm:$0xff] }
 0x2ec   : > { %4502 = vmatpush2.bf16.msra.mxu0 %v6472_v28 }
 0x2ed   : > { %4545 = vmatpush2.bf16.msra.mxu1 %v6728_v42 }
 0x2ef   : > { %v4247_v29 = vpop.f32.mrf.mxu0  ;;  %4504 = vmatmul.mubr.bf16.vlgmr.msra.gmra.mxu0 %v7692_v44 }
 0x2f0   : > { %v4290_v31 = vpop.f32.mrf.mxu1  ;;  %4547 = vmatmul.mubr.bf16.vlgmr.msra.gmra.mxu1 %v7694_v45 }
 0x2f1   : > { %v4291_v32 = vadd.f32 %v4290_v31, %v4247_v29  ;;  %v4249_v43 = vpop.f32.mrf.mxu0 }
 0x2f2   : > { %v4292_v34 = vpop.f32.mrf.mxu1 }
 0x2f3   : > { %v4565_v35 = vadd.f32 %v4291_v32, %v769_v30  ;;  %v4293_v36 = vadd.f32 %v4292_v34, %v4249_v43  ;;  %v4251_v37 = vpop.f32.mrf.mxu0  ;;  %v775_v32 = vld [vmem:[#allocation2 + $0x8] sm:$0xff] }
 0x2f4   : > { %v4294_v39 = vpop.f32.mrf.mxu1 }
 0x2f5   : > { %4597 = vst [vmem:[#allocation2 + $0x80] sm:$0xff] %v4565_v35  ;;  %v4566_v40 = vadd.f32 %v4293_v36, %v770_v33  ;;  %v4295_v41 = vadd.f32 %v4294_v39, %v4251_v37  ;;  %v4253_v46 = vpop.f32.mrf.mxu0  ;;  %v776_v35 = vld [vmem:[#allocation2 + $0x78] sm:$0xff] }
 0x2f6   : > { %v4296_v48 = vpop.f32.mrf.mxu1 }
 0x2f7   : > { %4598 = vst [vmem:[#allocation2 + $0x88] sm:$0xff] %v4566_v40  ;;  %v4581_v44 = vadd.f32 %v4295_v41, %v785_v38  ;;  %v4297_v49 = vadd.f32 %v4296_v48, %v4253_v46  ;;  %v791_v40 = vld [vmem:[#allocation2 + $0x20] sm:$0xff] }
 0x2f9   : > { %4613 = vst [vmem:[#allocation2 + $0xa8] sm:$0xff] %v4581_v44  ;;  %v4582_v45 = vadd.f32 %v4297_v49, %v786_v47  ;;  %v792_v44 = vld [vmem:[#allocation2 + $0x98] sm:$0xff] }
 0x2fb   : > { %4614 = vst [vmem:[#allocation2 + $0xd0] sm:$0xff] %v4582_v45 }
 0x32f   : > { %v4333_v50 = vpop.f32.mrf.mxu0 }
 0x330   : > { %v4376_v52 = vpop.f32.mrf.mxu1 }
 0x331   : > { %v4377_v53 = vadd.f32 %v4376_v52, %v4333_v50  ;;  %v4335_v54 = vpop.f32.mrf.mxu0 }
 0x332   : > { %v4378_v56 = vpop.f32.mrf.mxu1 }
 0x333   : > { %v4567_v57 = vadd.f32 %v4377_v53, %v771_v51  ;;  %v4379_v58 = vadd.f32 %v4378_v56, %v4335_v54  ;;  %v4337_v59 = vpop.f32.mrf.mxu0 }
 0x334   : > { %v4380_v61 = vpop.f32.mrf.mxu1 }
 0x335   : > { %4599 = vst [vmem:[#allocation2 + $0xe8] sm:$0xff] %v4567_v57  ;;  %v4568_v62 = vadd.f32 %v4379_v58, %v772_v55  ;;  %v4381_v63 = vadd.f32 %v4380_v61, %v4337_v59  ;;  %v4339_v0 = vpop.f32.mrf.mxu0 }
 0x336   : > { %v4382_v2 = vpop.f32.mrf.mxu1 }
 0x337   : > { %4600 = vst [vmem:[#allocation2 + $0xb8] sm:$0xff] %v4568_v62  ;;  %v4583_v3 = vadd.f32 %v4381_v63, %v787_v60  ;;  %v4383_v4 = vadd.f32 %v4382_v2, %v4339_v0 }
 0x339   : > { %4615 = vst [vmem:[#allocation2 + $0x10] sm:$0xff] %v4583_v3  ;;  %v4584_v5 = vadd.f32 %v4383_v4, %v788_v1 }
 0x33b   : > { %4616 = vst [vmem:[#allocation2 + $0x28] sm:$0xff] %v4584_v5 }
 0x36f   : > { %v4419_v6 = vpop.f32.mrf.mxu0 }
 0x370   : > { %v4462_v8 = vpop.f32.mrf.mxu1 }
 0x371   : > { %v4463_v9 = vadd.f32 %v4462_v8, %v4419_v6  ;;  %v4421_v10 = vpop.f32.mrf.mxu0 }
 0x372   : > { %v4464_v18 = vpop.f32.mrf.mxu1 }
 0x373   : > { %v4569_v19 = vadd.f32 %v4463_v9, %v773_v7  ;;  %v4465_v20 = vadd.f32 %v4464_v18, %v4421_v10  ;;  %v4423_v21 = vpop.f32.mrf.mxu0 }
 0x374   : > { %v4466_v23 = vpop.f32.mrf.mxu1 }
 0x375   : > { %4601 = vst [vmem:[#allocation2 + $0x60] sm:$0xff] %v4569_v19  ;;  %v4570_v24 = vadd.f32 %v4465_v20, %v774_v16  ;;  %v4467_v25 = vadd.f32 %v4466_v23, %v4423_v21  ;;  %v4425_v26 = vpop.f32.mrf.mxu0 }
 0x376   : > { %v4468_v28 = vpop.f32.mrf.mxu1 }
 0x377   : > { %4602 = vst [vmem:[#allocation2 + $0xf0] sm:$0xff] %v4570_v24  ;;  %v4585_v42 = vadd.f32 %v4467_v25, %v789_v22  ;;  %v4469_v29 = vadd.f32 %v4468_v28, %v4425_v26 }
 0x379   : > { %4617 = vst [vmem:[#allocation2 + $0xa0] sm:$0xff] %v4585_v42  ;;  %v4586_v30 = vadd.f32 %v4469_v29, %v790_v27 }
 0x37b   : > { %4618 = vst [vmem:[#allocation2 + $0xf8] sm:$0xff] %v4586_v30 }
 0x3af   : > { %v4505_v31 = vpop.f32.mrf.mxu0 }
 0x3b0   : > { %v4548_v43 = vpop.f32.mrf.mxu1 }
 0x3b1   : > { %v4549_v33 = vadd.f32 %v4548_v43, %v4505_v31  ;;  %v4507_v34 = vpop.f32.mrf.mxu0 }
 0x3b2   : > { %v4550_v36 = vpop.f32.mrf.mxu1 }
 0x3b3   : > { %v4571_v37 = vadd.f32 %v4549_v33, %v775_v32  ;;  %v4551_v38 = vadd.f32 %v4550_v36, %v4507_v34  ;;  %v4509_v39 = vpop.f32.mrf.mxu0 }
 0x3b4   : > { %v4552_v41 = vpop.f32.mrf.mxu1 }
 0x3b5   : > { %4603 = vst [vmem:[#allocation2 + $0x8] sm:$0xff] %v4571_v37  ;;  %v4572_v46 = vadd.f32 %v4551_v38, %v776_v35  ;;  %v4553_v47 = vadd.f32 %v4552_v41, %v4509_v39  ;;  %v4511_v48 = vpop.f32.mrf.mxu0 }
 0x3b6   : > { %v4554_v49 = vpop.f32.mrf.mxu1 }
 0x3b7   : > { %4604 = vst [vmem:[#allocation2 + $0x78] sm:$0xff] %v4572_v46  ;;  %v4587_v45 = vadd.f32 %v4553_v47, %v791_v40  ;;  %v4555_v50 = vadd.f32 %v4554_v49, %v4511_v48  ;;  %4624 = sbr.rel (%p6842_p11) target bundleno = 2171 (0x87b), region = 79 }
 0x3b9   : > { %4619 = vst [vmem:[#allocation2 + $0x20] sm:$0xff] %v4587_v45  ;;  %v4588_v51 = vadd.f32 %v4555_v50, %v792_v44 }
 0x3bb   : > { %4620 = vst [vmem:[#allocation2 + $0x98] sm:$0xff] %v4588_v51 }
 0x3bc   : > { %v7227_v52 = vld [vmem:[%s8645_s5 + $0x78] sm:$0xff]   ;;  %v7231_v56 = vld [vmem:[%s8645_s5 + $0x70] sm:$0xff]   ;;  %v7235_v60 = vld [vmem:[%s8645_s5 + $0x68] sm:$0xff]  }
 0x3bd   : > { %v7228_v53 = vld [vmem:[%s8645_s5 + $0xf8] sm:$0xff]   ;;  %6976 = vmatprep.subr.bf16.mxu0 %v7227_v52  ;;  %v7232_v57 = vld [vmem:[%s8645_s5 + $0xf0] sm:$0xff]   ;;  %v7236_v61 = vld [vmem:[%s8645_s5 + $0xe8] sm:$0xff]  }
 0x3be   : > { %v7229_v54 = vld [vmem:[%s8645_s5 + $0x38] sm:$0xff]   ;;  %6998 = vmatprep.subr.bf16.mxu1 %v7228_v53  ;;  %v7233_v58 = vld [vmem:[%s8645_s5 + $0x30] sm:$0xff]   ;;  %v7237_v62 = vld [vmem:[%s8645_s5 + $0x28] sm:$0xff]  }
 0x3bf   : > { %v7230_v55 = vld [vmem:[%s8645_s5 + $0xb8] sm:$0xff]   ;;  %6977 = vmatpush3.bf16.msra.mxu0 %v7229_v54  ;;  %v7234_v59 = vld [vmem:[%s8645_s5 + $0xb0] sm:$0xff]   ;;  %v7238_v63 = vld [vmem:[%s8645_s5 + $0xa8] sm:$0xff]  }
 0x3c0   : > { %6999 = vmatpush3.bf16.msra.mxu1 %v7230_v55  ;;  %6978 = vmatprep.subr.bf16.mxu0 %v7231_v56  ;;  %v7239_v0 = vld [vmem:[%s8645_s5 + $0x60] sm:$0xff]   ;;  %v7243_v4 = vld [vmem:[%s8645_s5 + $0x58] sm:$0xff]   ;;  %v7247_v8 = vld [vmem:[%s8645_s5 + $0x50] sm:$0xff]  }
 0x3c1   : > { %7000 = vmatprep.subr.bf16.mxu1 %v7232_v57  ;;  %v7240_v1 = vld [vmem:[%s8645_s5 + $0xe0] sm:$0xff]   ;;  %v7244_v5 = vld [vmem:[%s8645_s5 + $0xd8] sm:$0xff]   ;;  %v7248_v9 = vld [vmem:[%s8645_s5 + $0xd0] sm:$0xff]  }
 0x3c2   : > { %v7241_v2 = vld [vmem:[%s8645_s5 + $0x20] sm:$0xff]   ;;  %v7245_v6 = vld [vmem:[%s8645_s5 + $0x18] sm:$0xff]   ;;  %v7249_v10 = vld [vmem:[%s8645_s5 + $0x10] sm:$0xff]  }
 0x3c3   : > { %6979 = vmatpush3.bf16.msra.mxu0 %v7233_v58  ;;  %v7242_v3 = vld [vmem:[%s8645_s5 + $0xa0] sm:$0xff]   ;;  %v7246_v7 = vld [vmem:[%s8645_s5 + $0x98] sm:$0xff]   ;;  %v7250_v16 = vld [vmem:[%s8645_s5 + $0x90] sm:$0xff]  }
 0x3c4   : > { %7001 = vmatpush3.bf16.msra.mxu1 %v7234_v59  ;;  %6980 = vmatprep.subr.bf16.mxu0 %v7235_v60  ;;  %v7251_v18 = vld [vmem:[%s8645_s5 + $0x48] sm:$0xff]   ;;  %v7255_v22 = vld [vmem:[%s8645_s5 + $0x40] sm:$0xff]   ;;  %v4642_v27 = vld [vmem:[#allocation2 + $0x58] sm:$0xff] }
 0x3c5   : > { %7002 = vmatprep.subr.bf16.mxu1 %v7236_v61  ;;  %v7252_v19 = vld [vmem:[%s8645_s5 + $0xc8] sm:$0xff]   ;;  %v7256_v23 = vld [vmem:[%s8645_s5 + $0xc0] sm:$0xff]   ;;  %v4628_v29 = vld [vmem:[#allocation2 + $0x18] sm:$0xff] }
 0x3c6   : > { %v7253_v20 = vld [vmem:[%s8645_s5 + $0x8] sm:$0xff]   ;;  %v7257_v24 = vld [vmem:[%s8645_s5] sm:$0xff]   ;;  %v4625_v32 = vld [vmem:[#allocation2 + $0xb0] sm:$0xff] }
 0x3c7   : > { %6981 = vmatpush3.bf16.msra.mxu0 %v7237_v62  ;;  %v7254_v21 = vld [vmem:[%s8645_s5 + $0x88] sm:$0xff]   ;;  %v7258_v25 = vld [vmem:[%s8645_s5 + $0x80] sm:$0xff]   ;;  %v4641_v34 = vld [vmem:[#allocation2 + $0x38] sm:$0xff] }
 0x3c8   : > { %7003 = vmatpush3.bf16.msra.mxu1 %v7238_v63  ;;  %6982 = vmatprep.subr.bf16.mxu0 %v7239_v0  ;;  %v4626_v26 = vld [vmem:[#allocation2] sm:$0xff]  ;;  %v4644_v30 = vld [vmem:[#allocation2 + $0xc8] sm:$0xff]  ;;  %v4627_v35 = vld [vmem:[#allocation2 + $0xd8] sm:$0xff] }
 0x3c9   : > { %7004 = vmatprep.subr.bf16.mxu1 %v7240_v1  ;;  %v8268_v28 = vld [vmem:[%s8644_s4] sm:$0xff]  ;;  %v7259_v41 = vld [vmem:[%s8645_s5 + $0x178] sm:$0xff]   ;;  %v7263_v55 = vld [vmem:[%s8645_s5 + $0x170] sm:$0xff]  }
 0x3ca   : > { %v4668_v42 = vrot.slane %v8268_v28, %v7664_v13  ;;  %v4676_v31 = vrot.slane %v8268_v28, %v7667_v14  ;;  %v4664_v43 = vrot.slane %v8268_v28, %v7670_v15  ;;  %v4672_v33 = vrot.slane %v8268_v28, %v7673_v17  ;;  %v4643_v36 = vld [vmem:[#allocation2 + $0x40] sm:$0xff]  ;;  %v7260_v49 = vld [vmem:[%s8645_s5 + $0x1f8] sm:$0xff]   ;;  %v7264_v56 = vld [vmem:[%s8645_s5 + $0x1f0] sm:$0xff]  }
 0x3cb   : > { %6983 = vmatpush3.bf16.msra.mxu0 %v7241_v2  ;;  %v7261_v51 = vld [vmem:[%s8645_s5 + $0x138] sm:$0xff]   ;;  %v7265_v57 = vld [vmem:[%s8645_s5 + $0x130] sm:$0xff]   ;;  %v7267_v59 = vld [vmem:[%s8645_s5 + $0x168] sm:$0xff]  }
 0x3cc   : > { %7005 = vmatpush3.bf16.msra.mxu1 %v7242_v3  ;;  %6984 = vmatprep.subr.bf16.mxu0 %v7243_v4  ;;  %v4742_v37 = vadd.f32 %v4668_v42, %v4626_v26  ;;  %v4758_v38 = vadd.f32 %v4668_v42, %v4642_v27  ;;  %v4744_v39 = vadd.f32 %v4676_v31, %v4628_v29  ;;  %v7262_v54 = vld [vmem:[%s8645_s5 + $0x1b8] sm:$0xff]   ;;  %v7266_v58 = vld [vmem:[%s8645_s5 + $0x1b0] sm:$0xff]   ;;  %v7268_v60 = vld [vmem:[%s8645_s5 + $0x1e8] sm:$0xff]  }
 0x3cd   : > { %7006 = vmatprep.subr.bf16.mxu1 %v7244_v5  ;;  %v4760_v40 = vadd.f32 %v4676_v31, %v4644_v30  ;;  %v4741_v46 = vadd.f32 %v4664_v43, %v4625_v32  ;;  %v4757_v47 = vadd.f32 %v4664_v43, %v4641_v34  ;;  %v4743_v48 = vadd.f32 %v4672_v33, %v4627_v35  ;;  %v7269_v61 = vld [vmem:[%s8645_s5 + $0x128] sm:$0xff]   ;;  %v7271_v63 = vld [vmem:[%s8645_s5 + $0x160] sm:$0xff]   ;;  %v7275_v3 = vld [vmem:[%s8645_s5 + $0x158] sm:$0xff]  }
 0x3ce   : > { %v4759_v44 = vadd.f32 %v4672_v33, %v4643_v36  ;;  %v4774_v45 = vpack.c.bf16 %v4758_v38, %v4742_v37  ;;  %v7270_v62 = vld [vmem:[%s8645_s5 + $0x1a8] sm:$0xff]   ;;  %v7272_v0 = vld [vmem:[%s8645_s5 + $0x1e0] sm:$0xff]   ;;  %v7276_v4 = vld [vmem:[%s8645_s5 + $0x1d8] sm:$0xff]  }
 0x3cf   : > { %6985 = vmatpush3.bf16.msra.mxu0 %v7245_v6  ;;  %v4776_v50 = vpack.c.bf16 %v4760_v40, %v4744_v39  ;;  %v4773_v52 = vpack.c.bf16 %v4757_v47, %v4741_v46  ;;  %v7273_v1 = vld [vmem:[%s8645_s5 + $0x120] sm:$0xff]   ;;  %v7277_v5 = vld [vmem:[%s8645_s5 + $0x118] sm:$0xff]   ;;  %v4630_v43 = vld [vmem:[#allocation2 + $0x68] sm:$0xff] }
 0x3d0   : > { %7007 = vmatpush3.bf16.msra.mxu1 %v7246_v7  ;;  %6986 = vmatprep.subr.bf16.mxu0 %v7247_v8  ;;  %v4775_v53 = vpack.c.bf16 %v4759_v44, %v4743_v48  ;;  %v7274_v2 = vld [vmem:[%s8645_s5 + $0x1a0] sm:$0xff]   ;;  %v7278_v6 = vld [vmem:[%s8645_s5 + $0x198] sm:$0xff]   ;;  %v7279_v7 = vld [vmem:[%s8645_s5 + $0x150] sm:$0xff]  }
 0x3d1   : > { %7008 = vmatprep.subr.bf16.mxu1 %v7248_v9  ;;  %5852 = vmatprep.mubr.bf16.mxu0 %v4774_v45  ;;  %v7280_v8 = vld [vmem:[%s8645_s5 + $0x1d0] sm:$0xff]   ;;  %v7288_v26 = vld [vmem:[%s8645_s5 + $0x1c0] sm:$0xff]   ;;  %v4632_v34 = vld [vmem:[#allocation2 + $0x48] sm:$0xff] }
 0x3d2   : > { %5893 = vmatprep.mubr.bf16.mxu1 %v4776_v50  ;;  %v7281_v9 = vld [vmem:[%s8645_s5 + $0x110] sm:$0xff]   ;;  %v7289_v29 = vld [vmem:[%s8645_s5 + $0x100] sm:$0xff]  }
 0x3d3   : > { %6987 = vmatpush3.bf16.msra.mxu0 %v7249_v10  ;;  %v7282_v10 = vld [vmem:[%s8645_s5 + $0x190] sm:$0xff]   ;;  %v7290_v31 = vld [vmem:[%s8645_s5 + $0x180] sm:$0xff]  }
 0x3d4   : > { %7009 = vmatpush3.bf16.msra.mxu1 %v7250_v16  ;;  %6988 = vmatprep.subr.bf16.mxu0 %v7251_v18  ;;  %v7283_v16 = vld [vmem:[%s8645_s5 + $0x148] sm:$0xff]   ;;  %v4683_v18 = vsub.s32 5, %v7661_v12  ;;  %v4646_v33 = vld [vmem:[#allocation2 + $0x90] sm:$0xff]  ;;  %v4648_v37 = vld [vmem:[#allocation2 + $0xc0] sm:$0xff] }
 0x3d5   : > { %7010 = vmatprep.subr.bf16.mxu1 %v7252_v19  ;;  %v7284_v19 = vld [vmem:[%s8645_s5 + $0x1c8] sm:$0xff]   ;;  %v4629_v39 = vld [vmem:[#allocation2 + $0x50] sm:$0xff]  ;;  %v4645_v40 = vld [vmem:[#allocation2 + $0xe0] sm:$0xff] }
 0x3d6   : > { %v4684_v27 = vrot.slane %v8268_v28, %v4683_v18  ;;  %v4631_v48 = vld [vmem:[#allocation2 + $0x30] sm:$0xff] }
 0x3d7   : > { %6989 = vmatpush3.bf16.msra.mxu0 %v7253_v20  ;;  %v4691_v20 = vsub.s32 7, %v7661_v12  ;;  %v4647_v44 = vld [vmem:[#allocation2 + $0x70] sm:$0xff] }
 0x3d8   : > { %7011 = vmatpush3.bf16.msra.mxu1 %v7254_v21  ;;  %6990 = vmatprep.subr.bf16.mxu0 %v7255_v22  ;;  %v7285_v21 = vld [vmem:[%s8645_s5 + $0x108] sm:$0xff]   ;;  %v4679_v22 = vsub.s32 4, %v7661_v12  ;;  %v4746_v35 = vadd.f32 %v4684_v27, %v4630_v43  ;;  %v4762_v36 = vadd.f32 %v4684_v27, %v4646_v33  ;;  %v7319_v27 = vld [vmem:[%s8645_s5 + $0x240] sm:$0xff]   ;;  %v4636_v33 = vld [vmem:[#allocation2 + $0xb8] sm:$0xff] }
 0x3d9   : > { %7012 = vmatprep.subr.bf16.mxu1 %v7256_v23  ;;  %v7286_v23 = vld [vmem:[%s8645_s5 + $0x188] sm:$0xff]   ;;  %v4692_v42 = vrot.slane %v8268_v28, %v4691_v20 }
 0x3da   : > { %v4680_v30 = vrot.slane %v8268_v28, %v4679_v22  ;;  %v8489_v43 = vld [vmem:[%s8644_s4 + $0x8] sm:$0xff] }
 0x3db   : > { %6991 = vmatpush3.bf16.msra.mxu0 %v7257_v24  ;;  %v4687_v24 = vsub.s32 6, %v7661_v12  ;;  %v4748_v38 = vadd.f32 %v4692_v42, %v4632_v34  ;;  %v4700_v34 = vrot.slane %v8489_v43, %v7664_v13  ;;  %v7323_v13 = vld [vmem:[%s8645_s5 + $0x378] sm:$0xff]  }
 0x3dc   : > { %7013 = vmatpush3.bf16.msra.mxu1 %v7258_v25  ;;  %7020 = vmatprep.subr.bf16.mxu0 %v7259_v41  ;;  %v7287_v25 = vld [vmem:[%s8645_s5 + $0x140] sm:$0xff]   ;;  %v4764_v41 = vadd.f32 %v4692_v42, %v4648_v37  ;;  %v4745_v46 = vadd.f32 %v4680_v30, %v4629_v39  ;;  %v4761_v47 = vadd.f32 %v4680_v30, %v4645_v40  ;;  %v4635_v40 = vld [vmem:[#allocation2 + $0xe8] sm:$0xff] }
 0x3dd   : > { %7042 = vmatprep.subr.bf16.mxu1 %v7260_v49  ;;  %v4688_v32 = vrot.slane %v8268_v28, %v4687_v24  ;;  %v4778_v49 = vpack.c.bf16 %v4762_v36, %v4746_v35  ;;  %v7291_v28 = vld [vmem:[%s8645_s5 + $0x278] sm:$0xff]   ;;  %v7320_v42 = vld [vmem:[%s8645_s5 + $0x2c0] sm:$0xff]   ;;  %v4652_v35 = vld [vmem:[#allocation2 + $0x28] sm:$0xff]  ;;  %v4708_v36 = vrot.slane %v8489_v43, %v7667_v14  ;;  %v4696_v39 = vrot.slane %v8489_v43, %v7670_v15 }
 0x3de   : > { %5853 = vmatmul.mubr.bf16.vlgmr.msra.gmra.mxu0 %v4773_v52  ;;  %v4777_v52 = vpack.c.bf16 %v4761_v47, %v4745_v46  ;;  %v7322_v30 = vld [vmem:[%s8645_s5 + $0x280] sm:$0xff]   ;;  %v4704_v46 = vrot.slane %v8489_v43, %v7673_v17  ;;  %v7324_v15 = vld [vmem:[%s8645_s5 + $0x3f8] sm:$0xff]  }
 0x3df   : > { %5894 = vmatmul.mubr.bf16.vlgmr.msra.gmra.mxu1 %v4775_v53  ;;  %7021 = vmatpush3.bf16.msra.mxu0 %v7261_v51  ;;  %v4747_v45 = vadd.f32 %v4688_v32, %v4631_v48  ;;  %v4763_v50 = vadd.f32 %v4688_v32, %v4647_v44  ;;  %v4780_v51 = vpack.c.bf16 %v4764_v41, %v4748_v38  ;;  %v7292_v53 = vld [vmem:[%s8645_s5 + $0x2f8] sm:$0xff]   ;;  %v4650_v32 = vld [vmem:[#allocation2 + $0xd0] sm:$0xff]  ;;  %v4633_v37 = vld [vmem:[#allocation2 + $0x80] sm:$0xff] }
 0x3e0   : > { %7043 = vmatpush3.bf16.msra.mxu1 %v7262_v54  ;;  %7022 = vmatprep.subr.bf16.mxu0 %v7263_v55  ;;  %v7293_v55 = vld [vmem:[%s8645_s5 + $0x238] sm:$0xff]   ;;  %v4649_v38 = vld [vmem:[#allocation2 + $0xa8] sm:$0xff]  ;;  %v4651_v41 = vld [vmem:[#allocation2 + $0x10] sm:$0xff]  ;;  %v4766_v48 = vadd.f32 %v4700_v34, %v4650_v32  ;;  %v4752_v44 = vadd.f32 %v4708_v36, %v4636_v33 }
 0x3e1   : > { %7044 = vmatprep.subr.bf16.mxu1 %v7264_v56  ;;  %5934 = vmatprep.mubr.bf16.mxu0 %v4778_v49  ;;  %v4779_v54 = vpack.c.bf16 %v4763_v50, %v4747_v45  ;;  %v7294_v56 = vld [vmem:[%s8645_s5 + $0x2b8] sm:$0xff]   ;;  %v4768_v49 = vadd.f32 %v4708_v36, %v4652_v35  ;;  %v4749_v45 = vadd.f32 %v4696_v39, %v4633_v37  ;;  %v4638_v32 = vld [vmem:[#allocation2 + $0xf0] sm:$0xff] }
 0x3e2   : > { %5975 = vmatprep.mubr.bf16.mxu1 %v4780_v51  ;;  %v4765_v14 = vadd.f32 %v4696_v39, %v4649_v38  ;;  %v4751_v50 = vadd.f32 %v4704_v46, %v4635_v40  ;;  %v7325_v17 = vld [vmem:[%s8645_s5 + $0x338] sm:$0xff]   ;;  %v4637_v40 = vld [vmem:[#allocation2 + $0x60] sm:$0xff] }
 0x3e3   : > { %7023 = vmatpush3.bf16.msra.mxu0 %v7265_v57  ;;  %v7295_v57 = vld [vmem:[%s8645_s5 + $0x270] sm:$0xff]   ;;  %v4654_v33 = vld [vmem:[#allocation2 + $0xf8] sm:$0xff] }
 0x3e4   : > { %7045 = vmatpush3.bf16.msra.mxu1 %v7266_v58  ;;  %7024 = vmatprep.subr.bf16.mxu0 %v7267_v59  ;;  %v7296_v58 = vld [vmem:[%s8645_s5 + $0x2f0] sm:$0xff]   ;;  %v4640_v35 = vld [vmem:[#allocation2 + $0x78] sm:$0xff] }
 0x3e5   : > { %7046 = vmatprep.subr.bf16.mxu1 %v7268_v60  ;;  %v7297_v59 = vld [vmem:[%s8645_s5 + $0x230] sm:$0xff]   ;;  %v4656_v36 = vld [vmem:[#allocation2 + $0x98] sm:$0xff] }
 0x3e6   : > { %v7298_v60 = vld [vmem:[%s8645_s5 + $0x2b0] sm:$0xff]  }
 0x3e7   : > { %7025 = vmatpush3.bf16.msra.mxu0 %v7269_v61  ;;  %v7299_v61 = vld [vmem:[%s8645_s5 + $0x268] sm:$0xff]  }
 0x3e8   : > { %7047 = vmatpush3.bf16.msra.mxu1 %v7270_v62  ;;  %7026 = vmatprep.subr.bf16.mxu0 %v7271_v63  ;;  %v7300_v62 = vld [vmem:[%s8645_s5 + $0x2e8] sm:$0xff]  }
 0x3e9   : > { %7048 = vmatprep.subr.bf16.mxu1 %v7272_v0  ;;  %v7301_v63 = vld [vmem:[%s8645_s5 + $0x228] sm:$0xff]  }
 0x3ea   : > { %v7302_v0 = vld [vmem:[%s8645_s5 + $0x2a8] sm:$0xff]  }
 0x3eb   : > { %7027 = vmatpush3.bf16.msra.mxu0 %v7273_v1  ;;  %v7303_v1 = vld [vmem:[%s8645_s5 + $0x260] sm:$0xff]  }
 0x3ec   : > { %7049 = vmatpush3.bf16.msra.mxu1 %v7274_v2  ;;  %7028 = vmatprep.subr.bf16.mxu0 %v7275_v3  ;;  %v7304_v2 = vld [vmem:[%s8645_s5 + $0x2e0] sm:$0xff]  }
 0x3ed   : > { %7050 = vmatprep.subr.bf16.mxu1 %v7276_v4  ;;  %v7305_v3 = vld [vmem:[%s8645_s5 + $0x220] sm:$0xff]  }
 0x3ee   : > { %v7306_v4 = vld [vmem:[%s8645_s5 + $0x2a0] sm:$0xff]  }
 0x3ef   : > { %7029 = vmatpush3.bf16.msra.mxu0 %v7277_v5  ;;  %v7307_v5 = vld [vmem:[%s8645_s5 + $0x258] sm:$0xff]  }
 0x3f0   : > { %7051 = vmatpush3.bf16.msra.mxu1 %v7278_v6  ;;  %7030 = vmatprep.subr.bf16.mxu0 %v7279_v7  ;;  %v7308_v6 = vld [vmem:[%s8645_s5 + $0x2d8] sm:$0xff]  }
 0x3f1   : > { %7052 = vmatprep.subr.bf16.mxu1 %v7280_v8  ;;  %v7309_v7 = vld [vmem:[%s8645_s5 + $0x218] sm:$0xff]  }
 0x3f2   : > { %v7310_v8 = vld [vmem:[%s8645_s5 + $0x298] sm:$0xff]  }
 0x3f3   : > { %7031 = vmatpush3.bf16.msra.mxu0 %v7281_v9  ;;  %v7311_v9 = vld [vmem:[%s8645_s5 + $0x250] sm:$0xff]  }
 0x3f4   : > { %7053 = vmatpush3.bf16.msra.mxu1 %v7282_v10  ;;  %7032 = vmatprep.subr.bf16.mxu0 %v7283_v16  ;;  %v7312_v10 = vld [vmem:[%s8645_s5 + $0x2d0] sm:$0xff]  }
 0x3f5   : > { %7054 = vmatprep.subr.bf16.mxu1 %v7284_v19  ;;  %v7313_v16 = vld [vmem:[%s8645_s5 + $0x210] sm:$0xff]  }
 0x3f6   : > { %v7314_v19 = vld [vmem:[%s8645_s5 + $0x290] sm:$0xff]  }
 0x3f7   : > { %7033 = vmatpush3.bf16.msra.mxu0 %v7285_v21  ;;  %v7315_v21 = vld [vmem:[%s8645_s5 + $0x248] sm:$0xff]  }
 0x3f8   : > { %7055 = vmatpush3.bf16.msra.mxu1 %v7286_v23  ;;  %7034 = vmatprep.subr.bf16.mxu0 %v7287_v25  ;;  %v7316_v23 = vld [vmem:[%s8645_s5 + $0x2c8] sm:$0xff]  }
 0x3f9   : > { %7056 = vmatprep.subr.bf16.mxu1 %v7288_v26  ;;  %v7317_v25 = vld [vmem:[%s8645_s5 + $0x208] sm:$0xff]  }
 0x3fa   : > { %v7318_v26 = vld [vmem:[%s8645_s5 + $0x288] sm:$0xff]  }
 0x3fb   : > { %7035 = vmatpush3.bf16.msra.mxu0 %v7289_v29  ;;  %v7321_v29 = vld [vmem:[%s8645_s5 + $0x200] sm:$0xff]  }
 0x3fc   : > { %7057 = vmatpush3.bf16.msra.mxu1 %v7290_v31  ;;  %7064 = vmatprep.subr.bf16.mxu0 %v7291_v28  ;;  %v4634_v31 = vld [vmem:[#allocation2 + $0x88] sm:$0xff]  ;;  %v4767_v28 = vadd.f32 %v4704_v46, %v4651_v41 }
 0x3fd   : > { %7086 = vmatprep.subr.bf16.mxu1 %v7292_v53  ;;  %v4750_v47 = vadd.f32 %v4700_v34, %v4634_v31  ;;  %v4781_v53 = vpack.c.bf16 %v4765_v14, %v4749_v45  ;;  %v4712_v31 = vrot.slane %v8489_v43, %v4679_v22  ;;  %v4653_v22 = vld [vmem:[#allocation2 + $0xa0] sm:$0xff]  ;;  %v4639_v41 = vld [vmem:[#allocation2 + $0x8] sm:$0xff] }
 0x3fe   : > { %5935 = vmatmul.mubr.bf16.vlgmr.msra.gmra.mxu0 %v4777_v52  ;;  %v4784_v52 = vpack.c.bf16 %v4768_v49, %v4752_v44 }
 0x3ff   : > { %5976 = vmatmul.mubr.bf16.vlgmr.msra.gmra.mxu1 %v4779_v54  ;;  %7065 = vmatpush3.bf16.msra.mxu0 %v7293_v55  ;;  %v4782_v51 = vpack.c.bf16 %v4766_v48, %v4750_v47  ;;  %v4783_v54 = vpack.c.bf16 %v4767_v28, %v4751_v50  ;;  %v7326_v55 = vld [vmem:[%s8645_s5 + $0x3b8] sm:$0xff]   ;;  %v4753_v12 = vadd.f32 %v4712_v31, %v4637_v40 }
 0x400   : > { %7087 = vmatpush3.bf16.msra.mxu1 %v7294_v56  ;;  %7066 = vmatprep.subr.bf16.mxu0 %v7295_v57  ;;  %v7327_v56 = vld [vmem:[%s8645_s5 + $0x370] sm:$0xff]  }
 0x401   : > { %7088 = vmatprep.subr.bf16.mxu1 %v7296_v58  ;;  %6016 = vmatprep.mubr.bf16.mxu0 %v4782_v51  ;;  %v7328_v57 = vld [vmem:[%s8645_s5 + $0x3f0] sm:$0xff]  }
 0x402   : > { %6057 = vmatprep.mubr.bf16.mxu1 %v4784_v52  ;;  %v7329_v58 = vld [vmem:[%s8645_s5 + $0x330] sm:$0xff]  }
 0x403   : > { %7067 = vmatpush3.bf16.msra.mxu0 %v7297_v59  ;;  %v7330_v59 = vld [vmem:[%s8645_s5 + $0x3b0] sm:$0xff]  }
 0x404   : > { %7089 = vmatpush3.bf16.msra.mxu1 %v7298_v60  ;;  %7068 = vmatprep.subr.bf16.mxu0 %v7299_v61  ;;  %v7331_v60 = vld [vmem:[%s8645_s5 + $0x368] sm:$0xff]  }
 0x405   : > { %7090 = vmatprep.subr.bf16.mxu1 %v7300_v62  ;;  %v7332_v61 = vld [vmem:[%s8645_s5 + $0x3e8] sm:$0xff]  }
 0x406   : > { %v7333_v62 = vld [vmem:[%s8645_s5 + $0x328] sm:$0xff]  }
 0x407   : > { %7069 = vmatpush3.bf16.msra.mxu0 %v7301_v63  ;;  %v7334_v63 = vld [vmem:[%s8645_s5 + $0x3a8] sm:$0xff]  }
 0x408   : > { %7091 = vmatpush3.bf16.msra.mxu1 %v7302_v0  ;;  %7070 = vmatprep.subr.bf16.mxu0 %v7303_v1  ;;  %v7335_v0 = vld [vmem:[%s8645_s5 + $0x360] sm:$0xff]  }
 0x409   : > { %7092 = vmatprep.subr.bf16.mxu1 %v7304_v2  ;;  %v7336_v1 = vld [vmem:[%s8645_s5 + $0x3e0] sm:$0xff]  }
 0x40a   : > { %v7337_v2 = vld [vmem:[%s8645_s5 + $0x320] sm:$0xff]  }
 0x40b   : > { %7071 = vmatpush3.bf16.msra.mxu0 %v7305_v3  ;;  %v7338_v3 = vld [vmem:[%s8645_s5 + $0x3a0] sm:$0xff]  }
 0x40c   : > { %7093 = vmatpush3.bf16.msra.mxu1 %v7306_v4  ;;  %7072 = vmatprep.subr.bf16.mxu0 %v7307_v5  ;;  %v7339_v4 = vld [vmem:[%s8645_s5 + $0x358] sm:$0xff]  }
 0x40d   : > { %7094 = vmatprep.subr.bf16.mxu1 %v7308_v6  ;;  %v7340_v5 = vld [vmem:[%s8645_s5 + $0x3d8] sm:$0xff]  }
 0x40e   : > { %v7341_v6 = vld [vmem:[%s8645_s5 + $0x318] sm:$0xff]  }
 0x40f   : > { %7073 = vmatpush3.bf16.msra.mxu0 %v7309_v7  ;;  %v7342_v7 = vld [vmem:[%s8645_s5 + $0x398] sm:$0xff]  }
 0x410   : > { %7095 = vmatpush3.bf16.msra.mxu1 %v7310_v8  ;;  %7074 = vmatprep.subr.bf16.mxu0 %v7311_v9  ;;  %v7343_v8 = vld [vmem:[%s8645_s5 + $0x350] sm:$0xff]  }
 0x411   : > { %7096 = vmatprep.subr.bf16.mxu1 %v7312_v10  ;;  %v7344_v9 = vld [vmem:[%s8645_s5 + $0x3d0] sm:$0xff]  }
 0x412   : > { %v7345_v10 = vld [vmem:[%s8645_s5 + $0x310] sm:$0xff]  }
 0x413   : > { %7075 = vmatpush3.bf16.msra.mxu0 %v7313_v16  ;;  %v7346_v16 = vld [vmem:[%s8645_s5 + $0x390] sm:$0xff]  }
 0x414   : > { %7097 = vmatpush3.bf16.msra.mxu1 %v7314_v19  ;;  %7076 = vmatprep.subr.bf16.mxu0 %v7315_v21  ;;  %v7347_v19 = vld [vmem:[%s8645_s5 + $0x348] sm:$0xff]  }
 0x415   : > { %7098 = vmatprep.subr.bf16.mxu1 %v7316_v23  ;;  %v7348_v21 = vld [vmem:[%s8645_s5 + $0x3c8] sm:$0xff]  }
 0x416   : > { %v7349_v23 = vld [vmem:[%s8645_s5 + $0x308] sm:$0xff]  }
 0x417   : > { %7077 = vmatpush3.bf16.msra.mxu0 %v7317_v25  ;;  %v7350_v25 = vld [vmem:[%s8645_s5 + $0x388] sm:$0xff]  }
 0x418   : > { %7099 = vmatpush3.bf16.msra.mxu1 %v7318_v26  ;;  %7078 = vmatprep.subr.bf16.mxu0 %v7319_v27  ;;  %v7351_v26 = vld [vmem:[%s8645_s5 + $0x340] sm:$0xff]   ;;  %v4716_v27 = vrot.slane %v8489_v43, %v4683_v18  ;;  %v4720_v18 = vrot.slane %v8489_v43, %v4687_v24  ;;  %v4769_v24 = vadd.f32 %v4712_v31, %v4653_v22 }
 0x419   : > { %7100 = vmatprep.subr.bf16.mxu1 %v7320_v42  ;;  %v7352_v42 = vld [vmem:[%s8645_s5 + $0x3c0] sm:$0xff]  }
 0x41a   : > { %v4754_v34 = vadd.f32 %v4716_v27, %v4638_v32  ;;  %v4770_v37 = vadd.f32 %v4716_v27, %v4654_v33  ;;  %v4755_v46 = vadd.f32 %v4720_v18, %v4639_v41  ;;  %v4785_v49 = vpack.c.bf16 %v4769_v24, %v4753_v12 }
 0x41b   : > { %7079 = vmatpush3.bf16.msra.mxu0 %v7321_v29  ;;  %v4724_v29 = vrot.slane %v8489_v43, %v4691_v20  ;;  %v7354_v20 = vld [vmem:[%s8645_s5 + $0x380] sm:$0xff]  }
 0x41c   : > { %7101 = vmatpush3.bf16.msra.mxu1 %v7322_v30  ;;  %7108 = vmatprep.subr.bf16.mxu0 %v7323_v13  ;;  %v7353_v30 = vld [vmem:[%s8645_s5 + $0x300] sm:$0xff]   ;;  %v4786_v47 = vpack.c.bf16 %v4770_v37, %v4754_v34  ;;  %v8611_v37 = vand.u32 127, %v489_v11 }
 0x41d   : > { %7130 = vmatprep.subr.bf16.mxu1 %v7324_v15  ;;  %v4756_v38 = vadd.f32 %v4724_v29, %v4640_v35  ;;  %v4772_v39 = vadd.f32 %v4724_v29, %v4656_v36  ;;  %v4655_v43 = vld [vmem:[#allocation2 + $0x20] sm:$0xff] }
 0x41e   : > { %6017 = vmatmul.mubr.bf16.vlgmr.msra.gmra.mxu0 %v4781_v53  ;;  %v4771_v44 = vadd.f32 %v4720_v18, %v4655_v43  ;;  %vm6152_vm0 = vcmp.lt.s32.totalorder %v8611_v37, 10 }
 0x41f   : > { %6058 = vmatmul.mubr.bf16.vlgmr.msra.gmra.mxu1 %v4783_v54  ;;  %7109 = vmatpush3.bf16.msra.mxu0 %v7325_v17  ;;  %v4788_v48 = vpack.c.bf16 %v4772_v39, %v4756_v38 }
 0x420   : > { %7131 = vmatpush3.bf16.msra.mxu1 %v7326_v55  ;;  %7110 = vmatprep.subr.bf16.mxu0 %v7327_v56  ;;  %v4787_v13 = vpack.c.bf16 %v4771_v44, %v4755_v46 }
 0x421   : > { %7132 = vmatprep.subr.bf16.mxu1 %v7328_v57  ;;  %6098 = vmatprep.mubr.bf16.mxu0 %v4786_v47 }
 0x422   : > { %6139 = vmatprep.mubr.bf16.mxu1 %v4788_v48 }
 0x423   : > { %7111 = vmatpush3.bf16.msra.mxu0 %v7329_v58 }
 0x424   : > { %7133 = vmatpush3.bf16.msra.mxu1 %v7330_v59  ;;  %7112 = vmatprep.subr.bf16.mxu0 %v7331_v60 }
 0x425   : > { %7134 = vmatprep.subr.bf16.mxu1 %v7332_v61  ;;  %v6843_v61 = vld [vmem:[%s8646_s6] ss:$0 sm:$0xff] }
 0x427   : > { %7113 = vmatpush3.bf16.msra.mxu0 %v7333_v62 }
 0x428   : > { %7135 = vmatpush3.bf16.msra.mxu1 %v7334_v63  ;;  %7114 = vmatprep.subr.bf16.mxu0 %v7335_v0 }
 0x429   : > { %7136 = vmatprep.subr.bf16.mxu1 %v7336_v1 }
 0x42b   : > { %7115 = vmatpush3.bf16.msra.mxu0 %v7337_v2 }
 0x42c   : > { %7137 = vmatpush3.bf16.msra.mxu1 %v7338_v3  ;;  %7116 = vmatprep.subr.bf16.mxu0 %v7339_v4 }
 0x42d   : > { %7138 = vmatprep.subr.bf16.mxu1 %v7340_v5 }
 0x42f   : > { %7117 = vmatpush3.bf16.msra.mxu0 %v7341_v6 }
 0x430   : > { %7139 = vmatpush3.bf16.msra.mxu1 %v7342_v7  ;;  %7118 = vmatprep.subr.bf16.mxu0 %v7343_v8 }
 0x431   : > { %7140 = vmatprep.subr.bf16.mxu1 %v7344_v9 }
 0x433   : > { %7119 = vmatpush3.bf16.msra.mxu0 %v7345_v10 }
 0x434   : > { %7141 = vmatpush3.bf16.msra.mxu1 %v7346_v16  ;;  %7120 = vmatprep.subr.bf16.mxu0 %v7347_v19 }
 0x435   : > { %7142 = vmatprep.subr.bf16.mxu1 %v7348_v21 }
 0x437   : > { %7121 = vmatpush3.bf16.msra.mxu0 %v7349_v23 }
 0x438   : > { %7143 = vmatpush3.bf16.msra.mxu1 %v7350_v25  ;;  %7122 = vmatprep.subr.bf16.mxu0 %v7351_v26 }
 0x439   : > { %7144 = vmatprep.subr.bf16.mxu1 %v7352_v42 }
 0x43b   : > { %7123 = vmatpush3.bf16.msra.mxu0 %v7353_v30 }
 0x43c   : > { %7145 = vmatpush3.bf16.msra.mxu1 %v7354_v20 }
 0x43e   : > { %6099 = vmatmul.mubr.bf16.vlgmr.msra.gmra.mxu0 %v4785_v49 }
 0x43f   : > { %6140 = vmatmul.mubr.bf16.vlgmr.msra.gmra.mxu1 %v4787_v13 }
 0x49e   : > { %v6992_v45 = vpop.f32.mrf.mxu0 }
 0x49f   : > { %v7014_v14 = vpop.f32.mrf.mxu1 }
 0x4a0   : > { %v6993_v50 = vpop.f32.mrf.mxu0 }
 0x4a1   : > { %v7015_v28 = vpop.f32.mrf.mxu1  ;;  %v6994_v60 = vadd.f32 %v6993_v50, %v6992_v45 }
 0x4a2   : > { %v6995_v15 = vpop.f32.mrf.mxu0  ;;  %v7016_v1 = vadd.f32 %v7015_v28, %v7014_v14 }
 0x4a3   : > { %v7017_v51 = vpop.f32.mrf.mxu1  ;;  %v5855_v0 = vadd.f32 %v6994_v60, %v6843_v61 }
 0x4a4   : > { %v6996_v52 = vpop.f32.mrf.mxu0 }
 0x4a5   : > { %v7018_v53 = vpop.f32.mrf.mxu1  ;;  %v6997_v2 = vadd.f32 %v6996_v52, %v6995_v15  ;;  %v5896_v6 = vadd.f32 %v7016_v1, %v5855_v0 }
 0x4a6   : > { %v7019_v10 = vadd.f32 %v7018_v53, %v7017_v51 }
 0x4a7   : > { %v5858_v7 = vadd.f32 %v6997_v2, %v6843_v61 }
 0x4a9   : > { %v5899_v23 = vadd.f32 %v7019_v10, %v5858_v7 }
 0x4be   : > { %v7036_v17 = vpop.f32.mrf.mxu0 }
 0x4bf   : > { %v7058_v54 = vpop.f32.mrf.mxu1 }
 0x4c0   : > { %v7037_v55 = vpop.f32.mrf.mxu0 }
 0x4c1   : > { %v7059_v56 = vpop.f32.mrf.mxu1  ;;  %v7038_v5 = vadd.f32 %v7037_v55, %v7036_v17 }
 0x4c2   : > { %v7039_v57 = vpop.f32.mrf.mxu0  ;;  %v7060_v19 = vadd.f32 %v7059_v56, %v7058_v54 }
 0x4c3   : > { %v7061_v58 = vpop.f32.mrf.mxu1  ;;  %v5937_v16 = vadd.f32 %v7038_v5, %v5896_v6 }
 0x4c4   : > { %v7040_v59 = vpop.f32.mrf.mxu0 }
 0x4c5   : > { %v7062_v63 = vpop.f32.mrf.mxu1  ;;  %v7041_v21 = vadd.f32 %v7040_v59, %v7039_v57  ;;  %v5978_v42 = vadd.f32 %v7060_v19, %v5937_v16 }
 0x4c6   : > { %v7063_v30 = vadd.f32 %v7062_v63, %v7061_v58 }
 0x4c7   : > { %v5940_v29 = vadd.f32 %v7041_v21, %v5899_v23 }
 0x4c9   : > { %v5981_v34 = vadd.f32 %v7063_v30, %v5940_v29 }
 0x4de   : > { %v7080_v62 = vpop.f32.mrf.mxu0 }
 0x4df   : > { %v7102_v3 = vpop.f32.mrf.mxu1 }
 0x4e0   : > { %v7081_v4 = vpop.f32.mrf.mxu0 }
 0x4e1   : > { %v7103_v8 = vpop.f32.mrf.mxu1  ;;  %v7082_v25 = vadd.f32 %v7081_v4, %v7080_v62 }
 0x4e2   : > { %v7083_v9 = vpop.f32.mrf.mxu0  ;;  %v7104_v18 = vadd.f32 %v7103_v8, %v7102_v3 }
 0x4e3   : > { %v7105_v26 = vpop.f32.mrf.mxu1  ;;  %v6019_v31 = vadd.f32 %v7082_v25, %v5978_v42 }
 0x4e4   : > { %v7084_v27 = vpop.f32.mrf.mxu0 }
 0x4e5   : > { %v7085_v20 = vadd.f32 %v7084_v27, %v7083_v9  ;;  %v7106_v32 = vpop.f32.mrf.mxu1  ;;  %v6060_v38 = vadd.f32 %v7104_v18, %v6019_v31 }
 0x4e6   : > { %v7107_v12 = vadd.f32 %v7106_v32, %v7105_v26 }
 0x4e7   : > { %v6022_v39 = vadd.f32 %v7085_v20, %v5981_v34 }
 0x4e9   : > { %v6063_v48 = vadd.f32 %v7107_v12, %v6022_v39 }
 0x4fe   : > { %v7124_v33 = vpop.f32.mrf.mxu0 }
 0x4ff   : > { %v7146_v35 = vpop.f32.mrf.mxu1 }
 0x500   : > { %v7125_v36 = vpop.f32.mrf.mxu0 }
 0x501   : > { %v7126_v40 = vadd.f32 %v7125_v36, %v7124_v33  ;;  %v7147_v22 = vpop.f32.mrf.mxu1 }
 0x502   : > { %v7127_v41 = vpop.f32.mrf.mxu0  ;;  %v7148_v43 = vadd.f32 %v7147_v22, %v7146_v35 }
 0x503   : > { %v6101_v24 = vadd.f32 %v7126_v40, %v6060_v38  ;;  %v7149_v46 = vpop.f32.mrf.mxu1 }
 0x504   : > { %v7128_v47 = vpop.f32.mrf.mxu0 }
 0x505   : > { %v7129_v44 = vadd.f32 %v7128_v47, %v7127_v41  ;;  %v7150_v49 = vpop.f32.mrf.mxu1  ;;  %v6142_v13 = vadd.f32 %v7148_v43, %v6101_v24 }
 0x506   : > { %v7151_v14 = vadd.f32 %v7150_v49, %v7149_v46 }
 0x507   : > { %v6104_v45 = vadd.f32 %v7129_v44, %v6063_v48  ;;  %v6153_v11 = vsel %vm6152_vm0, %v6142_v13, -inf  ;;  %6148 = vst [vmem:[%s8647_s7] sm:$0xff] %v6142_v13 }
 0x508   : > { %6155 = vmax.xlane.f32.xlu0 %v6153_v11 }
 0x509   : > { %v6145_v50 = vadd.f32 %v7151_v14, %v6104_v45 }
 0x50b   : > { %6149 = vst [vmem:[%s8647_s7 + $0x8] sm:$0xff] %v6145_v50  ;;  %v6154_v28 = vsel %vm6152_vm0, %v6145_v50, -inf }
 0x50c   : > { %6157 = vmax.xlane.f32.xlu0 %v6154_v28 }
 0x591   : > { %v6156_v15 = vpop.xlane.xlu0 %6155 }
 0x592   : > { %v6159_v51 = vsub.f32 %v6153_v11, %v6156_v15 }
 0x594   : > { %v6161_v52 = vmul.f32 1.442695, %v6159_v51 }
 0x595   : > { %v6158_v17 = vpop.xlane.xlu0 %6157 }
 0x596   : > { %7355 = vpow2.f32 %v6161_v52  ;;  %v6160_v53 = vsub.f32 %v6154_v28, %v6158_v17 }
 0x598   : > { %v6163_v54 = vmul.f32 1.442695, %v6160_v53 }
 0x59a   : > { %7357 = vpow2.f32 %v6163_v54 }
 0x5a3   : > { %v7356_v55 = vpop.eup %7355 }
 0x5a4   : > { %6165 = vadd.xlane.f32.xlu1 %v7356_v55 }
 0x5a7   : > { %v7358_v56 = vpop.eup %7357 }
 0x5a8   : > { %6167 = vadd.xlane.f32.xlu1 %v7358_v56 }
 0x62d   : > { %v6166_v57 = vpop.xlane.xlu1 %6165 }
 0x62e   : > { %7359 = vrcp.f32 %v6166_v57 }
 0x631   : > { %v6168_v58 = vpop.xlane.xlu1 %6167 }
 0x632   : > { %7361 = vrcp.f32 %v6168_v58 }
 0x63b   : > { %v7360_v59 = vpop.eup %7359 }
 0x63c   : > { %v6170_v60 = vmul.f32 %v7360_v59, %v7356_v55 }
 0x63e   : > { %6173 = vmax.xlane.f32.xlu0 %v6170_v60 }
 0x63f   : > { %v7362_v61 = vpop.eup %7361 }
 0x640   : > { %v6172_v62 = vmul.f32 %v7362_v61, %v7358_v56 }
 0x642   : > { %6175 = vmax.xlane.f32.xlu1 %v6172_v62 }
 0x6c7   : > { %v6174_v63 = vpop.xlane.xlu0 %6173 }
 0x6c8   : > { %vm6177_vm1 = vcmp.eq.f32.partialorder %v6170_v60, %v6174_v63 }
 0x6c9   : > { %v6179_v0 = vsel %vm6177_vm1, %v8611_v37, 1073741824 }
 0x6ca   : > { %v6182_v1 = vshra.s32 %v6179_v0, 16  ;;  %v6181_v7 = vand.u32 65535, %v6179_v0 }
 0x6cb   : > { %v6176_v2 = vpop.xlane.xlu1 %6175 }
 0x6cc   : > { %vm6178_vm2 = vcmp.eq.f32.partialorder %v6172_v62, %v6176_v2  ;;  %v6184_v3 = vcvt.s32.f32 %v6182_v1  ;;  %v6183_v9 = vcvt.s32.f32 %v6181_v7 }
 0x6cd   : > { %v6180_v4 = vsel %vm6178_vm2, %v8611_v37, 1073741824 }
 0x6ce   : > { %6185 = vmin.xlane.f32.xlu0 %v6184_v3  ;;  %v6196_v5 = vshra.s32 %v6180_v4, 16  ;;  %v6195_v10 = vand.u32 65535, %v6180_v4 }
 0x6d0   : > { %v6198_v6 = vcvt.s32.f32 %v6196_v5  ;;  %v6197_v21 = vcvt.s32.f32 %v6195_v10 }
 0x6d2   : > { %6199 = vmin.xlane.f32.xlu1 %v6198_v6 }
 0x757   : > { %v6186_v8 = vpop.xlane.xlu0 %6185 }
 0x758   : > { %vm6187_vm3 = vcmp.eq.f32.partialorder %v6184_v3, %v6186_v8  ;;  %v6192_v25 = vcvt.f32.s32 %v6186_v8 }
 0x759   : > { %v6188_v16 = vsel %vm6187_vm3, %v6183_v9, inf }
 0x75a   : > { %6189 = vmin.xlane.f32.xlu0 %v6188_v16  ;;  %v6193_v27 = vshll.u32 %v6192_v25, 16 }
 0x75b   : > { %v6200_v19 = vpop.xlane.xlu1 %6199 }
 0x75c   : > { %vm6201_vm4 = vcmp.eq.f32.partialorder %v6198_v6, %v6200_v19  ;;  %v6206_v42 = vcvt.f32.s32 %v6200_v19 }
 0x75d   : > { %v6202_v23 = vsel %vm6201_vm4, %v6197_v21, inf }
 0x75e   : > { %6203 = vmin.xlane.f32.xlu1 %v6202_v23  ;;  %v6207_v18 = vshll.u32 %v6206_v42, 16 }
 0x7e3   : > { %v6190_v26 = vpop.xlane.xlu0 %6189 }
 0x7e4   : > { %v6191_v29 = vcvt.f32.s32 %v6190_v26 }
 0x7e6   : > { %v6194_v30 = vadd.s32 %v6193_v27, %v6191_v29 }
 0x7e7   : > { %v6204_v31 = vpop.xlane.xlu1 %6203 }
 0x7e8   : > { %v6205_v20 = vcvt.f32.s32 %v6204_v31  ;;  %vm6209_vm5 = vcmp.eq.s32.totalorder %v8611_v37, %v6194_v30 }
 0x7e9   : > { %v6211_v32 = vsel %vm6209_vm5, -inf, %v6170_v60 }
 0x7ea   : > { %v6208_v33 = vadd.s32 %v6207_v18, %v6205_v20  ;;  %6213 = vmax.xlane.f32.xlu0 %v6211_v32 }
 0x7ec   : > { %vm6210_vm6 = vcmp.eq.s32.totalorder %v8611_v37, %v6208_v33 }
 0x7ed   : > { %v6212_v34 = vsel %vm6210_vm6, -inf, %v6172_v62 }
 0x7ee   : > { %6215 = vmax.xlane.f32.xlu1 %v6212_v34 }
 0x873   : > { %v6214_v35 = vpop.xlane.xlu0 %6213 }
 0x874   : > { %v6217_v36 = vsub.f32 %v6174_v63, %v6214_v35 }
 0x876   : > { %6221 = vst [vmem:[%s8648_s8] sm:$0xff] %v6217_v36 }
 0x877   : > { %v6216_v38 = vpop.xlane.xlu1 %6215 }
 0x878   : > { %v6218_v39 = vsub.f32 %v6176_v2, %v6216_v38 }
 0x87a   : > { %6222 = vst [vmem:[%s8648_s8 + $0x8] sm:$0xff] %v6218_v39 }
 0x87b PF: > { %p16_p12 = scmp.ge.s32.totalorder %s7453_s9, 6   ;;  %s8649_s27 = smov %s7381_s28 }
 0x87c   : > { %s8650_s28 = smov %s7462_s12  ;;  %s8651_s29 = smov %s7453_s9 }
 0x87d   :  { %18 = sbr.rel (!%p16_p12) target bundleno = 2 (0x2), region = 124 }

</bundles_post_ra>
